<compile_context>
chip_gen: v5e
topology: v5e:2x2
jax: 0.10.0
libtpu: 0.0.40
codegen_flags: <defaults>
</compile_context>

<pallas_src>
import functools

import jax
import jax.numpy as jnp
from jax.experimental import pallas as pl
from jax.experimental.pallas import tpu as pltpu

EPS = 1e-5
LANE = 128
VMEM_LIMIT = 48 * 1024 * 1024


def _round_up(v, m):
    return -(-v // m) * m


# --------------------------------------------------------------------------- kernels
def _first_layer_kernel(x_ref, w_ref, y_ref, sum_ref, sq_ref, *, tile_n, n_pts):
    """y1 = x_block^T @ w1 (bf16 operands, f32 accumulate) + per-channel sum/sumsq.

    x_ref: (1, 1088, tile_n) f32 (native layout), w_ref: (1088, 512) bf16,
    y_ref: (1, tile_n, 512) bf16.
    """
    b = pl.program_id(0)
    j = pl.program_id(1)

    @pl.when(jnp.logical_and(b == 0, j == 0))
    def _():
        sum_ref[...] = jnp.zeros_like(sum_ref)
        sq_ref[...] = jnp.zeros_like(sq_ref)

    xb = x_ref[0].astype(jnp.bfloat16)                          # (1088, tile_n)
    y = jax.lax.dot_general(                                    # (tile_n, 512)
        xb, w_ref[...],
        dimension_numbers=(((0,), (0,)), ((), ())),
        preferred_element_type=jnp.float32)

    if n_pts % tile_n:   # static: only traced when the tail tile has padded points
        row = jax.lax.broadcasted_iota(jnp.int32, (tile_n, 1), 0)
        y = jnp.where(row < (n_pts - j * tile_n), y, 0.0)

    y_ref[0] = y.astype(jnp.bfloat16)
    sum_ref[...] += jnp.sum(y, axis=0, keepdims=True)
    sq_ref[...] += jnp.sum(y * y, axis=0, keepdims=True)


def _mid_layer_kernel(y_in_ref, sum_in_ref, sq_in_ref, g_ref, be_ref, w_ref,
                      y_ref, sum_ref, sq_ref, *, tile_n, n_pts, n_rows):
    """z = relu(bn_prev(y_in)) with full-batch stats folded in-kernel; y = z @ w; new stats."""
    b = pl.program_id(0)
    j = pl.program_id(1)

    @pl.when(jnp.logical_and(b == 0, j == 0))
    def _():
        sum_ref[...] = jnp.zeros_like(sum_ref)
        sq_ref[...] = jnp.zeros_like(sq_ref)

    inv_n = 1.0 / n_rows
    mu = sum_in_ref[...] * inv_n
    var = jnp.maximum(sq_in_ref[...] * inv_n - mu * mu, 0.0)
    scale = g_ref[...] * jax.lax.rsqrt(var + EPS)
    shift = be_ref[...] - mu * scale

    z = jnp.maximum(y_in_ref[0].astype(jnp.float32) * scale + shift, 0.0)
    if n_pts % tile_n:   # padded rows have y_in == 0 => z == relu(shift) != 0: mask them
        row = jax.lax.broadcasted_iota(jnp.int32, (tile_n, 1), 0)
        z = jnp.where(row < (n_pts - j * tile_n), z, 0.0)

    y = jnp.dot(z.astype(jnp.bfloat16), w_ref[...],
                preferred_element_type=jnp.float32)
    y_ref[0] = y.astype(jnp.bfloat16)
    sum_ref[...] += jnp.sum(y, axis=0, keepdims=True)
    sq_ref[...] += jnp.sum(y * y, axis=0, keepdims=True)


def _last_layer_kernel(y_in_ref, sum_in_ref, sq_in_ref, g_ref, be_ref,
                       w_ref, b_ref, o_ref, *, n_rows):
    """out = relu(bn3(y3)) @ w4 + b4, stored channel-major (c_pad, tile_n); no stats."""
    inv_n = 1.0 / n_rows
    mu = sum_in_ref[...] * inv_n
    var = jnp.maximum(sq_in_ref[...] * inv_n - mu * mu, 0.0)
    scale = g_ref[...] * jax.lax.rsqrt(var + EPS)
    shift = be_ref[...] - mu * scale

    z = jnp.maximum(y_in_ref[0].astype(jnp.float32) * scale + shift, 0.0)
    # Contract w4's 128-dim with z's 128-dim so the result is already (c_pad, tile_n);
    # out-of-bounds tail columns of the edge block are dropped by Pallas.
    o = jax.lax.dot_general(
        w_ref[...], z.astype(jnp.bfloat16),
        dimension_numbers=(((0,), (1,)), ((), ())),
        preferred_element_type=jnp.float32)
    o_ref[0] = o + b_ref[...]


# --------------------------------------------------------------------------- wrapper
def seg_head_forward(x, params, class_num, *, tile_n=512):
    """x: (B, 1088, N) float32 — same layout as the PyTorch module. Returns (B, class_num, N)."""
    B, c_in, N = x.shape
    assert c_in == 1088
    assert tile_n % LANE == 0
    M = B * N

    # Point tile: lane-aligned (last-dim blocks of x / the output must be 128-multiples),
    # clamped so blocks never exceed the point dimension.
    if N % LANE == 0:
        tile_n = min(tile_n, N)
    elif N > LANE:
        tile_n = min(tile_n, (N // LANE) * LANE)
    else:
        tile_n = N                      # single block equal to the full point dim
    nj = pl.cdiv(N, tile_n)
    n_pad = nj * tile_n                 # padded point count of the bf16 intermediates

    c_pad = _round_up(class_num, LANE)
    assert params["w4_t_pad"].shape[1] == c_pad

    def cspec(shape):                   # VMEM-resident constants (weights, stats, BN params)
        return pl.BlockSpec(shape, lambda b, j: (0,) * len(shape))

    def yspec(c):                       # point-major activation tiles
        return pl.BlockSpec((1, tile_n, c), lambda b, j: (b, j, 0))

    stat_params = pltpu.CompilerParams(
        dimension_semantics=("arbitrary", "arbitrary"),
        vmem_limit_bytes=VMEM_LIMIT)
    par_params = pltpu.CompilerParams(
        dimension_semantics=("parallel", "parallel"),
        vmem_limit_bytes=VMEM_LIMIT)

    # ---- layer 1: y1 = x^T @ w1 (native-layout x read, transposed MXU contraction) -----
    y1, s1, q1 = pl.pallas_call(
        functools.partial(_first_layer_kernel, tile_n=tile_n, n_pts=N),
        grid=(B, nj),
        in_specs=[pl.BlockSpec((1, 1088, tile_n), lambda b, j: (b, 0, j)),
                  cspec((1088, 512))],
        out_specs=[yspec(512), cspec((1, 512)), cspec((1, 512))],
        out_shape=(jax.ShapeDtypeStruct((B, n_pad, 512), jnp.bfloat16),
                   jax.ShapeDtypeStruct((1, 512), jnp.float32),
                   jax.ShapeDtypeStruct((1, 512), jnp.float32)),
        compiler_params=stat_params,
    )(x, params["w1_t"])

    # ---- layer 2: y2 = relu(bn1(y1)) @ w2 -----------------------------------------------
    y2, s2, q2 = pl.pallas_call(
        functools.partial(_mid_layer_kernel, tile_n=tile_n, n_pts=N, n_rows=M),
        grid=(B, nj),
        in_specs=[yspec(512), cspec((1, 512)), cspec((1, 512)),
                  cspec((1, 512)), cspec((1, 512)), cspec((512, 256))],
        out_specs=[yspec(256), cspec((1, 256)), cspec((1, 256))],
        out_shape=(jax.ShapeDtypeStruct((B, n_pad, 256), jnp.bfloat16),
                   jax.ShapeDtypeStruct((1, 256), jnp.float32),
                   jax.ShapeDtypeStruct((1, 256), jnp.float32)),
        compiler_params=stat_params,
    )(y1, s1, q1, params["g1"], params["be1"], params["w2_t"])

    # ---- layer 3: y3 = relu(bn2(y2)) @ w3 -----------------------------------------------
    y3, s3, q3 = pl.pallas_call(
        functools.partial(_mid_layer_kernel, tile_n=tile_n, n_pts=N, n_rows=M),
        grid=(B, nj),
        in_specs=[yspec(256), cspec((1, 256)), cspec((1, 256)),
                  cspec((1, 256)), cspec((1, 256)), cspec((256, 128))],
        out_specs=[yspec(128), cspec((1, 128)), cspec((1, 128))],
        out_shape=(jax.ShapeDtypeStruct((B, n_pad, 128), jnp.bfloat16),
                   jax.ShapeDtypeStruct((1, 128), jnp.float32),
                   jax.ShapeDtypeStruct((1, 128), jnp.float32)),
        compiler_params=stat_params,
    )(y2, s2, q2, params["g2"], params["be2"], params["w3_t"])

    # ---- layer 4: out = relu(bn3(y3)) @ w4 + b4, written channel-major ------------------
    out_pad = pl.pallas_call(
        functools.partial(_last_layer_kernel, n_rows=M),
        grid=(B, nj),
        in_specs=[yspec(128), cspec((1, 128)), cspec((1, 128)),
                  cspec((1, 128)), cspec((1, 128)),
                  cspec((128, c_pad)), cspec((c_pad, 1))],
        out_specs=pl.BlockSpec((1, c_pad, tile_n), lambda b, j: (b, 0, j)),
        out_shape=jax.ShapeDtypeStruct((B, c_pad, N), jnp.float32),
        compiler_params=par_params,
    )(y3, s3, q3, params["g3"], params["be3"], params["w4_t_pad"], params["b4_pad"])

    return out_pad[:, :class_num, :]          # drop lane padding only (no transpose pass)


# --------------------------------------------------------------------------- params
def init_params(key, class_num):
    """Shapes/init matching nn.Conv1d(k=1) / nn.BatchNorm1d; weights stored as bf16.

    conv1/2/3 biases are not materialized: a per-channel constant added right before a
    training-mode BatchNorm1d cancels exactly in (h - mean), so the forward output is
    identical with or without them.
    """
    ks = jax.random.split(key, 11)

    def conv_w(k, c_in, c_out):
        bound = 1.0 / jnp.sqrt(c_in)
        return jax.random.uniform(k, (c_out, c_in), jnp.float32, -bound, bound)

    def bn(kg, kb, c):
        g = jax.random.uniform(kg, (1, c), jnp.float32, 0.5, 1.5)
        be = jax.random.uniform(kb, (1, c), jnp.float32, -0.2, 0.2)
        return g, be

    w1 = conv_w(ks[0], 1088, 512)
    w2 = conv_w(ks[1], 512, 256)
    w3 = conv_w(ks[2], 256, 128)
    w4 = conv_w(ks[3], 128, class_num)
    bound4 = 1.0 / jnp.sqrt(128.0)
    b4 = jax.random.uniform(ks[4], (class_num,), jnp.float32, -bound4, bound4)

    g1, be1 = bn(ks[5], ks[6], 512)
    g2, be2 = bn(ks[7], ks[8], 256)
    g3, be3 = bn(ks[9], ks[10], 128)

    c_pad = _round_up(class_num, LANE)                 # lane-dense output width
    w4_t_pad = jnp.zeros((128, c_pad), jnp.float32).at[:, :class_num].set(w4.T)
    b4_pad = jnp.zeros((c_pad, 1), jnp.float32).at[:class_num, 0].set(b4)

    return {
        # (in, out) weights in bf16: half the HBM bytes, native MXU bf16 operands.
        "w1_t": w1.T.astype(jnp.bfloat16),
        "w2_t": w2.T.astype(jnp.bfloat16),
        "w3_t": w3.T.astype(jnp.bfloat16),
        "w4_t_pad": w4_t_pad.astype(jnp.bfloat16),
        "b4_pad": b4_pad,
        "g1": g1, "be1": be1,
        "g2": g2, "be2": be2,
        "g3": g3, "be3": be3,
    }


# --------------------------------------------------------------------------- reference
def reference_forward(x, params, class_num):
    """Pure-JAX f32 reference reproducing the PyTorch training-mode forward."""
    B, C, N = x.shape
    h = jnp.transpose(x, (0, 2, 1)).reshape(B * N, C)

    def mm(a, b):
        return jnp.dot(a, b, precision=jax.lax.Precision.HIGHEST)

    def bn_relu(h, g, be):
        mu = jnp.mean(h, axis=0, keepdims=True)
        var = jnp.mean((h - mu) ** 2, axis=0, keepdims=True)
        return jnp.maximum((h - mu) * jax.lax.rsqrt(var + EPS) * g + be, 0.0)

    w1 = params["w1_t"].astype(jnp.float32)
    w2 = params["w2_t"].astype(jnp.float32)
    w3 = params["w3_t"].astype(jnp.float32)
    w4 = params["w4_t_pad"].astype(jnp.float32)[:, :class_num]
    b4 = params["b4_pad"][:class_num, 0]

    h = bn_relu(mm(h, w1), params["g1"], params["be1"])
    h = bn_relu(mm(h, w2), params["g2"], params["be2"])
    h = bn_relu(mm(h, w3), params["g3"], params["be3"])
    h = mm(h, w4) + b4
    return jnp.transpose(h.reshape(B, N, class_num), (0, 2, 1))


# --------------------------------------------------------------------------- demo
if __name__ == "__main__":
    key = jax.random.PRNGKey(0)
    k_x, k_p = jax.random.split(key)

    # Small demo shapes: 1088 input channels are fixed by the module; N=200 (not a
    # multiple of 128) exercises the multi-tile grid, the padded-point masking and the
    # partially out-of-bounds edge blocks.
    B, N, CLASS_NUM = 2, 200, 5

    x = jax.random.normal(k_x, (B, 1088, N), jnp.float32)
    params = init_params(k_p, CLASS_NUM)

    out = jax.block_until_ready(seg_head_forward(x, params, CLASS_NUM))
    assert out.shape == (B, CLASS_NUM, N)

    # Robust correctness check vs. the f32 PyTorch-equivalent forward; the tolerance
    # budgets for bf16 matmul operands and bf16-stored intermediates (~0.5-1% relative).
    ref = reference_forward(x, params, CLASS_NUM)
    err = float(jnp.max(jnp.abs(out - ref)))
    scale = float(jnp.max(jnp.abs(ref)))
    assert err <= 0.05 * scale + 1e-3, f"max |err|={err:.4g} vs scale={scale:.4g}"

    print("KERNEL_OK")
</pallas_src>

<mosaic_0001>
module attributes {stable_mosaic.version = 11 : i64} {
  func.func @_first_layer_kernel(%arg0: i32, %arg1: i32, %arg2: memref<1x1088x128xf32, #tpu.memory_space<vmem>>, %arg3: memref<1088x512xbf16, #tpu.memory_space<vmem>>, %arg4: memref<1x128x512xbf16, #tpu.memory_space<vmem>>, %arg5: memref<1x512xf32, #tpu.memory_space<vmem>>, %arg6: memref<1x512xf32, #tpu.memory_space<vmem>>) attributes {dimension_semantics = [#tpu.dimension_semantics<arbitrary>, #tpu.dimension_semantics<arbitrary>], iteration_bounds = array<i64: 2, 2>, scalar_prefetch = 0 : i64, scratch_operands = 0 : i64, tpu.core_type = #tpu.core_type<tc>, window_params = [{transform_indices = @transform_0, window_bounds = array<i64: 1, 1088, 128>}, {pipeline_mode = #tpu.pipeline_mode<synchronous>, transform_indices = @transform_1, window_bounds = array<i64: 1088, 512>}, {transform_indices = @transform_2, window_bounds = array<i64: 1, 128, 512>}, {pipeline_mode = #tpu.pipeline_mode<synchronous>, transform_indices = @transform_3, window_bounds = array<i64: 1, 512>}, {pipeline_mode = #tpu.pipeline_mode<synchronous>, transform_indices = @transform_4, window_bounds = array<i64: 1, 512>}]} {
    %c0_i32 = arith.constant 0 : i32
    %0 = arith.cmpi eq, %arg0, %c0_i32 : i32
    %c0_i32_0 = arith.constant 0 : i32
    %1 = arith.cmpi eq, %arg1, %c0_i32_0 : i32
    %2 = arith.andi %0, %1 : i1
    %3 = arith.extui %2 : i1 to i32
    %c0_i32_1 = arith.constant 0 : i32
    %4 = arith.cmpi ne, %3, %c0_i32_1 : i32
    scf.if %4 {
      %cst_20 = arith.constant 0.000000e+00 : f32
      %34 = vector.broadcast %cst_20 : f32 to vector<1x512xf32>
      %c0_21 = arith.constant 0 : index
      %c0_22 = arith.constant 0 : index
      %35 = vector.load %arg5[%c0_21, %c0_22] : memref<1x512xf32, #tpu.memory_space<vmem>>, vector<1x512xf32>
      tpu.vector_store %arg5[%c0_21, %c0_22], %34 {strides = array<i32>} : memref<1x512xf32, #tpu.memory_space<vmem>>, vector<1x512xf32>,
      %cst_23 = arith.constant 0.000000e+00 : f32
      %36 = vector.broadcast %cst_23 : f32 to vector<1x512xf32>
      %c0_24 = arith.constant 0 : index
      %c0_25 = arith.constant 0 : index
      %37 = vector.load %arg6[%c0_24, %c0_25] : memref<1x512xf32, #tpu.memory_space<vmem>>, vector<1x512xf32>
      tpu.vector_store %arg6[%c0_24, %c0_25], %36 {strides = array<i32>} : memref<1x512xf32, #tpu.memory_space<vmem>>, vector<1x512xf32>,
    } else {
    }
    %c0 = arith.constant 0 : index
    %c0_2 = arith.constant 0 : index
    %c0_3 = arith.constant 0 : index
    %5 = vector.load %arg2[%c0, %c0_2, %c0_3] : memref<1x1088x128xf32, #tpu.memory_space<vmem>>, vector<1x1088x128xf32>
    %6 = vector.shape_cast %5 : vector<1x1088x128xf32> to vector<1088x128xf32>
    %7 = arith.truncf %6 : vector<1088x128xf32> to vector<1088x128xbf16>
    %c0_4 = arith.constant 0 : index
    %c0_5 = arith.constant 0 : index
    %8 = vector.load %arg3[%c0_4, %c0_5] : memref<1088x512xbf16, #tpu.memory_space<vmem>>, vector<1088x512xbf16>
    %cst = arith.constant dense<0.000000e+00> : vector<128x512xf32>
    %9 = tpu.matmul %7, %8, %cst {dimension_numbers = #tpu.dot_dimension_numbers<[0], [0], [1], [1], [0, 1, 1, 1], [], []>} : vector<1088x128xbf16>, vector<1088x512xbf16>, vector<128x512xf32> -> vector<128x512xf32>
    %10 = tpu.iota {dimensions = array<i32: 0>} : vector<128x1xi32>
    %c128_i32 = arith.constant 128 : i32
    %11 = arith.muli %arg1, %c128_i32 : i32
    %c200_i32 = arith.constant 200 : i32
    %12 = arith.subi %c200_i32, %11 : i32
    %13 = vector.broadcast %12 : i32 to vector<128x1xi32>
    %14 = arith.cmpi slt, %10, %13 : vector<128x1xi32>
    %cst_6 = arith.constant 0.000000e+00 : f32
    %15 = vector.shape_cast %14 : vector<128x1xi1> to vector<128x1xi1>
    %16 = vector.broadcast %15 : vector<128x1xi1> to vector<128x512xi1>
    %17 = vector.broadcast %cst_6 : f32 to vector<128x512xf32>
    %18 = arith.select %16, %9, %17 : vector<128x512xi1>, vector<128x512xf32>
    %19 = arith.truncf %18 : vector<128x512xf32> to vector<128x512xbf16>
    %c0_7 = arith.constant 0 : index
    %c0_8 = arith.constant 0 : index
    %c0_9 = arith.constant 0 : index
    %20 = vector.load %arg4[%c0_7, %c0_8, %c0_9] : memref<1x128x512xbf16, #tpu.memory_space<vmem>>, vector<1x128x512xbf16>
    %21 = vector.shape_cast %20 : vector<1x128x512xbf16> to vector<128x512xbf16>
    %22 = vector.shape_cast %19 : vector<128x512xbf16> to vector<1x128x512xbf16>
    tpu.vector_store %arg4[%c0_7, %c0_8, %c0_9], %22 {strides = array<i32>} : memref<1x128x512xbf16, #tpu.memory_space<vmem>>, vector<1x128x512xbf16>,
    %c0_10 = arith.constant 0 : index
    %c0_11 = arith.constant 0 : index
    %23 = vector.load %arg5[%c0_10, %c0_11] : memref<1x512xf32, #tpu.memory_space<vmem>>, vector<1x512xf32>
    %cst_12 = arith.constant dense<0.000000e+00> : vector<512xf32>
    %24 = vector.multi_reduction <add>, %18, %cst_12 [0] : vector<128x512xf32> to vector<512xf32>
    %25 = vector.shape_cast %24 : vector<512xf32> to vector<1x512xf32>
    %26 = arith.addf %23, %25 : vector<1x512xf32>
    %c0_13 = arith.constant 0 : index
    %c0_14 = arith.constant 0 : index
    %27 = vector.load %arg5[%c0_13, %c0_14] : memref<1x512xf32, #tpu.memory_space<vmem>>, vector<1x512xf32>
    tpu.vector_store %arg5[%c0_13, %c0_14], %26 {strides = array<i32>} : memref<1x512xf32, #tpu.memory_space<vmem>>, vector<1x512xf32>,
    %c0_15 = arith.constant 0 : index
    %c0_16 = arith.constant 0 : index
    %28 = vector.load %arg6[%c0_15, %c0_16] : memref<1x512xf32, #tpu.memory_space<vmem>>, vector<1x512xf32>
    %29 = arith.mulf %18, %18 : vector<128x512xf32>
    %cst_17 = arith.constant dense<0.000000e+00> : vector<512xf32>
    %30 = vector.multi_reduction <add>, %29, %cst_17 [0] : vector<128x512xf32> to vector<512xf32>
    %31 = vector.shape_cast %30 : vector<512xf32> to vector<1x512xf32>
    %32 = arith.addf %28, %31 : vector<1x512xf32>
    %c0_18 = arith.constant 0 : index
    %c0_19 = arith.constant 0 : index
    %33 = vector.load %arg6[%c0_18, %c0_19] : memref<1x512xf32, #tpu.memory_space<vmem>>, vector<1x512xf32>
    tpu.vector_store %arg6[%c0_18, %c0_19], %32 {strides = array<i32>} : memref<1x512xf32, #tpu.memory_space<vmem>>, vector<1x512xf32>,
    return
  }
  func.func @transform_0(%arg0: i32, %arg1: i32) -> (i32, i32, i32) {
    %c0_i32 = arith.constant 0 : i32
    %c0_i32_0 = arith.constant 0 : i32
    return %arg0, %c0_i32, %arg1 : i32, i32, i32
  }
  func.func @transform_1(%arg0: i32, %arg1: i32) -> (i32, i32) {
    %c0_i32 = arith.constant 0 : i32
    %c0_i32_0 = arith.constant 0 : i32
    %c0_i32_1 = arith.constant 0 : i32
    return %c0_i32, %c0_i32_0 : i32, i32
  }
  func.func @transform_2(%arg0: i32, %arg1: i32) -> (i32, i32, i32) {
    %c0_i32 = arith.constant 0 : i32
    %c0_i32_0 = arith.constant 0 : i32
    return %arg0, %arg1, %c0_i32 : i32, i32, i32
  }
  func.func @transform_3(%arg0: i32, %arg1: i32) -> (i32, i32) {
    %c0_i32 = arith.constant 0 : i32
    %c0_i32_0 = arith.constant 0 : i32
    %c0_i32_1 = arith.constant 0 : i32
    return %c0_i32, %c0_i32_0 : i32, i32
  }
  func.func @transform_4(%arg0: i32, %arg1: i32) -> (i32, i32) {
    %c0_i32 = arith.constant 0 : i32
    %c0_i32_0 = arith.constant 0 : i32
    %c0_i32_1 = arith.constant 0 : i32
    return %c0_i32, %c0_i32_0 : i32, i32
  }
}

</mosaic_0001>

<bundles_post_ra>
// kernel: tpu_custom_call.1
= control target key start
LH: loop header
LB: loop body
LE: loop exit
PB: predicated region body
PF: predicated region fallthrough
CT: control target
= control target key end

     0   :  { %s10895_s0 = inlined_call_operand.vmem [shape: f32[2,1088,200], index: 0, kind: input, shape index: {}]   ;;  %s10896_s1 = inlined_call_operand.vmem [shape: bf16[1088,512], index: 1, kind: input, shape index: {}]   ;;  %s10897_s2 = inlined_call_operand.hbm [shape: bf16[2,256,512], index: 2, kind: output, shape index: {0}]   ;;  %s10898_s3 = inlined_call_operand.hbm [shape: f32[1,512], index: 3, kind: output, shape index: {1}]   ;;  %s10899_s4 = inlined_call_operand.hbm [shape: f32[1,512], index: 4, kind: output, shape index: {2}]  }
   0x1   :  { %11037 = sst [smem:[#allocation71_spill]] %s10895_s0 }
   0x2   :  { %10 = vsyncpa [#allocation4], 0 }
   0x3   :  { %12 = vsyncpa [#allocation4 + $0x1], 0 }
   0x4   :  { %13 = vsyncpa [#allocation6], 0  ;;  %s7254_s15 = smov 0   ;;  %s7256_s16 = smov 0  }
   0x5   :  { %s7258_s17 = smov 0   ;;  %s7260_s18 = smov 0  }
   0x6   :  { %s7262_s19 = smov 0   ;;  %s7264_s20 = smov 0  }
   0x7   :  { %s7266_s21 = smov 0   ;;  %s7268_s22 = smov 0  }
   0x8 LB: > { %s5181_s23 = sadd.s32 4294967295, %s7212_s22   ;;  %s5182_s24 = sadd.s32 4294967294, %s7212_s22   ;;  %s7212_s22 = sphi %s7268_s22, %s19_s22   ;;  %s7208_s21 = sphi %s7266_s21, %s11304_s21   ;;  %s7204_s20 = sphi %s7264_s20, %s11303_s20   ;;  %s7200_s19 = sphi %s7262_s19, %s11302_s19   ;;  %s7196_s18 = sphi %s7260_s18, %s11301_s18   ;;  %s7192_s17 = sphi %s7258_s17, %s11300_s17   ;;  %s7188_s16 = sphi %s7256_s16, %s11299_s16   ;;  %s7184_s15 = sphi %s7254_s15, %s11298_s15  }
   0x9   : > { %s28_s25 = sadd.s32 1, %s7204_s20  ;;  %s31_s26 = sadd.s32 1, %s7208_s21 }
   0xa   : > { %p29_p0 = scmp.ge.s32.totalorder %s28_s25, 2  ;;  %p47_p1 = scmp.ne.s32.totalorder %s7192_s17, %s7188_s16 }
   0xb   : > { %p48_p2 = scmp.eq.s32.totalorder %s7212_s22, 0  ;;  %p7310_p5 = scmp.eq.s32.totalorder %s5181_s23, 3 }
   0xc   : > { %s11306_s25 = smov (%p29_p0, %s28_s25), 0  ;;  %s11308_s26 = smov (!%p29_p0, %s31_s26), %s7208_s21 }
   0xd   : > { %s36_s27 = ssub.s32 %s7204_s20, %s11306_s25  ;;  %p7306_p3 = por %p48_p2, %p47_p1 }
   0xe   : > { %p33_p4 = scmp.ge.s32.totalorder %s11308_s26, 2  ;;  %p105_p6 = scmp.ne.s32.totalorder %s7188_s16, %s7184_s15 }
   0xf   : > { %p106_p7 = scmp.eq.s32.totalorder %s5182_s24, 3  ;;  %p7320_p8 = por %p7310_p5, %p47_p1 }
  0x10   : > { %s11310_s26 = smov (%p33_p4, %s11308_s26), 0  ;;  %s40_s8 = sadd.s32 1, %s7192_s17 }
  0x11   : > { %11040 = sst [smem:[#allocation10_spill]] %s11310_s26  ;;  %p7324_p9 = por %p106_p7, %p105_p6 }
  0x12   : > { %s35_s6 = ssub.s32 %s7208_s21, %s11310_s26  ;;  %p5184_p11 = scmp.ge.s32.totalorder %s7212_s22, 4 }
  0x13   : > { %s37_s7 = sor.u32 %s36_s27, %s35_s6 }
  0x14   : > { %p38_p10 = scmp.eq.s32.totalorder %s37_s7, 0  ;;  %167 = sbr.rel (%p5184_p11) target bundleno = 170 (0xaa), region = 20 }
  0x16   : > { %s7332_s9 = scalar_select %p38_p10, %s7192_s17, %s40_s8  }
  0x19   : > { %170 = sbr.rel (!%p7306_p3) target bundleno = 170 (0xaa), region = 24  ;;  %s172_s10 = sand.u32 (%p7306_p3), 1, %s7192_s17  }
  0x1a   : > { %s6895_s11 = smul.u32 (%p7306_p3), 272, %s7208_s21  ;;  %s11043_s0 = sld [smem:[#allocation71_spill]] (%p7306_p3) }
  0x1b   : > { %s6894_s12 = smul.u32 (%p7306_p3), 1088, %s172_s10 }
  0x1c   : > { %s176_s13 = sadd.s32 (%p7306_p3), %s7204_s20, %s6895_s11 }
  0x1d   : > { %s5185_s14 = sshll.u32 (%p7306_p3), %s176_s13, 3  ;;  %s7348_s28 = scalar_lea.vmem (%p7306_p3), [#allocation2], %s6894_s12 }
  0x20   : > { %s7343_s27 = scalar_lea.vmem %s11043_s0, %s5185_s14 }
  0x21   : > { %v477_v0 = vld [vmem:[%s7343_s27] sm:$0xff]  ;;  %v479_v1 = vld [vmem:[%s7343_s27 + $0x10] sm:$0xff] }
  0x22   : > { %v481_v2 = vld [vmem:[%s7343_s27 + $0x20] sm:$0xff]  ;;  %478 = vst [vmem:[%s7348_s28] sm:$0xff] %v477_v0  ;;  %v483_v3 = vld [vmem:[%s7343_s27 + $0x30] sm:$0xff] }
  0x23   : > { %480 = vst [vmem:[%s7348_s28 + $0x8] sm:$0xff] %v479_v1  ;;  %v485_v4 = vld [vmem:[%s7343_s27 + $0x40] sm:$0xff]  ;;  %v487_v5 = vld [vmem:[%s7343_s27 + $0x50] sm:$0xff] }
  0x24   : > { %482 = vst [vmem:[%s7348_s28 + $0x10] sm:$0xff] %v481_v2  ;;  %v489_v6 = vld [vmem:[%s7343_s27 + $0x60] sm:$0xff]  ;;  %v491_v7 = vld [vmem:[%s7343_s27 + $0x70] sm:$0xff] }
  0x25   : > { %484 = vst [vmem:[%s7348_s28 + $0x18] sm:$0xff] %v483_v3  ;;  %v493_v8 = vld [vmem:[%s7343_s27 + $0x80] sm:$0xff]  ;;  %v495_v9 = vld [vmem:[%s7343_s27 + $0x90] sm:$0xff] }
  0x26   : > { %486 = vst [vmem:[%s7348_s28 + $0x20] sm:$0xff] %v485_v4  ;;  %v497_v10 = vld [vmem:[%s7343_s27 + $0xa0] sm:$0xff]  ;;  %v499_v11 = vld [vmem:[%s7343_s27 + $0xb0] sm:$0xff] }
  0x27   : > { %488 = vst [vmem:[%s7348_s28 + $0x28] sm:$0xff] %v487_v5  ;;  %v501_v12 = vld [vmem:[%s7343_s27 + $0xc0] sm:$0xff]  ;;  %v503_v13 = vld [vmem:[%s7343_s27 + $0xd0] sm:$0xff] }
  0x28   : > { %490 = vst [vmem:[%s7348_s28 + $0x30] sm:$0xff] %v489_v6  ;;  %v505_v14 = vld [vmem:[%s7343_s27 + $0xe0] sm:$0xff]  ;;  %v507_v15 = vld [vmem:[%s7343_s27 + $0xf0] sm:$0xff] }
  0x29   : > { %492 = vst [vmem:[%s7348_s28 + $0x38] sm:$0xff] %v491_v7  ;;  %v509_v16 = vld [vmem:[%s7343_s27 + $0x100] sm:$0xff]  ;;  %v511_v17 = vld [vmem:[%s7343_s27 + $0x110] sm:$0xff] }
  0x2a   : > { %494 = vst [vmem:[%s7348_s28 + $0x40] sm:$0xff] %v493_v8  ;;  %v513_v18 = vld [vmem:[%s7343_s27 + $0x120] sm:$0xff]  ;;  %v515_v19 = vld [vmem:[%s7343_s27 + $0x130] sm:$0xff] }
  0x2b   : > { %496 = vst [vmem:[%s7348_s28 + $0x48] sm:$0xff] %v495_v9  ;;  %v517_v20 = vld [vmem:[%s7343_s27 + $0x140] sm:$0xff]  ;;  %v519_v21 = vld [vmem:[%s7343_s27 + $0x150] sm:$0xff] }
  0x2c   : > { %498 = vst [vmem:[%s7348_s28 + $0x50] sm:$0xff] %v497_v10  ;;  %v521_v22 = vld [vmem:[%s7343_s27 + $0x160] sm:$0xff]  ;;  %v523_v23 = vld [vmem:[%s7343_s27 + $0x170] sm:$0xff] }
  0x2d   : > { %500 = vst [vmem:[%s7348_s28 + $0x58] sm:$0xff] %v499_v11  ;;  %v525_v24 = vld [vmem:[%s7343_s27 + $0x180] sm:$0xff]  ;;  %v527_v25 = vld [vmem:[%s7343_s27 + $0x190] sm:$0xff] }
  0x2e   : > { %502 = vst [vmem:[%s7348_s28 + $0x60] sm:$0xff] %v501_v12  ;;  %v529_v26 = vld [vmem:[%s7343_s27 + $0x1a0] sm:$0xff]  ;;  %v531_v27 = vld [vmem:[%s7343_s27 + $0x1b0] sm:$0xff] }
  0x2f   : > { %504 = vst [vmem:[%s7348_s28 + $0x68] sm:$0xff] %v503_v13  ;;  %v533_v28 = vld [vmem:[%s7343_s27 + $0x1c0] sm:$0xff]  ;;  %v535_v29 = vld [vmem:[%s7343_s27 + $0x1d0] sm:$0xff] }
  0x30   : > { %506 = vst [vmem:[%s7348_s28 + $0x70] sm:$0xff] %v505_v14  ;;  %v537_v30 = vld [vmem:[%s7343_s27 + $0x1e0] sm:$0xff]  ;;  %v539_v31 = vld [vmem:[%s7343_s27 + $0x1f0] sm:$0xff] }
  0x31   : > { %508 = vst [vmem:[%s7348_s28 + $0x78] sm:$0xff] %v507_v15  ;;  %v541_v32 = vld [vmem:[%s7343_s27 + $0x200] sm:$0xff]  ;;  %v543_v33 = vld [vmem:[%s7343_s27 + $0x210] sm:$0xff] }
  0x32   : > { %510 = vst [vmem:[%s7348_s28 + $0x80] sm:$0xff] %v509_v16  ;;  %v545_v34 = vld [vmem:[%s7343_s27 + $0x220] sm:$0xff]  ;;  %v547_v35 = vld [vmem:[%s7343_s27 + $0x230] sm:$0xff] }
  0x33   : > { %512 = vst [vmem:[%s7348_s28 + $0x88] sm:$0xff] %v511_v17  ;;  %v549_v36 = vld [vmem:[%s7343_s27 + $0x240] sm:$0xff]  ;;  %v551_v37 = vld [vmem:[%s7343_s27 + $0x250] sm:$0xff] }
  0x34   : > { %514 = vst [vmem:[%s7348_s28 + $0x90] sm:$0xff] %v513_v18  ;;  %v553_v38 = vld [vmem:[%s7343_s27 + $0x260] sm:$0xff]  ;;  %v555_v39 = vld [vmem:[%s7343_s27 + $0x270] sm:$0xff] }
  0x35   : > { %516 = vst [vmem:[%s7348_s28 + $0x98] sm:$0xff] %v515_v19  ;;  %v557_v40 = vld [vmem:[%s7343_s27 + $0x280] sm:$0xff]  ;;  %v559_v41 = vld [vmem:[%s7343_s27 + $0x290] sm:$0xff] }
  0x36   : > { %518 = vst [vmem:[%s7348_s28 + $0xa0] sm:$0xff] %v517_v20  ;;  %v561_v42 = vld [vmem:[%s7343_s27 + $0x2a0] sm:$0xff]  ;;  %v563_v43 = vld [vmem:[%s7343_s27 + $0x2b0] sm:$0xff] }
  0x37   : > { %520 = vst [vmem:[%s7348_s28 + $0xa8] sm:$0xff] %v519_v21  ;;  %v565_v44 = vld [vmem:[%s7343_s27 + $0x2c0] sm:$0xff]  ;;  %v567_v45 = vld [vmem:[%s7343_s27 + $0x2d0] sm:$0xff] }
  0x38   : > { %522 = vst [vmem:[%s7348_s28 + $0xb0] sm:$0xff] %v521_v22  ;;  %v569_v46 = vld [vmem:[%s7343_s27 + $0x2e0] sm:$0xff]  ;;  %v571_v47 = vld [vmem:[%s7343_s27 + $0x2f0] sm:$0xff] }
  0x39   : > { %524 = vst [vmem:[%s7348_s28 + $0xb8] sm:$0xff] %v523_v23  ;;  %v573_v48 = vld [vmem:[%s7343_s27 + $0x300] sm:$0xff]  ;;  %v575_v49 = vld [vmem:[%s7343_s27 + $0x310] sm:$0xff] }
  0x3a   : > { %526 = vst [vmem:[%s7348_s28 + $0xc0] sm:$0xff] %v525_v24  ;;  %v577_v50 = vld [vmem:[%s7343_s27 + $0x320] sm:$0xff]  ;;  %v579_v51 = vld [vmem:[%s7343_s27 + $0x330] sm:$0xff] }
  0x3b   : > { %528 = vst [vmem:[%s7348_s28 + $0xc8] sm:$0xff] %v527_v25  ;;  %v581_v52 = vld [vmem:[%s7343_s27 + $0x340] sm:$0xff]  ;;  %v583_v53 = vld [vmem:[%s7343_s27 + $0x350] sm:$0xff] }
  0x3c   : > { %530 = vst [vmem:[%s7348_s28 + $0xd0] sm:$0xff] %v529_v26  ;;  %v585_v54 = vld [vmem:[%s7343_s27 + $0x360] sm:$0xff]  ;;  %v587_v55 = vld [vmem:[%s7343_s27 + $0x370] sm:$0xff] }
  0x3d   : > { %532 = vst [vmem:[%s7348_s28 + $0xd8] sm:$0xff] %v531_v27  ;;  %v589_v56 = vld [vmem:[%s7343_s27 + $0x380] sm:$0xff]  ;;  %v591_v57 = vld [vmem:[%s7343_s27 + $0x390] sm:$0xff] }
  0x3e   : > { %534 = vst [vmem:[%s7348_s28 + $0xe0] sm:$0xff] %v533_v28  ;;  %v593_v58 = vld [vmem:[%s7343_s27 + $0x3a0] sm:$0xff]  ;;  %v595_v59 = vld [vmem:[%s7343_s27 + $0x3b0] sm:$0xff] }
  0x3f   : > { %536 = vst [vmem:[%s7348_s28 + $0xe8] sm:$0xff] %v535_v29  ;;  %v597_v60 = vld [vmem:[%s7343_s27 + $0x3c0] sm:$0xff]  ;;  %v599_v61 = vld [vmem:[%s7343_s27 + $0x3d0] sm:$0xff] }
  0x40   : > { %538 = vst [vmem:[%s7348_s28 + $0xf0] sm:$0xff] %v537_v30  ;;  %v601_v62 = vld [vmem:[%s7343_s27 + $0x3e0] sm:$0xff]  ;;  %v603_v63 = vld [vmem:[%s7343_s27 + $0x3f0] sm:$0xff] }
  0x41   : > { %540 = vst [vmem:[%s7348_s28 + $0xf8] sm:$0xff] %v539_v31  ;;  %v605_v0 = vld [vmem:[%s7343_s27 + $0x400] sm:$0xff]  ;;  %v607_v1 = vld [vmem:[%s7343_s27 + $0x410] sm:$0xff] }
  0x42   : > { %542 = vst [vmem:[%s7348_s28 + $0x100] sm:$0xff] %v541_v32  ;;  %v609_v2 = vld [vmem:[%s7343_s27 + $0x420] sm:$0xff]  ;;  %v611_v3 = vld [vmem:[%s7343_s27 + $0x430] sm:$0xff] }
  0x43   : > { %544 = vst [vmem:[%s7348_s28 + $0x108] sm:$0xff] %v543_v33  ;;  %v613_v4 = vld [vmem:[%s7343_s27 + $0x440] sm:$0xff]  ;;  %v615_v5 = vld [vmem:[%s7343_s27 + $0x450] sm:$0xff] }
  0x44   : > { %546 = vst [vmem:[%s7348_s28 + $0x110] sm:$0xff] %v545_v34  ;;  %v617_v6 = vld [vmem:[%s7343_s27 + $0x460] sm:$0xff]  ;;  %v619_v7 = vld [vmem:[%s7343_s27 + $0x470] sm:$0xff] }
  0x45   : > { %548 = vst [vmem:[%s7348_s28 + $0x118] sm:$0xff] %v547_v35  ;;  %v621_v8 = vld [vmem:[%s7343_s27 + $0x480] sm:$0xff]  ;;  %v623_v9 = vld [vmem:[%s7343_s27 + $0x490] sm:$0xff] }
  0x46   : > { %550 = vst [vmem:[%s7348_s28 + $0x120] sm:$0xff] %v549_v36  ;;  %v625_v10 = vld [vmem:[%s7343_s27 + $0x4a0] sm:$0xff]  ;;  %v627_v11 = vld [vmem:[%s7343_s27 + $0x4b0] sm:$0xff] }
  0x47   : > { %552 = vst [vmem:[%s7348_s28 + $0x128] sm:$0xff] %v551_v37  ;;  %v629_v12 = vld [vmem:[%s7343_s27 + $0x4c0] sm:$0xff]  ;;  %v631_v13 = vld [vmem:[%s7343_s27 + $0x4d0] sm:$0xff] }
  0x48   : > { %554 = vst [vmem:[%s7348_s28 + $0x130] sm:$0xff] %v553_v38  ;;  %v633_v14 = vld [vmem:[%s7343_s27 + $0x4e0] sm:$0xff]  ;;  %v635_v15 = vld [vmem:[%s7343_s27 + $0x4f0] sm:$0xff] }
  0x49   : > { %556 = vst [vmem:[%s7348_s28 + $0x138] sm:$0xff] %v555_v39  ;;  %v637_v16 = vld [vmem:[%s7343_s27 + $0x500] sm:$0xff]  ;;  %v639_v17 = vld [vmem:[%s7343_s27 + $0x510] sm:$0xff] }
  0x4a   : > { %558 = vst [vmem:[%s7348_s28 + $0x140] sm:$0xff] %v557_v40  ;;  %v641_v18 = vld [vmem:[%s7343_s27 + $0x520] sm:$0xff]  ;;  %v643_v19 = vld [vmem:[%s7343_s27 + $0x530] sm:$0xff] }
  0x4b   : > { %560 = vst [vmem:[%s7348_s28 + $0x148] sm:$0xff] %v559_v41  ;;  %v645_v20 = vld [vmem:[%s7343_s27 + $0x540] sm:$0xff]  ;;  %v647_v21 = vld [vmem:[%s7343_s27 + $0x550] sm:$0xff] }
  0x4c   : > { %562 = vst [vmem:[%s7348_s28 + $0x150] sm:$0xff] %v561_v42  ;;  %v649_v22 = vld [vmem:[%s7343_s27 + $0x560] sm:$0xff]  ;;  %v651_v23 = vld [vmem:[%s7343_s27 + $0x570] sm:$0xff] }
  0x4d   : > { %564 = vst [vmem:[%s7348_s28 + $0x158] sm:$0xff] %v563_v43  ;;  %v653_v24 = vld [vmem:[%s7343_s27 + $0x580] sm:$0xff]  ;;  %v655_v25 = vld [vmem:[%s7343_s27 + $0x590] sm:$0xff] }
  0x4e   : > { %566 = vst [vmem:[%s7348_s28 + $0x160] sm:$0xff] %v565_v44  ;;  %v657_v26 = vld [vmem:[%s7343_s27 + $0x5a0] sm:$0xff]  ;;  %v659_v27 = vld [vmem:[%s7343_s27 + $0x5b0] sm:$0xff] }
  0x4f   : > { %568 = vst [vmem:[%s7348_s28 + $0x168] sm:$0xff] %v567_v45  ;;  %v661_v28 = vld [vmem:[%s7343_s27 + $0x5c0] sm:$0xff]  ;;  %v663_v29 = vld [vmem:[%s7343_s27 + $0x5d0] sm:$0xff] }
  0x50   : > { %570 = vst [vmem:[%s7348_s28 + $0x170] sm:$0xff] %v569_v46  ;;  %v665_v30 = vld [vmem:[%s7343_s27 + $0x5e0] sm:$0xff]  ;;  %v667_v31 = vld [vmem:[%s7343_s27 + $0x5f0] sm:$0xff] }
  0x51   : > { %572 = vst [vmem:[%s7348_s28 + $0x178] sm:$0xff] %v571_v47  ;;  %v669_v32 = vld [vmem:[%s7343_s27 + $0x600] sm:$0xff]  ;;  %v671_v33 = vld [vmem:[%s7343_s27 + $0x610] sm:$0xff] }
  0x52   : > { %574 = vst [vmem:[%s7348_s28 + $0x180] sm:$0xff] %v573_v48  ;;  %v673_v34 = vld [vmem:[%s7343_s27 + $0x620] sm:$0xff]  ;;  %v675_v35 = vld [vmem:[%s7343_s27 + $0x630] sm:$0xff] }
  0x53   : > { %576 = vst [vmem:[%s7348_s28 + $0x188] sm:$0xff] %v575_v49  ;;  %v677_v36 = vld [vmem:[%s7343_s27 + $0x640] sm:$0xff]  ;;  %v679_v37 = vld [vmem:[%s7343_s27 + $0x650] sm:$0xff] }
  0x54   : > { %578 = vst [vmem:[%s7348_s28 + $0x190] sm:$0xff] %v577_v50  ;;  %v681_v38 = vld [vmem:[%s7343_s27 + $0x660] sm:$0xff]  ;;  %v683_v39 = vld [vmem:[%s7343_s27 + $0x670] sm:$0xff] }
  0x55   : > { %580 = vst [vmem:[%s7348_s28 + $0x198] sm:$0xff] %v579_v51  ;;  %v685_v40 = vld [vmem:[%s7343_s27 + $0x680] sm:$0xff]  ;;  %v687_v41 = vld [vmem:[%s7343_s27 + $0x690] sm:$0xff] }
  0x56   : > { %582 = vst [vmem:[%s7348_s28 + $0x1a0] sm:$0xff] %v581_v52  ;;  %v689_v42 = vld [vmem:[%s7343_s27 + $0x6a0] sm:$0xff]  ;;  %v691_v43 = vld [vmem:[%s7343_s27 + $0x6b0] sm:$0xff] }
  0x57   : > { %584 = vst [vmem:[%s7348_s28 + $0x1a8] sm:$0xff] %v583_v53  ;;  %v693_v44 = vld [vmem:[%s7343_s27 + $0x6c0] sm:$0xff]  ;;  %v695_v45 = vld [vmem:[%s7343_s27 + $0x6d0] sm:$0xff] }
  0x58   : > { %586 = vst [vmem:[%s7348_s28 + $0x1b0] sm:$0xff] %v585_v54  ;;  %v697_v46 = vld [vmem:[%s7343_s27 + $0x6e0] sm:$0xff]  ;;  %v699_v47 = vld [vmem:[%s7343_s27 + $0x6f0] sm:$0xff] }
  0x59   : > { %588 = vst [vmem:[%s7348_s28 + $0x1b8] sm:$0xff] %v587_v55  ;;  %v701_v48 = vld [vmem:[%s7343_s27 + $0x700] sm:$0xff]  ;;  %v703_v49 = vld [vmem:[%s7343_s27 + $0x710] sm:$0xff] }
  0x5a   : > { %590 = vst [vmem:[%s7348_s28 + $0x1c0] sm:$0xff] %v589_v56  ;;  %v705_v50 = vld [vmem:[%s7343_s27 + $0x720] sm:$0xff]  ;;  %v707_v51 = vld [vmem:[%s7343_s27 + $0x730] sm:$0xff] }
  0x5b   : > { %592 = vst [vmem:[%s7348_s28 + $0x1c8] sm:$0xff] %v591_v57  ;;  %v709_v52 = vld [vmem:[%s7343_s27 + $0x740] sm:$0xff]  ;;  %v711_v53 = vld [vmem:[%s7343_s27 + $0x750] sm:$0xff] }
  0x5c   : > { %594 = vst [vmem:[%s7348_s28 + $0x1d0] sm:$0xff] %v593_v58  ;;  %v713_v54 = vld [vmem:[%s7343_s27 + $0x760] sm:$0xff]  ;;  %v715_v55 = vld [vmem:[%s7343_s27 + $0x770] sm:$0xff] }
  0x5d   : > { %596 = vst [vmem:[%s7348_s28 + $0x1d8] sm:$0xff] %v595_v59  ;;  %v717_v56 = vld [vmem:[%s7343_s27 + $0x780] sm:$0xff]  ;;  %v719_v57 = vld [vmem:[%s7343_s27 + $0x790] sm:$0xff] }
  0x5e   : > { %598 = vst [vmem:[%s7348_s28 + $0x1e0] sm:$0xff] %v597_v60  ;;  %v721_v58 = vld [vmem:[%s7343_s27 + $0x7a0] sm:$0xff]  ;;  %v723_v59 = vld [vmem:[%s7343_s27 + $0x7b0] sm:$0xff] }
  0x5f   : > { %600 = vst [vmem:[%s7348_s28 + $0x1e8] sm:$0xff] %v599_v61  ;;  %v725_v60 = vld [vmem:[%s7343_s27 + $0x7c0] sm:$0xff]  ;;  %v727_v61 = vld [vmem:[%s7343_s27 + $0x7d0] sm:$0xff] }
  0x60   : > { %602 = vst [vmem:[%s7348_s28 + $0x1f0] sm:$0xff] %v601_v62  ;;  %v729_v62 = vld [vmem:[%s7343_s27 + $0x7e0] sm:$0xff] }
  0x61   : > { %604 = vst [vmem:[%s7348_s28 + $0x1f8] sm:$0xff] %v603_v63  ;;  %v731_v63 = vld [vmem:[%s7343_s27 + $0x7f0] sm:$0xff] }
  0x62   : > { %606 = vst [vmem:[%s7348_s28 + $0x200] sm:$0xff] %v605_v0  ;;  %v733_v0 = vld [vmem:[%s7343_s27 + $0x800] sm:$0xff] }
  0x63   : > { %608 = vst [vmem:[%s7348_s28 + $0x208] sm:$0xff] %v607_v1  ;;  %v735_v1 = vld [vmem:[%s7343_s27 + $0x810] sm:$0xff] }
  0x64   : > { %610 = vst [vmem:[%s7348_s28 + $0x210] sm:$0xff] %v609_v2  ;;  %v737_v2 = vld [vmem:[%s7343_s27 + $0x820] sm:$0xff] }
  0x65   : > { %612 = vst [vmem:[%s7348_s28 + $0x218] sm:$0xff] %v611_v3  ;;  %v739_v3 = vld [vmem:[%s7343_s27 + $0x830] sm:$0xff] }
  0x66   : > { %614 = vst [vmem:[%s7348_s28 + $0x220] sm:$0xff] %v613_v4  ;;  %v741_v4 = vld [vmem:[%s7343_s27 + $0x840] sm:$0xff] }
  0x67   : > { %616 = vst [vmem:[%s7348_s28 + $0x228] sm:$0xff] %v615_v5  ;;  %v743_v5 = vld [vmem:[%s7343_s27 + $0x850] sm:$0xff] }
  0x68   : > { %618 = vst [vmem:[%s7348_s28 + $0x230] sm:$0xff] %v617_v6  ;;  %v745_v6 = vld [vmem:[%s7343_s27 + $0x860] sm:$0xff] }
  0x69   : > { %620 = vst [vmem:[%s7348_s28 + $0x238] sm:$0xff] %v619_v7  ;;  %v747_v7 = vld [vmem:[%s7343_s27 + $0x870] sm:$0xff] }
  0x6a   : > { %622 = vst [vmem:[%s7348_s28 + $0x240] sm:$0xff] %v621_v8 }
  0x6b   : > { %624 = vst [vmem:[%s7348_s28 + $0x248] sm:$0xff] %v623_v9 }
  0x6c   : > { %626 = vst [vmem:[%s7348_s28 + $0x250] sm:$0xff] %v625_v10 }
  0x6d   : > { %628 = vst [vmem:[%s7348_s28 + $0x258] sm:$0xff] %v627_v11 }
  0x6e   : > { %630 = vst [vmem:[%s7348_s28 + $0x260] sm:$0xff] %v629_v12 }
  0x6f   : > { %632 = vst [vmem:[%s7348_s28 + $0x268] sm:$0xff] %v631_v13 }
  0x70   : > { %634 = vst [vmem:[%s7348_s28 + $0x270] sm:$0xff] %v633_v14 }
  0x71   : > { %636 = vst [vmem:[%s7348_s28 + $0x278] sm:$0xff] %v635_v15 }
  0x72   : > { %638 = vst [vmem:[%s7348_s28 + $0x280] sm:$0xff] %v637_v16 }
  0x73   : > { %640 = vst [vmem:[%s7348_s28 + $0x288] sm:$0xff] %v639_v17 }
  0x74   : > { %642 = vst [vmem:[%s7348_s28 + $0x290] sm:$0xff] %v641_v18 }
  0x75   : > { %644 = vst [vmem:[%s7348_s28 + $0x298] sm:$0xff] %v643_v19 }
  0x76   : > { %646 = vst [vmem:[%s7348_s28 + $0x2a0] sm:$0xff] %v645_v20 }
  0x77   : > { %648 = vst [vmem:[%s7348_s28 + $0x2a8] sm:$0xff] %v647_v21 }
  0x78   : > { %650 = vst [vmem:[%s7348_s28 + $0x2b0] sm:$0xff] %v649_v22 }
  0x79   : > { %652 = vst [vmem:[%s7348_s28 + $0x2b8] sm:$0xff] %v651_v23 }
  0x7a   : > { %654 = vst [vmem:[%s7348_s28 + $0x2c0] sm:$0xff] %v653_v24 }
  0x7b   : > { %656 = vst [vmem:[%s7348_s28 + $0x2c8] sm:$0xff] %v655_v25 }
  0x7c   : > { %658 = vst [vmem:[%s7348_s28 + $0x2d0] sm:$0xff] %v657_v26 }
  0x7d   : > { %660 = vst [vmem:[%s7348_s28 + $0x2d8] sm:$0xff] %v659_v27 }
  0x7e   : > { %662 = vst [vmem:[%s7348_s28 + $0x2e0] sm:$0xff] %v661_v28 }
  0x7f   : > { %664 = vst [vmem:[%s7348_s28 + $0x2e8] sm:$0xff] %v663_v29 }
  0x80   : > { %666 = vst [vmem:[%s7348_s28 + $0x2f0] sm:$0xff] %v665_v30 }
  0x81   : > { %668 = vst [vmem:[%s7348_s28 + $0x2f8] sm:$0xff] %v667_v31 }
  0x82   : > { %670 = vst [vmem:[%s7348_s28 + $0x300] sm:$0xff] %v669_v32 }
  0x83   : > { %672 = vst [vmem:[%s7348_s28 + $0x308] sm:$0xff] %v671_v33 }
  0x84   : > { %674 = vst [vmem:[%s7348_s28 + $0x310] sm:$0xff] %v673_v34 }
  0x85   : > { %676 = vst [vmem:[%s7348_s28 + $0x318] sm:$0xff] %v675_v35 }
  0x86   : > { %678 = vst [vmem:[%s7348_s28 + $0x320] sm:$0xff] %v677_v36 }
  0x87   : > { %680 = vst [vmem:[%s7348_s28 + $0x328] sm:$0xff] %v679_v37 }
  0x88   : > { %682 = vst [vmem:[%s7348_s28 + $0x330] sm:$0xff] %v681_v38 }
  0x89   : > { %684 = vst [vmem:[%s7348_s28 + $0x338] sm:$0xff] %v683_v39 }
  0x8a   : > { %686 = vst [vmem:[%s7348_s28 + $0x340] sm:$0xff] %v685_v40 }
  0x8b   : > { %688 = vst [vmem:[%s7348_s28 + $0x348] sm:$0xff] %v687_v41 }
  0x8c   : > { %690 = vst [vmem:[%s7348_s28 + $0x350] sm:$0xff] %v689_v42 }
  0x8d   : > { %692 = vst [vmem:[%s7348_s28 + $0x358] sm:$0xff] %v691_v43 }
  0x8e   : > { %694 = vst [vmem:[%s7348_s28 + $0x360] sm:$0xff] %v693_v44 }
  0x8f   : > { %696 = vst [vmem:[%s7348_s28 + $0x368] sm:$0xff] %v695_v45 }
  0x90   : > { %698 = vst [vmem:[%s7348_s28 + $0x370] sm:$0xff] %v697_v46 }
  0x91   : > { %700 = vst [vmem:[%s7348_s28 + $0x378] sm:$0xff] %v699_v47 }
  0x92   : > { %702 = vst [vmem:[%s7348_s28 + $0x380] sm:$0xff] %v701_v48 }
  0x93   : > { %704 = vst [vmem:[%s7348_s28 + $0x388] sm:$0xff] %v703_v49 }
  0x94   : > { %706 = vst [vmem:[%s7348_s28 + $0x390] sm:$0xff] %v705_v50 }
  0x95   : > { %708 = vst [vmem:[%s7348_s28 + $0x398] sm:$0xff] %v707_v51 }
  0x96   : > { %710 = vst [vmem:[%s7348_s28 + $0x3a0] sm:$0xff] %v709_v52 }
  0x97   : > { %712 = vst [vmem:[%s7348_s28 + $0x3a8] sm:$0xff] %v711_v53 }
  0x98   : > { %714 = vst [vmem:[%s7348_s28 + $0x3b0] sm:$0xff] %v713_v54 }
  0x99   : > { %716 = vst [vmem:[%s7348_s28 + $0x3b8] sm:$0xff] %v715_v55 }
  0x9a   : > { %718 = vst [vmem:[%s7348_s28 + $0x3c0] sm:$0xff] %v717_v56 }
  0x9b   : > { %720 = vst [vmem:[%s7348_s28 + $0x3c8] sm:$0xff] %v719_v57 }
  0x9c   : > { %722 = vst [vmem:[%s7348_s28 + $0x3d0] sm:$0xff] %v721_v58 }
  0x9d   : > { %724 = vst [vmem:[%s7348_s28 + $0x3d8] sm:$0xff] %v723_v59 }
  0x9e   : > { %726 = vst [vmem:[%s7348_s28 + $0x3e0] sm:$0xff] %v725_v60 }
  0x9f   : > { %728 = vst [vmem:[%s7348_s28 + $0x3e8] sm:$0xff] %v727_v61 }
  0xa0   : > { %730 = vst [vmem:[%s7348_s28 + $0x3f0] sm:$0xff] %v729_v62 }
  0xa1   : > { %732 = vst [vmem:[%s7348_s28 + $0x3f8] sm:$0xff] %v731_v63 }
  0xa2   : > { %734 = vst [vmem:[%s7348_s28 + $0x400] sm:$0xff] %v733_v0 }
  0xa3   : > { %736 = vst [vmem:[%s7348_s28 + $0x408] sm:$0xff] %v735_v1 }
  0xa4   : > { %738 = vst [vmem:[%s7348_s28 + $0x410] sm:$0xff] %v737_v2 }
  0xa5   : > { %740 = vst [vmem:[%s7348_s28 + $0x418] sm:$0xff] %v739_v3 }
  0xa6   : > { %742 = vst [vmem:[%s7348_s28 + $0x420] sm:$0xff] %v741_v4 }
  0xa7   : > { %744 = vst [vmem:[%s7348_s28 + $0x428] sm:$0xff] %v743_v5 }
  0xa8   : > { %746 = vst [vmem:[%s7348_s28 + $0x430] sm:$0xff] %v745_v6 }
  0xa9   : > { %748 = vst [vmem:[%s7348_s28 + $0x438] sm:$0xff] %v747_v7 }
  0xaa PF: > { %p5186_p12 = scmp.ge.s32.totalorder %s7212_s22, 1  ;;  %p753_p13 = scmp.lt.s32.totalorder %s7212_s22, 5 }
  0xac   : > { %p754_p0 = pnand %p5186_p12, %p753_p13 }
  0xae   : > { %757 = sbr.rel (%p754_p0) target bundleno = 1695 (0x69f), region = 62 }
  0xb3   : > { %s7622_s6 = sand.u32 1, %s7188_s16   ;;  %p787_p1 = scmp.eq.s32.totalorder %s7200_s19, 0 }
  0xb4   : > { %s6896_s7 = smul.u32 1088, %s7622_s6  ;;  %s5187_s8 = sshll.u32 %s7622_s6, 8 }
  0xb5   : > { %p788_p2 = scmp.eq.s32.totalorder %s7196_s18, 0  ;;  %s7630_s11 = scalar_lea.vmem [#allocation3], %s5187_s8 }
  0xb6   : > { %s7628_s10 = scalar_lea.vmem [#allocation2], %s6896_s7 }
  0xb7   : > { %p789_p3 = pnand %p788_p2, %p787_p1 }
  0xb9   : > { %792 = sbr.rel (%p789_p3) target bundleno = 195 (0xc3), region = 70 }
  0xbe   : > { %v793_v8 = vlaneseq  ;;  %v7214_v9 = vmov 0.0  }
  0xc0   : > { %vm795_vm0 = vcmp.lt.s32.totalorder %v793_v8, 512 }
  0xc1   : > { %797 = vst.msk [vmem:[#allocation5] sm:$0xf] %vm795_vm0, %v7214_v9 }
  0xc2   : > { %798 = vst.msk [vmem:[#allocation7] sm:$0xf] %vm795_vm0, %v7214_v9 }
  0xc3 PF: > { %v815_v10 = vld [vmem:[%s7628_s10 + $0x80] sm:$0xff]  ;;  %v816_v11 = vld [vmem:[%s7628_s10 + $0x88] sm:$0xff]  ;;  %v817_v22 = vld [vmem:[%s7628_s10 + $0x90] sm:$0xff]  ;;  %vm2779_vm1 = vcmask 523264   ;;  %s6308_s24 = sshll.u32 %s7196_s18, 7  ;;  %s6592_s26 = sshll.u32 %s7196_s18, 6 }
  0xc4   : > { %v847_v12 = vld [vmem:[%s7628_s10 + $0x180] sm:$0xff]  ;;  %v848_v13 = vld [vmem:[%s7628_s10 + $0x188] sm:$0xff]  ;;  %v7636_v14 = vpack.c.bf16 %v816_v11, %v815_v10  ;;  %v818_v23 = vld [vmem:[%s7628_s10 + $0x98] sm:$0xff]  ;;  %s6312_s13 = sshll.u32 %s7200_s19, 7  ;;  %s5047_s27 = sshll.u32 %s7630_s11, 4  ;;  %s10818_s27 = int_to_ptr.vmem [resolvable:$true] %s5047_s27 }
  0xc5   : > { %v799_v15 = vld [vmem:[%s7628_s10] sm:$0xff]  ;;  %v800_v16 = vld [vmem:[%s7628_s10 + $0x8] sm:$0xff]  ;;  %v7640_v17 = vpack.c.bf16 %v848_v13, %v847_v12  ;;  %v849_v24 = vld [vmem:[%s7628_s10 + $0x190] sm:$0xff]  ;;  %v7657_v30 = vpack.c.bf16 %v818_v23, %v817_v22  ;;  %s5044_s18 = sadd.s32 %s6592_s26, %s6312_s13  ;;  %s7078_s26 = scalar_lea.hbm %s10897_s2, 1024 }
  0xc6   : > { %11044 = vst [vmem:[#allocation11_spill] sm:$0xff] %v7636_v14  ;;  %v831_v18 = vld [vmem:[%s7628_s10 + $0x100] sm:$0xff]  ;;  %v832_v19 = vld [vmem:[%s7628_s10 + $0x108] sm:$0xff]  ;;  %v935_v20 = vpack.c.bf16 %v800_v16, %v799_v15  ;;  %v850_v25 = vld [vmem:[%s7628_s10 + $0x198] sm:$0xff]  ;;  %s6313_s19 = sshll.u32 %s5044_s18, 2 }
  0xc7   : > { %v7644_v21 = vpack.c.bf16 %v832_v19, %v831_v18  ;;  %7010 = vxpose.binary.xlu1.c.b16.start [1/16] %v7636_v14, %v7640_v17, 128  ;;  %v801_v26 = vld [vmem:[%s7628_s10 + $0x10] sm:$0xff]  ;;  %v802_v27 = vld [vmem:[%s7628_s10 + $0x18] sm:$0xff]  ;;  %11045 = vst [vmem:[#allocation12_spill] sm:$0xff] %v7657_v30  ;;  %v7659_v31 = vpack.c.bf16 %v850_v25, %v849_v24  ;;  %v819_v34 = vld [vmem:[%s7628_s10 + $0xa0] sm:$0xff] }
  0xc8   : > { %v833_v28 = vld [vmem:[%s7628_s10 + $0x110] sm:$0xff]  ;;  %v834_v29 = vld [vmem:[%s7628_s10 + $0x118] sm:$0xff]  ;;  %v936_v32 = vpack.c.bf16 %v802_v27, %v801_v26  ;;  %v820_v35 = vld [vmem:[%s7628_s10 + $0xa8] sm:$0xff] }
  0xc9   : > { %6986 = vxpose.binary.xlu0.c.b16.start [1/16] %v935_v20, %v7644_v21, 128  ;;  %v7661_v33 = vpack.c.bf16 %v834_v29, %v833_v28  ;;  %v851_v36 = vld [vmem:[%s7628_s10 + $0x1a0] sm:$0xff]  ;;  %v852_v37 = vld [vmem:[%s7628_s10 + $0x1a8] sm:$0xff]  ;;  %v7674_v42 = vpack.c.bf16 %v820_v35, %v819_v34  ;;  %v821_v46 = vld [vmem:[%s7628_s10 + $0xb0] sm:$0xff] }
  0xca   : > { %v803_v38 = vld [vmem:[%s7628_s10 + $0x20] sm:$0xff]  ;;  %v804_v39 = vld [vmem:[%s7628_s10 + $0x28] sm:$0xff]  ;;  %v7676_v43 = vpack.c.bf16 %v852_v37, %v851_v36  ;;  %v822_v47 = vld [vmem:[%s7628_s10 + $0xb8] sm:$0xff] }
  0xcb   : > { %v835_v40 = vld [vmem:[%s7628_s10 + $0x120] sm:$0xff]  ;;  %v836_v41 = vld [vmem:[%s7628_s10 + $0x128] sm:$0xff]  ;;  %11046 = vst [vmem:[#allocation13_spill] sm:$0xff] %v7674_v42  ;;  %v937_v44 = vpack.c.bf16 %v804_v39, %v803_v38  ;;  %v853_v48 = vld [vmem:[%s7628_s10 + $0x1b0] sm:$0xff]  ;;  %v7691_v54 = vpack.c.bf16 %v822_v47, %v821_v46 }
  0xcc   : > { %v7678_v45 = vpack.c.bf16 %v836_v41, %v835_v40  ;;  %v854_v49 = vld [vmem:[%s7628_s10 + $0x1b8] sm:$0xff]  ;;  %v805_v50 = vld [vmem:[%s7628_s10 + $0x30] sm:$0xff]  ;;  %v823_v58 = vld [vmem:[%s7628_s10 + $0xc0] sm:$0xff] }
  0xcd   : > { %v806_v51 = vld [vmem:[%s7628_s10 + $0x38] sm:$0xff]  ;;  %v837_v52 = vld [vmem:[%s7628_s10 + $0x130] sm:$0xff]  ;;  %11047 = vst [vmem:[#allocation14_spill] sm:$0xff] %v7691_v54  ;;  %v7693_v55 = vpack.c.bf16 %v854_v49, %v853_v48  ;;  %v824_v59 = vld [vmem:[%s7628_s10 + $0xc8] sm:$0xff] }
  0xce   : > { %v838_v53 = vld [vmem:[%s7628_s10 + $0x138] sm:$0xff]  ;;  %v938_v56 = vpack.c.bf16 %v806_v51, %v805_v50  ;;  %v855_v60 = vld [vmem:[%s7628_s10 + $0x1c0] sm:$0xff]  ;;  %v856_v61 = vld [vmem:[%s7628_s10 + $0x1c8] sm:$0xff]  ;;  %v7708_v2 = vpack.c.bf16 %v824_v59, %v823_v58 }
  0xcf   : > { %v7695_v57 = vpack.c.bf16 %v838_v53, %v837_v52  ;;  %v807_v62 = vld [vmem:[%s7628_s10 + $0x40] sm:$0xff]  ;;  %v808_v63 = vld [vmem:[%s7628_s10 + $0x48] sm:$0xff]  ;;  %v7710_v3 = vpack.c.bf16 %v856_v61, %v855_v60  ;;  %v825_v6 = vld [vmem:[%s7628_s10 + $0xd0] sm:$0xff] }
  0xd0   : > { %v839_v0 = vld [vmem:[%s7628_s10 + $0x140] sm:$0xff]  ;;  %v840_v1 = vld [vmem:[%s7628_s10 + $0x148] sm:$0xff]  ;;  %11048 = vst [vmem:[#allocation15_spill] sm:$0xff] %v7708_v2  ;;  %v939_v4 = vpack.c.bf16 %v808_v63, %v807_v62  ;;  %v826_v7 = vld [vmem:[%s7628_s10 + $0xd8] sm:$0xff] }
  0xd1   : > { %v7712_v5 = vpack.c.bf16 %v840_v1, %v839_v0  ;;  %v857_v8 = vld [vmem:[%s7628_s10 + $0x1d0] sm:$0xff]  ;;  %v858_v9 = vld [vmem:[%s7628_s10 + $0x1d8] sm:$0xff]  ;;  %v7725_v15 = vpack.c.bf16 %v826_v7, %v825_v6  ;;  %v895_v20 = vld [vmem:[%s7628_s10 + $0x300] sm:$0xff] }
  0xd2   : > { %v809_v10 = vld [vmem:[%s7628_s10 + $0x50] sm:$0xff]  ;;  %v810_v11 = vld [vmem:[%s7628_s10 + $0x58] sm:$0xff]  ;;  %v7727_v16 = vpack.c.bf16 %v858_v9, %v857_v8  ;;  %v896_v22 = vld [vmem:[%s7628_s10 + $0x308] sm:$0xff] }
  0xd3   : > { %v841_v12 = vld [vmem:[%s7628_s10 + $0x150] sm:$0xff]  ;;  %v842_v13 = vld [vmem:[%s7628_s10 + $0x158] sm:$0xff]  ;;  %11049 = vst [vmem:[#allocation16_spill] sm:$0xff] %v7725_v15  ;;  %v940_v18 = vpack.c.bf16 %v810_v11, %v809_v10  ;;  %v911_v23 = vld [vmem:[%s7628_s10 + $0x380] sm:$0xff]  ;;  %v983_v25 = vpack.c.bf16 %v896_v22, %v895_v20 }
  0xd4   : > { %v7729_v19 = vpack.c.bf16 %v842_v13, %v841_v12  ;;  %v912_v24 = vld [vmem:[%s7628_s10 + $0x388] sm:$0xff]  ;;  %v827_v27 = vld [vmem:[%s7628_s10 + $0xe0] sm:$0xff]  ;;  %v6414_v46 = vld [vmem:[%s10896_s1 + $0x2ec] sm:$0xf0] }
  0xd5   : > { %v991_v26 = vpack.c.bf16 %v912_v24, %v911_v23  ;;  %v828_v28 = vld [vmem:[%s7628_s10 + $0xe8] sm:$0xff]  ;;  %v859_v29 = vld [vmem:[%s7628_s10 + $0x1e0] sm:$0xff]  ;;  %v6446_v49 = vld [vmem:[%s10896_s1 + $0x3ec] sm:$0xf0] }
  0xd6   : > { %v811_v34 = vld [vmem:[%s7628_s10 + $0x60] sm:$0xff]  ;;  %v812_v35 = vld [vmem:[%s7628_s10 + $0x68] sm:$0xff]  ;;  %v7746_v38 = vpack.c.bf16 %v828_v28, %v827_v27  ;;  %v6410_v51 = vld [vmem:[%s10896_s1 + $0x2cc] sm:$0xf0] }
  0xd7   : > { %7011 = vxpose.binary.xlu1.c.b16.cont [2/16] %v7657_v30, %v7659_v31, 128  ;;  %v843_v36 = vld [vmem:[%s7628_s10 + $0x160] sm:$0xff]  ;;  %v844_v37 = vld [vmem:[%s7628_s10 + $0x168] sm:$0xff]  ;;  %v941_v40 = vpack.c.bf16 %v812_v35, %v811_v34  ;;  %v897_v58 = vld [vmem:[%s7628_s10 + $0x310] sm:$0xff] }
  0xd8   : > { %7034 = vxpose.binary.xlu2.c.b16.start [1/16] %v991_v26, %v983_v25, 128  ;;  %11050 = vst [vmem:[#allocation17_spill] sm:$0xff] %v7746_v38  ;;  %v7750_v41 = vpack.c.bf16 %v844_v37, %v843_v36  ;;  %v5686_v47 = vld [vmem:[%s10896_s1 + $0x3e0] sm:$0xf]  ;;  %v898_v60 = vld [vmem:[%s7628_s10 + $0x318] sm:$0xff]  ;;  %v913_v61 = vld [vmem:[%s7628_s10 + $0x390] sm:$0xff] }
  0xd9   : > { %6987 = vxpose.binary.xlu0.c.b16.cont [2/16] %v936_v32, %v7661_v33, 128  ;;  %v860_v32 = vld [vmem:[%s7628_s10 + $0x1e8] sm:$0xff]  ;;  %v5542_v50 = vld [vmem:[%s10896_s1 + $0x2c0] sm:$0xf]  ;;  %v5687_v52 = vor.u32 %v6446_v49, %v5686_v47  ;;  %v914_v62 = vld [vmem:[%s7628_s10 + $0x398] sm:$0xff]  ;;  %v984_v0 = vpack.c.bf16 %v898_v60, %v897_v58 }
  0xda   : > { %v7748_v39 = vpack.c.bf16 %v860_v32, %v859_v29  ;;  %v5670_v53 = vld [vmem:[%s10896_s1 + $0x3c0] sm:$0xf]  ;;  %v5543_v59 = vor.u32 %v6410_v51, %v5542_v50  ;;  %v992_v1 = vpack.c.bf16 %v914_v62, %v913_v61  ;;  %v6350_v6 = vld [vmem:[%s10896_s1 + $0xec] sm:$0xf0]  ;;  %v830_v22 = vld [vmem:[%s7628_s10 + $0xf8] sm:$0xff] }
  0xdb   : > { %2951 = vmatpush.bf16.msra.mxu3 %v5687_v52  ;;  %v5430_v7 = vld [vmem:[%s10896_s1 + $0x1e0] sm:$0xf]  ;;  %v6382_v9 = vld [vmem:[%s10896_s1 + $0x1ec] sm:$0xf0]  ;;  %v862_v25 = vld [vmem:[%s7628_s10 + $0x1f8] sm:$0xff] }
  0xdc   : > { %v5526_v10 = vld [vmem:[%s10896_s1 + $0x2a0] sm:$0xf]  ;;  %v6406_v11 = vld [vmem:[%s10896_s1 + $0x2ac] sm:$0xf0]  ;;  %v5431_v12 = vor.u32 %v6382_v9, %v5430_v7  ;;  %v814_v28 = vld [vmem:[%s7628_s10 + $0x78] sm:$0xff] }
  0xdd   : > { %v5654_v13 = vld [vmem:[%s10896_s1 + $0x3a0] sm:$0xf]  ;;  %v829_v20 = vld [vmem:[%s7628_s10 + $0xf0] sm:$0xff]  ;;  %v5527_v23 = vor.u32 %v6406_v11, %v5526_v10  ;;  %v846_v32 = vld [vmem:[%s7628_s10 + $0x178] sm:$0xff] }
  0xde   : > { %v861_v24 = vld [vmem:[%s7628_s10 + $0x1f0] sm:$0xff]  ;;  %2853 = vmatpush.bf16.msra.mxu1 %v5431_v12  ;;  %v7815_v34 = vpack.c.bf16 %v830_v22, %v829_v20  ;;  %v5510_v49 = vld [vmem:[%s10896_s1 + $0x280] sm:$0xf]  ;;  %v880_v22 = vld [vmem:[%s7628_s10 + $0x288] sm:$0xff] }
  0xdf   : > { %v813_v26 = vld [vmem:[%s7628_s10 + $0x70] sm:$0xff]  ;;  %v7817_v35 = vpack.c.bf16 %v862_v25, %v861_v24  ;;  %v5270_v58 = vld [vmem:[%s10896_s1 + $0xa0] sm:$0xf] }
  0xe0   : > { %v845_v29 = vld [vmem:[%s7628_s10 + $0x170] sm:$0xff]  ;;  %11051 = vst [vmem:[#allocation18_spill] sm:$0xff] %v7815_v34  ;;  %v942_v36 = vpack.c.bf16 %v814_v28, %v813_v26  ;;  %v5398_v61 = vld [vmem:[%s10896_s1 + $0x1a0] sm:$0xf] }
  0xe1   : > { %v7819_v37 = vpack.c.bf16 %v846_v32, %v845_v29  ;;  %v6402_v50 = vld [vmem:[%s10896_s1 + $0x28c] sm:$0xf0]  ;;  %v5254_v9 = vld [vmem:[%s10896_s1 + $0x80] sm:$0xf]  ;;  %v900_v32 = vld [vmem:[%s7628_s10 + $0x328] sm:$0xff] }
  0xe2   : > { %v5511_v52 = vor.u32 %v6402_v50, %v5510_v49  ;;  %v6342_v60 = vld [vmem:[%s10896_s1 + $0xac] sm:$0xf0]  ;;  %v5382_v12 = vld [vmem:[%s10896_s1 + $0x180] sm:$0xf] }
  0xe3   : > { %11052 = vst [vmem:[#allocation19_spill] sm:$0xff] %v7819_v37  ;;  %v6374_v62 = vld [vmem:[%s10896_s1 + $0x1ac] sm:$0xf0]  ;;  %v879_v20 = vld [vmem:[%s7628_s10 + $0x280] sm:$0xff] }
  0xe4   : > { %v6338_v10 = vld [vmem:[%s10896_s1 + $0x8c] sm:$0xf0]  ;;  %v5606_v25 = vld [vmem:[%s10896_s1 + $0x340] sm:$0xf] }
  0xe5   : > { %v6394_v24 = vld [vmem:[%s10896_s1 + $0x24c] sm:$0xf0]  ;;  %v899_v29 = vld [vmem:[%s7628_s10 + $0x320] sm:$0xff] }
  0xe6   : > { %v6426_v26 = vld [vmem:[%s10896_s1 + $0x34c] sm:$0xf0]  ;;  %v5366_v50 = vld [vmem:[%s10896_s1 + $0x160] sm:$0xf] }
  0xe7   : > { %7012 = vxpose.binary.xlu1.c.b16.cont [3/16] %v7674_v42, %v7676_v43, 128 }
  0xe8   : > { %7035 = vxpose.binary.xlu2.c.b16.cont [2/16] %v992_v1, %v984_v0, 128  ;;  %v5399_v0 = vor.u32 %v6374_v62, %v5398_v61  ;;  %v5494_v1 = vld [vmem:[%s10896_s1 + $0x260] sm:$0xf] }
  0xe9   : > { %6988 = vxpose.binary.xlu0.c.b16.cont [3/16] %v937_v44, %v7678_v45, 128  ;;  %v5558_v44 = vld [vmem:[%s10896_s1 + $0x2e0] sm:$0xf] }
  0xea   : > { %v5559_v48 = vor.u32 %v6414_v46, %v5558_v44  ;;  %v6346_v44 = vld [vmem:[%s10896_s1 + $0xcc] sm:$0xf0]  ;;  %v5414_v46 = vld [vmem:[%s10896_s1 + $0x1c0] sm:$0xf] }
  0xec   : > { %2902 = vmatpush.bf16.msra.mxu2 %v5559_v48  ;;  %v6378_v48 = vld [vmem:[%s10896_s1 + $0x1cc] sm:$0xf0] }
  0xed   : > { %v5415_v51 = vor.u32 %v6378_v48, %v5414_v46  ;;  %v5238_v46 = vld [vmem:[%s10896_s1 + $0x60] sm:$0xf]  ;;  %v985_v48 = vpack.c.bf16 %v900_v32, %v899_v29 }
  0xee   : > { %v5190_v32 = vld [vmem:[%s10896_s1] sm:$0xf] }
  0xef   : > { %2854 = vmatpush.bf16.msra.mxu1 %v5415_v51  ;;  %v6366_v51 = vld [vmem:[%s10896_s1 + $0x16c] sm:$0xf0] }
  0xf0   : > { %2903 = vmatpush.bf16.msra.mxu2 %v5543_v59  ;;  %v5367_v61 = vor.u32 %v6366_v51, %v5366_v50  ;;  %v917_v50 = vld [vmem:[%s7628_s10 + $0x3b0] sm:$0xff]  ;;  %v918_v51 = vld [vmem:[%s7628_s10 + $0x3b8] sm:$0xff] }
  0xf3   : > { %2855 = vmatpush.bf16.msra.mxu1 %v5399_v0  ;;  %v5222_v0 = vld [vmem:[%s10896_s1 + $0x40] sm:$0xf] }
  0xf4   : > { %2904 = vmatpush.bf16.msra.mxu2 %v5527_v23  ;;  %v5255_v23 = vor.u32 %v6338_v10, %v5254_v9  ;;  %v6386_v9 = vld [vmem:[%s10896_s1 + $0x20c] sm:$0xf0] }
  0xf7   : > { %7013 = vxpose.binary.xlu1.c.b16.cont [4/16] %v7691_v54, %v7693_v55, 128 }
  0xf8   : > { %2905 = vmatpush.bf16.msra.mxu2 %v5511_v52  ;;  %v5462_v52 = vld [vmem:[%s10896_s1 + $0x220] sm:$0xf] }
  0xf9   : > { %6989 = vxpose.binary.xlu0.c.b16.cont [4/16] %v938_v56, %v7695_v57, 128  ;;  %v6442_v56 = vld [vmem:[%s10896_s1 + $0x3cc] sm:$0xf0] }
  0xfa   : > { %v5671_v63 = vor.u32 %v6442_v56, %v5670_v53  ;;  %v5638_v53 = vld [vmem:[%s10896_s1 + $0x380] sm:$0xf]  ;;  %v6434_v56 = vld [vmem:[%s10896_s1 + $0x38c] sm:$0xf0] }
  0xfb   : > { %v5639_v59 = vor.u32 %v6434_v56, %v5638_v53  ;;  %v6390_v56 = vld [vmem:[%s10896_s1 + $0x22c] sm:$0xf0] }
  0xfc   : > { %2952 = vmatpush.bf16.msra.mxu3 %v5671_v63  ;;  %v5271_v63 = vor.u32 %v6342_v60, %v5270_v58  ;;  %v5590_v58 = vld [vmem:[%s10896_s1 + $0x320] sm:$0xf]  ;;  %v975_v60 = vpack.c.bf16 %v880_v22, %v879_v20  ;;  %v5463_v62 = vor.u32 %v6390_v56, %v5462_v52  ;;  %v881_v20 = vld [vmem:[%s7628_s10 + $0x290] sm:$0xff]  ;;  %v882_v22 = vld [vmem:[%s7628_s10 + $0x298] sm:$0xff] }
  0xfd   : > { %v883_v56 = vld [vmem:[%s7628_s10 + $0x2a0] sm:$0xff] }
 0x107   : > { %7014 = vxpose.binary.xlu1.c.b16.cont [5/16] %v7708_v2, %v7710_v3, 128 }
 0x109   : > { %6990 = vxpose.binary.xlu0.c.b16.cont [5/16] %v939_v4, %v7712_v5, 128  ;;  %v5302_v4 = vld [vmem:[%s10896_s1 + $0xe0] sm:$0xf] }
 0x10a   : > { %v5303_v8 = vor.u32 %v6350_v6, %v5302_v4  ;;  %v6398_v4 = vld [vmem:[%s10896_s1 + $0x26c] sm:$0xf0]  ;;  %v5622_v6 = vld [vmem:[%s10896_s1 + $0x360] sm:$0xf] }
 0x10b   : > { %v5495_v7 = vor.u32 %v6398_v4, %v5494_v1  ;;  %v6330_v1 = vld [vmem:[%s10896_s1 + $0x4c] sm:$0xf0]  ;;  %v5350_v4 = vld [vmem:[%s10896_s1 + $0x140] sm:$0xf] }
 0x10c   : > { %2804 = vmatpush.bf16.msra.mxu0 %v5303_v8  ;;  %v6430_v8 = vld [vmem:[%s10896_s1 + $0x36c] sm:$0xf0] }
 0x10d   : > { %v5623_v11 = vor.u32 %v6430_v8, %v5622_v6  ;;  %2906 = vmatpush.bf16.msra.mxu2 %v5495_v7  ;;  %v5223_v6 = vor.u32 %v6330_v1, %v5222_v0  ;;  %v6362_v7 = vld [vmem:[%s10896_s1 + $0x14c] sm:$0xf0]  ;;  %v5446_v8 = vld [vmem:[%s10896_s1 + $0x200] sm:$0xf] }
 0x10e   : > { %v5351_v10 = vor.u32 %v6362_v7, %v5350_v4  ;;  %v6198_v4 = vld [vmem:[%s10896_s1 + $0x7e0] sm:$0xf] }
 0x10f   : > { %v6070_v7 = vld [vmem:[%s10896_s1 + $0x6e0] sm:$0xf] }
 0x117   : > { %7015 = vxpose.binary.xlu1.c.b16.cont [6/16] %v7725_v15, %v7727_v16, 128 }
 0x119   : > { %6991 = vxpose.binary.xlu0.c.b16.cont [6/16] %v940_v18, %v7729_v19, 128  ;;  %v6438_v18 = vld [vmem:[%s10896_s1 + $0x3ac] sm:$0xf0] }
 0x11a   : > { %v5655_v27 = vor.u32 %v6438_v18, %v5654_v13  ;;  %v6370_v13 = vld [vmem:[%s10896_s1 + $0x18c] sm:$0xf0]  ;;  %v5478_v18 = vld [vmem:[%s10896_s1 + $0x240] sm:$0xf] }
 0x11b   : > { %v5479_v28 = vor.u32 %v6394_v24, %v5478_v18  ;;  %v6326_v24 = vld [vmem:[%s10896_s1 + $0x2c] sm:$0xf0] }
 0x11c   : > { %2953 = vmatpush.bf16.msra.mxu3 %v5655_v27  ;;  %v5383_v27 = vor.u32 %v6370_v13, %v5382_v12  ;;  %v5574_v12 = vld [vmem:[%s10896_s1 + $0x300] sm:$0xf]  ;;  %v6418_v13 = vld [vmem:[%s10896_s1 + $0x30c] sm:$0xf0] }
 0x11d   : > { %2907 = vmatpush.bf16.msra.mxu2 %v5479_v28  ;;  %v5575_v18 = vor.u32 %v6418_v13, %v5574_v12  ;;  %v6358_v28 = vld [vmem:[%s10896_s1 + $0x12c] sm:$0xf0]  ;;  %v6182_v13 = vld [vmem:[%s10896_s1 + $0x7c0] sm:$0xf] }
 0x11e   : > { %2856 = vmatpush.bf16.msra.mxu1 %v5383_v27 }
 0x120   : > { %2954 = vmatpush.bf16.msra.mxu3 %v5639_v59  ;;  %v6422_v59 = vld [vmem:[%s10896_s1 + $0x32c] sm:$0xf0] }
 0x121   : > { %2908 = vmatpush.bf16.msra.mxu2 %v5463_v62  ;;  %v919_v62 = vld [vmem:[%s7628_s10 + $0x3c0] sm:$0xff] }
 0x122   : > { %2857 = vmatpush.bf16.msra.mxu1 %v5367_v61  ;;  %v904_v61 = vld [vmem:[%s7628_s10 + $0x348] sm:$0xff] }
 0x124   : > { %2955 = vmatpush.bf16.msra.mxu3 %v5623_v11  ;;  %v5447_v11 = vor.u32 %v6386_v9, %v5446_v8  ;;  %v6542_v8 = vld [vmem:[%s10896_s1 + $0x6ec] sm:$0xf0] }
 0x125   : > { %v6071_v12 = vor.u32 %v6542_v8, %v6070_v7  ;;  %v5910_v7 = vld [vmem:[%s10896_s1 + $0x5a0] sm:$0xf]  ;;  %v6502_v8 = vld [vmem:[%s10896_s1 + $0x5ac] sm:$0xf0] }
 0x126   : > { %2858 = vmatpush.bf16.msra.mxu1 %v5351_v10  ;;  %2909 = vmatpush.bf16.msra.mxu2 %v5447_v11  ;;  %v885_v10 = vld [vmem:[%s7628_s10 + $0x2b0] sm:$0xff]  ;;  %v886_v11 = vld [vmem:[%s7628_s10 + $0x2b8] sm:$0xff] }
 0x127   : > { %7016 = vxpose.binary.xlu1.c.b16.cont [7/16] %v7746_v38, %v7748_v39, 128 }
 0x129   : > { %6992 = vxpose.binary.xlu0.c.b16.cont [7/16] %v941_v40, %v7750_v41, 128  ;;  %v5286_v40 = vld [vmem:[%s10896_s1 + $0xc0] sm:$0xf] }
 0x12a   : > { %v5287_v47 = vor.u32 %v6346_v44, %v5286_v40  ;;  %v5607_v40 = vor.u32 %v6426_v26, %v5606_v25  ;;  %v916_v44 = vld [vmem:[%s7628_s10 + $0x3a8] sm:$0xff]  ;;  %v5334_v25 = vld [vmem:[%s10896_s1 + $0x120] sm:$0xf]  ;;  %v976_v26 = vpack.c.bf16 %v882_v22, %v881_v20 }
 0x12b   : > { %v5335_v29 = vor.u32 %v6358_v28, %v5334_v25  ;;  %v6054_v22 = vld [vmem:[%s10896_s1 + $0x6c0] sm:$0xf]  ;;  %v978_v25 = vpack.c.bf16 %v886_v11, %v885_v10  ;;  %v6478_v28 = vld [vmem:[%s10896_s1 + $0x4ec] sm:$0xf0] }
 0x12c   : > { %2805 = vmatpush.bf16.msra.mxu0 %v5287_v47  ;;  %v6334_v47 = vld [vmem:[%s10896_s1 + $0x6c] sm:$0xf0]  ;;  %2956 = vmatpush.bf16.msra.mxu3 %v5607_v40  ;;  %v5318_v40 = vld [vmem:[%s10896_s1 + $0x100] sm:$0xf] }
 0x12d   : > { %v5239_v53 = vor.u32 %v6334_v47, %v5238_v46  ;;  %v6354_v46 = vld [vmem:[%s10896_s1 + $0x10c] sm:$0xf0]  ;;  %2859 = vmatpush.bf16.msra.mxu1 %v5335_v29  ;;  %v5942_v29 = vld [vmem:[%s10896_s1 + $0x5e0] sm:$0xf] }
 0x12e   : > { %v901_v47 = vld [vmem:[%s7628_s10 + $0x330] sm:$0xff] }
 0x12f   : > { %v6470_v10 = vld [vmem:[%s10896_s1 + $0x4ac] sm:$0xf0] }
 0x130   : > { %2806 = vmatpush.bf16.msra.mxu0 %v5271_v63  ;;  %v5591_v63 = vor.u32 %v6422_v59, %v5590_v58  ;;  %v884_v58 = vld [vmem:[%s7628_s10 + $0x2a8] sm:$0xff] }
 0x131   : > { %v977_v59 = vpack.c.bf16 %v884_v58, %v883_v56 }
 0x132   : > { %2957 = vmatpush.bf16.msra.mxu3 %v5591_v63  ;;  %v920_v63 = vld [vmem:[%s7628_s10 + $0x3c8] sm:$0xff] }
 0x133   : > { %v995_v1 = vpack.c.bf16 %v920_v63, %v919_v62 }
 0x134   : > { %2807 = vmatpush.bf16.msra.mxu0 %v5255_v23  ;;  %v5206_v23 = vld [vmem:[%s10896_s1 + $0x20] sm:$0xf] }
 0x135   : > { %v5207_v27 = vor.u32 %v6326_v24, %v5206_v23  ;;  %v6538_v23 = vld [vmem:[%s10896_s1 + $0x6cc] sm:$0xf0] }
 0x136   : > { %2958 = vmatpush.bf16.msra.mxu3 %v5575_v18  ;;  %v6570_v18 = vld [vmem:[%s10896_s1 + $0x7cc] sm:$0xf0] }
 0x137   : > { %7017 = vxpose.binary.xlu1.c.b16.end [8/16] %v7815_v34, %v7817_v35, 128 }
 0x138   : > { %2808 = vmatpush.bf16.msra.mxu0 %v5239_v53  ;;  %v994_v53 = vpack.c.bf16 %v918_v51, %v917_v50 }
 0x139   : > { %6993 = vxpose.binary.xlu0.c.b16.end [8/16] %v942_v36, %v7819_v37, 128  ;;  %v915_v36 = vld [vmem:[%s7628_s10 + $0x3a0] sm:$0xff] }
 0x13a   : > { %v993_v49 = vpack.c.bf16 %v916_v44, %v915_v36  ;;  %v6322_v36 = vld [vmem:[%s10896_s1 + $0xc] sm:$0xf0] }
 0x13b   : > { %v5191_v44 = vor.u32 %v6322_v36, %v5190_v32  ;;  %v6510_v32 = vld [vmem:[%s10896_s1 + $0x5ec] sm:$0xf0]  ;;  %v6055_v36 = vor.u32 %v6538_v23, %v6054_v22 }
 0x13c   : > { %7036 = vxpose.binary.xlu2.c.b16.cont [3/16] %v993_v49, %v985_v48, 128  ;;  %v902_v48 = vld [vmem:[%s7628_s10 + $0x338] sm:$0xff]  ;;  %v5319_v49 = vor.u32 %v6354_v46, %v5318_v40  ;;  %v905_v40 = vld [vmem:[%s7628_s10 + $0x350] sm:$0xff]  ;;  %v5943_v50 = vor.u32 %v6510_v32, %v5942_v29  ;;  %v908_v32 = vld [vmem:[%s7628_s10 + $0x368] sm:$0xff] }
 0x13d   : > { %2809 = vmatpush.bf16.msra.mxu0 %v5223_v6  ;;  %v986_v52 = vpack.c.bf16 %v902_v48, %v901_v47  ;;  %v6574_v6 = vld [vmem:[%s10896_s1 + $0x7ec] sm:$0xf0]  ;;  %v906_v47 = vld [vmem:[%s7628_s10 + $0x358] sm:$0xff] }
 0x13e   : > { %2860 = vmatpush.bf16.msra.mxu1 %v5319_v49  ;;  %v6199_v9 = vor.u32 %v6574_v6, %v6198_v4  ;;  %v6534_v46 = vld [vmem:[%s10896_s1 + $0x6ac] sm:$0xf0]  ;;  %v922_v49 = vld [vmem:[%s7628_s10 + $0x3d8] sm:$0xff] }
 0x13f   : > { %v921_v48 = vld [vmem:[%s7628_s10 + $0x3d0] sm:$0xff] }
 0x140   : > { %v996_v62 = vpack.c.bf16 %v922_v49, %v921_v48  ;;  %v6566_v6 = vld [vmem:[%s10896_s1 + $0x7ac] sm:$0xf0]  ;;  %v5766_v49 = vld [vmem:[%s10896_s1 + $0x480] sm:$0xf] }
 0x141   : > { %2810 = vmatpush.bf16.msra.mxu0 %v5207_v27  ;;  %v6183_v27 = vor.u32 %v6570_v18, %v6182_v13  ;;  %v888_v13 = vld [vmem:[%s7628_s10 + $0x2c8] sm:$0xff]  ;;  %v5911_v18 = vor.u32 %v6502_v8, %v5910_v7  ;;  %v6006_v7 = vld [vmem:[%s10896_s1 + $0x660] sm:$0xf]  ;;  %v6526_v8 = vld [vmem:[%s10896_s1 + $0x66c] sm:$0xf0] }
 0x145   : > { %2811 = vmatpush.bf16.msra.mxu0 %v5191_v44  ;;  %v6038_v44 = vld [vmem:[%s10896_s1 + $0x6a0] sm:$0xf] }
 0x146   : > { %v6039_v56 = vor.u32 %v6534_v46, %v6038_v44 }
 0x149   : > { %1355 = vxpose.xlu0.c.b16.start [1/8] %v975_v60, 128  ;;  %v903_v60 = vld [vmem:[%s7628_s10 + $0x340] sm:$0xff] }
 0x14a   : > { %v987_v0 = vpack.c.bf16 %v904_v61, %v903_v60  ;;  %v6474_v60 = vld [vmem:[%s10896_s1 + $0x4cc] sm:$0xf0]  ;;  %v988_v61 = vpack.c.bf16 %v906_v47, %v905_v40  ;;  %v924_v40 = vld [vmem:[%s7628_s10 + $0x3e8] sm:$0xff] }
 0x14c   : > { %7037 = vxpose.binary.xlu2.c.b16.cont [4/16] %v994_v53, %v986_v52, 128  ;;  %v5926_v52 = vld [vmem:[%s10896_s1 + $0x5c0] sm:$0xf]  ;;  %v6506_v53 = vld [vmem:[%s10896_s1 + $0x5cc] sm:$0xf0] }
 0x159   : > { %1356 = vxpose.xlu0.c.b16.cont [2/8] %v976_v26, 128  ;;  %v5814_v26 = vld [vmem:[%s10896_s1 + $0x4e0] sm:$0xf] }
 0x15a   : > { %v5815_v51 = vor.u32 %v6478_v28, %v5814_v26  ;;  %v6022_v26 = vld [vmem:[%s10896_s1 + $0x680] sm:$0xf] }
 0x15b   : > { %v907_v28 = vld [vmem:[%s7628_s10 + $0x360] sm:$0xff] }
 0x15c   : > { %7038 = vxpose.binary.xlu2.c.b16.cont [5/16] %v995_v1, %v987_v0, 128  ;;  %v5927_v0 = vor.u32 %v6506_v53, %v5926_v52  ;;  %v6166_v1 = vld [vmem:[%s10896_s1 + $0x7a0] sm:$0xf]  ;;  %v989_v46 = vpack.c.bf16 %v908_v32, %v907_v28  ;;  %v6562_v53 = vld [vmem:[%s10896_s1 + $0x78c] sm:$0xf0] }
 0x15d   : > { %v6167_v11 = vor.u32 %v6566_v6, %v6166_v1  ;;  %v6462_v32 = vld [vmem:[%s10896_s1 + $0x46c] sm:$0xf0] }
 0x169   : > { %1357 = vxpose.xlu0.c.b16.cont [3/8] %v977_v59, 128  ;;  %v5798_v59 = vld [vmem:[%s10896_s1 + $0x4c0] sm:$0xf] }
 0x16a   : > { %v5799_v4 = vor.u32 %v6474_v60, %v5798_v59  ;;  %v6498_v59 = vld [vmem:[%s10896_s1 + $0x58c] sm:$0xf0] }
 0x16c   : > { %7039 = vxpose.binary.xlu2.c.b16.cont [6/16] %v996_v62, %v988_v61, 128  ;;  %v889_v62 = vld [vmem:[%s7628_s10 + $0x2d0] sm:$0xff] }
 0x173   : > { %v7018_v20 = vpop.trf.xlu1 }
 0x174   : > { %2959 = vmatmul.bf16.vlgmr.msra.gmra.mxu3 %v7018_v20 }
 0x175   : > { %v8012_v24 = vpop.trf.xlu0  ;;  %3147 = vmatpush.bf16.msra.mxu3 %v6199_v9  ;;  %v5782_v9 = vld [vmem:[%s10896_s1 + $0x4a0] sm:$0xf] }
 0x176   : > { %2910 = vmatmul.bf16.vlgmr.msra.gmra.mxu2 %v8012_v24  ;;  %v5783_v20 = vor.u32 %v6470_v10, %v5782_v9  ;;  %v909_v9 = vld [vmem:[%s7628_s10 + $0x370] sm:$0xff]  ;;  %v6007_v10 = vor.u32 %v6526_v8, %v6006_v7  ;;  %v871_v8 = vld [vmem:[%s7628_s10 + $0x240] sm:$0xff] }
 0x177   : > { %3098 = vmatpush.bf16.msra.mxu2 %v6071_v12  ;;  %v887_v12 = vld [vmem:[%s7628_s10 + $0x2c0] sm:$0xff] }
 0x179   : > { %1358 = vxpose.xlu0.c.b16.cont [4/8] %v978_v25, 128  ;;  %3148 = vmatpush.bf16.msra.mxu3 %v6183_v27  ;;  %v979_v25 = vpack.c.bf16 %v888_v13, %v887_v12  ;;  %v6530_v27 = vld [vmem:[%s10896_s1 + $0x68c] sm:$0xf0]  ;;  %v926_v13 = vld [vmem:[%s7628_s10 + $0x3f8] sm:$0xff] }
 0x17a   : > { %v6023_v29 = vor.u32 %v6530_v27, %v6022_v26  ;;  %v925_v12 = vld [vmem:[%s7628_s10 + $0x3f0] sm:$0xff]  ;;  %v878_v26 = vld [vmem:[%s7628_s10 + $0x278] sm:$0xff] }
 0x17b   : > { %3099 = vmatpush.bf16.msra.mxu2 %v6055_v36  ;;  %v8043_v58 = vpop.trf.xlu1  ;;  %v923_v36 = vld [vmem:[%s7628_s10 + $0x3e0] sm:$0xff] }
 0x17c   : > { %11053 = vst [vmem:[#allocation20_spill] sm:$0xff] %v8043_v58  ;;  %2861 = vmatmul.bf16.vlgmr.msra.gmra.mxu1 %v8043_v58  ;;  %v997_v47 = vpack.c.bf16 %v924_v40, %v923_v36  ;;  %v6134_v36 = vld [vmem:[%s10896_s1 + $0x760] sm:$0xf] }
 0x17d   : > { %v8051_v63 = vpop.trf.xlu0  ;;  %3049 = vmatpush.bf16.msra.mxu1 %v5943_v50  ;;  %3149 = vmatpush.bf16.msra.mxu3 %v6167_v11  ;;  %v6466_v50 = vld [vmem:[%s10896_s1 + $0x48c] sm:$0xf0]  ;;  %v910_v11 = vld [vmem:[%s7628_s10 + $0x378] sm:$0xff] }
 0x17e   : > { %11054 = vst [vmem:[#allocation21_spill] sm:$0xff] %v8051_v63  ;;  %2812 = vmatmul.bf16.vlgmr.msra.gmra.mxu0 %v8051_v63  ;;  %v5767_v52 = vor.u32 %v6466_v50, %v5766_v49  ;;  %v6494_v49 = vld [vmem:[%s10896_s1 + $0x56c] sm:$0xf0] }
 0x17f   : > { %3000 = vmatpush.bf16.msra.mxu0 %v5815_v51  ;;  %3100 = vmatpush.bf16.msra.mxu2 %v6039_v56  ;;  %v6150_v51 = vld [vmem:[%s10896_s1 + $0x780] sm:$0xf] }
 0x180   : > { %v5894_v56 = vld [vmem:[%s10896_s1 + $0x580] sm:$0xf]  ;;  %7040 = vxpose.binary.xlu2.c.b16.cont [7/16] %v997_v47, %v989_v46, 128  ;;  %v6151_v60 = vor.u32 %v6562_v53, %v6150_v51  ;;  %v6558_v46 = vld [vmem:[%s10896_s1 + $0x76c] sm:$0xf0]  ;;  %v876_v53 = vld [vmem:[%s7628_s10 + $0x268] sm:$0xff] }
 0x181   : > { %3050 = vmatpush.bf16.msra.mxu1 %v5927_v0  ;;  %v5895_v61 = vor.u32 %v6498_v59, %v5894_v56  ;;  %v890_v0 = vld [vmem:[%s7628_s10 + $0x2d8] sm:$0xff]  ;;  %v5878_v47 = vld [vmem:[%s10896_s1 + $0x560] sm:$0xf]  ;;  %v6135_v50 = vor.u32 %v6558_v46, %v6134_v36  ;;  %v892_v59 = vld [vmem:[%s7628_s10 + $0x2e8] sm:$0xff] }
 0x182   : > { %3150 = vmatpush.bf16.msra.mxu3 %v6151_v60  ;;  %v980_v6 = vpack.c.bf16 %v890_v0, %v889_v62  ;;  %v5879_v51 = vor.u32 %v6494_v49, %v5878_v47  ;;  %v891_v56 = vld [vmem:[%s7628_s10 + $0x2e0] sm:$0xff]  ;;  %v873_v62 = vld [vmem:[%s7628_s10 + $0x250] sm:$0xff]  ;;  %v874_v0 = vld [vmem:[%s7628_s10 + $0x258] sm:$0xff] }
 0x183   : > { %3001 = vmatpush.bf16.msra.mxu0 %v5799_v4  ;;  %v7020_v22 = vpop.trf.xlu1  ;;  %3101 = vmatpush.bf16.msra.mxu2 %v6023_v29  ;;  %v5750_v29 = vld [vmem:[%s10896_s1 + $0x460] sm:$0xf]  ;;  %v972_v7 = vpack.c.bf16 %v874_v0, %v873_v62  ;;  %v6554_v46 = vld [vmem:[%s10896_s1 + $0x74c] sm:$0xf0]  ;;  %v894_v62 = vld [vmem:[%s7628_s10 + $0x2f8] sm:$0xff] }
 0x184   : > { %2964 = vmatmul.bf16.gmra.mxu3 %v7020_v22  ;;  %v998_v22 = vpack.c.bf16 %v926_v13, %v925_v12  ;;  %v5751_v40 = vor.u32 %v6462_v32, %v5750_v29  ;;  %v5734_v29 = vld [vmem:[%s10896_s1 + $0x440] sm:$0xf]  ;;  %v6458_v32 = vld [vmem:[%s10896_s1 + $0x44c] sm:$0xf0] }
 0x185   : > { %v8075_v23 = vpop.trf.xlu0  ;;  %3051 = vmatpush.bf16.msra.mxu1 %v5911_v18  ;;  %v6118_v36 = vld [vmem:[%s10896_s1 + $0x740] sm:$0xf]  ;;  %v6490_v49 = vld [vmem:[%s10896_s1 + $0x54c] sm:$0xf0] }
 0x186   : > { %2915 = vmatmul.bf16.gmra.mxu2 %v8075_v23  ;;  %3151 = vmatpush.bf16.msra.mxu3 %v6135_v50  ;;  %v5862_v47 = vld [vmem:[%s10896_s1 + $0x540] sm:$0xf]  ;;  %v6119_v50 = vor.u32 %v6554_v46, %v6118_v36  ;;  %v6454_v46 = vld [vmem:[%s10896_s1 + $0x42c] sm:$0xf0] }
 0x187   : > { %3002 = vmatpush.bf16.msra.mxu0 %v5783_v20  ;;  %3102 = vmatpush.bf16.msra.mxu2 %v6007_v10  ;;  %v990_v20 = vpack.c.bf16 %v910_v11, %v909_v9  ;;  %v872_v9 = vld [vmem:[%s7628_s10 + $0x248] sm:$0xff]  ;;  %v5990_v10 = vld [vmem:[%s10896_s1 + $0x640] sm:$0xf]  ;;  %v6522_v11 = vld [vmem:[%s10896_s1 + $0x64c] sm:$0xf0] }
 0x188   : > { %v971_v12 = vpack.c.bf16 %v872_v9, %v871_v8  ;;  %v5991_v13 = vor.u32 %v6522_v11, %v5990_v10  ;;  %v866_v8 = vld [vmem:[%s7628_s10 + $0x218] sm:$0xff] }
 0x189   : > { %1359 = vxpose.xlu0.c.b16.cont [5/8] %v979_v25, 128  ;;  %3052 = vmatpush.bf16.msra.mxu1 %v5895_v61  ;;  %v877_v25 = vld [vmem:[%s7628_s10 + $0x270] sm:$0xff] }
 0x18a   : > { %v974_v28 = vpack.c.bf16 %v878_v26, %v877_v25  ;;  %v870_v25 = vld [vmem:[%s7628_s10 + $0x238] sm:$0xff] }
 0x18b   : > { %v8088_v44 = vpop.trf.xlu1  ;;  %3003 = vmatpush.bf16.msra.mxu0 %v5767_v52  ;;  %v875_v52 = vld [vmem:[%s7628_s10 + $0x260] sm:$0xff] }
 0x18c   : > { %2866 = vmatmul.bf16.gmra.mxu1 %v8088_v44  ;;  %6813 = vmatpush.lsf.bf16.msrb.mxu2 %v974_v28  ;;  %v973_v60 = vpack.c.bf16 %v876_v53, %v875_v52  ;;  %v927_v52 = vld [vmem:[%s7628_s10 + $0x400] sm:$0xff]  ;;  %v928_v53 = vld [vmem:[%s7628_s10 + $0x408] sm:$0xff] }
 0x18d   : > { %v8090_v48 = vpop.trf.xlu0  ;;  %6729 = vmatpush.lsf.bf16.msrb.mxu1 %v974_v28  ;;  %6869 = vmatpush.lsf.bf16.msrb.mxu3 %v974_v28 }
 0x18e   : > { %2817 = vmatmul.bf16.gmra.mxu0 %v8090_v48 }
 0x18f   : > { %6617 = vmatpush.lsf.bf16.msrb.mxu0 %v974_v28 }
 0x190   : > { %7041 = vxpose.binary.xlu2.c.b16.end [8/16] %v998_v22, %v990_v20, 128  ;;  %v869_v22 = vld [vmem:[%s7628_s10 + $0x230] sm:$0xff] }
 0x191   : > { %3053 = vmatpush.bf16.msra.mxu1 %v5879_v51  ;;  %6814 = vmatpush.lsf.bf16.msrb.mxu2 %v973_v60  ;;  %v970_v28 = vpack.c.bf16 %v870_v25, %v869_v22  ;;  %v5863_v51 = vor.u32 %v6490_v49, %v5862_v47  ;;  %v5974_v22 = vld [vmem:[%s10896_s1 + $0x620] sm:$0xf]  ;;  %v6518_v25 = vld [vmem:[%s10896_s1 + $0x62c] sm:$0xf0] }
 0x192   : > { %6870 = vmatpush.lsf.bf16.msrb.mxu3 %v973_v60  ;;  %v6102_v47 = vld [vmem:[%s10896_s1 + $0x720] sm:$0xf] }
 0x193   : > { %v7022_v1 = vpop.trf.xlu1  ;;  %3004 = vmatpush.bf16.msra.mxu0 %v5751_v40  ;;  %v5735_v40 = vor.u32 %v6458_v32, %v5734_v29  ;;  %v5975_v29 = vor.u32 %v6518_v25, %v5974_v22  ;;  %v5830_v22 = vld [vmem:[%s10896_s1 + $0x500] sm:$0xf]  ;;  %v6482_v25 = vld [vmem:[%s10896_s1 + $0x50c] sm:$0xf0] }
 0x194   : > { %2969 = vmatmul.bf16.gmra.mxu3 %v7022_v1 }
 0x195   : > { %v8114_v4 = vpop.trf.xlu0  ;;  %6730 = vmatpush.lsf.bf16.msrb.mxu1 %v973_v60  ;;  %6815 = vmatpush.lsf.bf16.msrb.mxu2 %v972_v7 }
 0x196   : > { %2920 = vmatmul.bf16.gmra.mxu2 %v8114_v4  ;;  %6871 = vmatpush.lsf.bf16.msrb.mxu3 %v972_v7 }
 0x197   : > { %6618 = vmatpush.lsf.bf16.msrb.mxu0 %v973_v60  ;;  %v868_v60 = vld [vmem:[%s7628_s10 + $0x228] sm:$0xff] }
 0x199   : > { %1360 = vxpose.xlu0.c.b16.cont [6/8] %v980_v6, 128  ;;  %v981_v6 = vpack.c.bf16 %v892_v59, %v891_v56  ;;  %6731 = vmatpush.lsf.bf16.msrb.mxu1 %v972_v7  ;;  %v867_v56 = vld [vmem:[%s7628_s10 + $0x220] sm:$0xff]  ;;  %v999_v59 = vpack.c.bf16 %v928_v53, %v927_v52  ;;  %v6486_v52 = vld [vmem:[%s10896_s1 + $0x52c] sm:$0xf0] }
 0x19a   : > { %3103 = vmatpush.bf16.msra.mxu2 %v5991_v13  ;;  %6872 = vmatpush.lsf.bf16.msrb.mxu3 %v971_v12  ;;  %v969_v0 = vpack.c.bf16 %v868_v60, %v867_v56  ;;  %v864_v13 = vld [vmem:[%s7628_s10 + $0x208] sm:$0xff]  ;;  %v930_v60 = vld [vmem:[%s7628_s10 + $0x418] sm:$0xff] }
 0x19b   : > { %v8127_v18 = vpop.trf.xlu1  ;;  %6619 = vmatpush.lsf.bf16.msrb.mxu0 %v972_v7  ;;  %1403 = vxpose.xlu1.c.b16.start [1/4] (short) %v999_v59, 128  ;;  %v865_v7 = vld [vmem:[%s7628_s10 + $0x210] sm:$0xff] }
 0x19c   : > { %2871 = vmatmul.bf16.gmra.mxu1 %v8127_v18  ;;  %v968_v11 = vpack.c.bf16 %v866_v8, %v865_v7  ;;  %v929_v59 = vld [vmem:[%s7628_s10 + $0x410] sm:$0xff] }
 0x19d   : > { %v8131_v27 = vpop.trf.xlu0  ;;  %6732 = vmatpush.lsf.bf16.msrb.mxu1 %v971_v12  ;;  %v6514_v7 = vld [vmem:[%s10896_s1 + $0x60c] sm:$0xf0] }
 0x19e   : > { %2822 = vmatmul.bf16.gmra.mxu0 %v8131_v27  ;;  %6816 = vmatpush.lsf.bf16.msrb.mxu2 %v971_v12 }
 0x19f   : > { %6620 = vmatpush.lsf.bf16.msrb.mxu0 %v971_v12  ;;  %3152 = vmatpush.bf16.msra.mxu3 %v6119_v50  ;;  %v863_v12 = vld [vmem:[%s7628_s10 + $0x200] sm:$0xff]  ;;  %v6550_v50 = vld [vmem:[%s10896_s1 + $0x72c] sm:$0xf0] }
 0x1a0   : > { %v6103_v53 = vor.u32 %v6550_v50, %v6102_v47 }
 0x1a1   : > { %6733 = vmatpush.lsf.bf16.msrb.mxu1 %v970_v28 }
 0x1a2   : > { %6817 = vmatpush.lsf.bf16.msrb.mxu2 %v970_v28 }
 0x1a3   : > { %v7024_v61 = vpop.trf.xlu1  ;;  %6621 = vmatpush.lsf.bf16.msrb.mxu0 %v970_v28  ;;  %6873 = vmatpush.lsf.bf16.msrb.mxu3 %v970_v28  ;;  %v967_v28 = vpack.c.bf16 %v864_v13, %v863_v12  ;;  %v6546_v13 = vld [vmem:[%s10896_s1 + $0x70c] sm:$0xf0] }
 0x1a4   : > { %2974 = vmatmul.bf16.gmra.mxu3 %v7024_v61  ;;  %v893_v61 = vld [vmem:[%s7628_s10 + $0x2f0] sm:$0xff] }
 0x1a5   : > { %v8159_v1 = vpop.trf.xlu0  ;;  %3054 = vmatpush.bf16.msra.mxu1 %v5863_v51  ;;  %v982_v10 = vpack.c.bf16 %v894_v62, %v893_v61  ;;  %v5846_v51 = vld [vmem:[%s10896_s1 + $0x520] sm:$0xf]  ;;  %v1000_v61 = vpack.c.bf16 %v930_v60, %v929_v59 }
 0x1a6   : > { %2925 = vmatmul.bf16.gmra.mxu2 %v8159_v1  ;;  %v5847_v56 = vor.u32 %v6486_v52, %v5846_v51 }
 0x1a7   : > { %3005 = vmatpush.bf16.msra.mxu0 %v5735_v40  ;;  %6818 = vmatpush.lsf.bf16.msrb.mxu2 %v969_v0  ;;  %v5718_v40 = vld [vmem:[%s10896_s1 + $0x420] sm:$0xf] }
 0x1a8   : > { %6874 = vmatpush.lsf.bf16.msrb.mxu3 %v969_v0  ;;  %v5719_v49 = vor.u32 %v6454_v46, %v5718_v40  ;;  %v931_v40 = vld [vmem:[%s7628_s10 + $0x420] sm:$0xff]  ;;  %v932_v46 = vld [vmem:[%s7628_s10 + $0x428] sm:$0xff] }
 0x1a9   : > { %1361 = vxpose.xlu0.c.b16.cont [7/8] %v981_v6, 128  ;;  %6734 = vmatpush.lsf.bf16.msrb.mxu1 %v969_v0 }
 0x1ab   : > { %v8170_v20 = vpop.trf.xlu1  ;;  %6622 = vmatpush.lsf.bf16.msrb.mxu0 %v969_v0  ;;  %6819 = vmatpush.lsf.bf16.msrb.mxu2 %v968_v11 }
 0x1ac   : > { %2876 = vmatmul.bf16.gmra.mxu1 %v8170_v20  ;;  %6875 = vmatpush.lsf.bf16.msrb.mxu3 %v968_v11 }
 0x1ad   : > { %v8174_v26 = vpop.trf.xlu0  ;;  %6735 = vmatpush.lsf.bf16.msrb.mxu1 %v968_v11  ;;  %1404 = vxpose.xlu1.c.b16.cont [2/4] (short) %v1000_v61, 128 }
 0x1ae   : > { %2827 = vmatmul.bf16.gmra.mxu0 %v8174_v26 }
 0x1af   : > { %6623 = vmatpush.lsf.bf16.msrb.mxu0 %v968_v11  ;;  %3104 = vmatpush.bf16.msra.mxu2 %v5975_v29  ;;  %v6086_v11 = vld [vmem:[%s10896_s1 + $0x700] sm:$0xf]  ;;  %v5831_v29 = vor.u32 %v6482_v25, %v5830_v22  ;;  %v5544_v22 = vld [vmem:[%s10896_s1 + $0x2d0] sm:$0xf0]  ;;  %v6376_v25 = vld [vmem:[%s10896_s1 + $0x1c4] sm:$0xf] }
 0x1b0   : > { %6876 = vmatpush.lsf.bf16.msrb.mxu3 %v967_v28 }
 0x1b1   : > { %6736 = vmatpush.lsf.bf16.msrb.mxu1 %v967_v28 }
 0x1b3   : > { %v7026_v6 = vpop.trf.xlu1  ;;  %6624 = vmatpush.lsf.bf16.msrb.mxu0 %v967_v28  ;;  %6820 = vmatpush.lsf.bf16.msrb.mxu2 %v967_v28  ;;  %v6087_v28 = vor.u32 %v6546_v13, %v6086_v11  ;;  %v6408_v13 = vld [vmem:[%s10896_s1 + $0x2c4] sm:$0xf] }
 0x1b4   : > { %2979 = vmatmul.bf16.gmra.mxu3 %v7026_v6  ;;  %v5958_v6 = vld [vmem:[%s10896_s1 + $0x600] sm:$0xf] }
 0x1b5   : > { %v8204_v9 = vpop.trf.xlu0  ;;  %3153 = vmatpush.bf16.msra.mxu3 %v6103_v53  ;;  %v933_v53 = vld [vmem:[%s7628_s10 + $0x430] sm:$0xff] }
 0x1b6   : > { %2930 = vmatmul.bf16.gmra.mxu2 %v8204_v9 }
 0x1b7   : > { %3006 = vmatpush.bf16.msra.mxu0 %v5719_v49  ;;  %v1001_v49 = vpack.c.bf16 %v932_v46, %v931_v40  ;;  %v6348_v40 = vld [vmem:[%s10896_s1 + $0xe4] sm:$0xf]  ;;  %v5304_v46 = vld [vmem:[%s10896_s1 + $0xf0] sm:$0xf0] }
 0x1b9   : > { %1362 = vxpose.xlu0.c.b16.end [8/8] %v982_v10, 128  ;;  %3154 = vmatpush.bf16.msra.mxu3 %v6087_v28  ;;  %v5416_v28 = vld [vmem:[%s10896_s1 + $0x1d0] sm:$0xf0] }
 0x1bb   : > { %v8215_v32 = vpop.trf.xlu1 }
 0x1bc   : > { %2881 = vmatmul.bf16.gmra.mxu1 %v8215_v32 }
 0x1bd   : > { %v8217_v36 = vpop.trf.xlu0  ;;  %1405 = vxpose.xlu1.c.b16.cont [3/4] (short) %v1001_v49, 128  ;;  %v5419_v49 = vor.u32 %v6376_v25, %v5416_v28 }
 0x1be   : > { %2832 = vmatmul.bf16.gmra.mxu0 %v8217_v36 }
 0x1c1   : > { %v8289_v47 = vpop.trf.xlu2 }
 0x1c2   : > { %11055 = vst [vmem:[#allocation22_spill] sm:$0xff] %v8289_v47 }
 0x1c3   : > { %v7028_v62 = vpop.trf.xlu1  ;;  %6877 = vllmr.16.mxu3 }
 0x1c4   : > { %2984 = vmatmul.bf16.gmra.mxu3 %v7028_v62 }
 0x1c5   : > { %6821 = vllmr.16.mxu2  ;;  %v8245_v0 = vpop.trf.xlu0 }
 0x1c6   : > { %2935 = vmatmul.bf16.gmra.mxu2 %v8245_v0 }
 0x1c7   : > { %6838 = vmatpush.lsf.bf16.msrb.mxu2 %v7817_v35 }
 0x1c9   : > { %v8300_v51 = vpop.trf.xlu2 }
 0x1ca   : > { %11056 = vst [vmem:[#allocation23_spill] sm:$0xff] %v8300_v51 }
 0x1cb   : > { %6737 = vllmr.16.mxu1  ;;  %6839 = vmatpush.lsf.bf16.msrb.mxu2 %v7748_v39  ;;  %v8259_v8 = vpop.trf.xlu1 }
 0x1cc   : > { %2886 = vmatmul.bf16.gmra.mxu1 %v8259_v8 }
 0x1cd   : > { %6625 = vllmr.16.mxu0  ;;  %6754 = vmatpush.lsf.bf16.msrb.mxu1 %v7817_v35  ;;  %v8262_v10 = vpop.trf.xlu0 }
 0x1ce   : > { %2837 = vmatmul.bf16.gmra.mxu0 %v8262_v10 }
 0x1cf   : > { %6642 = vmatpush.lsf.bf16.msrb.mxu0 %v7817_v35  ;;  %v5959_v35 = vor.u32 %v6514_v7, %v5958_v6  ;;  %v5560_v7 = vld [vmem:[%s10896_s1 + $0x2f0] sm:$0xf0] }
 0x1d1   : > { %3055 = vmatpush.bf16.msra.mxu1 %v5847_v56  ;;  %3105 = vmatpush.bf16.msra.mxu2 %v5959_v35  ;;  %v934_v56 = vld [vmem:[%s7628_s10 + $0x438] sm:$0xff]  ;;  %v6380_v35 = vld [vmem:[%s10896_s1 + $0x1e4] sm:$0xf]  ;;  %s4586_s10 = ssub.s32 200, %s6308_s24  ;;  %s5046_s24 = scalar_lea.hbm %s10897_s2, %s6313_s19 }
 0x1d2   : > { %v1002_v59 = vpack.c.bf16 %v934_v56, %v933_v53  ;;  %v6262_v53 = vld [vmem:[%s10896_s1 + $0x860] sm:$0xf]  ;;  %v6590_v56 = vld [vmem:[%s10896_s1 + $0x86c] sm:$0xf0]  ;;  %s5049_s0 = sshll.u32 %s5046_s24, 4  ;;  %s10820_s0 = int_to_ptr.hbm [resolvable:$true] %s5049_s0 }
 0x1d3   : > { %6643 = vmatpush.lsf.bf16.msrb.mxu0 %v7748_v39  ;;  %v7030_v50 = vpop.trf.xlu1  ;;  %s7072_s28 = sshra.s32 %s10820_s0, 4  ;;  %s7073_s28 = int_to_ptr.hbm [resolvable:$true] %s7072_s28 }
 0x1d4   : > { %2989 = vmatmul.bf16.gmra.mxu3 %v7030_v50  ;;  %1406 = vxpose.xlu1.c.b16.end [4/4] (short) %v1002_v59, 128  ;;  %s7074_s7 = scalar_lea.hbm %s7073_s28, 256  ;;  %p7079_p10 = scmp.lt.s32.totalorder %s7073_s28, %s10897_s2 }
 0x1d5   : > { %6755 = vmatpush.lsf.bf16.msrb.mxu1 %v7748_v39  ;;  %6840 = vmatpush.lsf.bf16.msrb.mxu2 %v7727_v16  ;;  %v5702_v39 = vld [vmem:[%s10896_s1 + $0x400] sm:$0xf]  ;;  %p7075_p4 = scmp.ne.s32.totalorder %s7073_s28, %s7074_s7  ;;  %p7080_p11 = scmp.lt.s32.totalorder %s7078_s26, %s7074_s7 }
 0x1d7   : > { %6644 = vmatpush.lsf.bf16.msrb.mxu0 %v7727_v16  ;;  %p7076_p6 = pnand %p7075_p4, %p7320_p8  ;;  %p7081_p12 = por %p7080_p11, %p7079_p10 }
 0x1d9   : > { %6756 = vmatpush.lsf.bf16.msrb.mxu1 %v7727_v16  ;;  %v6450_v16 = vld [vmem:[%s10896_s1 + $0x40c] sm:$0xf0]  ;;  %6841 = vmatpush.lsf.bf16.msrb.mxu2 %v7710_v3  ;;  %p7077_p7 = pneg %p7076_p6 }
 0x1da   : > { %v5703_v12 = vor.u32 %v6450_v16, %v5702_v39  ;;  %v5432_v39 = vld [vmem:[%s10896_s1 + $0x1f0] sm:$0xf0] }
 0x1db   : > { %6645 = vmatpush.lsf.bf16.msrb.mxu0 %v7710_v3  ;;  %v8303_v52 = vpop.trf.xlu1  ;;  %v5435_v11 = vor.u32 %v6380_v35, %v5432_v39  ;;  %v6263_v39 = vor.u32 %v6590_v56, %v6262_v53  ;;  %v6586_v53 = vld [vmem:[%s10896_s1 + $0x84c] sm:$0xf0]  ;;  %v6404_v56 = vld [vmem:[%s10896_s1 + $0x2a4] sm:$0xf]  ;;  %p7082_p13 = pnand %p7081_p12, %p7077_p7 }
 0x1dc   : > { %2891 = vmatmul.bf16.gmra.mxu1 %v8303_v52 }
 0x1dd   : > { %6757 = vmatpush.lsf.bf16.msrb.mxu1 %v7710_v3  ;;  %6842 = vmatpush.lsf.bf16.msrb.mxu2 %v7693_v55  ;;  %v8294_v3 = vpop.trf.xlu0 }
 0x1de   : > { %2940 = vmatmul.bf16.gmra.mxu2 %v8294_v3 }
 0x1df   : > { %3007 = vmatpush.bf16.msra.mxu0 %v5703_v12 }
 0x1e1   : > { %6758 = vmatpush.lsf.bf16.msrb.mxu1 %v7693_v55  ;;  %6843 = vmatpush.lsf.bf16.msrb.mxu2 %v7676_v43 }
 0x1e3   : > { %6646 = vmatpush.lsf.bf16.msrb.mxu0 %v7693_v55  ;;  %v7032_v60 = vpop.trf.xlu1 }
 0x1e4   : > { %2994 = vmatmul.bf16.gmra.mxu3 %v7032_v60 }
 0x1e5   : > { %3056 = vmatpush.bf16.msra.mxu1 %v5831_v29  ;;  %6844 = vmatpush.lsf.bf16.msrb.mxu2 %v7659_v31  ;;  %v8307_v55 = vpop.trf.xlu0  ;;  %v5547_v29 = vor.u32 %v6408_v13, %v5544_v22 }
 0x1e6   : > { %2842 = vmatmul.bf16.gmra.mxu0 %v8307_v55 }
 0x1e7   : > { %6647 = vmatpush.lsf.bf16.msrb.mxu0 %v7676_v43 }
 0x1e9   : > { %6759 = vmatpush.lsf.bf16.msrb.mxu1 %v7676_v43  ;;  %6845 = vmatpush.lsf.bf16.msrb.mxu2 %v7640_v17  ;;  %v8314_v43 = vpop.trf.xlu2 }
 0x1ea   : > { %11057 = vst [vmem:[#allocation24_spill] sm:$0xff] %v8314_v43 }
 0x1eb   : > { %6648 = vmatpush.lsf.bf16.msrb.mxu0 %v7659_v31  ;;  %v8322_v62 = vpop.trf.xlu1 }
 0x1ec   : > { %2896 = vmatmul.bf16.gmra.mxu1 %v8322_v62 }
 0x1ed   : > { %6760 = vmatpush.lsf.bf16.msrb.mxu1 %v7659_v31  ;;  %v8317_v61 = vpop.trf.xlu0 }
 0x1ee   : > { %2945 = vmatmul.bf16.gmra.mxu2 %v8317_v61 }
 0x1ef   : > { %6649 = vmatpush.lsf.bf16.msrb.mxu0 %v7640_v17 }
 0x1f1   : > { %6761 = vmatpush.lsf.bf16.msrb.mxu1 %v7640_v17  ;;  %v8320_v31 = vpop.trf.xlu2  ;;  %v6412_v17 = vld [vmem:[%s10896_s1 + $0x2e4] sm:$0xf] }
 0x1f2   : > { %11058 = vst [vmem:[#allocation25_spill] sm:$0xff] %v8320_v31  ;;  %v5563_v16 = vor.u32 %v6412_v17, %v5560_v7  ;;  %v5307_v7 = vor.u32 %v6348_v40, %v5304_v46  ;;  %v5400_v40 = vld [vmem:[%s10896_s1 + $0x1b0] sm:$0xf0]  ;;  %v6246_v46 = vld [vmem:[%s10896_s1 + $0x840] sm:$0xf] }
 0x1f4   : > { %3155 = vmatmul.bf16.vlgmr.msra.gmra.mxu3 %v8300_v51 }
 0x1f5   : > { %v8324_v6 = vpop.trf.xlu0  ;;  %3343 = vmatpush.bf16.msra.mxu3 %v5563_v16  ;;  %v6344_v16 = vld [vmem:[%s10896_s1 + $0xc4] sm:$0xf] }
 0x1f6   : > { %2847 = vmatmul.bf16.gmra.mxu0 %v8324_v6 }
 0x1f7   : > { %v2960_v50 = vpop.f32.mrf.mxu3 }
 0x1f9   : > { %v8340_v12 = vpop.trf.xlu2  ;;  %v2911_v59 = vpop.f32.mrf.mxu2  ;;  %3344 = vmatpush.bf16.msra.mxu3 %v5547_v29  ;;  %v6372_v29 = vld [vmem:[%s10896_s1 + $0x1a4] sm:$0xf] }
 0x1fa   : > { %11059 = vst [vmem:[#allocation26_spill] sm:$0xff] %v8340_v12  ;;  %v2862_v60 = vpop.f32.mrf.mxu1 }
 0x1fb   : > { %v2813_v35 = vpop.f32.mrf.mxu0 }
 0x1fc   : > { %v2863_v13 = vadd.f32 %v2862_v60, %v2813_v35 }
 0x1fd   : > { %v8368_v17 = vpop.trf.xlu0 }
 0x1fe   : > { %3106 = vmatmul.bf16.vlgmr.msra.gmra.mxu2 %v8289_v47  ;;  %11060 = vst [vmem:[#allocation27_spill] sm:$0xff] %v8368_v17  ;;  %3057 = vmatmul.bf16.vlgmr.msra.gmra.mxu1 %v8368_v17  ;;  %v2912_v25 = vadd.f32 %v2911_v59, %v2863_v13  ;;  %v5528_v59 = vld [vmem:[%s10896_s1 + $0x2b0] sm:$0xf0]  ;;  %v6536_v17 = vld [vmem:[%s10896_s1 + $0x6c4] sm:$0xf] }
 0x1ff   : > { %3294 = vmatpush.bf16.msra.mxu2 %v5435_v11  ;;  %v5288_v11 = vld [vmem:[%s10896_s1 + $0xd0] sm:$0xf0]  ;;  %3245 = vmatpush.bf16.msra.mxu1 %v5307_v7  ;;  %v2962_v60 = vpop.f32.mrf.mxu3  ;;  %v6247_v7 = vor.u32 %v6586_v53, %v6246_v46  ;;  %v5531_v35 = vor.u32 %v6404_v56, %v5528_v59 }
 0x200   : > { %v5291_v28 = vor.u32 %v6344_v16, %v5288_v11  ;;  %v5272_v16 = vld [vmem:[%s10896_s1 + $0xb0] sm:$0xf0]  ;;  %v8403_v11 = vadd.f32 %v2960_v50, %v2912_v25 }
 0x201   : > { %v8377_v22 = vpop.trf.xlu2  ;;  %v2913_v13 = vpop.f32.mrf.mxu2  ;;  %3345 = vmatpush.bf16.msra.mxu3 %v5531_v35 }
 0x202   : > { %11061 = vst [vmem:[#allocation28_spill] sm:$0xff] %v8377_v22 }
 0x203   : > { %3295 = vmatpush.bf16.msra.mxu2 %v5419_v49  ;;  %v5403_v49 = vor.u32 %v6372_v29, %v5400_v40  ;;  %v2864_v29 = vpop.f32.mrf.mxu1  ;;  %3246 = vmatpush.bf16.msra.mxu1 %v5291_v28  ;;  %v2815_v40 = vpop.f32.mrf.mxu0 }
 0x204   : > { %v2865_v46 = vadd.f32 %v2864_v29, %v2815_v40  ;;  %3160 = vmatmul.bf16.gmra.mxu3 %v8320_v31  ;;  %v5512_v29 = vld [vmem:[%s10896_s1 + $0x290] sm:$0xf0]  ;;  %v6336_v40 = vld [vmem:[%s10896_s1 + $0x84] sm:$0xf] }
 0x205   : > { %v8411_v28 = vpop.trf.xlu0 }
 0x206   : > { %6626 = vmatmul.lmr.bf16.vlgmr.msra.gmra.16.mxu0  ;;  %v2914_v53 = vadd.f32 %v2913_v13, %v2865_v46  ;;  %11063 = vst [vmem:[#allocation30_spill] sm:$0xff] %v8411_v28  ;;  %v5256_v46 = vld [vmem:[%s10896_s1 + $0x90] sm:$0xf0] }
 0x207   : > { %3200 = vmatpush.bf16.msra.mxu0 %v6263_v39  ;;  %v6340_v39 = vld [vmem:[%s10896_s1 + $0xa4] sm:$0xf]  ;;  %3296 = vmatpush.bf16.msra.mxu2 %v5403_v49  ;;  %v2965_v50 = vpop.f32.mrf.mxu3 }
 0x208   : > { %v5275_v14 = vor.u32 %v6340_v39, %v5272_v16  ;;  %v8409_v25 = vadd.f32 %v2962_v60, %v2914_v53  ;;  %v6368_v16 = vld [vmem:[%s10896_s1 + $0x184] sm:$0xf] }
 0x209   : > { %v8407_v56 = vpop.trf.xlu2  ;;  %v2916_v49 = vpop.f32.mrf.mxu2  ;;  %v6400_v60 = vld [vmem:[%s10896_s1 + $0x284] sm:$0xf] }
 0x20a   : > { %11062 = vst [vmem:[#allocation29_spill] sm:$0xff] %v8407_v56  ;;  %3247 = vmatpush.bf16.msra.mxu1 %v5275_v14  ;;  %v5384_v14 = vld [vmem:[%s10896_s1 + $0x190] sm:$0xf0] }
 0x20b   : > { %3201 = vmatpush.bf16.msra.mxu0 %v6247_v7  ;;  %v2867_v59 = vpop.f32.mrf.mxu1  ;;  %v2818_v35 = vpop.f32.mrf.mxu0  ;;  %v5387_v13 = vor.u32 %v6368_v16, %v5384_v14 }
 0x20c   : > { %v2868_v7 = vadd.f32 %v2867_v59, %v2818_v35  ;;  %v5259_v59 = vor.u32 %v6336_v40, %v5256_v46 }
 0x20d   : > { %3297 = vmatpush.bf16.msra.mxu2 %v5387_v13 }
 0x20e   : > { %6627 = vmatmul.lmr.bf16.gmra.16.mxu0  ;;  %3111 = vmatmul.bf16.gmra.mxu2 %v8314_v43  ;;  %v2917_v39 = vadd.f32 %v2916_v49, %v2868_v7  ;;  %v5515_v49 = vor.u32 %v6400_v60, %v5512_v29 }
 0x20f   : > { %3062 = vmatmul.bf16.gmra.mxu1 %v8411_v28  ;;  %v2967_v53 = vpop.f32.mrf.mxu3 }
 0x210   : > { %v8432_v35 = vadd.f32 %v2965_v50, %v2917_v39  ;;  %3346 = vmatpush.bf16.msra.mxu3 %v5515_v49  ;;  %3248 = vmatpush.bf16.msra.mxu1 %v5259_v59 }
 0x211   : > { %v2918_v7 = vpop.f32.mrf.mxu2  ;;  %v8434_v30 = vpop.trf.xlu2 }
 0x212   : > { %11064 = vst [vmem:[#allocation31_spill] sm:$0xff] %v8434_v30 }
 0x213   : > { %v2869_v16 = vpop.f32.mrf.mxu1  ;;  %v2820_v14 = vpop.f32.mrf.mxu0 }
 0x214   : > { %v2870_v42 = vadd.f32 %v2869_v16, %v2820_v14  ;;  %3165 = vmatmul.bf16.gmra.mxu3 %v8377_v22  ;;  %v6396_v16 = vld [vmem:[%s10896_s1 + $0x264] sm:$0xf]  ;;  %v5496_v14 = vld [vmem:[%s10896_s1 + $0x270] sm:$0xf0] }
 0x215   : > { %v8440_v29 = vpop.trf.xlu0 }
 0x216   : > { %6628 = vmatmul.lmr.bf16.gmra.16.mxu0  ;;  %v2919_v54 = vadd.f32 %v2918_v7, %v2870_v42  ;;  %11065 = vst [vmem:[#allocation32_spill] sm:$0xff] %v8440_v29  ;;  %v6364_v42 = vld [vmem:[%s10896_s1 + $0x164] sm:$0xf]  ;;  %v6582_v7 = vld [vmem:[%s10896_s1 + $0x82c] sm:$0xf0] }
 0x217   : > { %v2970_v31 = vpop.f32.mrf.mxu3 }
 0x218   : > { %v8438_v60 = vadd.f32 %v2967_v53, %v2919_v54  ;;  %v5368_v54 = vld [vmem:[%s10896_s1 + $0x170] sm:$0xf0]  ;;  %v6230_v53 = vld [vmem:[%s10896_s1 + $0x820] sm:$0xf] }
 0x219   : > { %v2921_v50 = vpop.f32.mrf.mxu2  ;;  %v8442_v13 = vpop.trf.xlu2  ;;  %v5371_v59 = vor.u32 %v6364_v42, %v5368_v54  ;;  %v5240_v42 = vld [vmem:[%s10896_s1 + $0x70] sm:$0xf0] }
 0x21a   : > { %11066 = vst [vmem:[#allocation33_spill] sm:$0xff] %v8442_v13 }
 0x21b   : > { %v2872_v39 = vpop.f32.mrf.mxu1  ;;  %v2823_v40 = vpop.f32.mrf.mxu0  ;;  %3298 = vmatpush.bf16.msra.mxu2 %v5371_v59 }
 0x21c   : > { %v2873_v46 = vadd.f32 %v2872_v39, %v2823_v40  ;;  %v6231_v39 = vor.u32 %v6582_v7, %v6230_v53  ;;  %v5499_v40 = vor.u32 %v6396_v16, %v5496_v14 }
 0x21e   : > { %6629 = vmatmul.lmr.bf16.gmra.16.mxu0  ;;  %3116 = vmatmul.bf16.gmra.mxu2 %v8340_v12  ;;  %v2922_v49 = vadd.f32 %v2921_v50, %v2873_v46  ;;  %v6332_v46 = vld [vmem:[%s10896_s1 + $0x64] sm:$0xf] }
 0x21f   : > { %3067 = vmatmul.bf16.gmra.mxu1 %v8440_v29  ;;  %v2972_v50 = vpop.f32.mrf.mxu3  ;;  %v5243_v2 = vor.u32 %v6332_v46, %v5240_v42  ;;  %3202 = vmatpush.bf16.msra.mxu0 %v6231_v39 }
 0x220   : > { %v8469_v54 = vadd.f32 %v2970_v31, %v2922_v49  ;;  %3347 = vmatpush.bf16.msra.mxu3 %v5499_v40 }
 0x221   : > { %v2923_v22 = vpop.f32.mrf.mxu2  ;;  %3249 = vmatpush.bf16.msra.mxu1 %v5243_v2  ;;  %v8472_v7 = vpop.trf.xlu2 }
 0x222   : > { %11067 = vst [vmem:[#allocation34_spill] sm:$0xff] %v8472_v7 }
 0x223   : > { %v2874_v15 = vpop.f32.mrf.mxu1  ;;  %v2825_v38 = vpop.f32.mrf.mxu0 }
 0x224   : > { %v2875_v53 = vadd.f32 %v2874_v15, %v2825_v38  ;;  %3170 = vmatmul.bf16.gmra.mxu3 %v8434_v30  ;;  %v6360_v15 = vld [vmem:[%s10896_s1 + $0x144] sm:$0xf]  ;;  %v5352_v38 = vld [vmem:[%s10896_s1 + $0x150] sm:$0xf0] }
 0x225   : > { %v8477_v46 = vpop.trf.xlu0  ;;  %v5355_v42 = vor.u32 %v6360_v15, %v5352_v38 }
 0x226   : > { %6630 = vmatmul.lmr.bf16.gmra.16.mxu0  ;;  %v2924_v16 = vadd.f32 %v2923_v22, %v2875_v53  ;;  %11068 = vst [vmem:[#allocation35_spill] sm:$0xff] %v8477_v46  ;;  %v6392_v22 = vld [vmem:[%s10896_s1 + $0x244] sm:$0xf]  ;;  %v5480_v53 = vld [vmem:[%s10896_s1 + $0x250] sm:$0xf0] }
 0x227   : > { %v2975_v14 = vpop.f32.mrf.mxu3  ;;  %3299 = vmatpush.bf16.msra.mxu2 %v5355_v42 }
 0x228   : > { %v8475_v31 = vadd.f32 %v2972_v50, %v2924_v16  ;;  %v6328_v16 = vld [vmem:[%s10896_s1 + $0x44] sm:$0xf] }
 0x229   : > { %v2926_v49 = vpop.f32.mrf.mxu2  ;;  %v8489_v50 = vpop.trf.xlu2 }
 0x22a   : > { %11069 = vst [vmem:[#allocation36_spill] sm:$0xff] %v8489_v50 }
 0x22b   : > { %v2877_v59 = vpop.f32.mrf.mxu1  ;;  %v2828_v39 = vpop.f32.mrf.mxu0 }
 0x22c   : > { %v2878_v40 = vadd.f32 %v2877_v59, %v2828_v39  ;;  %v5483_v39 = vor.u32 %v6392_v22, %v5480_v53 }
 0x22e   : > { %6631 = vmatmul.lmr.bf16.gmra.16.mxu0  ;;  %3121 = vmatmul.bf16.gmra.mxu2 %v8407_v56  ;;  %v2927_v2 = vadd.f32 %v2926_v49, %v2878_v40  ;;  %v5224_v49 = vld [vmem:[%s10896_s1 + $0x50] sm:$0xf0] }
 0x22f   : > { %3072 = vmatmul.bf16.gmra.mxu1 %v8477_v46  ;;  %v2977_v59 = vpop.f32.mrf.mxu3  ;;  %v5227_v40 = vor.u32 %v6328_v16, %v5224_v49  ;;  %3348 = vmatpush.bf16.msra.mxu3 %v5483_v39  ;;  %v6578_v39 = vld [vmem:[%s10896_s1 + $0x80c] sm:$0xf0] }
 0x230   : > { %v8500_v30 = vadd.f32 %v2975_v14, %v2927_v2 }
 0x231   : > { %v2928_v34 = vpop.f32.mrf.mxu2  ;;  %3250 = vmatpush.bf16.msra.mxu1 %v5227_v40  ;;  %v8506_v53 = vpop.trf.xlu2  ;;  %v6388_v40 = vld [vmem:[%s10896_s1 + $0x224] sm:$0xf] }
 0x232   : > { %11070 = vst [vmem:[#allocation37_spill] sm:$0xff] %v8506_v53 }
 0x233   : > { %v2879_v15 = vpop.f32.mrf.mxu1  ;;  %v2830_v38 = vpop.f32.mrf.mxu0 }
 0x234   : > { %v2880_v51 = vadd.f32 %v2879_v15, %v2830_v38  ;;  %3175 = vmatmul.bf16.gmra.mxu3 %v8472_v7  ;;  %v5464_v15 = vld [vmem:[%s10896_s1 + $0x230] sm:$0xf0] }
 0x235   : > { %v8508_v2 = vpop.trf.xlu0 }
 0x236   : > { %6632 = vmatmul.lmr.bf16.gmra.16.mxu0  ;;  %v2929_v46 = vadd.f32 %v2928_v34, %v2880_v51  ;;  %11071 = vst [vmem:[#allocation38_spill] sm:$0xff] %v8508_v2  ;;  %v6356_v34 = vld [vmem:[%s10896_s1 + $0x124] sm:$0xf]  ;;  %v5336_v51 = vld [vmem:[%s10896_s1 + $0x130] sm:$0xf0] }
 0x237   : > { %v2980_v56 = vpop.f32.mrf.mxu3 }
 0x238   : > { %v8504_v29 = vadd.f32 %v2977_v59, %v2929_v46  ;;  %v6214_v46 = vld [vmem:[%s10896_s1 + $0x800] sm:$0xf]  ;;  %v5339_v59 = vor.u32 %v6356_v34, %v5336_v51 }
 0x239   : > { %v2931_v22 = vpop.f32.mrf.mxu2 }
 0x23a   : > { %3300 = vmatpush.bf16.msra.mxu2 %v5339_v59 }
 0x23b   : > { %v2882_v14 = vpop.f32.mrf.mxu1  ;;  %v2833_v42 = vpop.f32.mrf.mxu0 }
 0x23c   : > { %v2883_v16 = vadd.f32 %v2882_v14, %v2833_v42  ;;  %v5467_v14 = vor.u32 %v6388_v40, %v5464_v15  ;;  %v6324_v42 = vld [vmem:[%s10896_s1 + $0x24] sm:$0xf] }
 0x23e   : > { %6633 = vmatmul.lmr.bf16.gmra.16.mxu0  ;;  %3126 = vmatmul.bf16.gmra.mxu2 %v8442_v13  ;;  %v2932_v49 = vadd.f32 %v2931_v22, %v2883_v16  ;;  %v6215_v22 = vor.u32 %v6578_v39, %v6214_v46  ;;  %v5208_v16 = vld [vmem:[%s10896_s1 + $0x30] sm:$0xf0]  ;;  %v8537_v39 = vpop.trf.xlu2 }
 0x23f   : > { %3077 = vmatmul.bf16.gmra.mxu1 %v8508_v2  ;;  %v2982_v38 = vpop.f32.mrf.mxu3  ;;  %v5211_v7 = vor.u32 %v6324_v42, %v5208_v16  ;;  %3349 = vmatpush.bf16.msra.mxu3 %v5467_v14  ;;  %11072 = vst [vmem:[#allocation39_spill] sm:$0xff] %v8537_v39  ;;  %v6384_v16 = vld [vmem:[%s10896_s1 + $0x204] sm:$0xf] }
 0x240   : > { %v8535_v34 = vadd.f32 %v2980_v56, %v2932_v49  ;;  %3203 = vmatpush.bf16.msra.mxu0 %v6215_v22 }
 0x241   : > { %v2933_v51 = vpop.f32.mrf.mxu2  ;;  %3251 = vmatpush.bf16.msra.mxu1 %v5211_v7 }
 0x243   : > { %v2884_v2 = vpop.f32.mrf.mxu1  ;;  %v2835_v13 = vpop.f32.mrf.mxu0 }
 0x244   : > { %v2885_v46 = vadd.f32 %v2884_v2, %v2835_v13  ;;  %3180 = vmatmul.bf16.gmra.mxu3 %v8506_v53  ;;  %v6352_v2 = vld [vmem:[%s10896_s1 + $0x104] sm:$0xf] }
 0x245   : > { %v8543_v42 = vpop.trf.xlu0 }
 0x246   : > { %6634 = vmatmul.lmr.bf16.gmra.16.mxu0  ;;  %v2934_v40 = vadd.f32 %v2933_v51, %v2885_v46  ;;  %11073 = vst [vmem:[#allocation40_spill] sm:$0xff] %v8543_v42  ;;  %v8546_v7 = vpop.trf.xlu2  ;;  %v5448_v46 = vld [vmem:[%s10896_s1 + $0x210] sm:$0xf0] }
 0x247   : > { %v2985_v15 = vpop.f32.mrf.mxu3  ;;  %11074 = vst [vmem:[#allocation41_spill] sm:$0xff] %v8546_v7 }
 0x248   : > { %v8541_v56 = vadd.f32 %v2982_v38, %v2934_v40  ;;  %v5320_v38 = vld [vmem:[%s10896_s1 + $0x110] sm:$0xf0]  ;;  %v6320_v40 = vld [vmem:[%s10896_s1 + $0x4] sm:$0xf] }
 0x249   : > { %v2936_v49 = vpop.f32.mrf.mxu2  ;;  %v5323_v51 = vor.u32 %v6352_v2, %v5320_v38 }
 0x24b   : > { %v2887_v59 = vpop.f32.mrf.mxu1  ;;  %v2838_v22 = vpop.f32.mrf.mxu0  ;;  %3301 = vmatpush.bf16.msra.mxu2 %v5323_v51 }
 0x24c   : > { %v2888_v14 = vadd.f32 %v2887_v59, %v2838_v22  ;;  %v5451_v22 = vor.u32 %v6384_v16, %v5448_v46 }
 0x24e   : > { %6635 = vmatmul.lmr.bf16.gmra.16.mxu0  ;;  %3131 = vmatmul.bf16.gmra.mxu2 %v8489_v50  ;;  %v2937_v13 = vadd.f32 %v2936_v49, %v2888_v14  ;;  %v5192_v49 = vld [vmem:[%s10896_s1 + $0x10] sm:$0xf0]  ;;  %v8570_v43 = vpop.trf.xlu2 }
 0x24f   : > { %3082 = vmatmul.bf16.gmra.mxu1 %v8543_v42  ;;  %v2987_v59 = vpop.f32.mrf.mxu3  ;;  %v5195_v14 = vor.u32 %v6320_v40, %v5192_v49  ;;  %3350 = vmatpush.bf16.msra.mxu3 %v5451_v22  ;;  %11075 = vst [vmem:[#allocation42_spill] sm:$0xff] %v8570_v43 }
 0x250   : > { %v8566_v53 = vadd.f32 %v2985_v15, %v2937_v13  ;;  %v8630_v47 = vpop.trf.xlu1 }
 0x251   : > { %v2938_v42 = vpop.f32.mrf.mxu2  ;;  %3252 = vmatpush.bf16.msra.mxu1 %v5195_v14  ;;  %11079 = vst [vmem:[#allocation46_spill] sm:$0xff] %v8630_v47 }
 0x253   : > { %v2889_v2 = vpop.f32.mrf.mxu1  ;;  %v2840_v38 = vpop.f32.mrf.mxu0 }
 0x254   : > { %v2890_v50 = vadd.f32 %v2889_v2, %v2840_v38  ;;  %3185 = vmatmul.bf16.gmra.mxu3 %v8546_v7 }
 0x255   : > { %v8574_v46 = vpop.trf.xlu0 }
 0x256   : > { %6636 = vmatmul.lmr.bf16.gmra.16.mxu0  ;;  %v2939_v12 = vadd.f32 %v2938_v42, %v2890_v50  ;;  %11076 = vst [vmem:[#allocation43_spill] sm:$0xff] %v8574_v46  ;;  %v8579_v2 = vpop.trf.xlu2 }
 0x257   : > { %v2990_v28 = vpop.f32.mrf.mxu3  ;;  %11077 = vst [vmem:[#allocation44_spill] sm:$0xff] %v8579_v2 }
 0x258   : > { %v8572_v16 = vadd.f32 %v2987_v59, %v2939_v12 }
 0x25b   : > { %v2892_v13 = vpop.f32.mrf.mxu1 }
 0x25e   : > { %6637 = vmatmul.lmr.bf16.gmra.16.mxu0  ;;  %3136 = vmatmul.bf16.gmra.mxu2 %v8537_v39  ;;  %v5928_v39 = vld [vmem:[%s10896_s1 + $0x5d0] sm:$0xf0] }
 0x25f   : > { %3087 = vmatmul.bf16.gmra.mxu1 %v8574_v46  ;;  %v2992_v22 = vpop.f32.mrf.mxu3 }
 0x261   : > { %v2941_v15 = vpop.f32.mrf.mxu2 }
 0x263   : > { %v2843_v51 = vpop.f32.mrf.mxu0  ;;  %v2894_v14 = vpop.f32.mrf.mxu1 }
 0x264   : > { %v2893_v40 = vadd.f32 %v2892_v13, %v2843_v51  ;;  %3190 = vmatmul.bf16.gmra.mxu3 %v8579_v2 }
 0x265   : > { %v8585_v7 = vpop.trf.xlu0 }
 0x266   : > { %v2942_v49 = vadd.f32 %v2941_v15, %v2893_v40  ;;  %6638 = vmatmul.lmr.bf16.gmra.16.mxu0  ;;  %11078 = vst [vmem:[#allocation45_spill] sm:$0xff] %v8585_v7 }
 0x267   : > { %v2995_v13 = vpop.f32.mrf.mxu3 }
 0x268   : > { %v8577_v50 = vadd.f32 %v2990_v28, %v2942_v49 }
 0x269   : > { %v2943_v42 = vpop.f32.mrf.mxu2 }
 0x26b   : > { %v2845_v38 = vpop.f32.mrf.mxu0  ;;  %v2897_v40 = vpop.f32.mrf.mxu1 }
 0x26c   : > { %v2895_v12 = vadd.f32 %v2894_v14, %v2845_v38  ;;  %v6540_v38 = vld [vmem:[%s10896_s1 + $0x6e4] sm:$0xf] }
 0x26e   : > { %v2944_v59 = vadd.f32 %v2943_v42, %v2895_v12  ;;  %6639 = vmatmul.lmr.bf16.gmra.16.mxu0  ;;  %3141 = vmatmul.bf16.gmra.mxu2 %v8570_v43  ;;  %v6508_v42 = vld [vmem:[%s10896_s1 + $0x5e4] sm:$0xf]  ;;  %v6072_v12 = vld [vmem:[%s10896_s1 + $0x6f0] sm:$0xf0] }
 0x26f   : > { %3092 = vmatmul.bf16.gmra.mxu1 %v8585_v7  ;;  %v2997_v14 = vpop.f32.mrf.mxu3  ;;  %v6075_v2 = vor.u32 %v6540_v38, %v6072_v12  ;;  %v6504_v7 = vld [vmem:[%s10896_s1 + $0x5c4] sm:$0xf] }
 0x270   : > { %v8583_v51 = vadd.f32 %v2992_v22, %v2944_v59  ;;  %v5944_v22 = vld [vmem:[%s10896_s1 + $0x5f0] sm:$0xf0]  ;;  %v5931_v38 = vor.u32 %v6504_v7, %v5928_v39 }
 0x271   : > { %v2946_v15 = vpop.f32.mrf.mxu2  ;;  %v5800_v7 = vld [vmem:[%s10896_s1 + $0x4d0] sm:$0xf0] }
 0x273   : > { %v2848_v28 = vpop.f32.mrf.mxu0 }
 0x274   : > { %v2898_v49 = vadd.f32 %v2897_v40, %v2848_v28  ;;  %v2899_v40 = vpop.f32.mrf.mxu1  ;;  %3351 = vmatmul.bf16.vlgmr.msra.gmra.mxu3 %v8012_v24  ;;  %v6444_v24 = vld [vmem:[%s10896_s1 + $0x3e4] sm:$0xf] }
 0x275   : > { %3539 = vmatpush.bf16.msra.mxu3 %v6075_v2 }
 0x276   : > { %v2947_v46 = vadd.f32 %v2946_v15, %v2898_v49  ;;  %6640 = vmatmul.lmr.bf16.gmra.16.mxu0  ;;  %v5947_v49 = vor.u32 %v6508_v42, %v5944_v22  ;;  %v6476_v42 = vld [vmem:[%s10896_s1 + $0x4e4] sm:$0xf]  ;;  %v5816_v22 = vld [vmem:[%s10896_s1 + $0x4f0] sm:$0xf0] }
 0x278   : > { %v8600_v59 = vadd.f32 %v2995_v13, %v2947_v46  ;;  %v6056_v46 = vld [vmem:[%s10896_s1 + $0x6d0] sm:$0xf0] }
 0x279   : > { %v2948_v15 = vpop.f32.mrf.mxu2  ;;  %v6059_v12 = vor.u32 %v6536_v17, %v6056_v46  ;;  %v6472_v17 = vld [vmem:[%s10896_s1 + $0x4c4] sm:$0xf] }
 0x27a   : > { %v6440_v46 = vld [vmem:[%s10896_s1 + $0x3c4] sm:$0xf] }
 0x27b   : > { %v2850_v28 = vpop.f32.mrf.mxu0  ;;  %3540 = vmatpush.bf16.msra.mxu3 %v6059_v12  ;;  %v6500_v12 = vld [vmem:[%s10896_s1 + $0x5a4] sm:$0xf] }
 0x27c   : > { %v2900_v43 = vadd.f32 %v2899_v40, %v2850_v28  ;;  %v3156_v40 = vpop.f32.mrf.mxu3  ;;  %v3058_v28 = vpop.f32.mrf.mxu1 }
 0x27e   : > { %v2949_v13 = vadd.f32 %v2948_v15, %v2900_v43  ;;  %6641 = vmatmul.lmr.bf16.gmra.16.mxu0  ;;  %3302 = vmatmul.bf16.vlgmr.msra.gmra.mxu2 %v8043_v58  ;;  %v5688_v43 = vld [vmem:[%s10896_s1 + $0x3f0] sm:$0xf0] }
 0x27f   : > { %3490 = vmatpush.bf16.msra.mxu2 %v5947_v49  ;;  %v5819_v49 = vor.u32 %v6476_v42, %v5816_v22  ;;  %v5691_v39 = vor.u32 %v6444_v24, %v5688_v43  ;;  %3253 = vmatmul.bf16.vlgmr.msra.gmra.mxu1 %v8051_v63  ;;  %v5803_v22 = vor.u32 %v6472_v17, %v5800_v7  ;;  %v5912_v24 = vld [vmem:[%s10896_s1 + $0x5b0] sm:$0xf0]  ;;  %v6436_v43 = vld [vmem:[%s10896_s1 + $0x3a4] sm:$0xf] }
 0x280   : > { %v8628_v2 = vadd.f32 %v2997_v14, %v2949_v13  ;;  %v5672_v13 = vld [vmem:[%s10896_s1 + $0x3d0] sm:$0xf0] }
 0x281   : > { %v3107_v15 = vpop.f32.mrf.mxu2  ;;  %3441 = vmatpush.bf16.msra.mxu1 %v5819_v49  ;;  %v5915_v49 = vor.u32 %v6500_v12, %v5912_v24  ;;  %v6040_v17 = vld [vmem:[%s10896_s1 + $0x6b0] sm:$0xf0] }
 0x283   : > { %v3009_v58 = vpop.f32.mrf.mxu0  ;;  %3491 = vmatpush.bf16.msra.mxu2 %v5931_v38  ;;  %v5675_v38 = vor.u32 %v6440_v46, %v5672_v13  ;;  %v6468_v46 = vld [vmem:[%s10896_s1 + $0x4a4] sm:$0xf]  ;;  %v5784_v13 = vld [vmem:[%s10896_s1 + $0x4b0] sm:$0xf0] }
 0x284   : > { %v3010_v14 = vadd.f32 %v3009_v58, %v8403_v11  ;;  %v3158_v11 = vpop.f32.mrf.mxu3  ;;  %v3060_v7 = vpop.f32.mrf.mxu1  ;;  %3356 = vmatmul.bf16.gmra.mxu3 %v8075_v23 }
 0x285   : > { %6650 = vllmr.16.mxu0  ;;  %3442 = vmatpush.bf16.msra.mxu1 %v5803_v22 }
 0x286   : > { %v3059_v42 = vadd.f32 %v3058_v28, %v3010_v14  ;;  %6276 = vmatmul.msk.bf16.vlgmr.msra.gmra.mxu0 %vm2779_vm1, %v8630_v47 }
 0x287   : > { %3392 = vmatpush.bf16.msra.mxu0 %v5691_v39  ;;  %v6532_v39 = vld [vmem:[%s10896_s1 + $0x6a4] sm:$0xf]  ;;  %3492 = vmatpush.bf16.msra.mxu2 %v5915_v49 }
 0x288   : > { %v3108_v58 = vadd.f32 %v3107_v15, %v3059_v42  ;;  %v5656_v15 = vld [vmem:[%s10896_s1 + $0x3b0] sm:$0xf0]  ;;  %v6043_v14 = vor.u32 %v6532_v39, %v6040_v17 }
 0x289   : > { %v3109_v28 = vpop.f32.mrf.mxu2  ;;  %v5659_v24 = vor.u32 %v6436_v43, %v5656_v15 }
 0x28a   : > { %v8673_v42 = vadd.f32 %v3156_v40, %v3108_v58  ;;  %3541 = vmatpush.bf16.msra.mxu3 %v6043_v14  ;;  %v5640_v14 = vld [vmem:[%s10896_s1 + $0x390] sm:$0xf0] }
 0x28b   : > { %6667 = vmatpush.lsf.bf16.msrb.mxu0 %v7819_v37  ;;  %v3011_v12 = vpop.f32.mrf.mxu0  ;;  %v5787_v37 = vor.u32 %v6468_v46, %v5784_v13  ;;  %v6528_v46 = vld [vmem:[%s10896_s1 + $0x684] sm:$0xf]  ;;  %v6024_v13 = vld [vmem:[%s10896_s1 + $0x690] sm:$0xf0] }
 0x28c   : > { %11080 = vst [vmem:[#allocation47_spill] sm:$0xff] %v8673_v42  ;;  %v3012_v47 = vadd.f32 %v3011_v12, %v8409_v25  ;;  %v3161_v40 = vpop.f32.mrf.mxu3  ;;  %v3063_v58 = vpop.f32.mrf.mxu1 }
 0x28d   : > { %3443 = vmatpush.bf16.msra.mxu1 %v5787_v37  ;;  %v8682_v25 = vpop.trf.xlu1 }
 0x28e   : > { %v3061_v22 = vadd.f32 %v3060_v7, %v3012_v47  ;;  %3307 = vmatmul.bf16.gmra.mxu2 %v8088_v44 }
 0x28f   : > { %3393 = vmatpush.bf16.msra.mxu0 %v5675_v38  ;;  %3258 = vmatmul.bf16.gmra.mxu1 %v8090_v48 }
 0x290   : > { %v3110_v39 = vadd.f32 %v3109_v28, %v3061_v22  ;;  %v5896_v28 = vld [vmem:[%s10896_s1 + $0x590] sm:$0xf0]  ;;  %v6027_v22 = vor.u32 %v6528_v46, %v6024_v13 }
 0x291   : > { %v3112_v38 = vpop.f32.mrf.mxu2 }
 0x292   : > { %v8680_v43 = vadd.f32 %v3158_v11, %v3110_v39  ;;  %v6496_v11 = vld [vmem:[%s10896_s1 + $0x584] sm:$0xf]  ;;  %3542 = vmatpush.bf16.msra.mxu3 %v6027_v22 }
 0x293   : > { %6668 = vmatpush.lsf.bf16.msrb.mxu0 %v7750_v41  ;;  %v3014_v49 = vpop.f32.mrf.mxu0  ;;  %v5899_v7 = vor.u32 %v6496_v11, %v5896_v28  ;;  %v6464_v39 = vld [vmem:[%s10896_s1 + $0x484] sm:$0xf] }
 0x294   : > { %11081 = vst [vmem:[#allocation48_spill] sm:$0xff] %v8680_v43  ;;  %v3015_v15 = vadd.f32 %v3014_v49, %v8432_v35  ;;  %v3163_v47 = vpop.f32.mrf.mxu3  ;;  %v6432_v35 = vld [vmem:[%s10896_s1 + $0x384] sm:$0xf]  ;;  %v3065_v12 = vpop.f32.mrf.mxu1  ;;  %3361 = vmatmul.bf16.gmra.mxu3 %v8114_v4 }
 0x295   : > { %3493 = vmatpush.bf16.msra.mxu2 %v5899_v7 }
 0x296   : > { %v3064_v23 = vadd.f32 %v3063_v58, %v3015_v15  ;;  %6277 = vmatmul.msk.bf16.gmra.mxu0 %vm2779_vm1, %v8682_v25 }
 0x297   : > { %3394 = vmatpush.bf16.msra.mxu0 %v5659_v24  ;;  %v5643_v24 = vor.u32 %v6432_v35, %v5640_v14 }
 0x298   : > { %v3113_v37 = vadd.f32 %v3112_v38, %v3064_v23  ;;  %v5768_v38 = vld [vmem:[%s10896_s1 + $0x490] sm:$0xf0] }
 0x299   : > { %v3114_v17 = vpop.f32.mrf.mxu2  ;;  %v5771_v15 = vor.u32 %v6464_v39, %v5768_v38  ;;  %v5624_v39 = vld [vmem:[%s10896_s1 + $0x370] sm:$0xf0]  ;;  %v6524_v38 = vld [vmem:[%s10896_s1 + $0x664] sm:$0xf] }
 0x29a   : > { %v8714_v58 = vadd.f32 %v3161_v40, %v3113_v37 }
 0x29b   : > { %6669 = vmatpush.lsf.bf16.msrb.mxu0 %v7729_v19  ;;  %v3016_v49 = vpop.f32.mrf.mxu0  ;;  %3444 = vmatpush.bf16.msra.mxu1 %v5771_v15 }
 0x29c   : > { %11082 = vst [vmem:[#allocation49_spill] sm:$0xff] %v8714_v58  ;;  %v3017_v23 = vadd.f32 %v3016_v49, %v8438_v60  ;;  %v3166_v35 = vpop.f32.mrf.mxu3  ;;  %v3068_v40 = vpop.f32.mrf.mxu1  ;;  %v6008_v49 = vld [vmem:[%s10896_s1 + $0x670] sm:$0xf0] }
 0x29d   : > { %v8723_v60 = vpop.trf.xlu1 }
 0x29e   : > { %v3066_v11 = vadd.f32 %v3065_v12, %v3017_v23  ;;  %3312 = vmatmul.bf16.gmra.mxu2 %v8127_v18  ;;  %v5880_v12 = vld [vmem:[%s10896_s1 + $0x570] sm:$0xf0] }
 0x29f   : > { %6670 = vmatpush.lsf.bf16.msrb.mxu0 %v7712_v5  ;;  %3263 = vmatmul.bf16.gmra.mxu1 %v8131_v27 }
 0x2a0   : > { %v3115_v28 = vadd.f32 %v3114_v17, %v3066_v11  ;;  %v6011_v11 = vor.u32 %v6524_v38, %v6008_v49 }
 0x2a1   : > { %v3117_v14 = vpop.f32.mrf.mxu2 }
 0x2a2   : > { %v8720_v37 = vadd.f32 %v3163_v47, %v3115_v28  ;;  %v6492_v47 = vld [vmem:[%s10896_s1 + $0x564] sm:$0xf]  ;;  %3543 = vmatpush.bf16.msra.mxu3 %v6011_v11 }
 0x2a3   : > { %6671 = vmatpush.lsf.bf16.msrb.mxu0 %v7695_v57  ;;  %v3019_v7 = vpop.f32.mrf.mxu0  ;;  %v5883_v22 = vor.u32 %v6492_v47, %v5880_v12  ;;  %v6460_v28 = vld [vmem:[%s10896_s1 + $0x464] sm:$0xf] }
 0x2a4   : > { %11083 = vst [vmem:[#allocation50_spill] sm:$0xff] %v8720_v37  ;;  %v3020_v46 = vadd.f32 %v3019_v7, %v8469_v54  ;;  %v3168_v13 = vpop.f32.mrf.mxu3  ;;  %v6428_v54 = vld [vmem:[%s10896_s1 + $0x364] sm:$0xf]  ;;  %v3070_v15 = vpop.f32.mrf.mxu1  ;;  %3366 = vmatmul.bf16.gmra.mxu3 %v8159_v1 }
 0x2a5   : > { %v5627_v23 = vor.u32 %v6428_v54, %v5624_v39  ;;  %3494 = vmatpush.bf16.msra.mxu2 %v5883_v22 }
 0x2a6   : > { %v3069_v4 = vadd.f32 %v3068_v40, %v3020_v46  ;;  %6278 = vmatmul.msk.bf16.gmra.mxu0 %vm2779_vm1, %v8723_v60 }
 0x2a7   : > { %3395 = vmatpush.bf16.msra.mxu0 %v5643_v24 }
 0x2a8   : > { %v3118_v17 = vadd.f32 %v3117_v14, %v3069_v4  ;;  %v5752_v14 = vld [vmem:[%s10896_s1 + $0x470] sm:$0xf0] }
 0x2a9   : > { %v3119_v24 = vpop.f32.mrf.mxu2  ;;  %v5755_v46 = vor.u32 %v6460_v28, %v5752_v14  ;;  %v5608_v28 = vld [vmem:[%s10896_s1 + $0x350] sm:$0xf0]  ;;  %v6520_v14 = vld [vmem:[%s10896_s1 + $0x644] sm:$0xf] }
 0x2aa   : > { %v8754_v40 = vadd.f32 %v3166_v35, %v3118_v17  ;;  %v8761_v17 = vpop.trf.xlu1 }
 0x2ab   : > { %6672 = vmatpush.lsf.bf16.msrb.mxu0 %v7678_v45  ;;  %v3021_v7 = vpop.f32.mrf.mxu0  ;;  %3445 = vmatpush.bf16.msra.mxu1 %v5755_v46 }
 0x2ac   : > { %11084 = vst [vmem:[#allocation51_spill] sm:$0xff] %v8754_v40  ;;  %v3022_v4 = vadd.f32 %v3021_v7, %v8475_v31  ;;  %v3171_v54 = vpop.f32.mrf.mxu3  ;;  %v3073_v38 = vpop.f32.mrf.mxu1  ;;  %v5992_v7 = vld [vmem:[%s10896_s1 + $0x650] sm:$0xf0] }
 0x2ad   : > { %v11097_v40 = vld [vmem:[#allocation32_spill] sm:$0xff] }
 0x2ae   : > { %v3071_v47 = vadd.f32 %v3070_v15, %v3022_v4  ;;  %3317 = vmatmul.bf16.gmra.mxu2 %v8170_v20 }
 0x2af   : > { %6673 = vmatpush.lsf.bf16.msrb.mxu0 %v7661_v33  ;;  %3268 = vmatmul.bf16.gmra.mxu1 %v8174_v26 }
 0x2b0   : > { %v3120_v12 = vadd.f32 %v3119_v24, %v3071_v47  ;;  %v6488_v24 = vld [vmem:[%s10896_s1 + $0x544] sm:$0xf]  ;;  %v5995_v47 = vor.u32 %v6520_v14, %v5992_v7 }
 0x2b1   : > { %v3122_v39 = vpop.f32.mrf.mxu2 }
 0x2b2   : > { %v8759_v49 = vadd.f32 %v3168_v13, %v3120_v12  ;;  %v5864_v13 = vld [vmem:[%s10896_s1 + $0x550] sm:$0xf0]  ;;  %v6456_v12 = vld [vmem:[%s10896_s1 + $0x444] sm:$0xf]  ;;  %3544 = vmatpush.bf16.msra.mxu3 %v5995_v47 }
 0x2b3   : > { %6674 = vmatpush.lsf.bf16.msrb.mxu0 %v7644_v21  ;;  %v3024_v35 = vpop.f32.mrf.mxu0  ;;  %v5867_v11 = vor.u32 %v6488_v24, %v5864_v13 }
 0x2b4   : > { %11085 = vst [vmem:[#allocation52_spill] sm:$0xff] %v8759_v49  ;;  %v3025_v22 = vadd.f32 %v3024_v35, %v8500_v30  ;;  %v3173_v15 = vpop.f32.mrf.mxu3  ;;  %v6424_v30 = vld [vmem:[%s10896_s1 + $0x344] sm:$0xf]  ;;  %v3075_v46 = vpop.f32.mrf.mxu1  ;;  %3371 = vmatmul.bf16.gmra.mxu3 %v8204_v9 }
 0x2b5   : > { %v5611_v4 = vor.u32 %v6424_v30, %v5608_v28  ;;  %3495 = vmatpush.bf16.msra.mxu2 %v5867_v11 }
 0x2b6   : > { %v3074_v31 = vadd.f32 %v3073_v38, %v3025_v22  ;;  %6279 = vmatmul.msk.bf16.gmra.mxu0 %vm2779_vm1, %v8761_v17 }
 0x2b7   : > { %3396 = vmatpush.bf16.msra.mxu0 %v5627_v23 }
 0x2b8   : > { %v3123_v1 = vadd.f32 %v3122_v39, %v3074_v31  ;;  %v5736_v39 = vld [vmem:[%s10896_s1 + $0x450] sm:$0xf0] }
 0x2b9   : > { %v3124_v23 = vpop.f32.mrf.mxu2  ;;  %v5739_v22 = vor.u32 %v6456_v12, %v5736_v39  ;;  %v5592_v12 = vld [vmem:[%s10896_s1 + $0x330] sm:$0xf0]  ;;  %v6516_v39 = vld [vmem:[%s10896_s1 + $0x624] sm:$0xf] }
 0x2ba   : > { %v8791_v38 = vadd.f32 %v3171_v54, %v3123_v1  ;;  %v8798_v1 = vpop.trf.xlu1 }
 0x2bb   : > { %v3026_v35 = vpop.f32.mrf.mxu0  ;;  %3397 = vmatpush.bf16.msra.mxu0 %v5611_v4  ;;  %3446 = vmatpush.bf16.msra.mxu1 %v5739_v22 }
 0x2bc   : > { %11086 = vst [vmem:[#allocation53_spill] sm:$0xff] %v8791_v38  ;;  %v3027_v31 = vadd.f32 %v3026_v35, %v8504_v29  ;;  %v3176_v30 = vpop.f32.mrf.mxu3  ;;  %v3078_v14 = vpop.f32.mrf.mxu1  ;;  %v5976_v35 = vld [vmem:[%s10896_s1 + $0x630] sm:$0xf0] }
 0x2be   : > { %v3076_v24 = vadd.f32 %v3075_v46, %v3027_v31  ;;  %3322 = vmatmul.bf16.gmra.mxu2 %v8215_v32 }
 0x2bf   : > { %3273 = vmatmul.bf16.gmra.mxu1 %v8217_v36 }
 0x2c0   : > { %v3125_v13 = vadd.f32 %v3124_v23, %v3076_v24  ;;  %v6484_v23 = vld [vmem:[%s10896_s1 + $0x524] sm:$0xf]  ;;  %v5979_v24 = vor.u32 %v6516_v39, %v5976_v35 }
 0x2c1   : > { %v3127_v28 = vpop.f32.mrf.mxu2 }
 0x2c2   : > { %v8796_v7 = vadd.f32 %v3173_v15, %v3125_v13  ;;  %v5848_v15 = vld [vmem:[%s10896_s1 + $0x530] sm:$0xf0]  ;;  %v6452_v13 = vld [vmem:[%s10896_s1 + $0x424] sm:$0xf]  ;;  %3545 = vmatpush.bf16.msra.mxu3 %v5979_v24 }
 0x2c3   : > { %v3029_v54 = vpop.f32.mrf.mxu0  ;;  %v5851_v47 = vor.u32 %v6484_v23, %v5848_v15 }
 0x2c4   : > { %11087 = vst [vmem:[#allocation54_spill] sm:$0xff] %v8796_v7  ;;  %v3030_v11 = vadd.f32 %v3029_v54, %v8535_v34  ;;  %v3178_v46 = vpop.f32.mrf.mxu3  ;;  %v6420_v34 = vld [vmem:[%s10896_s1 + $0x324] sm:$0xf]  ;;  %v3080_v22 = vpop.f32.mrf.mxu1  ;;  %3376 = vmatmul.bf16.gmra.mxu3 %v8245_v0  ;;  %v11092_v7 = vld [vmem:[#allocation24_spill] sm:$0xff] }
 0x2c5   : > { %v5595_v31 = vor.u32 %v6420_v34, %v5592_v12  ;;  %3496 = vmatpush.bf16.msra.mxu2 %v5851_v47 }
 0x2c6   : > { %v3079_v29 = vadd.f32 %v3078_v14, %v3030_v11  ;;  %6280 = vmatmul.msk.bf16.gmra.mxu0 %vm2779_vm1, %v8798_v1 }
 0x2c7   : > { %3398 = vmatpush.bf16.msra.mxu0 %v5595_v31 }
 0x2c8   : > { %v3128_v9 = vadd.f32 %v3127_v28, %v3079_v29  ;;  %v5720_v28 = vld [vmem:[%s10896_s1 + $0x430] sm:$0xf0] }
 0x2c9   : > { %v3129_v4 = vpop.f32.mrf.mxu2  ;;  %v5723_v11 = vor.u32 %v6452_v13, %v5720_v28  ;;  %v5576_v13 = vld [vmem:[%s10896_s1 + $0x310] sm:$0xf0]  ;;  %v6512_v28 = vld [vmem:[%s10896_s1 + $0x604] sm:$0xf] }
 0x2ca   : > { %v8828_v14 = vadd.f32 %v3176_v30, %v3128_v9  ;;  %v8835_v9 = vpop.trf.xlu1 }
 0x2cb   : > { %v3031_v54 = vpop.f32.mrf.mxu0  ;;  %3447 = vmatpush.bf16.msra.mxu1 %v5723_v11 }
 0x2cc   : > { %v3032_v29 = vadd.f32 %v3031_v54, %v8541_v56  ;;  %v3181_v34 = vpop.f32.mrf.mxu3  ;;  %v3083_v39 = vpop.f32.mrf.mxu1  ;;  %v5960_v54 = vld [vmem:[%s10896_s1 + $0x610] sm:$0xf0] }
 0x2ce   : > { %v3081_v23 = vadd.f32 %v3080_v22, %v3032_v29  ;;  %3327 = vmatmul.bf16.gmra.mxu2 %v8259_v8 }
 0x2cf   : > { %3278 = vmatmul.bf16.gmra.mxu1 %v8262_v10 }
 0x2d0   : > { %v3130_v15 = vadd.f32 %v3129_v4, %v3081_v23  ;;  %v6480_v4 = vld [vmem:[%s10896_s1 + $0x504] sm:$0xf]  ;;  %v5963_v23 = vor.u32 %v6512_v28, %v5960_v54 }
 0x2d1   : > { %v3132_v12 = vpop.f32.mrf.mxu2 }
 0x2d2   : > { %v8833_v35 = vadd.f32 %v3178_v46, %v3130_v15  ;;  %v5832_v46 = vld [vmem:[%s10896_s1 + $0x510] sm:$0xf0]  ;;  %v6448_v15 = vld [vmem:[%s10896_s1 + $0x404] sm:$0xf]  ;;  %3546 = vmatpush.bf16.msra.mxu3 %v5963_v23 }
 0x2d3   : > { %v3034_v30 = vpop.f32.mrf.mxu0  ;;  %v5835_v24 = vor.u32 %v6480_v4, %v5832_v46 }
 0x2d4   : > { %v3035_v47 = vadd.f32 %v3034_v30, %v8566_v53  ;;  %v3183_v22 = vpop.f32.mrf.mxu3  ;;  %v6416_v53 = vld [vmem:[%s10896_s1 + $0x304] sm:$0xf]  ;;  %v3085_v11 = vpop.f32.mrf.mxu1  ;;  %3381 = vmatmul.bf16.gmra.mxu3 %v8294_v3 }
 0x2d5   : > { %v5579_v29 = vor.u32 %v6416_v53, %v5576_v13  ;;  %3497 = vmatpush.bf16.msra.mxu2 %v5835_v24 }
 0x2d6   : > { %v3084_v56 = vadd.f32 %v3083_v39, %v3035_v47  ;;  %6281 = vmatmul.msk.bf16.gmra.mxu0 %vm2779_vm1, %v8835_v9 }
 0x2d7   : > { %3399 = vmatpush.bf16.msra.mxu0 %v5579_v29 }
 0x2d8   : > { %v3133_v0 = vadd.f32 %v3132_v12, %v3084_v56  ;;  %v5704_v12 = vld [vmem:[%s10896_s1 + $0x410] sm:$0xf0] }
 0x2d9   : > { %v3134_v31 = vpop.f32.mrf.mxu2  ;;  %v5707_v47 = vor.u32 %v6448_v15, %v5704_v12 }
 0x2da   : > { %v8865_v39 = vadd.f32 %v3181_v34, %v3133_v0  ;;  %v8872_v0 = vpop.trf.xlu1 }
 0x2db   : > { %v3036_v30 = vpop.f32.mrf.mxu0  ;;  %3448 = vmatpush.bf16.msra.mxu1 %v5707_v47 }
 0x2dc   : > { %v3037_v56 = vadd.f32 %v3036_v30, %v8572_v16  ;;  %v3186_v53 = vpop.f32.mrf.mxu3  ;;  %v3088_v28 = vpop.f32.mrf.mxu1 }
 0x2de   : > { %v3086_v4 = vadd.f32 %v3085_v11, %v3037_v56  ;;  %3332 = vmatmul.bf16.gmra.mxu2 %v8303_v52 }
 0x2df   : > { %3283 = vmatmul.bf16.gmra.mxu1 %v8307_v55 }
 0x2e0   : > { %v3135_v46 = vadd.f32 %v3134_v31, %v3086_v4 }
 0x2e1   : > { %v3137_v13 = vpop.f32.mrf.mxu2 }
 0x2e2   : > { %v8870_v54 = vadd.f32 %v3183_v22, %v3135_v46 }
 0x2e3   : > { %v3039_v34 = vpop.f32.mrf.mxu0 }
 0x2e4   : > { %v3040_v24 = vadd.f32 %v3039_v34, %v8577_v50  ;;  %v3188_v11 = vpop.f32.mrf.mxu3  ;;  %v3090_v31 = vpop.f32.mrf.mxu1  ;;  %3386 = vmatmul.bf16.gmra.mxu3 %v8317_v61  ;;  %v5438_v61 = vld [vmem:[%s10896_s1 + $0x1e8] sm:$0xf] }
 0x2e6   : > { %v3089_v16 = vadd.f32 %v3088_v28, %v3040_v24  ;;  %6282 = vmatmul.msk.bf16.gmra.mxu0 %vm2779_vm1, %v8872_v0 }
 0x2e8   : > { %v3138_v3 = vadd.f32 %v3137_v13, %v3089_v16  ;;  %v8885_v13 = vpop.trf.xlu1  ;;  %v6351_v16 = vld [vmem:[%s10896_s1 + $0xf4] sm:$0xf0] }
 0x2e9   : > { %v3139_v29 = vpop.f32.mrf.mxu2 }
 0x2ea   : > { %v8878_v23 = vadd.f32 %v3186_v53, %v3138_v3 }
 0x2eb   : > { %v3041_v15 = vpop.f32.mrf.mxu0 }
 0x2ec   : > { %v3042_v22 = vadd.f32 %v3041_v15, %v8583_v51  ;;  %v3191_v30 = vpop.f32.mrf.mxu3  ;;  %v3093_v56 = vpop.f32.mrf.mxu1  ;;  %v6383_v51 = vld [vmem:[%s10896_s1 + $0x1f4] sm:$0xf0] }
 0x2ee   : > { %v3091_v12 = vadd.f32 %v3090_v31, %v3042_v22  ;;  %3337 = vmatmul.bf16.gmra.mxu2 %v8322_v62 }
 0x2ef   : > { %3288 = vmatmul.bf16.gmra.mxu1 %v8324_v6 }
 0x2f0   : > { %v3140_v50 = vadd.f32 %v3139_v29, %v3091_v12  ;;  %v5439_v29 = vor.u32 %v6383_v51, %v5438_v61  ;;  %v5422_v12 = vld [vmem:[%s10896_s1 + $0x1c8] sm:$0xf]  ;;  %v6264_v51 = vld [vmem:[%s10896_s1 + $0x870] sm:$0xf0] }
 0x2f1   : > { %v3142_v47 = vpop.f32.mrf.mxu2 }
 0x2f2   : > { %v8883_v4 = vadd.f32 %v3188_v11, %v3140_v50  ;;  %v6379_v50 = vld [vmem:[%s10896_s1 + $0x1d4] sm:$0xf0] }
 0x2f3   : > { %v3044_v46 = vpop.f32.mrf.mxu0  ;;  %v5423_v61 = vor.u32 %v6379_v50, %v5422_v12 }
 0x2f4   : > { %v3045_v53 = vadd.f32 %v3044_v46, %v8600_v59  ;;  %v3193_v24 = vpop.f32.mrf.mxu3  ;;  %v5310_v59 = vld [vmem:[%s10896_s1 + $0xe8] sm:$0xf]  ;;  %v3095_v11 = vpop.f32.mrf.mxu1  ;;  %v11088_v46 = vld [vmem:[#allocation22_spill] sm:$0xff] }
 0x2f5   : > { %v5311_v22 = vor.u32 %v6351_v16, %v5310_v59  ;;  %3547 = vmatmul.bf16.vlgmr.msra.gmra.mxu3 %v11088_v46 }
 0x2f6   : > { %v3094_v28 = vadd.f32 %v3093_v56, %v3045_v53  ;;  %6283 = vmatmul.msk.bf16.gmra.mxu0 %vm2779_vm1, %v8885_v13  ;;  %v5294_v56 = vld [vmem:[%s10896_s1 + $0xc8] sm:$0xf]  ;;  %3735 = vmatpush.bf16.msra.mxu3 %v5439_v29  ;;  %v6200_v29 = vld [vmem:[%s10896_s1 + $0x7f0] sm:$0xf0] }
 0x2f8   : > { %v3143_v34 = vadd.f32 %v3142_v47, %v3094_v28  ;;  %v11089_v28 = vld [vmem:[#allocation27_spill] sm:$0xff] }
 0x2f9   : > { %v3144_v3 = vpop.f32.mrf.mxu2 }
 0x2fa   : > { %v8903_v31 = vadd.f32 %v3191_v30, %v3143_v34  ;;  %v6347_v30 = vld [vmem:[%s10896_s1 + $0xd4] sm:$0xf0]  ;;  %3736 = vmatpush.bf16.msra.mxu3 %v5423_v61 }
 0x2fb   : > { %v3046_v15 = vpop.f32.mrf.mxu0  ;;  %v5295_v34 = vor.u32 %v6347_v30, %v5294_v56  ;;  %v6184_v30 = vld [vmem:[%s10896_s1 + $0x7d0] sm:$0xf0] }
 0x2fc   : > { %v3047_v47 = vadd.f32 %v3046_v15, %v8628_v2  ;;  %v6588_v2 = vld [vmem:[%s10896_s1 + $0x864] sm:$0xf]  ;;  %v3352_v16 = vpop.f32.mrf.mxu3 }
 0x2fd   : > { %v6267_v12 = vor.u32 %v6588_v2, %v6264_v51  ;;  %v5278_v51 = vld [vmem:[%s10896_s1 + $0xa8] sm:$0xf] }
 0x2fe   : > { %v3096_v53 = vadd.f32 %v3095_v11, %v3047_v47  ;;  %3498 = vmatmul.bf16.vlgmr.msra.gmra.mxu2 %v11089_v28  ;;  %v6572_v11 = vld [vmem:[%s10896_s1 + $0x7e4] sm:$0xf] }
 0x2ff   : > { %3686 = vmatpush.bf16.msra.mxu2 %v5311_v22  ;;  %v3254_v22 = vpop.f32.mrf.mxu1  ;;  %v6203_v56 = vor.u32 %v6572_v11, %v6200_v29  ;;  %6738 = vmatmul.lmr.bf16.vlgmr.msra.gmra.16.mxu1  ;;  %v6168_v11 = vld [vmem:[%s10896_s1 + $0x7b0] sm:$0xf0]  ;;  %v5406_v29 = vld [vmem:[%s10896_s1 + $0x1a8] sm:$0xf] }
 0x300   : > { %v3145_v59 = vadd.f32 %v3144_v3, %v3096_v53  ;;  %v6568_v3 = vld [vmem:[%s10896_s1 + $0x7c4] sm:$0xf]  ;;  %3641 = vmatpush.bf16.msra.mxu1 %v6267_v12 }
 0x301   : > { %v3303_v15 = vpop.f32.mrf.mxu2 }
 0x302   : > { %v8932_v50 = vadd.f32 %v3193_v24, %v3145_v59  ;;  %v3304_v46 = vadd.f32 %v3303_v15, %v3254_v22  ;;  %v6187_v24 = vor.u32 %v6568_v3, %v6184_v30  ;;  %v6564_v59 = vld [vmem:[%s10896_s1 + $0x7a4] sm:$0xf]  ;;  %v6375_v15 = vld [vmem:[%s10896_s1 + $0x1b4] sm:$0xf0] }
 0x303   : > { %v8934_v47 = vpop.f32.mrf.mxu0  ;;  %3687 = vmatpush.bf16.msra.mxu2 %v5295_v34  ;;  %v6343_v34 = vld [vmem:[%s10896_s1 + $0xb4] sm:$0xf0]  ;;  %v5407_v3 = vor.u32 %v6375_v15, %v5406_v29  ;;  %v6584_v30 = vld [vmem:[%s10896_s1 + $0x844] sm:$0xf] }
 0x304   : > { %11090 = vst [vmem:[#allocation55_spill] sm:$0xff] %v8934_v47  ;;  %v8942_v53 = vadd.f32 %v3352_v16, %v3304_v46  ;;  %v3354_v61 = vpop.f32.mrf.mxu3  ;;  %v5279_v16 = vor.u32 %v6343_v34, %v5278_v51  ;;  %v6248_v51 = vld [vmem:[%s10896_s1 + $0x850] sm:$0xf0] }
 0x305   : > { %v6251_v34 = vor.u32 %v6584_v30, %v6248_v51  ;;  %3552 = vmatmul.bf16.gmra.mxu3 %v11092_v7 }
 0x306   : > { %6651 = vmatmul.lmr.bf16.vlgmr.msra.gmra.16.mxu0  ;;  %3737 = vmatpush.bf16.msra.mxu3 %v5407_v3 }
 0x307   : > { %3588 = vmatpush.bf16.msra.mxu0 %v6203_v56  ;;  %v3256_v46 = vpop.f32.mrf.mxu1  ;;  %v6171_v56 = vor.u32 %v6564_v59, %v6168_v11  ;;  %3688 = vmatpush.bf16.msra.mxu2 %v5279_v16 }
 0x308   : > { %6739 = vmatmul.lmr.bf16.gmra.16.mxu1 }
 0x309   : > { %v3305_v2 = vpop.f32.mrf.mxu2  ;;  %3642 = vmatpush.bf16.msra.mxu1 %v6251_v34  ;;  %v6152_v34 = vld [vmem:[%s10896_s1 + $0x790] sm:$0xf0] }
 0x30a   : > { %v3306_v12 = vadd.f32 %v3305_v2, %v3256_v46  ;;  %v11093_v2 = vld [vmem:[#allocation30_spill] sm:$0xff] }
 0x30b   : > { %v8962_v22 = vpop.f32.mrf.mxu0  ;;  %3589 = vmatpush.bf16.msra.mxu0 %v6187_v24 }
 0x30c   : > { %11091 = vst [vmem:[#allocation56_spill] sm:$0xff] %v8962_v22  ;;  %v8971_v38 = vadd.f32 %v3354_v61, %v3306_v12  ;;  %v3357_v24 = vpop.f32.mrf.mxu3  ;;  %v5262_v61 = vld [vmem:[%s10896_s1 + $0x88] sm:$0xf]  ;;  %v6339_v12 = vld [vmem:[%s10896_s1 + $0x94] sm:$0xf0] }
 0x30d   : > { %v5263_v51 = vor.u32 %v6339_v12, %v5262_v61  ;;  %v11096_v61 = vld [vmem:[#allocation26_spill] sm:$0xff] }
 0x30e   : > { %6652 = vmatmul.lmr.bf16.gmra.16.mxu0  ;;  %3503 = vmatmul.bf16.gmra.mxu2 %v11093_v2 }
 0x30f   : > { %3590 = vmatpush.bf16.msra.mxu0 %v6171_v56  ;;  %v3259_v46 = vpop.f32.mrf.mxu1  ;;  %v6560_v56 = vld [vmem:[%s10896_s1 + $0x784] sm:$0xf]  ;;  %3689 = vmatpush.bf16.msra.mxu2 %v5263_v51 }
 0x310   : > { %6740 = vmatmul.lmr.bf16.gmra.16.mxu1  ;;  %v6155_v7 = vor.u32 %v6560_v56, %v6152_v34  ;;  %v6367_v34 = vld [vmem:[%s10896_s1 + $0x174] sm:$0xf0] }
 0x311   : > { %v3308_v59 = vpop.f32.mrf.mxu2 }
 0x312   : > { %v3309_v29 = vadd.f32 %v3308_v59, %v3259_v46  ;;  %v6371_v59 = vld [vmem:[%s10896_s1 + $0x194] sm:$0xf0] }
 0x313   : > { %v8974_v11 = vpop.f32.mrf.mxu0  ;;  %3591 = vmatpush.bf16.msra.mxu0 %v6155_v7  ;;  %v6556_v7 = vld [vmem:[%s10896_s1 + $0x764] sm:$0xf] }
 0x314   : > { %11094 = vst [vmem:[#allocation57_spill] sm:$0xff] %v8974_v11  ;;  %v8976_v16 = vadd.f32 %v3357_v24, %v3309_v29  ;;  %v3359_v15 = vpop.f32.mrf.mxu3  ;;  %v5390_v24 = vld [vmem:[%s10896_s1 + $0x188] sm:$0xf] }
 0x315   : > { %v5391_v49 = vor.u32 %v6371_v59, %v5390_v24  ;;  %3557 = vmatmul.bf16.gmra.mxu3 %v11096_v61 }
 0x316   : > { %6653 = vmatmul.lmr.bf16.gmra.16.mxu0 }
 0x317   : > { %v3261_v3 = vpop.f32.mrf.mxu1  ;;  %3738 = vmatpush.bf16.msra.mxu3 %v5391_v49  ;;  %v6335_v49 = vld [vmem:[%s10896_s1 + $0x74] sm:$0xf0] }
 0x318   : > { %6741 = vmatmul.lmr.bf16.gmra.16.mxu1 }
 0x319   : > { %v3310_v30 = vpop.f32.mrf.mxu2 }
 0x31a   : > { %v3311_v29 = vadd.f32 %v3310_v30, %v3261_v3 }
 0x31b   : > { %v8996_v46 = vpop.f32.mrf.mxu0 }
 0x31c   : > { %11095 = vst [vmem:[#allocation58_spill] sm:$0xff] %v8996_v46  ;;  %v8999_v12 = vadd.f32 %v3359_v15, %v3311_v29  ;;  %v3362_v37 = vpop.f32.mrf.mxu3  ;;  %v5246_v15 = vld [vmem:[%s10896_s1 + $0x68] sm:$0xf] }
 0x31e   : > { %6654 = vmatmul.lmr.bf16.gmra.16.mxu0  ;;  %3508 = vmatmul.bf16.gmra.mxu2 %v11097_v40 }
 0x31f   : > { %v3264_v58 = vpop.f32.mrf.mxu1 }
 0x320   : > { %6742 = vmatmul.lmr.bf16.gmra.16.mxu1 }
 0x321   : > { %v3313_v11 = vpop.f32.mrf.mxu2 }
 0x322   : > { %v3314_v46 = vadd.f32 %v3313_v11, %v3264_v58  ;;  %v5247_v58 = vor.u32 %v6335_v49, %v5246_v15  ;;  %v5374_v11 = vld [vmem:[%s10896_s1 + $0x168] sm:$0xf]  ;;  %v6580_v15 = vld [vmem:[%s10896_s1 + $0x824] sm:$0xf]  ;;  %v6232_v49 = vld [vmem:[%s10896_s1 + $0x830] sm:$0xf0] }
 0x323   : > { %v9002_v2 = vpop.f32.mrf.mxu0  ;;  %v5375_v29 = vor.u32 %v6367_v34, %v5374_v11  ;;  %v6235_v61 = vor.u32 %v6580_v15, %v6232_v49  ;;  %v6120_v49 = vld [vmem:[%s10896_s1 + $0x750] sm:$0xf0] }
 0x324   : > { %11098 = vst [vmem:[#allocation59_spill] sm:$0xff] %v9002_v2  ;;  %v9004_v30 = vadd.f32 %v3362_v37, %v3314_v46  ;;  %v3364_v56 = vpop.f32.mrf.mxu3  ;;  %v6136_v37 = vld [vmem:[%s10896_s1 + $0x770] sm:$0xf0]  ;;  %3690 = vmatpush.bf16.msra.mxu2 %v5247_v58  ;;  %v11100_v2 = vld [vmem:[#allocation29_spill] sm:$0xff] }
 0x325   : > { %v6139_v46 = vor.u32 %v6556_v7, %v6136_v37  ;;  %3562 = vmatmul.bf16.gmra.mxu3 %v11100_v2  ;;  %3643 = vmatpush.bf16.msra.mxu1 %v6235_v61  ;;  %v6552_v61 = vld [vmem:[%s10896_s1 + $0x744] sm:$0xf] }
 0x326   : > { %6655 = vmatmul.lmr.bf16.gmra.16.mxu0  ;;  %3739 = vmatpush.bf16.msra.mxu3 %v5375_v29  ;;  %v6123_v2 = vor.u32 %v6552_v61, %v6120_v49 }
 0x327   : > { %v3266_v51 = vpop.f32.mrf.mxu1  ;;  %3592 = vmatpush.bf16.msra.mxu0 %v6139_v46 }
 0x328   : > { %6743 = vmatmul.lmr.bf16.gmra.16.mxu1 }
 0x329   : > { %v3315_v3 = vpop.f32.mrf.mxu2 }
 0x32a   : > { %v3316_v59 = vadd.f32 %v3315_v3, %v3266_v51 }
 0x32b   : > { %v9024_v24 = vpop.f32.mrf.mxu0  ;;  %3593 = vmatpush.bf16.msra.mxu0 %v6123_v2  ;;  %v6327_v2 = vld [vmem:[%s10896_s1 + $0x34] sm:$0xf0] }
 0x32c   : > { %11099 = vst [vmem:[#allocation60_spill] sm:$0xff] %v9024_v24  ;;  %v9033_v40 = vadd.f32 %v3364_v56, %v3316_v59  ;;  %v11101_v24 = vld [vmem:[#allocation35_spill] sm:$0xff]  ;;  %v3367_v3 = vpop.f32.mrf.mxu3  ;;  %v6331_v59 = vld [vmem:[%s10896_s1 + $0x54] sm:$0xf0] }
 0x32d   : > { %v5230_v56 = vld [vmem:[%s10896_s1 + $0x48] sm:$0xf] }
 0x32e   : > { %6656 = vmatmul.lmr.bf16.gmra.16.mxu0  ;;  %3513 = vmatmul.bf16.gmra.mxu2 %v11101_v24  ;;  %v5231_v29 = vor.u32 %v6331_v59, %v5230_v56  ;;  %v11104_v56 = vld [vmem:[#allocation33_spill] sm:$0xff]  ;;  %v11105_v24 = vld [vmem:[#allocation38_spill] sm:$0xff] }
 0x32f   : > { %v3269_v51 = vpop.f32.mrf.mxu1 }
 0x330   : > { %6744 = vmatmul.lmr.bf16.gmra.16.mxu1  ;;  %3691 = vmatpush.bf16.msra.mxu2 %v5231_v29  ;;  %v5214_v29 = vld [vmem:[%s10896_s1 + $0x28] sm:$0xf] }
 0x331   : > { %v3318_v7 = vpop.f32.mrf.mxu2 }
 0x332   : > { %v3319_v11 = vadd.f32 %v3318_v7, %v3269_v51  ;;  %v6363_v7 = vld [vmem:[%s10896_s1 + $0x154] sm:$0xf0] }
 0x333   : > { %v9036_v37 = vpop.f32.mrf.mxu0 }
 0x334   : > { %11102 = vst [vmem:[#allocation61_spill] sm:$0xff] %v9036_v37  ;;  %v9038_v58 = vadd.f32 %v3367_v3, %v3319_v11  ;;  %v3369_v34 = vpop.f32.mrf.mxu3  ;;  %v5358_v3 = vld [vmem:[%s10896_s1 + $0x148] sm:$0xf] }
 0x335   : > { %v5359_v37 = vor.u32 %v6363_v7, %v5358_v3  ;;  %3567 = vmatmul.bf16.gmra.mxu3 %v11104_v56 }
 0x336   : > { %6657 = vmatmul.lmr.bf16.gmra.16.mxu0 }
 0x337   : > { %v3271_v46 = vpop.f32.mrf.mxu1  ;;  %3740 = vmatpush.bf16.msra.mxu3 %v5359_v37 }
 0x338   : > { %6745 = vmatmul.lmr.bf16.gmra.16.mxu1 }
 0x339   : > { %v3320_v15 = vpop.f32.mrf.mxu2 }
 0x33a   : > { %v3321_v11 = vadd.f32 %v3320_v15, %v3271_v46 }
 0x33b   : > { %v9058_v51 = vpop.f32.mrf.mxu0 }
 0x33c   : > { %11103 = vst [vmem:[#allocation62_spill] sm:$0xff] %v9058_v51  ;;  %v9061_v59 = vadd.f32 %v3369_v34, %v3321_v11  ;;  %v3372_v22 = vpop.f32.mrf.mxu3  ;;  %v6576_v11 = vld [vmem:[%s10896_s1 + $0x804] sm:$0xf] }
 0x33e   : > { %6658 = vmatmul.lmr.bf16.gmra.16.mxu0  ;;  %3518 = vmatmul.bf16.gmra.mxu2 %v11105_v24 }
 0x33f   : > { %v3274_v47 = vpop.f32.mrf.mxu1 }
 0x340   : > { %6746 = vmatmul.lmr.bf16.gmra.16.mxu1 }
 0x341   : > { %v3323_v43 = vpop.f32.mrf.mxu2 }
 0x342   : > { %v3324_v28 = vadd.f32 %v3323_v43, %v3274_v47  ;;  %v6548_v43 = vld [vmem:[%s10896_s1 + $0x724] sm:$0xf]  ;;  %v5342_v47 = vld [vmem:[%s10896_s1 + $0x128] sm:$0xf] }
 0x343   : > { %v3225_v42 = vpop.f32.mrf.mxu0 }
 0x344   : > { %v9065_v15 = vadd.f32 %v3225_v42, %v8828_v14  ;;  %v9067_v61 = vadd.f32 %v3372_v22, %v3324_v28  ;;  %v3374_v46 = vpop.f32.mrf.mxu3  ;;  %v5215_v14 = vor.u32 %v6327_v2, %v5214_v29  ;;  %v6104_v28 = vld [vmem:[%s10896_s1 + $0x730] sm:$0xf0]  ;;  %v6359_v22 = vld [vmem:[%s10896_s1 + $0x134] sm:$0xf0] }
 0x345   : > { %v6107_v3 = vor.u32 %v6548_v43, %v6104_v28  ;;  %v5343_v7 = vor.u32 %v6359_v22, %v5342_v47  ;;  %v6216_v29 = vld [vmem:[%s10896_s1 + $0x810] sm:$0xf0] }
 0x346   : > { %11106 = vst [vmem:[#allocation63_spill] sm:$0xff] %v9065_v15  ;;  %6659 = vmatmul.lmr.bf16.gmra.16.mxu0  ;;  %3692 = vmatpush.bf16.msra.mxu2 %v5215_v14  ;;  %v6219_v56 = vor.u32 %v6576_v11, %v6216_v29  ;;  %v11108_v15 = vld [vmem:[#allocation36_spill] sm:$0xff]  ;;  %v6355_v29 = vld [vmem:[%s10896_s1 + $0x114] sm:$0xf0] }
 0x347   : > { %v3276_v42 = vpop.f32.mrf.mxu1  ;;  %3572 = vmatmul.bf16.gmra.mxu3 %v11108_v15  ;;  %3594 = vmatpush.bf16.msra.mxu0 %v6107_v3  ;;  %v6088_v11 = vld [vmem:[%s10896_s1 + $0x710] sm:$0xf0] }
 0x348   : > { %6747 = vmatmul.lmr.bf16.gmra.16.mxu1  ;;  %3741 = vmatpush.bf16.msra.mxu3 %v5343_v7  ;;  %v6544_v7 = vld [vmem:[%s10896_s1 + $0x704] sm:$0xf] }
 0x349   : > { %v3325_v34 = vpop.f32.mrf.mxu2  ;;  %3644 = vmatpush.bf16.msra.mxu1 %v6219_v56  ;;  %v6323_v56 = vld [vmem:[%s10896_s1 + $0x14] sm:$0xf0] }
 0x34a   : > { %v3326_v49 = vadd.f32 %v3325_v34, %v3276_v42  ;;  %v11109_v34 = vld [vmem:[#allocation40_spill] sm:$0xff] }
 0x34b   : > { %v3227_v37 = vpop.f32.mrf.mxu0 }
 0x34c   : > { %v9094_v2 = vadd.f32 %v3227_v37, %v8833_v35  ;;  %v9097_v24 = vadd.f32 %v3374_v46, %v3326_v49  ;;  %v3377_v43 = vpop.f32.mrf.mxu3  ;;  %v5198_v37 = vld [vmem:[%s10896_s1 + $0x8] sm:$0xf] }
 0x34d   : > { %v5326_v49 = vld [vmem:[%s10896_s1 + $0x108] sm:$0xf] }
 0x34e   : > { %11107 = vst [vmem:[#allocation64_spill] sm:$0xff] %v9094_v2  ;;  %6660 = vmatmul.lmr.bf16.gmra.16.mxu0  ;;  %3523 = vmatmul.bf16.gmra.mxu2 %v11109_v34 }
 0x34f   : > { %v3279_v28 = vpop.f32.mrf.mxu1 }
 0x350   : > { %6748 = vmatmul.lmr.bf16.gmra.16.mxu1 }
 0x351   : > { %v3328_v42 = vpop.f32.mrf.mxu2 }
 0x352   : > { %v3329_v22 = vadd.f32 %v3328_v42, %v3279_v28  ;;  %v6091_v42 = vor.u32 %v6544_v7, %v6088_v11  ;;  %v5327_v28 = vor.u32 %v6355_v29, %v5326_v49 }
 0x353   : > { %v3230_v47 = vpop.f32.mrf.mxu0 }
 0x354   : > { %v9101_v35 = vadd.f32 %v3230_v47, %v8865_v39  ;;  %v9103_v14 = vadd.f32 %v3377_v43, %v3329_v22  ;;  %v3379_v46 = vpop.f32.mrf.mxu3  ;;  %v5199_v39 = vor.u32 %v6323_v56, %v5198_v37  ;;  %3595 = vmatpush.bf16.msra.mxu0 %v6091_v42  ;;  %3742 = vmatpush.bf16.msra.mxu3 %v5327_v28  ;;  %v11112_v56 = vld [vmem:[#allocation39_spill] sm:$0xff] }
 0x356   : > { %11110 = vst [vmem:[#allocation65_spill] sm:$0xff] %v9101_v35  ;;  %6661 = vmatmul.lmr.bf16.gmra.16.mxu0  ;;  %3693 = vmatpush.bf16.msra.mxu2 %v5199_v39  ;;  %v11113_v35 = vld [vmem:[#allocation43_spill] sm:$0xff] }
 0x357   : > { %v3281_v43 = vpop.f32.mrf.mxu1  ;;  %3577 = vmatmul.bf16.gmra.mxu3 %v11112_v56 }
 0x358   : > { %6749 = vmatmul.lmr.bf16.gmra.16.mxu1 }
 0x359   : > { %v3330_v3 = vpop.f32.mrf.mxu2 }
 0x35a   : > { %v3331_v22 = vadd.f32 %v3330_v3, %v3281_v43 }
 0x35b   : > { %v3232_v47 = vpop.f32.mrf.mxu0 }
 0x35c   : > { %v9124_v37 = vadd.f32 %v3232_v47, %v8870_v54  ;;  %v9127_v15 = vadd.f32 %v3379_v46, %v3331_v22  ;;  %v3382_v2 = vpop.f32.mrf.mxu3  ;;  %v11116_v47 = vld [vmem:[#allocation42_spill] sm:$0xff] }
 0x35e   : > { %11111 = vst [vmem:[#allocation66_spill] sm:$0xff] %v9124_v37  ;;  %6662 = vmatmul.lmr.bf16.gmra.16.mxu0  ;;  %3528 = vmatmul.bf16.gmra.mxu2 %v11113_v35  ;;  %v5790_v37 = vld [vmem:[%s10896_s1 + $0x4a8] sm:$0xf]  ;;  %v11125_v35 = vld [vmem:[#allocation17_spill] sm:$0xff] }
 0x35f   : > { %v3284_v7 = vpop.f32.mrf.mxu1 }
 0x360   : > { %6750 = vmatmul.lmr.bf16.gmra.16.mxu1 }
 0x361   : > { %v3333_v34 = vpop.f32.mrf.mxu2 }
 0x362   : > { %v3334_v11 = vadd.f32 %v3333_v34, %v3284_v7 }
 0x363   : > { %v3235_v49 = vpop.f32.mrf.mxu0 }
 0x364   : > { %v9131_v3 = vadd.f32 %v3235_v49, %v8878_v23  ;;  %v9133_v54 = vadd.f32 %v3382_v2, %v3334_v11  ;;  %v3384_v39 = vpop.f32.mrf.mxu3  ;;  %v11117_v23 = vld [vmem:[#allocation45_spill] sm:$0xff] }
 0x366   : > { %11114 = vst [vmem:[#allocation67_spill] sm:$0xff] %v9131_v3  ;;  %6663 = vmatmul.lmr.bf16.gmra.16.mxu0 }
 0x367   : > { %v3286_v43 = vpop.f32.mrf.mxu1  ;;  %3582 = vmatmul.bf16.gmra.mxu3 %v11116_v47  ;;  %v5806_v47 = vld [vmem:[%s10896_s1 + $0x4c8] sm:$0xf] }
 0x368   : > { %6751 = vmatmul.lmr.bf16.gmra.16.mxu1 }
 0x369   : > { %v3335_v29 = vpop.f32.mrf.mxu2 }
 0x36a   : > { %v3336_v42 = vadd.f32 %v3335_v29, %v3286_v43  ;;  %v6479_v43 = vld [vmem:[%s10896_s1 + $0x4f4] sm:$0xf0] }
 0x36b   : > { %v3237_v46 = vpop.f32.mrf.mxu0 }
 0x36c   : > { %v9136_v28 = vadd.f32 %v3237_v46, %v8883_v4  ;;  %v9139_v22 = vadd.f32 %v3384_v39, %v3336_v42  ;;  %v3387_v2 = vpop.f32.mrf.mxu3  ;;  %v5822_v4 = vld [vmem:[%s10896_s1 + $0x4e8] sm:$0xf] }
 0x36d   : > { %v5950_v46 = vld [vmem:[%s10896_s1 + $0x5e8] sm:$0xf] }
 0x36e   : > { %11115 = vst [vmem:[#allocation68_spill] sm:$0xff] %v9136_v28  ;;  %6664 = vmatmul.lmr.bf16.gmra.16.mxu0  ;;  %3533 = vmatmul.bf16.gmra.mxu2 %v11117_v23  ;;  %v6475_v28 = vld [vmem:[%s10896_s1 + $0x4d4] sm:$0xf0]  ;;  %v5934_v23 = vld [vmem:[%s10896_s1 + $0x5c8] sm:$0xf] }
 0x36f   : > { %v3289_v7 = vpop.f32.mrf.mxu1 }
 0x370   : > { %6752 = vmatmul.lmr.bf16.gmra.16.mxu1 }
 0x371   : > { %v3338_v34 = vpop.f32.mrf.mxu2 }
 0x372   : > { %v3339_v11 = vadd.f32 %v3338_v34, %v3289_v7 }
 0x373   : > { %v3240_v49 = vpop.f32.mrf.mxu0 }
 0x374   : > { %v9143_v56 = vadd.f32 %v3240_v49, %v8903_v31  ;;  %v9145_v29 = vadd.f32 %v3387_v2, %v3339_v11  ;;  %v3389_v39 = vpop.f32.mrf.mxu3  ;;  %v6511_v31 = vld [vmem:[%s10896_s1 + $0x5f4] sm:$0xf0]  ;;  %v5823_v49 = vor.u32 %v6479_v43, %v5822_v4  ;;  %v11120_v43 = vld [vmem:[#allocation20_spill] sm:$0xff] }
 0x375   : > { %v5951_v11 = vor.u32 %v6511_v31, %v5950_v46  ;;  %v6507_v4 = vld [vmem:[%s10896_s1 + $0x5d4] sm:$0xf0] }
 0x376   : > { %11118 = vst [vmem:[#allocation69_spill] sm:$0xff] %v9143_v56  ;;  %6665 = vmatmul.lmr.bf16.gmra.16.mxu0  ;;  %v6447_v31 = vld [vmem:[%s10896_s1 + $0x3f4] sm:$0xf0] }
 0x377   : > { %v3291_v2 = vpop.f32.mrf.mxu1  ;;  %3743 = vmatmul.bf16.vlgmr.msra.gmra.mxu3 %v11120_v43 }
 0x378   : > { %6753 = vmatmul.lmr.bf16.gmra.16.mxu1  ;;  %3931 = vmatpush.bf16.msra.mxu3 %v5951_v11 }
 0x379   : > { %v3340_v42 = vpop.f32.mrf.mxu2 }
 0x37a   : > { %v3341_v7 = vadd.f32 %v3340_v42, %v3291_v2  ;;  %v5807_v42 = vor.u32 %v6475_v28, %v5806_v47  ;;  %v5935_v2 = vor.u32 %v6507_v4, %v5934_v23  ;;  %v5678_v28 = vld [vmem:[%s10896_s1 + $0x3c8] sm:$0xf]  ;;  %v6443_v47 = vld [vmem:[%s10896_s1 + $0x3d4] sm:$0xf0] }
 0x37b   : > { %v3242_v34 = vpop.f32.mrf.mxu0  ;;  %v5550_v4 = vld [vmem:[%s10896_s1 + $0x2c8] sm:$0xf] }
 0x37c   : > { %v9163_v56 = vadd.f32 %v3242_v34, %v8932_v50  ;;  %v9175_v46 = vadd.f32 %v3389_v39, %v3341_v7  ;;  %v5694_v50 = vld [vmem:[%s10896_s1 + $0x3e8] sm:$0xf]  ;;  %v3548_v34 = vpop.f32.mrf.mxu3  ;;  %v6415_v7 = vld [vmem:[%s10896_s1 + $0x2f4] sm:$0xf0]  ;;  %3932 = vmatpush.bf16.msra.mxu3 %v5935_v2 }
 0x37d   : > { %v5566_v39 = vld [vmem:[%s10896_s1 + $0x2e8] sm:$0xf]  ;;  %v5695_v43 = vor.u32 %v6447_v31, %v5694_v50  ;;  %v6411_v50 = vld [vmem:[%s10896_s1 + $0x2d4] sm:$0xf0]  ;;  %v11121_v31 = vld [vmem:[#allocation46_spill] sm:$0xff] }
 0x37e   : > { %11119 = vst [vmem:[#allocation70_spill] sm:$0xff] %v9163_v56  ;;  %6666 = vmatmul.lmr.bf16.gmra.16.mxu0  ;;  %3694 = vmatmul.bf16.vlgmr.msra.gmra.mxu2 %v8051_v63  ;;  %v5567_v63 = vor.u32 %v6415_v7, %v5566_v39  ;;  %v11122_v2 = vld [vmem:[#allocation23_spill] sm:$0xff]  ;;  %v5679_v39 = vor.u32 %v6443_v47, %v5678_v28 }
 0x37f   : > { %3882 = vmatpush.bf16.msra.mxu2 %v5823_v49  ;;  %v3450_v11 = vpop.f32.mrf.mxu1  ;;  %6762 = vllmr.16.mxu1  ;;  %v5918_v47 = vld [vmem:[%s10896_s1 + $0x5a8] sm:$0xf] }
 0x380   : > { %6284 = vmatmul.msk.bf16.vlgmr.msra.gmra.mxu1 %vm2779_vm1, %v11121_v31  ;;  %v6471_v31 = vld [vmem:[%s10896_s1 + $0x4b4] sm:$0xf0] }
 0x381   : > { %v3499_v49 = vpop.f32.mrf.mxu2  ;;  %3833 = vmatpush.bf16.msra.mxu1 %v5695_v43  ;;  %v11124_v43 = vld [vmem:[#allocation18_spill] sm:$0xff]  ;;  %v5791_v28 = vor.u32 %v6471_v31, %v5790_v37  ;;  %v6439_v37 = vld [vmem:[%s10896_s1 + $0x3b4] sm:$0xf0] }
 0x383   : > { %v3401_v56 = vpop.f32.mrf.mxu0  ;;  %3883 = vmatpush.bf16.msra.mxu2 %v5807_v42 }
 0x384   : > { %v3402_v23 = vadd.f32 %v3401_v56, %v8942_v53  ;;  %v5551_v53 = vor.u32 %v6411_v50, %v5550_v4  ;;  %v11123_v56 = vld [vmem:[#allocation19_spill] sm:$0xff]  ;;  %v3550_v3 = vpop.f32.mrf.mxu3  ;;  %v6503_v4 = vld [vmem:[%s10896_s1 + $0x5b4] sm:$0xf0] }
 0x385   : > { %6675 = vllmr.16.mxu0  ;;  %6779 = vmatpush.lsf.bf16.msrb.mxu1 %v11123_v56  ;;  %v5662_v50 = vld [vmem:[%s10896_s1 + $0x3a8] sm:$0xf] }
 0x386   : > { %v3451_v42 = vadd.f32 %v3450_v11, %v3402_v23  ;;  %3596 = vmatmul.bf16.vlgmr.msra.gmra.mxu0 %v11122_v2  ;;  %v5534_v11 = vld [vmem:[%s10896_s1 + $0x2a8] sm:$0xf] }
 0x387   : > { %3784 = vmatpush.bf16.msra.mxu0 %v5567_v63  ;;  %v3452_v23 = vpop.f32.mrf.mxu1  ;;  %3884 = vmatpush.bf16.msra.mxu2 %v5791_v28 }
 0x388   : > { %v3500_v7 = vadd.f32 %v3499_v49, %v3451_v42  ;;  %v6407_v49 = vld [vmem:[%s10896_s1 + $0x2b4] sm:$0xf0]  ;;  %3748 = vmatmul.bf16.gmra.mxu3 %v8088_v44  ;;  %v11127_v44 = vld [vmem:[#allocation15_spill] sm:$0xff] }
 0x389   : > { %v3501_v63 = vpop.f32.mrf.mxu2  ;;  %3834 = vmatpush.bf16.msra.mxu1 %v5679_v39  ;;  %v5535_v56 = vor.u32 %v6407_v49, %v5534_v11  ;;  %v5663_v39 = vor.u32 %v6439_v37, %v5662_v50  ;;  %v5902_v50 = vld [vmem:[%s10896_s1 + $0x588] sm:$0xf]  ;;  %v6499_v37 = vld [vmem:[%s10896_s1 + $0x594] sm:$0xf0] }
 0x38a   : > { %v9232_v31 = vadd.f32 %v3548_v34, %v3500_v7  ;;  %v11126_v7 = vld [vmem:[#allocation16_spill] sm:$0xff] }
 0x38b   : > { %6692 = vmatpush.lsf.bf16.msrb.mxu0 %v11124_v43  ;;  %v3403_v42 = vpop.f32.mrf.mxu0  ;;  %v5919_v43 = vor.u32 %v6503_v4, %v5918_v47  ;;  %v6403_v4 = vld [vmem:[%s10896_s1 + $0x294] sm:$0xf0] }
 0x38c   : > { %v3404_v2 = vadd.f32 %v3403_v42, %v8971_v38 }
 0x38d   : > { %6780 = vmatpush.lsf.bf16.msrb.mxu1 %v7750_v41  ;;  %3933 = vmatpush.bf16.msra.mxu3 %v5919_v43  ;;  %v5903_v43 = vor.u32 %v6499_v37, %v5902_v50  ;;  %v5886_v37 = vld [vmem:[%s10896_s1 + $0x568] sm:$0xf] }
 0x38e   : > { %v3453_v51 = vadd.f32 %v3452_v23, %v3404_v2  ;;  %3699 = vmatmul.bf16.gmra.mxu2 %v8090_v48  ;;  %v11128_v2 = vld [vmem:[#allocation25_spill] sm:$0xff] }
 0x38f   : > { %3785 = vmatpush.bf16.msra.mxu0 %v5551_v53  ;;  %v3553_v53 = vpop.f32.mrf.mxu3  ;;  %v3455_v38 = vpop.f32.mrf.mxu1 }
 0x390   : > { %v3502_v34 = vadd.f32 %v3501_v63, %v3453_v51  ;;  %6285 = vmatmul.msk.bf16.gmra.mxu1 %vm2779_vm1, %v8682_v25 }
 0x391   : > { %3835 = vmatpush.bf16.msra.mxu1 %v5663_v39  ;;  %v3504_v11 = vpop.f32.mrf.mxu2  ;;  %v6435_v39 = vld [vmem:[%s10896_s1 + $0x394] sm:$0xf0]  ;;  %3934 = vmatpush.bf16.msra.mxu3 %v5903_v43 }
 0x392   : > { %v9241_v28 = vadd.f32 %v3550_v3, %v3502_v34  ;;  %v11129_v3 = vld [vmem:[#allocation14_spill] sm:$0xff] }
 0x393   : > { %6693 = vmatpush.lsf.bf16.msrb.mxu0 %v11125_v35  ;;  %v3406_v35 = vpop.f32.mrf.mxu0 }
 0x394   : > { %v3407_v41 = vadd.f32 %v3406_v35, %v8976_v16  ;;  %v6467_v16 = vld [vmem:[%s10896_s1 + $0x494] sm:$0xf0] }
 0x395   : > { %6781 = vmatpush.lsf.bf16.msrb.mxu1 %v7729_v19  ;;  %v5774_v19 = vld [vmem:[%s10896_s1 + $0x488] sm:$0xf] }
 0x396   : > { %v3456_v51 = vadd.f32 %v3455_v38, %v3407_v41  ;;  %3601 = vmatmul.bf16.gmra.mxu0 %v11128_v2  ;;  %v5775_v23 = vor.u32 %v6467_v16, %v5774_v19  ;;  %v11130_v41 = vld [vmem:[#allocation13_spill] sm:$0xff]  ;;  %v11131_v16 = vld [vmem:[#allocation12_spill] sm:$0xff] }
 0x397   : > { %3786 = vmatpush.bf16.msra.mxu0 %v5535_v56  ;;  %v3555_v49 = vpop.f32.mrf.mxu3  ;;  %v3457_v42 = vpop.f32.mrf.mxu1 }
 0x398   : > { %v3505_v63 = vadd.f32 %v3504_v11, %v3456_v51  ;;  %3885 = vmatpush.bf16.msra.mxu2 %v5775_v23  ;;  %3753 = vmatmul.bf16.gmra.mxu3 %v8127_v18  ;;  %v5758_v23 = vld [vmem:[%s10896_s1 + $0x468] sm:$0xf] }
 0x399   : > { %6782 = vmatpush.lsf.bf16.msrb.mxu1 %v7712_v5  ;;  %v5518_v5 = vld [vmem:[%s10896_s1 + $0x288] sm:$0xf]  ;;  %v3506_v47 = vpop.f32.mrf.mxu2 }
 0x39a   : > { %v5519_v56 = vor.u32 %v6403_v4, %v5518_v5  ;;  %v9275_v34 = vadd.f32 %v3553_v53, %v3505_v63 }
 0x39b   : > { %6694 = vmatpush.lsf.bf16.msrb.mxu0 %v11126_v7  ;;  %v3408_v7 = vpop.f32.mrf.mxu0 }
 0x39c   : > { %v3409_v38 = vadd.f32 %v3408_v7, %v8999_v12  ;;  %v6431_v7 = vld [vmem:[%s10896_s1 + $0x374] sm:$0xf0] }
 0x39d   : > { %6783 = vmatpush.lsf.bf16.msrb.mxu1 %v7695_v57  ;;  %v5646_v57 = vld [vmem:[%s10896_s1 + $0x388] sm:$0xf] }
 0x39e   : > { %v5647_v11 = vor.u32 %v6435_v39, %v5646_v57  ;;  %v3458_v35 = vadd.f32 %v3457_v42, %v3409_v38  ;;  %3704 = vmatmul.bf16.gmra.mxu2 %v8131_v27  ;;  %v6495_v42 = vld [vmem:[%s10896_s1 + $0x574] sm:$0xf0]  ;;  %v5630_v39 = vld [vmem:[%s10896_s1 + $0x368] sm:$0xf] }
 0x39f   : > { %6695 = vmatpush.lsf.bf16.msrb.mxu0 %v11127_v44  ;;  %v3558_v53 = vpop.f32.mrf.mxu3  ;;  %v3460_v63 = vpop.f32.mrf.mxu1  ;;  %v5887_v57 = vor.u32 %v6495_v42, %v5886_v37 }
 0x3a0   : > { %v3507_v44 = vadd.f32 %v3506_v47, %v3458_v35  ;;  %6286 = vmatmul.msk.bf16.gmra.mxu1 %vm2779_vm1, %v8723_v60  ;;  %v5631_v35 = vor.u32 %v6431_v7, %v5630_v39 }
 0x3a1   : > { %3836 = vmatpush.bf16.msra.mxu1 %v5647_v11  ;;  %v3509_v51 = vpop.f32.mrf.mxu2  ;;  %3935 = vmatpush.bf16.msra.mxu3 %v5887_v57  ;;  %v6427_v57 = vld [vmem:[%s10896_s1 + $0x354] sm:$0xf0] }
 0x3a2   : > { %v9282_v19 = vadd.f32 %v3555_v49, %v3507_v44 }
 0x3a3   : > { %6696 = vmatpush.lsf.bf16.msrb.mxu0 %v11129_v3  ;;  %v3411_v12 = vpop.f32.mrf.mxu0  ;;  %v11132_v3 = vld [vmem:[#allocation28_spill] sm:$0xff] }
 0x3a4   : > { %v3412_v18 = vadd.f32 %v3411_v12, %v9004_v30  ;;  %v5502_v30 = vld [vmem:[%s10896_s1 + $0x268] sm:$0xf] }
 0x3a5   : > { %6784 = vmatpush.lsf.bf16.msrb.mxu1 %v7678_v45  ;;  %v11133_v45 = vld [vmem:[#allocation11_spill] sm:$0xff] }
 0x3a6   : > { %v3461_v5 = vadd.f32 %v3460_v63, %v3412_v18  ;;  %3606 = vmatmul.bf16.gmra.mxu0 %v11132_v3 }
 0x3a7   : > { %3787 = vmatpush.bf16.msra.mxu0 %v5519_v56  ;;  %v3560_v49 = vpop.f32.mrf.mxu3  ;;  %v3462_v56 = vpop.f32.mrf.mxu1 }
 0x3a8   : > { %v3510_v47 = vadd.f32 %v3509_v51, %v3461_v5  ;;  %3758 = vmatmul.bf16.gmra.mxu3 %v8170_v20 }
 0x3a9   : > { %6785 = vmatpush.lsf.bf16.msrb.mxu1 %v7661_v33  ;;  %v6463_v33 = vld [vmem:[%s10896_s1 + $0x474] sm:$0xf0]  ;;  %v3511_v4 = vpop.f32.mrf.mxu2 }
 0x3aa   : > { %v5759_v50 = vor.u32 %v6463_v33, %v5758_v23  ;;  %v9316_v11 = vadd.f32 %v3558_v53, %v3510_v47  ;;  %v5742_v23 = vld [vmem:[%s10896_s1 + $0x448] sm:$0xf] }
 0x3ab   : > { %6697 = vmatpush.lsf.bf16.msrb.mxu0 %v11130_v41  ;;  %v3413_v38 = vpop.f32.mrf.mxu0 }
 0x3ac   : > { %3886 = vmatpush.bf16.msra.mxu2 %v5759_v50  ;;  %v3414_v41 = vadd.f32 %v3413_v38, %v9033_v40  ;;  %v5870_v50 = vld [vmem:[%s10896_s1 + $0x548] sm:$0xf] }
 0x3ad   : > { %6786 = vmatpush.lsf.bf16.msrb.mxu1 %v7644_v21  ;;  %v6399_v21 = vld [vmem:[%s10896_s1 + $0x274] sm:$0xf0] }
 0x3ae   : > { %v5503_v43 = vor.u32 %v6399_v21, %v5502_v30  ;;  %v3463_v44 = vadd.f32 %v3462_v56, %v3414_v41  ;;  %3709 = vmatmul.bf16.gmra.mxu2 %v8174_v26  ;;  %v6491_v21 = vld [vmem:[%s10896_s1 + $0x554] sm:$0xf0] }
 0x3af   : > { %6698 = vmatpush.lsf.bf16.msrb.mxu0 %v11131_v16  ;;  %v3563_v63 = vpop.f32.mrf.mxu3  ;;  %v3465_v12 = vpop.f32.mrf.mxu1  ;;  %v5871_v56 = vor.u32 %v6491_v21, %v5870_v50 }
 0x3b0   : > { %v3512_v51 = vadd.f32 %v3511_v4, %v3463_v44  ;;  %6287 = vmatmul.msk.bf16.gmra.mxu1 %vm2779_vm1, %v8761_v17  ;;  %v6395_v4 = vld [vmem:[%s10896_s1 + $0x254] sm:$0xf0] }
 0x3b1   : > { %3837 = vmatpush.bf16.msra.mxu1 %v5631_v35  ;;  %v3514_v16 = vpop.f32.mrf.mxu2  ;;  %3936 = vmatpush.bf16.msra.mxu3 %v5871_v56  ;;  %v6423_v56 = vld [vmem:[%s10896_s1 + $0x334] sm:$0xf0] }
 0x3b2   : > { %v9321_v18 = vadd.f32 %v3560_v49, %v3512_v51  ;;  %v6459_v49 = vld [vmem:[%s10896_s1 + $0x454] sm:$0xf0] }
 0x3b3   : > { %6699 = vmatpush.lsf.bf16.msrb.mxu0 %v11133_v45  ;;  %v3416_v53 = vpop.f32.mrf.mxu0  ;;  %v11134_v45 = vld [vmem:[#allocation31_spill] sm:$0xff]  ;;  %v5743_v30 = vor.u32 %v6459_v49, %v5742_v23 }
 0x3b4   : > { %v3417_v5 = vadd.f32 %v3416_v53, %v9038_v58  ;;  %v5486_v58 = vld [vmem:[%s10896_s1 + $0x248] sm:$0xf] }
 0x3b5   : > { %v5487_v42 = vor.u32 %v6395_v4, %v5486_v58  ;;  %3887 = vmatpush.bf16.msra.mxu2 %v5743_v30  ;;  %v5726_v23 = vld [vmem:[%s10896_s1 + $0x428] sm:$0xf]  ;;  %v6487_v4 = vld [vmem:[%s10896_s1 + $0x534] sm:$0xf0] }
 0x3b6   : > { %v3466_v40 = vadd.f32 %v3465_v12, %v3417_v5  ;;  %3611 = vmatmul.bf16.gmra.mxu0 %v11134_v45  ;;  %v5854_v30 = vld [vmem:[%s10896_s1 + $0x528] sm:$0xf] }
 0x3b7   : > { %3788 = vmatpush.bf16.msra.mxu0 %v5503_v43  ;;  %v3565_v47 = vpop.f32.mrf.mxu3  ;;  %v3467_v37 = vpop.f32.mrf.mxu1  ;;  %v5614_v43 = vld [vmem:[%s10896_s1 + $0x348] sm:$0xf] }
 0x3b8   : > { %v3515_v20 = vadd.f32 %v3514_v16, %v3466_v40  ;;  %v5615_v38 = vor.u32 %v6427_v57, %v5614_v43  ;;  %3763 = vmatmul.bf16.gmra.mxu3 %v8215_v32  ;;  %v11135_v40 = vld [vmem:[#allocation34_spill] sm:$0xff] }
 0x3b9   : > { %v3516_v33 = vpop.f32.mrf.mxu2 }
 0x3ba   : > { %v9351_v39 = vadd.f32 %v3563_v63, %v3515_v20  ;;  %3838 = vmatpush.bf16.msra.mxu1 %v5615_v38 }
 0x3bb   : > { %v3418_v7 = vpop.f32.mrf.mxu0  ;;  %3789 = vmatpush.bf16.msra.mxu0 %v5487_v42  ;;  %v5598_v42 = vld [vmem:[%s10896_s1 + $0x328] sm:$0xf] }
 0x3bc   : > { %v3419_v35 = vadd.f32 %v3418_v7, %v9061_v59  ;;  %v5599_v7 = vor.u32 %v6423_v56, %v5598_v42 }
 0x3be   : > { %v3468_v41 = vadd.f32 %v3467_v37, %v3419_v35  ;;  %3714 = vmatmul.bf16.gmra.mxu2 %v8217_v36  ;;  %v5855_v37 = vor.u32 %v6487_v4, %v5854_v30  ;;  %3839 = vmatpush.bf16.msra.mxu1 %v5599_v7 }
 0x3bf   : > { %v3568_v51 = vpop.f32.mrf.mxu3  ;;  %v3470_v12 = vpop.f32.mrf.mxu1 }
 0x3c0   : > { %v3517_v44 = vadd.f32 %v3516_v33, %v3468_v41  ;;  %6288 = vmatmul.msk.bf16.gmra.mxu1 %vm2779_vm1, %v8798_v1  ;;  %v6391_v33 = vld [vmem:[%s10896_s1 + $0x234] sm:$0xf0]  ;;  %3937 = vmatpush.bf16.msra.mxu3 %v5855_v37 }
 0x3c1   : > { %v3519_v16 = vpop.f32.mrf.mxu2  ;;  %v6419_v37 = vld [vmem:[%s10896_s1 + $0x314] sm:$0xf0] }
 0x3c2   : > { %v9356_v53 = vadd.f32 %v3565_v47, %v3517_v44  ;;  %v6455_v47 = vld [vmem:[%s10896_s1 + $0x434] sm:$0xf0] }
 0x3c3   : > { %v3421_v63 = vpop.f32.mrf.mxu0  ;;  %v5727_v58 = vor.u32 %v6455_v47, %v5726_v23  ;;  %v5710_v23 = vld [vmem:[%s10896_s1 + $0x408] sm:$0xf] }
 0x3c4   : > { %v3422_v5 = vadd.f32 %v3421_v63, %v9067_v61  ;;  %v5470_v61 = vld [vmem:[%s10896_s1 + $0x228] sm:$0xf] }
 0x3c5   : > { %v5471_v21 = vor.u32 %v6391_v33, %v5470_v61  ;;  %3888 = vmatpush.bf16.msra.mxu2 %v5727_v58  ;;  %v5838_v58 = vld [vmem:[%s10896_s1 + $0x508] sm:$0xf]  ;;  %v6483_v33 = vld [vmem:[%s10896_s1 + $0x514] sm:$0xf0] }
 0x3c6   : > { %v3471_v59 = vadd.f32 %v3470_v12, %v3422_v5  ;;  %3616 = vmatmul.bf16.gmra.mxu0 %v11135_v40 }
 0x3c7   : > { %v3570_v20 = vpop.f32.mrf.mxu3  ;;  %v3472_v50 = vpop.f32.mrf.mxu1  ;;  %3790 = vmatpush.bf16.msra.mxu0 %v5471_v21  ;;  %v5582_v21 = vld [vmem:[%s10896_s1 + $0x308] sm:$0xf] }
 0x3c8   : > { %v3520_v32 = vadd.f32 %v3519_v16, %v3471_v59  ;;  %3768 = vmatmul.bf16.gmra.mxu3 %v8259_v8  ;;  %v11136_v59 = vld [vmem:[#allocation37_spill] sm:$0xff] }
 0x3c9   : > { %v3521_v49 = vpop.f32.mrf.mxu2 }
 0x3ca   : > { %v9386_v43 = vadd.f32 %v3568_v51, %v3520_v32 }
 0x3cb   : > { %v3423_v57 = vpop.f32.mrf.mxu0 }
 0x3cc   : > { %v3424_v38 = vadd.f32 %v3423_v57, %v9097_v24  ;;  %v5583_v57 = vor.u32 %v6419_v37, %v5582_v21  ;;  %v5312_v37 = vld [vmem:[%s10896_s1 + $0xf8] sm:$0xf0] }
 0x3ce   : > { %v3473_v35 = vadd.f32 %v3472_v50, %v3424_v38  ;;  %3719 = vmatmul.bf16.gmra.mxu2 %v8262_v10  ;;  %v5839_v50 = vor.u32 %v6483_v33, %v5838_v58  ;;  %3840 = vmatpush.bf16.msra.mxu1 %v5583_v57 }
 0x3cf   : > { %v3573_v44 = vpop.f32.mrf.mxu3  ;;  %v3475_v12 = vpop.f32.mrf.mxu1 }
 0x3d0   : > { %v3522_v41 = vadd.f32 %v3521_v49, %v3473_v35  ;;  %6289 = vmatmul.msk.bf16.gmra.mxu1 %vm2779_vm1, %v8835_v9  ;;  %v6387_v49 = vld [vmem:[%s10896_s1 + $0x214] sm:$0xf0]  ;;  %3938 = vmatpush.bf16.msra.mxu3 %v5839_v50 }
 0x3d1   : > { %v3524_v16 = vpop.f32.mrf.mxu2 }
 0x3d2   : > { %v9391_v63 = vadd.f32 %v3570_v20, %v3522_v41  ;;  %v6451_v20 = vld [vmem:[%s10896_s1 + $0x414] sm:$0xf0] }
 0x3d3   : > { %v3426_v51 = vpop.f32.mrf.mxu0  ;;  %v5711_v61 = vor.u32 %v6451_v20, %v5710_v23 }
 0x3d4   : > { %v3427_v5 = vadd.f32 %v3426_v51, %v9103_v14  ;;  %v5454_v14 = vld [vmem:[%s10896_s1 + $0x208] sm:$0xf] }
 0x3d5   : > { %v5455_v4 = vor.u32 %v6387_v49, %v5454_v14  ;;  %3889 = vmatpush.bf16.msra.mxu2 %v5711_v61 }
 0x3d6   : > { %v3476_v24 = vadd.f32 %v3475_v12, %v3427_v5  ;;  %3621 = vmatmul.bf16.gmra.mxu0 %v11136_v59 }
 0x3d7   : > { %v3575_v32 = vpop.f32.mrf.mxu3  ;;  %v3477_v30 = vpop.f32.mrf.mxu1  ;;  %3791 = vmatpush.bf16.msra.mxu0 %v5455_v4 }
 0x3d8   : > { %v3525_v8 = vadd.f32 %v3524_v16, %v3476_v24  ;;  %3773 = vmatmul.bf16.gmra.mxu3 %v8303_v52  ;;  %v11137_v24 = vld [vmem:[#allocation41_spill] sm:$0xff] }
 0x3d9   : > { %v3526_v47 = vpop.f32.mrf.mxu2 }
 0x3da   : > { %v9421_v42 = vadd.f32 %v3573_v44, %v3525_v8 }
 0x3db   : > { %v3428_v56 = vpop.f32.mrf.mxu0 }
 0x3dc   : > { %v3429_v7 = vadd.f32 %v3428_v56, %v9127_v15 }
 0x3de   : > { %v3478_v38 = vadd.f32 %v3477_v30, %v3429_v7  ;;  %3724 = vmatmul.bf16.gmra.mxu2 %v8307_v55  ;;  %v6591_v7 = vld [vmem:[%s10896_s1 + $0x874] sm:$0xf0] }
 0x3df   : > { %v3578_v41 = vpop.f32.mrf.mxu3  ;;  %v3480_v12 = vpop.f32.mrf.mxu1 }
 0x3e0   : > { %v3527_v35 = vadd.f32 %v3526_v47, %v3478_v38  ;;  %6290 = vmatmul.msk.bf16.gmra.mxu1 %vm2779_vm1, %v8872_v0 }
 0x3e1   : > { %v3529_v16 = vpop.f32.mrf.mxu2 }
 0x3e2   : > { %v9426_v51 = vadd.f32 %v3575_v32, %v3527_v35 }
 0x3e3   : > { %v3431_v44 = vpop.f32.mrf.mxu0 }
 0x3e4   : > { %v3432_v5 = vadd.f32 %v3431_v44, %v9133_v54 }
 0x3e6   : > { %v3481_v15 = vadd.f32 %v3480_v12, %v3432_v5  ;;  %3626 = vmatmul.bf16.gmra.mxu0 %v11137_v24  ;;  %v6345_v5 = vld [vmem:[%s10896_s1 + $0xcc] sm:$0xf] }
 0x3e7   : > { %v3580_v8 = vpop.f32.mrf.mxu3  ;;  %v3482_v20 = vpop.f32.mrf.mxu1 }
 0x3e8   : > { %v3530_v52 = vadd.f32 %v3529_v16, %v3481_v15  ;;  %3778 = vmatmul.bf16.gmra.mxu3 %v8322_v62  ;;  %v6349_v62 = vld [vmem:[%s10896_s1 + $0xec] sm:$0xf] }
 0x3e9   : > { %v3531_v23 = vpop.f32.mrf.mxu2 }
 0x3ea   : > { %v9432_v14 = vadd.f32 %v3578_v41, %v3530_v52  ;;  %v5315_v41 = vor.u32 %v6349_v62, %v5312_v37  ;;  %v5296_v52 = vld [vmem:[%s10896_s1 + $0xd8] sm:$0xf0] }
 0x3eb   : > { %v3433_v47 = vpop.f32.mrf.mxu0 }
 0x3ec   : > { %v3434_v61 = vadd.f32 %v3433_v47, %v9139_v22  ;;  %v11138_v22 = vld [vmem:[#allocation44_spill] sm:$0xff]  ;;  %v5299_v47 = vor.u32 %v6345_v5, %v5296_v52  ;;  %v6539_v5 = vld [vmem:[%s10896_s1 + $0x6d4] sm:$0xf0] }
 0x3ee   : > { %v3483_v32 = vadd.f32 %v3482_v20, %v3434_v61  ;;  %3729 = vmatmul.bf16.gmra.mxu2 %v8324_v6  ;;  %v6078_v61 = vld [vmem:[%s10896_s1 + $0x6e8] sm:$0xf] }
 0x3ef   : > { %v3583_v49 = vpop.f32.mrf.mxu3  ;;  %v3485_v33 = vpop.f32.mrf.mxu1 }
 0x3f0   : > { %v3532_v54 = vadd.f32 %v3531_v23, %v3483_v32  ;;  %6291 = vmatmul.msk.bf16.gmra.mxu1 %vm2779_vm1, %v8885_v13  ;;  %v11139_v23 = vld [vmem:[#allocation27_spill] sm:$0xff] }
 0x3f1   : > { %v3534_v58 = vpop.f32.mrf.mxu2 }
 0x3f2   : > { %v9437_v30 = vadd.f32 %v3580_v8, %v3532_v54  ;;  %v10962_v8 = vlaneseq }
 0x3f3   : > { %v3436_v4 = vpop.f32.mrf.mxu0 }
 0x3f4   : > { %v3437_v50 = vadd.f32 %v3436_v4, %v9145_v29  ;;  %v6270_v29 = vld [vmem:[%s10896_s1 + $0x868] sm:$0xf] }
 0x3f5   : > { %v6271_v44 = vor.u32 %v6591_v7, %v6270_v29 }
 0x3f6   : > { %v3486_v21 = vadd.f32 %v3485_v33, %v3437_v50  ;;  %3631 = vmatmul.bf16.gmra.mxu0 %v11138_v22  ;;  %v9479_v33 = vshrl.u32 %v10962_v8, 7  ;;  %v9481_v50 = vstv %s4586_s10  ;;  %s5032_s10 = scalar_lea.sflag [#allocation4], %s7622_s6 }
 0x3f7   : > { %v3585_v57 = vpop.f32.mrf.mxu3  ;;  %v3487_v35 = vpop.f32.mrf.mxu1 }
 0x3f8   : > { %v3535_v56 = vadd.f32 %v3534_v58, %v3486_v21  ;;  %3939 = vmatmul.bf16.vlgmr.msra.gmra.mxu3 %v11139_v23  ;;  %v6575_v58 = vld [vmem:[%s10896_s1 + $0x7f4] sm:$0xf0]  ;;  %vm4588_vm2 = vcmp.lt.s32.totalorder %v9479_v33, %v9481_v50 }
 0x3f9   : > { %v3536_v38 = vpop.f32.mrf.mxu2  ;;  %4127 = vmatpush.bf16.msra.mxu3 %v5315_v41  ;;  %v11141_v41 = vld [vmem:[#allocation55_spill] sm:$0xff] }
 0x3fa   : > { %v9455_v16 = vadd.f32 %v3583_v49, %v3535_v56  ;;  %v6206_v49 = vld [vmem:[%s10896_s1 + $0x7e8] sm:$0xf] }
 0x3fb   : > { %v3438_v12 = vpop.f32.mrf.mxu0  ;;  %v6207_v7 = vor.u32 %v6575_v58, %v6206_v49 }
 0x3fc   : > { %v3439_v15 = vadd.f32 %v3438_v12, %v9175_v46  ;;  %v6543_v46 = vld [vmem:[%s10896_s1 + $0x6f4] sm:$0xf0] }
 0x3fd   : > { %4128 = vmatpush.bf16.msra.mxu3 %v5299_v47  ;;  %v6079_v29 = vor.u32 %v6543_v46, %v6078_v61 }
 0x3fe   : > { %v3488_v20 = vadd.f32 %v3487_v35, %v3439_v15  ;;  %6822 = vmatmul.lmr.bf16.vlgmr.msra.gmra.16.mxu2  ;;  %v11140_v35 = vld [vmem:[#allocation47_spill] sm:$0xff]  ;;  %v6571_v15 = vld [vmem:[%s10896_s1 + $0x7d4] sm:$0xf0] }
 0x3ff   : > { %4082 = vmatpush.bf16.msra.mxu2 %v6271_v44  ;;  %v3744_v54 = vpop.f32.mrf.mxu3  ;;  %v3646_v62 = vpop.f32.mrf.mxu1  ;;  %v3206_v12 = vadd.f32 %v11141_v41, %v11140_v35  ;;  %v11144_v35 = vld [vmem:[#allocation56_spill] sm:$0xff] }
 0x400   : > { %v3537_v32 = vadd.f32 %v3536_v38, %v3488_v20  ;;  %v6062_v38 = vld [vmem:[%s10896_s1 + $0x6c8] sm:$0xf]  ;;  %6763 = vmatmul.lmr.bf16.vlgmr.msra.gmra.16.mxu1 }
 0x401   : > { %v3695_v4 = vpop.f32.mrf.mxu2  ;;  %4029 = vmatpush.bf16.msra.mxu1 %v6207_v7  ;;  %v9507_v47 = vsel %vm4588_vm2, %v3206_v12, 0.0  ;;  %v6046_v7 = vld [vmem:[%s10896_s1 + $0x6a8] sm:$0xf] }
 0x402   : > { %v9483_v21 = vadd.f32 %v3744_v54, %v3695_v4  ;;  %v9485_v37 = vadd.f32 %v3585_v57, %v3537_v32  ;;  %v6190_v57 = vld [vmem:[%s10896_s1 + $0x7c8] sm:$0xf]  ;;  %11142 = vst [vmem:[#allocation20_spill] sm:$0xff] %v9507_v47  ;;  %v9513_v54 = vadd.s32 8, %v9479_v33 }
 0x403   : > { %v3597_v56 = vpop.f32.mrf.mxu0  ;;  %v6191_v20 = vor.u32 %v6571_v15, %v6190_v57  ;;  %v6341_v57 = vld [vmem:[%s10896_s1 + $0xac] sm:$0xf]  ;;  %v5280_v15 = vld [vmem:[%s10896_s1 + $0xb8] sm:$0xf0] }
 0x404   : > { %v3598_v44 = vadd.f32 %v3597_v56, %v9232_v31  ;;  %v6063_v31 = vor.u32 %v6539_v5, %v6062_v38  ;;  %v6254_v56 = vld [vmem:[%s10896_s1 + $0x848] sm:$0xf]  ;;  %v11143_v38 = vld [vmem:[#allocation48_spill] sm:$0xff]  ;;  %v6535_v5 = vld [vmem:[%s10896_s1 + $0x6b4] sm:$0xf0]  ;;  %vm4589_vm3 = vcmp.lt.s32.totalorder %v9513_v54, %v9481_v50 }
 0x405   : > { %4030 = vmatpush.bf16.msra.mxu1 %v6191_v20  ;;  %v3208_v41 = vadd.f32 %v11144_v35, %v11143_v38  ;;  %v6174_v20 = vld [vmem:[%s10896_s1 + $0x7a8] sm:$0xf] }
 0x406   : > { %v3647_v52 = vadd.f32 %v3646_v62, %v3598_v44  ;;  %6676 = vmatmul.lmr.bf16.vlgmr.msra.gmra.16.mxu0  ;;  %6823 = vmatmul.lmr.bf16.gmra.16.mxu2 }
 0x407   : > { %3980 = vmatpush.bf16.msra.mxu0 %v6079_v29  ;;  %v3746_v32 = vpop.f32.mrf.mxu3  ;;  %v3648_v4 = vpop.f32.mrf.mxu1  ;;  %v6587_v29 = vld [vmem:[%s10896_s1 + $0x854] sm:$0xf0] }
 0x408   : > { %v4637_v61 = vsel %vm4588_vm2, %v3647_v52, 0.0  ;;  %v6255_v44 = vor.u32 %v6587_v29, %v6254_v56  ;;  %6764 = vmatmul.lmr.bf16.gmra.16.mxu1  ;;  %v11145_v52 = vld [vmem:[#allocation30_spill] sm:$0xff]  ;;  %v9555_v56 = vadd.s32 16, %v9479_v33 }
 0x409   : > { %v4700_v46 = vpack.c.bf16 %v4637_v61, %v9507_v47  ;;  %v3697_v49 = vpop.f32.mrf.mxu2  ;;  %3944 = vmatmul.bf16.gmra.mxu3 %v11145_v52  ;;  %v11158_v47 = vld [vmem:[#allocation59_spill] sm:$0xff]  ;;  %v11167_v52 = vld [vmem:[#allocation61_spill] sm:$0xff] }
 0x40a   : > { %v9516_v58 = vadd.f32 %v3746_v32, %v3697_v49  ;;  %v6567_v32 = vld [vmem:[%s10896_s1 + $0x7b4] sm:$0xf0]  ;;  %4083 = vmatpush.bf16.msra.mxu2 %v6255_v44  ;;  %11147 = vst [vmem:[#allocation18_spill] sm:$0xff] %v9555_v56  ;;  %vm4590_vm4 = vcmp.lt.s32.totalorder %v9555_v56, %v9481_v50 }
 0x40b   : > { %4732 = vst [vmem:[%s7630_s11] sm:$0xff] %v4700_v46  ;;  %v3599_v62 = vpop.f32.mrf.mxu0  ;;  %3981 = vmatpush.bf16.msra.mxu0 %v6063_v31  ;;  %v5283_v31 = vor.u32 %v6341_v57, %v5280_v15  ;;  %v6175_v49 = vor.u32 %v6567_v32, %v6174_v20  ;;  %v11149_v20 = vld [vmem:[#allocation57_spill] sm:$0xff] }
 0x40c   : > { %v3600_v12 = vadd.f32 %v3599_v62, %v9241_v28  ;;  %v6047_v28 = vor.u32 %v6535_v5, %v6046_v7  ;;  %v9552_v62 = vsel %vm4589_vm3, %v3208_v41, 0.0 }
 0x40d   : > { %11146 = vst [vmem:[#allocation19_spill] sm:$0xff] %v9552_v62  ;;  %4129 = vmatpush.bf16.msra.mxu3 %v5283_v31  ;;  %4031 = vmatpush.bf16.msra.mxu1 %v6175_v49 }
 0x40e   : > { %v3649_v46 = vadd.f32 %v3648_v4, %v3600_v12  ;;  %6677 = vmatmul.lmr.bf16.gmra.16.mxu0  ;;  %6824 = vmatmul.lmr.bf16.gmra.16.mxu2  ;;  %v4871_v4 = vmul.f32 %v4637_v61, %v4637_v61 }
 0x40f   : > { %3982 = vmatpush.bf16.msra.mxu0 %v6047_v28  ;;  %v3749_v7 = vpop.f32.mrf.mxu3  ;;  %v3651_v41 = vpop.f32.mrf.mxu1  ;;  %v11148_v28 = vld [vmem:[#allocation49_spill] sm:$0xff] }
 0x410   : > { %v4641_v29 = vsel %vm4589_vm3, %v3649_v46, 0.0  ;;  %v3211_v32 = vadd.f32 %v11149_v20, %v11148_v28  ;;  %6765 = vmatmul.lmr.bf16.gmra.16.mxu1  ;;  %v6030_v20 = vld [vmem:[%s10896_s1 + $0x688] sm:$0xf] }
 0x411   : > { %v4702_v38 = vpack.c.bf16 %v4641_v29, %v9552_v62  ;;  %v4786_v35 = vadd.f32 %v4641_v29, %v4637_v61  ;;  %v4875_v12 = vmul.f32 %v4641_v29, %v4641_v29  ;;  %v3700_v44 = vpop.f32.mrf.mxu2 }
 0x412   : > { %v9561_v5 = vadd.f32 %v3749_v7, %v3700_v44  ;;  %v9572_v61 = vsel %vm4590_vm4, %v3211_v32, 0.0  ;;  %v6531_v32 = vld [vmem:[%s10896_s1 + $0x694] sm:$0xf0] }
 0x413   : > { %4734 = vst [vmem:[%s7630_s11 + $0x10] sm:$0xff] %v4702_v38  ;;  %v4955_v57 = vadd.f32 %v4875_v12, %v4871_v4  ;;  %v3602_v15 = vpop.f32.mrf.mxu0 }
 0x414   : > { %v3603_v46 = vadd.f32 %v3602_v15, %v9275_v34  ;;  %11150 = vst [vmem:[#allocation17_spill] sm:$0xff] %v9572_v61  ;;  %v9578_v34 = vadd.s32 24, %v9479_v33 }
 0x416   : > { %v3652_v31 = vadd.f32 %v3651_v41, %v3603_v46  ;;  %6678 = vmatmul.lmr.bf16.gmra.16.mxu0  ;;  %6825 = vmatmul.lmr.bf16.gmra.16.mxu2  ;;  %11151 = vst [vmem:[#allocation16_spill] sm:$0xff] %v9578_v34  ;;  %v11152_v46 = vld [vmem:[#allocation50_spill] sm:$0xff]  ;;  %vm4591_vm5 = vcmp.lt.s32.totalorder %v9578_v34, %v9481_v50 }
 0x417   : > { %v3751_v29 = vpop.f32.mrf.mxu3  ;;  %v3653_v41 = vpop.f32.mrf.mxu1 }
 0x418   : > { %v4645_v49 = vsel %vm4590_vm4, %v3652_v31, 0.0  ;;  %v11153_v31 = vld [vmem:[#allocation58_spill] sm:$0xff]  ;;  %6766 = vmatmul.lmr.bf16.gmra.16.mxu1 }
 0x419   : > { %v4704_v7 = vpack.c.bf16 %v4645_v49, %v9572_v61  ;;  %v4787_v4 = vadd.f32 %v4786_v35, %v4645_v49  ;;  %v4879_v38 = vmul.f32 %v4645_v49, %v4645_v49  ;;  %v3702_v12 = vpop.f32.mrf.mxu2  ;;  %v3213_v8 = vadd.f32 %v11153_v31, %v11152_v46  ;;  %v11157_v61 = vld [vmem:[#allocation51_spill] sm:$0xff] }
 0x41a   : > { %v9581_v44 = vadd.f32 %v3751_v29, %v3702_v12  ;;  %v6031_v49 = vor.u32 %v6531_v32, %v6030_v20  ;;  %v6337_v29 = vld [vmem:[%s10896_s1 + $0x8c] sm:$0xf]  ;;  %v6563_v12 = vld [vmem:[%s10896_s1 + $0x794] sm:$0xf0]  ;;  %v3216_v62 = vadd.f32 %v11158_v47, %v11157_v61 }
 0x41b   : > { %4736 = vst [vmem:[%s7630_s11 + $0x20] sm:$0xff] %v4704_v7  ;;  %v4956_v15 = vadd.f32 %v4955_v57, %v4879_v38  ;;  %v3604_v28 = vpop.f32.mrf.mxu0  ;;  %v5264_v57 = vld [vmem:[%s10896_s1 + $0x98] sm:$0xf0]  ;;  %v6158_v7 = vld [vmem:[%s10896_s1 + $0x788] sm:$0xf]  ;;  %v11154_v38 = vld [vmem:[#allocation32_spill] sm:$0xff] }
 0x41c   : > { %v3605_v35 = vadd.f32 %v3604_v28, %v9282_v19  ;;  %3949 = vmatmul.bf16.gmra.mxu3 %v11154_v38  ;;  %v5267_v19 = vor.u32 %v6337_v29, %v5264_v57  ;;  %v6159_v20 = vor.u32 %v6563_v12, %v6158_v7  ;;  %3983 = vmatpush.bf16.msra.mxu0 %v6031_v49  ;;  %v9611_v32 = vsel %vm4591_vm5, %v3213_v8, 0.0  ;;  %v11166_v38 = vld [vmem:[#allocation53_spill] sm:$0xff] }
 0x41d   : > { %11155 = vst [vmem:[#allocation15_spill] sm:$0xff] %v9611_v32  ;;  %v9617_v29 = vadd.s32 32, %v9479_v33 }
 0x41e   : > { %v3654_v28 = vadd.f32 %v3653_v41, %v3605_v35  ;;  %6679 = vmatmul.lmr.bf16.gmra.16.mxu0  ;;  %6826 = vmatmul.lmr.bf16.gmra.16.mxu2 }
 0x41f   : > { %4130 = vmatpush.bf16.msra.mxu3 %v5267_v19  ;;  %v3754_v31 = vpop.f32.mrf.mxu3  ;;  %4032 = vmatpush.bf16.msra.mxu1 %v6159_v20  ;;  %11156 = vst [vmem:[#allocation25_spill] sm:$0xff] %v9617_v29  ;;  %v3656_v19 = vpop.f32.mrf.mxu1  ;;  %vm4592_vm6 = vcmp.lt.s32.totalorder %v9617_v29, %v9481_v50 }
 0x420   : > { %v4649_v46 = vsel %vm4591_vm5, %v3654_v28, 0.0  ;;  %6767 = vmatmul.lmr.bf16.gmra.16.mxu1 }
 0x421   : > { %v4706_v41 = vpack.c.bf16 %v4649_v46, %v9611_v32  ;;  %v4788_v35 = vadd.f32 %v4787_v4, %v4649_v46  ;;  %v4883_v57 = vmul.f32 %v4649_v46, %v4649_v46  ;;  %v3705_v49 = vpop.f32.mrf.mxu2  ;;  %v9631_v4 = vsel %vm4592_vm6, %v3216_v62, 0.0  ;;  %v11162_v32 = vld [vmem:[#allocation60_spill] sm:$0xff] }
 0x422   : > { %v9620_v7 = vadd.f32 %v3754_v31, %v3705_v49  ;;  %11159 = vst [vmem:[#allocation14_spill] sm:$0xff] %v9631_v4 }
 0x423   : > { %4738 = vst [vmem:[%s7630_s11 + $0x30] sm:$0xff] %v4706_v41  ;;  %v4957_v8 = vadd.f32 %v4956_v15, %v4883_v57  ;;  %v3607_v12 = vpop.f32.mrf.mxu0 }
 0x424   : > { %v3608_v28 = vadd.f32 %v3607_v12, %v9316_v11  ;;  %v9637_v11 = vadd.s32 40, %v9479_v33  ;;  %v6238_v12 = vld [vmem:[%s10896_s1 + $0x828] sm:$0xf] }
 0x426   : > { %v3657_v20 = vadd.f32 %v3656_v19, %v3608_v28  ;;  %6680 = vmatmul.lmr.bf16.gmra.16.mxu0  ;;  %6827 = vmatmul.lmr.bf16.gmra.16.mxu2  ;;  %11160 = vst [vmem:[#allocation13_spill] sm:$0xff] %v9637_v11  ;;  %v6583_v28 = vld [vmem:[%s10896_s1 + $0x834] sm:$0xf0]  ;;  %vm4593_vm7 = vcmp.lt.s32.totalorder %v9637_v11, %v9481_v50  ;;  %v6441_v11 = vld [vmem:[%s10896_s1 + $0x3cc] sm:$0xf] }
 0x427   : > { %v3756_v47 = vpop.f32.mrf.mxu3  ;;  %v3658_v49 = vpop.f32.mrf.mxu1 }
 0x428   : > { %v4653_v15 = vsel %vm4592_vm6, %v3657_v20, 0.0  ;;  %v11161_v20 = vld [vmem:[#allocation52_spill] sm:$0xff]  ;;  %6768 = vmatmul.lmr.bf16.gmra.16.mxu1 }
 0x429   : > { %v4708_v61 = vpack.c.bf16 %v4653_v15, %v9631_v4  ;;  %v4789_v46 = vadd.f32 %v4788_v35, %v4653_v15  ;;  %v4887_v31 = vmul.f32 %v4653_v15, %v4653_v15  ;;  %v3707_v41 = vpop.f32.mrf.mxu2  ;;  %v3218_v4 = vadd.f32 %v11162_v32, %v11161_v20  ;;  %v11163_v32 = vld [vmem:[#allocation35_spill] sm:$0xff] }
 0x42a   : > { %v9640_v57 = vadd.f32 %v3756_v47, %v3707_v41  ;;  %v6239_v15 = vor.u32 %v6583_v28, %v6238_v12  ;;  %v6014_v47 = vld [vmem:[%s10896_s1 + $0x668] sm:$0xf] }
 0x42b   : > { %4740 = vst [vmem:[%s7630_s11 + $0x40] sm:$0xff] %v4708_v61  ;;  %v4958_v19 = vadd.f32 %v4957_v8, %v4887_v31  ;;  %v3609_v62 = vpop.f32.mrf.mxu0  ;;  %v6527_v8 = vld [vmem:[%s10896_s1 + $0x674] sm:$0xf0]  ;;  %v6333_v61 = vld [vmem:[%s10896_s1 + $0x6c] sm:$0xf] }
 0x42c   : > { %v3610_v35 = vadd.f32 %v3609_v62, %v9321_v18  ;;  %3954 = vmatmul.bf16.gmra.mxu3 %v11163_v32  ;;  %v6015_v18 = vor.u32 %v6527_v8, %v6014_v47  ;;  %v5248_v31 = vld [vmem:[%s10896_s1 + $0x78] sm:$0xf0]  ;;  %v6142_v41 = vld [vmem:[%s10896_s1 + $0x768] sm:$0xf]  ;;  %v6559_v62 = vld [vmem:[%s10896_s1 + $0x774] sm:$0xf0]  ;;  %4084 = vmatpush.bf16.msra.mxu2 %v6239_v15 }
 0x42d   : > { %v5251_v28 = vor.u32 %v6333_v61, %v5248_v31  ;;  %v6143_v20 = vor.u32 %v6559_v62, %v6142_v41  ;;  %v9676_v47 = vsel %vm4593_vm7, %v3218_v4, 0.0 }
 0x42e   : > { %v3659_v12 = vadd.f32 %v3658_v49, %v3610_v35  ;;  %6681 = vmatmul.lmr.bf16.gmra.16.mxu0  ;;  %6828 = vmatmul.lmr.bf16.gmra.16.mxu2  ;;  %11164 = vst [vmem:[#allocation12_spill] sm:$0xff] %v9676_v47  ;;  %v9682_v49 = vadd.s32 48, %v9479_v33 }
 0x42f   : > { %3984 = vmatpush.bf16.msra.mxu0 %v6015_v18  ;;  %v3759_v32 = vpop.f32.mrf.mxu3  ;;  %4131 = vmatpush.bf16.msra.mxu3 %v5251_v28  ;;  %v3661_v41 = vpop.f32.mrf.mxu1 }
 0x430   : > { %v4657_v8 = vsel %vm4593_vm7, %v3659_v12, 0.0  ;;  %4033 = vmatpush.bf16.msra.mxu1 %v6143_v20  ;;  %11165 = vst [vmem:[#allocation28_spill] sm:$0xff] %v9682_v49  ;;  %v3221_v12 = vadd.f32 %v11167_v52, %v11166_v38  ;;  %vm4594_vm8 = vcmp.lt.s32.totalorder %v9682_v49, %v9481_v50 }
 0x431   : > { %v4710_v35 = vpack.c.bf16 %v4657_v8, %v9676_v47  ;;  %v4790_v61 = vadd.f32 %v4789_v46, %v4657_v8  ;;  %v4891_v15 = vmul.f32 %v4657_v8, %v4657_v8  ;;  %v3710_v18 = vpop.f32.mrf.mxu2  ;;  %6769 = vmatmul.lmr.bf16.gmra.16.mxu1  ;;  %v11171_v47 = vld [vmem:[#allocation62_spill] sm:$0xff] }
 0x432   : > { %v9685_v31 = vadd.f32 %v3759_v32, %v3710_v18  ;;  %v9696_v46 = vsel %vm4594_vm8, %v3221_v12, 0.0  ;;  %v5998_v12 = vld [vmem:[%s10896_s1 + $0x648] sm:$0xf] }
 0x433   : > { %4742 = vst [vmem:[%s7630_s11 + $0x50] sm:$0xff] %v4710_v35  ;;  %v4959_v4 = vadd.f32 %v4958_v19, %v4891_v15  ;;  %v3612_v62 = vpop.f32.mrf.mxu0 }
 0x434   : > { %v3613_v28 = vadd.f32 %v3612_v62, %v9351_v39  ;;  %11168 = vst [vmem:[#allocation11_spill] sm:$0xff] %v9696_v46  ;;  %v9702_v39 = vadd.s32 56, %v9479_v33 }
 0x436   : > { %v3662_v20 = vadd.f32 %v3661_v41, %v3613_v28  ;;  %6682 = vmatmul.lmr.bf16.gmra.16.mxu0  ;;  %6829 = vmatmul.lmr.bf16.gmra.16.mxu2  ;;  %11169 = vst [vmem:[#allocation31_spill] sm:$0xff] %v9702_v39  ;;  %v6523_v28 = vld [vmem:[%s10896_s1 + $0x654] sm:$0xf0]  ;;  %vm4595_vm9 = vcmp.lt.s32.totalorder %v9702_v39, %v9481_v50 }
 0x437   : > { %v3761_v52 = vpop.f32.mrf.mxu3  ;;  %v3663_v18 = vpop.f32.mrf.mxu1  ;;  %v6515_v39 = vld [vmem:[%s10896_s1 + $0x614] sm:$0xf0] }
 0x438   : > { %v4661_v19 = vsel %vm4594_vm8, %v3662_v20, 0.0  ;;  %v11170_v20 = vld [vmem:[#allocation54_spill] sm:$0xff] }
 0x439   : > { %v4712_v38 = vpack.c.bf16 %v4661_v19, %v9696_v46  ;;  %v4791_v32 = vadd.f32 %v4790_v61, %v4661_v19  ;;  %v4895_v8 = vmul.f32 %v4661_v19, %v4661_v19  ;;  %v3712_v35 = vpop.f32.mrf.mxu2  ;;  %v3223_v46 = vadd.f32 %v11171_v47, %v11170_v20  ;;  %6770 = vmatmul.lmr.bf16.gmra.16.mxu1  ;;  %v11172_v47 = vld [vmem:[#allocation38_spill] sm:$0xff] }
 0x43a   : > { %v9705_v15 = vadd.f32 %v3761_v52, %v3712_v35  ;;  %v5999_v19 = vor.u32 %v6523_v28, %v5998_v12  ;;  %v6329_v52 = vld [vmem:[%s10896_s1 + $0x4c] sm:$0xf] }
 0x43b   : > { %4744 = vst [vmem:[%s7630_s11 + $0x60] sm:$0xff] %v4712_v38  ;;  %v4960_v41 = vadd.f32 %v4959_v4, %v4895_v8  ;;  %v3614_v62 = vpop.f32.mrf.mxu0  ;;  %v5232_v4 = vld [vmem:[%s10896_s1 + $0x58] sm:$0xf0]  ;;  %v6126_v38 = vld [vmem:[%s10896_s1 + $0x748] sm:$0xf]  ;;  %v9735_v12 = vsel %vm4595_vm9, %v3223_v46, 0.0 }
 0x43c   : > { %v3615_v61 = vadd.f32 %v3614_v62, %v9356_v53  ;;  %3959 = vmatmul.bf16.gmra.mxu3 %v11172_v47  ;;  %v5235_v53 = vor.u32 %v6329_v52, %v5232_v4  ;;  %v6555_v8 = vld [vmem:[%s10896_s1 + $0x754] sm:$0xf0]  ;;  %3985 = vmatpush.bf16.msra.mxu0 %v5999_v19  ;;  %11173 = vst [vmem:[#allocation34_spill] sm:$0xff] %v9735_v12  ;;  %v9741_v52 = vadd.s32 64, %v9479_v33 }
 0x43d   : > { %v6127_v62 = vor.u32 %v6555_v8, %v6126_v38 }
 0x43e   : > { %v3664_v35 = vadd.f32 %v3663_v18, %v3615_v61  ;;  %6683 = vmatmul.lmr.bf16.gmra.16.mxu0  ;;  %6830 = vmatmul.lmr.bf16.gmra.16.mxu2  ;;  %11174 = vst [vmem:[#allocation37_spill] sm:$0xff] %v9741_v52  ;;  %vm4596_vm10 = vcmp.lt.s32.totalorder %v9741_v52, %v9481_v50 }
 0x43f   : > { %4132 = vmatpush.bf16.msra.mxu3 %v5235_v53  ;;  %v3764_v20 = vpop.f32.mrf.mxu3  ;;  %4034 = vmatpush.bf16.msra.mxu1 %v6127_v62  ;;  %v3666_v53 = vpop.f32.mrf.mxu1  ;;  %v11175_v62 = vld [vmem:[#allocation63_spill] sm:$0xff] }
 0x440   : > { %v4665_v28 = vsel %vm4595_vm9, %v3664_v35, 0.0 }
 0x441   : > { %v4714_v18 = vpack.c.bf16 %v4665_v28, %v9735_v12  ;;  %v4792_v61 = vadd.f32 %v4791_v32, %v4665_v28  ;;  %v4899_v4 = vmul.f32 %v4665_v28, %v4665_v28  ;;  %v3715_v19 = vpop.f32.mrf.mxu2  ;;  %6771 = vmatmul.lmr.bf16.gmra.16.mxu1  ;;  %v9754_v32 = vsel %vm4596_vm10, %v11175_v62, 0.0  ;;  %v6222_v12 = vld [vmem:[%s10896_s1 + $0x808] sm:$0xf] }
 0x442   : > { %v9744_v38 = vadd.f32 %v3764_v20, %v3715_v19  ;;  %11176 = vst [vmem:[#allocation41_spill] sm:$0xff] %v9754_v32 }
 0x443   : > { %4746 = vst [vmem:[%s7630_s11 + $0x70] sm:$0xff] %v4714_v18  ;;  %v4961_v46 = vadd.f32 %v4960_v41, %v4899_v4  ;;  %v3617_v8 = vpop.f32.mrf.mxu0 }
 0x444   : > { %v3618_v47 = vadd.f32 %v3617_v8, %v9386_v43  ;;  %v9760_v43 = vadd.s32 72, %v9479_v33 }
 0x446   : > { %v3667_v35 = vadd.f32 %v3666_v53, %v3618_v47  ;;  %6684 = vmatmul.lmr.bf16.gmra.16.mxu0  ;;  %6831 = vmatmul.lmr.bf16.gmra.16.mxu2  ;;  %11177 = vst [vmem:[#allocation44_spill] sm:$0xff] %v9760_v43  ;;  %vm4597_vm11 = vcmp.lt.s32.totalorder %v9760_v43, %v9481_v50 }
 0x447   : > { %v3766_v28 = vpop.f32.mrf.mxu3  ;;  %v3668_v53 = vpop.f32.mrf.mxu1 }
 0x448   : > { %v4669_v41 = vsel %vm4596_vm10, %v3667_v35, 0.0  ;;  %v6579_v35 = vld [vmem:[%s10896_s1 + $0x814] sm:$0xf0] }
 0x449   : > { %v4716_v20 = vpack.c.bf16 %v4669_v41, %v9754_v32  ;;  %v4793_v18 = vadd.f32 %v4792_v61, %v4669_v41  ;;  %v4903_v47 = vmul.f32 %v4669_v41, %v4669_v41  ;;  %v3717_v4 = vpop.f32.mrf.mxu2  ;;  %v6223_v32 = vor.u32 %v6579_v35, %v6222_v12  ;;  %v5982_v61 = vld [vmem:[%s10896_s1 + $0x628] sm:$0xf]  ;;  %v6325_v41 = vld [vmem:[%s10896_s1 + $0x2c] sm:$0xf]  ;;  %6772 = vmatmul.lmr.bf16.gmra.16.mxu1  ;;  %v5216_v12 = vld [vmem:[%s10896_s1 + $0x38] sm:$0xf0] }
 0x44a   : > { %v9763_v19 = vadd.f32 %v3766_v28, %v3717_v4  ;;  %v11178_v28 = vld [vmem:[#allocation40_spill] sm:$0xff] }
 0x44b   : > { %4748 = vst [vmem:[%s7630_s11 + $0x80] sm:$0xff] %v4716_v20  ;;  %v4962_v8 = vadd.f32 %v4961_v46, %v4903_v47  ;;  %v3619_v62 = vpop.f32.mrf.mxu0  ;;  %v6519_v46 = vld [vmem:[%s10896_s1 + $0x634] sm:$0xf0]  ;;  %v6110_v20 = vld [vmem:[%s10896_s1 + $0x728] sm:$0xf]  ;;  %4085 = vmatpush.bf16.msra.mxu2 %v6223_v32 }
 0x44c   : > { %v3620_v23 = vadd.f32 %v3619_v62, %v9391_v63  ;;  %3964 = vmatmul.bf16.gmra.mxu3 %v11178_v28  ;;  %v5983_v63 = vor.u32 %v6519_v46, %v5982_v61  ;;  %v6551_v47 = vld [vmem:[%s10896_s1 + $0x734] sm:$0xf0]  ;;  %v5219_v62 = vor.u32 %v6325_v41, %v5216_v12  ;;  %v11179_v61 = vld [vmem:[#allocation64_spill] sm:$0xff] }
 0x44d   : > { %v6111_v35 = vor.u32 %v6551_v47, %v6110_v20  ;;  %v9798_v46 = vsel %vm4597_vm11, %v11179_v61, 0.0 }
 0x44e   : > { %v3669_v4 = vadd.f32 %v3668_v53, %v3620_v23  ;;  %6685 = vmatmul.lmr.bf16.gmra.16.mxu0  ;;  %6832 = vmatmul.lmr.bf16.gmra.16.mxu2  ;;  %11180 = vst [vmem:[#allocation47_spill] sm:$0xff] %v9798_v46  ;;  %v9804_v23 = vadd.s32 80, %v9479_v33 }
 0x44f   : > { %3986 = vmatpush.bf16.msra.mxu0 %v5983_v63  ;;  %v3769_v52 = vpop.f32.mrf.mxu3  ;;  %4133 = vmatpush.bf16.msra.mxu3 %v5219_v62  ;;  %v3671_v20 = vpop.f32.mrf.mxu1  ;;  %v5200_v62 = vld [vmem:[%s10896_s1 + $0x18] sm:$0xf0] }
 0x450   : > { %v4673_v28 = vsel %vm4597_vm11, %v3669_v4, 0.0  ;;  %4035 = vmatpush.bf16.msra.mxu1 %v6111_v35  ;;  %11181 = vst [vmem:[#allocation55_spill] sm:$0xff] %v9804_v23  ;;  %vm4598_vm12 = vcmp.lt.s32.totalorder %v9804_v23, %v9481_v50  ;;  %v5966_v23 = vld [vmem:[%s10896_s1 + $0x608] sm:$0xf] }
 0x451   : > { %v4718_v53 = vpack.c.bf16 %v4673_v28, %v9798_v46  ;;  %v4794_v32 = vadd.f32 %v4793_v18, %v4673_v28  ;;  %v4907_v41 = vmul.f32 %v4673_v28, %v4673_v28  ;;  %v3720_v63 = vpop.f32.mrf.mxu2  ;;  %6773 = vmatmul.lmr.bf16.gmra.16.mxu1  ;;  %v9814_v18 = vadd.s32 88, %v9479_v33  ;;  %v11183_v28 = vld [vmem:[#allocation65_spill] sm:$0xff] }
 0x452   : > { %v9807_v12 = vadd.f32 %v3769_v52, %v3720_v63  ;;  %v9820_v52 = vsel %vm4598_vm12, %v11183_v28, 0.0 }
 0x453   : > { %4750 = vst [vmem:[%s7630_s11 + $0x90] sm:$0xff] %v4718_v53  ;;  %v4963_v47 = vadd.f32 %v4962_v8, %v4907_v41  ;;  %v3622_v61 = vpop.f32.mrf.mxu0  ;;  %vm4599_vm13 = vcmp.lt.s32.totalorder %v9814_v18, %v9481_v50 }
 0x454   : > { %v3623_v43 = vadd.f32 %v3622_v61, %v9421_v42  ;;  %11182 = vst [vmem:[#allocation48_spill] sm:$0xff] %v9814_v18 }
 0x455   : > { %11184 = vst [vmem:[#allocation56_spill] sm:$0xff] %v9820_v52 }
 0x456   : > { %v3672_v4 = vadd.f32 %v3671_v20, %v3623_v43  ;;  %6686 = vmatmul.lmr.bf16.gmra.16.mxu0  ;;  %6833 = vmatmul.lmr.bf16.gmra.16.mxu2  ;;  %v6321_v43 = vld [vmem:[%s10896_s1 + $0xc] sm:$0xf] }
 0x457   : > { %v3771_v8 = vpop.f32.mrf.mxu3  ;;  %v5203_v20 = vor.u32 %v6321_v43, %v5200_v62  ;;  %v3673_v28 = vpop.f32.mrf.mxu1  ;;  %v11185_v43 = vld [vmem:[#allocation43_spill] sm:$0xff] }
 0x458   : > { %v4677_v42 = vsel %vm4598_vm12, %v3672_v4, 0.0 }
 0x459   : > { %v4720_v35 = vpack.c.bf16 %v4677_v42, %v9820_v52  ;;  %v4795_v53 = vadd.f32 %v4794_v32, %v4677_v42  ;;  %v4911_v41 = vmul.f32 %v4677_v42, %v4677_v42  ;;  %v3722_v63 = vpop.f32.mrf.mxu2  ;;  %4134 = vmatpush.bf16.msra.mxu3 %v5203_v20  ;;  %v5967_v42 = vor.u32 %v6515_v39, %v5966_v23  ;;  %6774 = vmatmul.lmr.bf16.gmra.16.mxu1 }
 0x45a   : > { %v9832_v61 = vadd.f32 %v3771_v8, %v3722_v63  ;;  %v6094_v8 = vld [vmem:[%s10896_s1 + $0x708] sm:$0xf] }
 0x45b   : > { %4752 = vst [vmem:[%s7630_s11 + $0xa0] sm:$0xff] %v4720_v35  ;;  %v4964_v4 = vadd.f32 %v4963_v47, %v4911_v41  ;;  %v3624_v46 = vpop.f32.mrf.mxu0  ;;  %v6547_v47 = vld [vmem:[%s10896_s1 + $0x714] sm:$0xf0]  ;;  %3987 = vmatpush.bf16.msra.mxu0 %v5967_v42  ;;  %v9861_v41 = vadd.s32 96, %v9479_v33 }
 0x45c   : > { %v3625_v32 = vadd.f32 %v3624_v46, %v9426_v51  ;;  %3969 = vmatmul.bf16.gmra.mxu3 %v11185_v43  ;;  %v6095_v62 = vor.u32 %v6547_v47, %v6094_v8  ;;  %v11186_v51 = vld [vmem:[#allocation66_spill] sm:$0xff] }
 0x45d   : > { %v9855_v39 = vsel %vm4599_vm13, %v11186_v51, 0.0  ;;  %11188 = vst [vmem:[#allocation57_spill] sm:$0xff] %v9861_v41  ;;  %vm4600_vm14 = vcmp.lt.s32.totalorder %v9861_v41, %v9481_v50 }
 0x45e   : > { %v3674_v35 = vadd.f32 %v3673_v28, %v3625_v32  ;;  %6687 = vmatmul.lmr.bf16.gmra.16.mxu0  ;;  %6834 = vmatmul.lmr.bf16.gmra.16.mxu2  ;;  %11187 = vst [vmem:[#allocation49_spill] sm:$0xff] %v9855_v39 }
 0x45f   : > { %4036 = vmatpush.bf16.msra.mxu1 %v6095_v62  ;;  %v3774_v23 = vpop.f32.mrf.mxu3  ;;  %v3676_v8 = vpop.f32.mrf.mxu1 }
 0x460   : > { %v4681_v46 = vsel %vm4599_vm13, %v3674_v35, 0.0 }
 0x461   : > { %v4722_v63 = vpack.c.bf16 %v4681_v46, %v9855_v39  ;;  %v4796_v20 = vadd.f32 %v4795_v53, %v4681_v46  ;;  %v4915_v28 = vmul.f32 %v4681_v46, %v4681_v46  ;;  %v3725_v32 = vpop.f32.mrf.mxu2  ;;  %6775 = vmatmul.lmr.bf16.gmra.16.mxu1  ;;  %v11189_v39 = vld [vmem:[#allocation67_spill] sm:$0xff] }
 0x462   : > { %v9864_v42 = vadd.f32 %v3774_v23, %v3725_v32  ;;  %v9874_v53 = vsel %vm4600_vm14, %v11189_v39, 0.0 }
 0x463   : > { %4754 = vst [vmem:[%s7630_s11 + $0xb0] sm:$0xff] %v4722_v63  ;;  %v4965_v47 = vadd.f32 %v4964_v4, %v4915_v28  ;;  %v3627_v62 = vpop.f32.mrf.mxu0 }
 0x464   : > { %v3628_v51 = vadd.f32 %v3627_v62, %v9432_v14  ;;  %11190 = vst [vmem:[#allocation50_spill] sm:$0xff] %v9874_v53  ;;  %v9880_v14 = vadd.s32 104, %v9479_v33 }
 0x466   : > { %v3677_v35 = vadd.f32 %v3676_v8, %v3628_v51  ;;  %6688 = vmatmul.lmr.bf16.gmra.16.mxu0  ;;  %6835 = vmatmul.lmr.bf16.gmra.16.mxu2  ;;  %11191 = vst [vmem:[#allocation58_spill] sm:$0xff] %v9880_v14  ;;  %vm11033_vm15 = vcmp.lt.s32.totalorder %v9880_v14, %v9481_v50 }
 0x467   : > { %v3776_v46 = vpop.f32.mrf.mxu3  ;;  %v3678_v62 = vpop.f32.mrf.mxu1 }
 0x468   : > { %v4685_v4 = vsel %vm4600_vm14, %v3677_v35, 0.0  ;;  %v11192_v35 = vld [vmem:[#allocation45_spill] sm:$0xff] }
 0x469   : > { %v4724_v23 = vpack.c.bf16 %v4685_v4, %v9874_v53  ;;  %v4797_v63 = vadd.f32 %v4796_v20, %v4685_v4  ;;  %v4919_v28 = vmul.f32 %v4685_v4, %v4685_v4  ;;  %v3727_v32 = vpop.f32.mrf.mxu2  ;;  %6776 = vmatmul.lmr.bf16.gmra.16.mxu1  ;;  %v11193_v20 = vld [vmem:[#allocation68_spill] sm:$0xff] }
 0x46a   : > { %v9883_v8 = vadd.f32 %v3776_v46, %v3727_v32  ;;  %v9894_v4 = vsel %vm11033_vm15, %v11193_v20, 0.0  ;;  %v9900_v46 = vadd.s32 112, %v9479_v33 }
 0x46b   : > { %4756 = vst [vmem:[%s7630_s11 + $0xc0] sm:$0xff] %v4724_v23  ;;  %v4966_v51 = vadd.f32 %v4965_v47, %v4919_v28  ;;  %v3629_v39 = vpop.f32.mrf.mxu0 }
 0x46c   : > { %v3630_v52 = vadd.f32 %v3629_v39, %v9437_v30  ;;  %3974 = vmatmul.bf16.gmra.mxu3 %v11192_v35  ;;  %11194 = vst [vmem:[#allocation51_spill] sm:$0xff] %v9894_v4  ;;  %vm11013_vm0 = vcmp.lt.s32.totalorder %v9900_v46, %v9481_v50 }
 0x46d   : > { %11195 = vst [vmem:[#allocation59_spill] sm:$0xff] %v9900_v46 }
 0x46e   : > { %v3679_v43 = vadd.f32 %v3678_v62, %v3630_v52  ;;  %6689 = vmatmul.lmr.bf16.gmra.16.mxu0  ;;  %6836 = vmatmul.lmr.bf16.gmra.16.mxu2 }
 0x46f   : > { %v3779_v47 = vpop.f32.mrf.mxu3  ;;  %v3681_v39 = vpop.f32.mrf.mxu1 }
 0x470   : > { %v4689_v30 = vsel %vm11033_vm15, %v3679_v43, 0.0 }
 0x471   : > { %v4726_v23 = vpack.c.bf16 %v4689_v30, %v9894_v4  ;;  %v4798_v28 = vadd.f32 %v4797_v63, %v4689_v30  ;;  %v4923_v52 = vmul.f32 %v4689_v30, %v4689_v30  ;;  %v3730_v32 = vpop.f32.mrf.mxu2  ;;  %6777 = vmatmul.lmr.bf16.gmra.16.mxu1  ;;  %v6445_v63 = vld [vmem:[%s10896_s1 + $0x3ec] sm:$0xf]  ;;  %v5696_v30 = vld [vmem:[%s10896_s1 + $0x3f8] sm:$0xf0] }
 0x472   : > { %v9903_v62 = vadd.f32 %v3779_v47, %v3730_v32  ;;  %v9931_v32 = vadd.s32 120, %v9479_v33  ;;  %v5699_v18 = vor.u32 %v6445_v63, %v5696_v30  ;;  %v11199_v63 = vld [vmem:[#allocation21_spill] sm:$0xff] }
 0x473   : > { %4758 = vst [vmem:[%s7630_s11 + $0xd0] sm:$0xff] %v4726_v23  ;;  %v4967_v53 = vadd.f32 %v4966_v51, %v4923_v52  ;;  %v3632_v20 = vpop.f32.mrf.mxu0  ;;  %v11196_v51 = vld [vmem:[#allocation69_spill] sm:$0xff]  ;;  %v6477_v23 = vld [vmem:[%s10896_s1 + $0x4ec] sm:$0xf] }
 0x474   : > { %v3633_v35 = vadd.f32 %v3632_v20, %v9455_v16  ;;  %v9919_v16 = vsel %vm11013_vm0, %v11196_v51, 0.0  ;;  %v5824_v52 = vld [vmem:[%s10896_s1 + $0x4f8] sm:$0xf0]  ;;  %11198 = vst [vmem:[#allocation60_spill] sm:$0xff] %v9931_v32 }
 0x475   : > { %11197 = vst [vmem:[#allocation52_spill] sm:$0xff] %v9919_v16  ;;  %v5827_v49 = vor.u32 %v6477_v23, %v5824_v52  ;;  %v11201_v52 = vld [vmem:[#allocation70_spill] sm:$0xff] }
 0x476   : > { %v3682_v43 = vadd.f32 %v3681_v39, %v3633_v35  ;;  %6690 = vmatmul.lmr.bf16.gmra.16.mxu0  ;;  %6837 = vmatmul.lmr.bf16.gmra.16.mxu2 }
 0x477   : > { %v3781_v47 = vpop.f32.mrf.mxu3 }
 0x478   : > { %v4693_v35 = vsel %vm11013_vm0, %v3682_v43, 0.0  ;;  %v3683_v43 = vpop.f32.mrf.mxu1  ;;  %vm4603_vm0 = vcmp.lt.s32.totalorder %v9931_v32, %v9481_v50  ;;  %v6409_v32 = vld [vmem:[%s10896_s1 + $0x2cc] sm:$0xf] }
 0x479   : > { %v4728_v39 = vpack.c.bf16 %v4693_v35, %v9919_v16  ;;  %v4799_v20 = vadd.f32 %v4798_v28, %v4693_v35  ;;  %v4927_v51 = vmul.f32 %v4693_v35, %v4693_v35  ;;  %v3732_v4 = vpop.f32.mrf.mxu2  ;;  %v5680_v28 = vld [vmem:[%s10896_s1 + $0x3d8] sm:$0xf0]  ;;  %6778 = vmatmul.lmr.bf16.gmra.16.mxu1 }
 0x47a   : > { %v9934_v14 = vadd.f32 %v3781_v47, %v3732_v4  ;;  %v6473_v4 = vld [vmem:[%s10896_s1 + $0x4cc] sm:$0xf]  ;;  %v5568_v35 = vld [vmem:[%s10896_s1 + $0x2f8] sm:$0xf0]  ;;  %v5683_v47 = vor.u32 %v6441_v11, %v5680_v28 }
 0x47b   : > { %4760 = vst [vmem:[%s7630_s11 + $0xe0] sm:$0xff] %v4728_v39  ;;  %v4968_v46 = vadd.f32 %v4967_v53, %v4927_v51  ;;  %v3634_v41 = vpop.f32.mrf.mxu0  ;;  %v5808_v53 = vld [vmem:[%s10896_s1 + $0x4d8] sm:$0xf0]  ;;  %v6381_v39 = vld [vmem:[%s10896_s1 + $0x1ec] sm:$0xf] }
 0x47c   : > { %v3635_v29 = vadd.f32 %v3634_v41, %v9485_v37  ;;  %4135 = vmatmul.bf16.vlgmr.msra.gmra.mxu3 %v11199_v63  ;;  %v11200_v37 = vld [vmem:[#allocation46_spill] sm:$0xff]  ;;  %v6413_v41 = vld [vmem:[%s10896_s1 + $0x2ec] sm:$0xf]  ;;  %v5811_v23 = vor.u32 %v6473_v4, %v5808_v53  ;;  %v5440_v11 = vld [vmem:[%s10896_s1 + $0x1f8] sm:$0xf0] }
 0x47d   : > { %4323 = vmatpush.bf16.msra.mxu3 %v5827_v49  ;;  %v5571_v63 = vor.u32 %v6413_v41, %v5568_v35  ;;  %v5443_v16 = vor.u32 %v6381_v39, %v5440_v11  ;;  %v6377_v41 = vld [vmem:[%s10896_s1 + $0x1cc] sm:$0xf] }
 0x47e   : > { %v3684_v30 = vadd.f32 %v3683_v43, %v3635_v29  ;;  %6691 = vmatmul.lmr.bf16.gmra.16.mxu0  ;;  %6292 = vmatmul.msk.bf16.vlgmr.msra.gmra.mxu2 %vm2779_vm1, %v11200_v37  ;;  %v9965_v29 = vsel %vm4603_vm0, %v11201_v52, 0.0  ;;  %v11205_v35 = vld [vmem:[#allocation23_spill] sm:$0xff] }
 0x47f   : > { %4274 = vmatpush.bf16.msra.mxu2 %v5699_v18  ;;  %11202 = vst [vmem:[#allocation53_spill] sm:$0xff] %v9965_v29  ;;  %v3940_v18 = vpop.f32.mrf.mxu3 }
 0x480   : > { %v4697_v49 = vsel %vm4603_vm0, %v3684_v30, 0.0  ;;  %v3842_v53 = vpop.f32.mrf.mxu1  ;;  %6787 = vllmr.16.mxu1 }
 0x481   : > { %v4730_v51 = vpack.c.bf16 %v4697_v49, %v9965_v29  ;;  %v9977_v43 = vadd.f32 %v4799_v20, %v4697_v49  ;;  %v4931_v28 = vmul.f32 %v4697_v49, %v4697_v49  ;;  %v3891_v4 = vpop.f32.mrf.mxu2  ;;  %4324 = vmatpush.bf16.msra.mxu3 %v5811_v23  ;;  %v5552_v20 = vld [vmem:[%s10896_s1 + $0x2d8] sm:$0xf0]  ;;  %4037 = vmatmul.bf16.vlgmr.msra.gmra.mxu1 %v11205_v35  ;;  %v11206_v23 = vld [vmem:[#allocation22_spill] sm:$0xff] }
 0x482   : > { %4225 = vmatpush.bf16.msra.mxu1 %v5571_v63  ;;  %v5555_v39 = vor.u32 %v6409_v32, %v5552_v20  ;;  %v6469_v32 = vld [vmem:[%s10896_s1 + $0x4ac] sm:$0xf]  ;;  %v5792_v63 = vld [vmem:[%s10896_s1 + $0x4b8] sm:$0xf0] }
 0x483   : > { %11203 = vst [vmem:[#allocation61_spill] sm:$0xff] %v9977_v43  ;;  %v9980_v30 = vadd.f32 %v4968_v46, %v4931_v28  ;;  %v3793_v52 = vpop.f32.mrf.mxu0  ;;  %4275 = vmatpush.bf16.msra.mxu2 %v5683_v47  ;;  %v5424_v46 = vld [vmem:[%s10896_s1 + $0x1d8] sm:$0xf0]  ;;  %v6437_v28 = vld [vmem:[%s10896_s1 + $0x3ac] sm:$0xf] }
 0x484   : > { %4762 = vst [vmem:[%s7630_s11 + $0xf0] sm:$0xff] %v4730_v51  ;;  %v3794_v49 = vadd.f32 %v3793_v52, %v9483_v21  ;;  %v5427_v11 = vor.u32 %v6377_v41, %v5424_v46  ;;  %v5664_v52 = vld [vmem:[%s10896_s1 + $0x3b8] sm:$0xf0]  ;;  %v6405_v20 = vld [vmem:[%s10896_s1 + $0x2ac] sm:$0xf] }
 0x485   : > { %11204 = vst [vmem:[#allocation54_spill] sm:$0xff] %v9980_v30  ;;  %6700 = vllmr.16.mxu0  ;;  %v5667_v30 = vor.u32 %v6437_v28, %v5664_v52  ;;  %v5536_v41 = vld [vmem:[%s10896_s1 + $0x2b8] sm:$0xf0]  ;;  %v5795_v52 = vor.u32 %v6469_v32, %v5792_v63  ;;  %v6433_v32 = vld [vmem:[%s10896_s1 + $0x38c] sm:$0xf] }
 0x486   : > { %v3843_v47 = vadd.f32 %v3842_v53, %v3794_v49  ;;  %3988 = vmatmul.bf16.vlgmr.msra.gmra.mxu0 %v11206_v23  ;;  %v6373_v53 = vld [vmem:[%s10896_s1 + $0x1ac] sm:$0xf]  ;;  %4226 = vmatpush.bf16.msra.mxu1 %v5555_v39  ;;  %v5539_v39 = vor.u32 %v6405_v20, %v5536_v41 }
 0x487   : > { %4176 = vmatpush.bf16.msra.mxu0 %v5443_v16  ;;  %v3942_v51 = vpop.f32.mrf.mxu3  ;;  %v5408_v16 = vld [vmem:[%s10896_s1 + $0x1b8] sm:$0xf0]  ;;  %4276 = vmatpush.bf16.msra.mxu2 %v5667_v30 }
 0x488   : > { %v3892_v21 = vadd.f32 %v3891_v4, %v3843_v47  ;;  %v3844_v4 = vpop.f32.mrf.mxu1  ;;  %v5411_v28 = vor.u32 %v6373_v53, %v5408_v16  ;;  %4325 = vmatpush.bf16.msra.mxu3 %v5795_v52 }
 0x489   : > { %v3893_v49 = vpop.f32.mrf.mxu2 }
 0x48a   : > { %v10021_v46 = vadd.f32 %v3940_v18, %v3892_v21  ;;  %4227 = vmatpush.bf16.msra.mxu1 %v5539_v39 }
 0x48b   : > { %v3795_v47 = vpop.f32.mrf.mxu0  ;;  %4177 = vmatpush.bf16.msra.mxu0 %v5427_v11 }
 0x48c   : > { %v3796_v43 = vadd.f32 %v3795_v47, %v9516_v58  ;;  %4140 = vmatmul.bf16.gmra.mxu3 %v8090_v48  ;;  %v11207_v48 = vld [vmem:[#allocation24_spill] sm:$0xff]  ;;  %v6401_v47 = vld [vmem:[%s10896_s1 + $0x28c] sm:$0xf] }
 0x48d   : > { %6846 = vllmr.16.mxu2 }
 0x48e   : > { %v3845_v29 = vadd.f32 %v3844_v4, %v3796_v43  ;;  %6293 = vmatmul.msk.bf16.gmra.mxu2 %vm2779_vm1, %v8682_v25  ;;  %v5776_v4 = vld [vmem:[%s10896_s1 + $0x498] sm:$0xf0] }
 0x48f   : > { %4178 = vmatpush.bf16.msra.mxu0 %v5411_v28  ;;  %v3945_v18 = vpop.f32.mrf.mxu3  ;;  %v5520_v28 = vld [vmem:[%s10896_s1 + $0x298] sm:$0xf0] }
 0x490   : > { %v3894_v23 = vadd.f32 %v3893_v49, %v3845_v29  ;;  %v3847_v35 = vpop.f32.mrf.mxu1  ;;  %v5648_v29 = vld [vmem:[%s10896_s1 + $0x398] sm:$0xf0]  ;;  %v6465_v49 = vld [vmem:[%s10896_s1 + $0x48c] sm:$0xf] }
 0x491   : > { %v3896_v21 = vpop.f32.mrf.mxu2  ;;  %4042 = vmatmul.bf16.gmra.mxu1 %v11128_v2  ;;  %v5779_v41 = vor.u32 %v6465_v49, %v5776_v4  ;;  %v6429_v4 = vld [vmem:[%s10896_s1 + $0x36c] sm:$0xf] }
 0x492   : > { %v10027_v11 = vadd.f32 %v3942_v51, %v3894_v23  ;;  %v6369_v23 = vld [vmem:[%s10896_s1 + $0x18c] sm:$0xf]  ;;  %v5651_v51 = vor.u32 %v6433_v32, %v5648_v29 }
 0x493   : > { %v3798_v30 = vpop.f32.mrf.mxu0  ;;  %4326 = vmatpush.bf16.msra.mxu3 %v5779_v41  ;;  %v6461_v41 = vld [vmem:[%s10896_s1 + $0x46c] sm:$0xf] }
 0x494   : > { %v3799_v53 = vadd.f32 %v3798_v30, %v9561_v5  ;;  %4277 = vmatpush.bf16.msra.mxu2 %v5651_v51 }
 0x496   : > { %v3848_v58 = vadd.f32 %v3847_v35, %v3799_v53  ;;  %3993 = vmatmul.bf16.gmra.mxu0 %v11207_v48  ;;  %v5392_v35 = vld [vmem:[%s10896_s1 + $0x198] sm:$0xf0] }
 0x497   : > { %v3947_v16 = vpop.f32.mrf.mxu3  ;;  %v5395_v20 = vor.u32 %v6369_v23, %v5392_v35  ;;  %v11208_v35 = vld [vmem:[#allocation26_spill] sm:$0xff] }
 0x498   : > { %v3897_v43 = vadd.f32 %v3896_v21, %v3848_v58  ;;  %v3849_v63 = vpop.f32.mrf.mxu1  ;;  %v5523_v21 = vor.u32 %v6401_v47, %v5520_v28  ;;  %v5760_v47 = vld [vmem:[%s10896_s1 + $0x478] sm:$0xf0] }
 0x499   : > { %v3898_v5 = vpop.f32.mrf.mxu2  ;;  %4179 = vmatpush.bf16.msra.mxu0 %v5395_v20  ;;  %v5376_v20 = vld [vmem:[%s10896_s1 + $0x178] sm:$0xf0] }
 0x49a   : > { %v10056_v52 = vadd.f32 %v3945_v18, %v3897_v43  ;;  %4228 = vmatpush.bf16.msra.mxu1 %v5523_v21  ;;  %v5763_v21 = vor.u32 %v6461_v41, %v5760_v47  ;;  %v6425_v47 = vld [vmem:[%s10896_s1 + $0x34c] sm:$0xf] }
 0x49b   : > { %v3800_v39 = vpop.f32.mrf.mxu0 }
 0x49c   : > { %v3801_v30 = vadd.f32 %v3800_v39, %v9581_v44  ;;  %4145 = vmatmul.bf16.gmra.mxu3 %v8131_v27 }
 0x49d   : > { %4327 = vmatpush.bf16.msra.mxu3 %v5763_v21  ;;  %v6457_v21 = vld [vmem:[%s10896_s1 + $0x44c] sm:$0xf] }
 0x49e   : > { %v3850_v53 = vadd.f32 %v3849_v63, %v3801_v30  ;;  %6294 = vmatmul.msk.bf16.gmra.mxu2 %vm2779_vm1, %v8723_v60  ;;  %v6397_v30 = vld [vmem:[%s10896_s1 + $0x26c] sm:$0xf] }
 0x49f   : > { %v3950_v32 = vpop.f32.mrf.mxu3 }
 0x4a0   : > { %v3899_v58 = vadd.f32 %v3898_v5, %v3850_v53  ;;  %v3852_v23 = vpop.f32.mrf.mxu1  ;;  %v5632_v5 = vld [vmem:[%s10896_s1 + $0x378] sm:$0xf0] }
 0x4a1   : > { %v3901_v29 = vpop.f32.mrf.mxu2  ;;  %4047 = vmatmul.bf16.gmra.mxu1 %v11132_v3  ;;  %v5635_v63 = vor.u32 %v6429_v4, %v5632_v5  ;;  %v5504_v53 = vld [vmem:[%s10896_s1 + $0x278] sm:$0xf0] }
 0x4a2   : > { %v10062_v18 = vadd.f32 %v3947_v16, %v3899_v58  ;;  %v6365_v16 = vld [vmem:[%s10896_s1 + $0x16c] sm:$0xf] }
 0x4a3   : > { %v3803_v43 = vpop.f32.mrf.mxu0  ;;  %v5379_v39 = vor.u32 %v6365_v16, %v5376_v20  ;;  %4278 = vmatpush.bf16.msra.mxu2 %v5635_v63  ;;  %v11209_v20 = vld [vmem:[#allocation29_spill] sm:$0xff] }
 0x4a4   : > { %v3804_v51 = vadd.f32 %v3803_v43, %v9620_v7 }
 0x4a5   : > { %4180 = vmatpush.bf16.msra.mxu0 %v5379_v39  ;;  %v5360_v39 = vld [vmem:[%s10896_s1 + $0x158] sm:$0xf0] }
 0x4a6   : > { %v3853_v44 = vadd.f32 %v3852_v23, %v3804_v51  ;;  %3998 = vmatmul.bf16.gmra.mxu0 %v11208_v35  ;;  %v5507_v23 = vor.u32 %v6397_v30, %v5504_v53  ;;  %v5744_v30 = vld [vmem:[%s10896_s1 + $0x458] sm:$0xf0] }
 0x4a7   : > { %v3952_v49 = vpop.f32.mrf.mxu3 }
 0x4a8   : > { %v3902_v27 = vadd.f32 %v3901_v29, %v3853_v44  ;;  %v3854_v28 = vpop.f32.mrf.mxu1  ;;  %4229 = vmatpush.bf16.msra.mxu1 %v5507_v23  ;;  %v5747_v23 = vor.u32 %v6457_v21, %v5744_v30  ;;  %v6421_v30 = vld [vmem:[%s10896_s1 + $0x32c] sm:$0xf] }
 0x4a9   : > { %v3903_v7 = vpop.f32.mrf.mxu2 }
 0x4aa   : > { %v10091_v58 = vadd.f32 %v3950_v32, %v3902_v27  ;;  %4328 = vmatpush.bf16.msra.mxu3 %v5747_v23  ;;  %v6453_v23 = vld [vmem:[%s10896_s1 + $0x42c] sm:$0xf] }
 0x4ab   : > { %v3805_v29 = vpop.f32.mrf.mxu0 }
 0x4ac   : > { %v3806_v43 = vadd.f32 %v3805_v29, %v9640_v57  ;;  %4150 = vmatmul.bf16.gmra.mxu3 %v8174_v26 }
 0x4ae   : > { %v3855_v51 = vadd.f32 %v3854_v28, %v3806_v43  ;;  %6295 = vmatmul.msk.bf16.gmra.mxu2 %vm2779_vm1, %v8761_v17  ;;  %v6393_v43 = vld [vmem:[%s10896_s1 + $0x24c] sm:$0xf] }
 0x4af   : > { %v3955_v4 = vpop.f32.mrf.mxu3 }
 0x4b0   : > { %v3904_v44 = vadd.f32 %v3903_v7, %v3855_v51  ;;  %v3857_v16 = vpop.f32.mrf.mxu1  ;;  %v5616_v7 = vld [vmem:[%s10896_s1 + $0x358] sm:$0xf0] }
 0x4b1   : > { %v3906_v5 = vpop.f32.mrf.mxu2  ;;  %4052 = vmatmul.bf16.gmra.mxu1 %v11134_v45  ;;  %v5619_v28 = vor.u32 %v6425_v47, %v5616_v7  ;;  %v5488_v51 = vld [vmem:[%s10896_s1 + $0x258] sm:$0xf0] }
 0x4b2   : > { %v10097_v32 = vadd.f32 %v3952_v49, %v3904_v44  ;;  %v6361_v49 = vld [vmem:[%s10896_s1 + $0x14c] sm:$0xf] }
 0x4b3   : > { %v3808_v27 = vpop.f32.mrf.mxu0  ;;  %v5363_v29 = vor.u32 %v6361_v49, %v5360_v39  ;;  %4279 = vmatpush.bf16.msra.mxu2 %v5619_v28  ;;  %v11210_v39 = vld [vmem:[#allocation33_spill] sm:$0xff] }
 0x4b4   : > { %v3809_v63 = vadd.f32 %v3808_v27, %v9685_v31 }
 0x4b5   : > { %4181 = vmatpush.bf16.msra.mxu0 %v5363_v29  ;;  %v5344_v29 = vld [vmem:[%s10896_s1 + $0x138] sm:$0xf0] }
 0x4b6   : > { %v3858_v57 = vadd.f32 %v3857_v16, %v3809_v63  ;;  %4003 = vmatmul.bf16.gmra.mxu0 %v11209_v20  ;;  %v5491_v16 = vor.u32 %v6393_v43, %v5488_v51  ;;  %v5728_v43 = vld [vmem:[%s10896_s1 + $0x438] sm:$0xf0] }
 0x4b7   : > { %v3957_v41 = vpop.f32.mrf.mxu3 }
 0x4b8   : > { %v3907_v26 = vadd.f32 %v3906_v5, %v3858_v57  ;;  %v3859_v53 = vpop.f32.mrf.mxu1  ;;  %4230 = vmatpush.bf16.msra.mxu1 %v5491_v16  ;;  %v5731_v16 = vor.u32 %v6453_v23, %v5728_v43  ;;  %v6417_v43 = vld [vmem:[%s10896_s1 + $0x30c] sm:$0xf] }
 0x4b9   : > { %v3908_v31 = vpop.f32.mrf.mxu2 }
 0x4ba   : > { %v10126_v44 = vadd.f32 %v3955_v4, %v3907_v26  ;;  %4329 = vmatpush.bf16.msra.mxu3 %v5731_v16  ;;  %v6449_v16 = vld [vmem:[%s10896_s1 + $0x40c] sm:$0xf] }
 0x4bb   : > { %v3810_v5 = vpop.f32.mrf.mxu0 }
 0x4bc   : > { %v3811_v27 = vadd.f32 %v3810_v5, %v9705_v15  ;;  %4155 = vmatmul.bf16.gmra.mxu3 %v8217_v36 }
 0x4be   : > { %v3860_v63 = vadd.f32 %v3859_v53, %v3811_v27  ;;  %6296 = vmatmul.msk.bf16.gmra.mxu2 %vm2779_vm1, %v8798_v1  ;;  %v6389_v27 = vld [vmem:[%s10896_s1 + $0x22c] sm:$0xf] }
 0x4bf   : > { %v3960_v47 = vpop.f32.mrf.mxu3 }
 0x4c0   : > { %v3909_v57 = vadd.f32 %v3908_v31, %v3860_v63  ;;  %v3862_v49 = vpop.f32.mrf.mxu1  ;;  %v5600_v31 = vld [vmem:[%s10896_s1 + $0x338] sm:$0xf0] }
 0x4c1   : > { %v3911_v7 = vpop.f32.mrf.mxu2  ;;  %4057 = vmatmul.bf16.gmra.mxu1 %v11135_v40  ;;  %v5603_v53 = vor.u32 %v6421_v30, %v5600_v31  ;;  %v5472_v63 = vld [vmem:[%s10896_s1 + $0x238] sm:$0xf0] }
 0x4c2   : > { %v10132_v4 = vadd.f32 %v3957_v41, %v3909_v57  ;;  %v6357_v41 = vld [vmem:[%s10896_s1 + $0x12c] sm:$0xf] }
 0x4c3   : > { %v3813_v26 = vpop.f32.mrf.mxu0  ;;  %v5347_v5 = vor.u32 %v6357_v41, %v5344_v29  ;;  %4280 = vmatpush.bf16.msra.mxu2 %v5603_v53  ;;  %v11211_v29 = vld [vmem:[#allocation36_spill] sm:$0xff] }
 0x4c4   : > { %v3814_v28 = vadd.f32 %v3813_v26, %v9744_v38 }
 0x4c5   : > { %4182 = vmatpush.bf16.msra.mxu0 %v5347_v5  ;;  %v5328_v5 = vld [vmem:[%s10896_s1 + $0x118] sm:$0xf0] }
 0x4c6   : > { %v3863_v15 = vadd.f32 %v3862_v49, %v3814_v28  ;;  %4008 = vmatmul.bf16.gmra.mxu0 %v11210_v39  ;;  %v5475_v49 = vor.u32 %v6389_v27, %v5472_v63  ;;  %v5712_v27 = vld [vmem:[%s10896_s1 + $0x418] sm:$0xf0] }
 0x4c7   : > { %v3962_v21 = vpop.f32.mrf.mxu3 }
 0x4c8   : > { %v3912_v36 = vadd.f32 %v3911_v7, %v3863_v15  ;;  %v3864_v51 = vpop.f32.mrf.mxu1  ;;  %4231 = vmatpush.bf16.msra.mxu1 %v5475_v49  ;;  %v5715_v49 = vor.u32 %v6449_v16, %v5712_v27 }
 0x4c9   : > { %v3913_v38 = vpop.f32.mrf.mxu2 }
 0x4ca   : > { %v10161_v57 = vadd.f32 %v3960_v47, %v3912_v36  ;;  %4330 = vmatpush.bf16.msra.mxu3 %v5715_v49 }
 0x4cb   : > { %v3815_v7 = vpop.f32.mrf.mxu0 }
 0x4cc   : > { %v3816_v26 = vadd.f32 %v3815_v7, %v9763_v19  ;;  %4160 = vmatmul.bf16.gmra.mxu3 %v8262_v10 }
 0x4ce   : > { %v3865_v28 = vadd.f32 %v3864_v51, %v3816_v26  ;;  %6297 = vmatmul.msk.bf16.gmra.mxu2 %vm2779_vm1, %v8835_v9  ;;  %v6385_v26 = vld [vmem:[%s10896_s1 + $0x20c] sm:$0xf] }
 0x4cf   : > { %v3965_v30 = vpop.f32.mrf.mxu3 }
 0x4d0   : > { %v3914_v15 = vadd.f32 %v3913_v38, %v3865_v28  ;;  %v3867_v41 = vpop.f32.mrf.mxu1  ;;  %v5584_v38 = vld [vmem:[%s10896_s1 + $0x318] sm:$0xf0] }
 0x4d1   : > { %v3916_v31 = vpop.f32.mrf.mxu2  ;;  %4062 = vmatmul.bf16.gmra.mxu1 %v11136_v59  ;;  %v5587_v51 = vor.u32 %v6417_v43, %v5584_v38  ;;  %v5456_v28 = vld [vmem:[%s10896_s1 + $0x218] sm:$0xf0] }
 0x4d2   : > { %v10167_v47 = vadd.f32 %v3962_v21, %v3914_v15  ;;  %v6353_v21 = vld [vmem:[%s10896_s1 + $0x10c] sm:$0xf] }
 0x4d3   : > { %v3818_v36 = vpop.f32.mrf.mxu0  ;;  %v5331_v7 = vor.u32 %v6353_v21, %v5328_v5  ;;  %4281 = vmatpush.bf16.msra.mxu2 %v5587_v51  ;;  %v11212_v5 = vld [vmem:[#allocation39_spill] sm:$0xff] }
 0x4d4   : > { %v3819_v53 = vadd.f32 %v3818_v36, %v9807_v12 }
 0x4d5   : > { %4183 = vmatpush.bf16.msra.mxu0 %v5331_v7 }
 0x4d6   : > { %v3868_v19 = vadd.f32 %v3867_v41, %v3819_v53  ;;  %4013 = vmatmul.bf16.gmra.mxu0 %v11211_v29  ;;  %v5459_v41 = vor.u32 %v6385_v26, %v5456_v28 }
 0x4d7   : > { %v3967_v23 = vpop.f32.mrf.mxu3 }
 0x4d8   : > { %v3917_v10 = vadd.f32 %v3916_v31, %v3868_v19  ;;  %v3869_v63 = vpop.f32.mrf.mxu1  ;;  %4232 = vmatpush.bf16.msra.mxu1 %v5459_v41 }
 0x4d9   : > { %v3918_v12 = vpop.f32.mrf.mxu2 }
 0x4da   : > { %v10196_v15 = vadd.f32 %v3965_v30, %v3917_v10 }
 0x4db   : > { %v3820_v31 = vpop.f32.mrf.mxu0 }
 0x4dc   : > { %v3821_v36 = vadd.f32 %v3820_v31, %v9832_v61  ;;  %4165 = vmatmul.bf16.gmra.mxu3 %v8307_v55 }
 0x4de   : > { %v3870_v53 = vadd.f32 %v3869_v63, %v3821_v36  ;;  %6298 = vmatmul.msk.bf16.gmra.mxu2 %vm2779_vm1, %v8872_v0 }
 0x4df   : > { %v3970_v43 = vpop.f32.mrf.mxu3 }
 0x4e0   : > { %v3919_v19 = vadd.f32 %v3918_v12, %v3870_v53  ;;  %v3872_v21 = vpop.f32.mrf.mxu1 }
 0x4e1   : > { %v3921_v38 = vpop.f32.mrf.mxu2  ;;  %4067 = vmatmul.bf16.gmra.mxu1 %v11137_v24 }
 0x4e2   : > { %v10202_v30 = vadd.f32 %v3967_v23, %v3919_v19 }
 0x4e3   : > { %v3823_v10 = vpop.f32.mrf.mxu0 }
 0x4e4   : > { %v3824_v51 = vadd.f32 %v3823_v10, %v9864_v42  ;;  %v6573_v10 = vld [vmem:[%s10896_s1 + $0x7ec] sm:$0xf] }
 0x4e6   : > { %v3873_v61 = vadd.f32 %v3872_v21, %v3824_v51  ;;  %4018 = vmatmul.bf16.gmra.mxu0 %v11212_v5 }
 0x4e7   : > { %v3972_v16 = vpop.f32.mrf.mxu3 }
 0x4e8   : > { %v3922_v55 = vadd.f32 %v3921_v38, %v3873_v61  ;;  %v3874_v63 = vpop.f32.mrf.mxu1 }
 0x4e9   : > { %v3923_v27 = vpop.f32.mrf.mxu2 }
 0x4ea   : > { %v10207_v7 = vadd.f32 %v3970_v43, %v3922_v55  ;;  %v11213_v43 = vld [vmem:[#allocation42_spill] sm:$0xff] }
 0x4eb   : > { %v3825_v12 = vpop.f32.mrf.mxu0 }
 0x4ec   : > { %v3826_v49 = vadd.f32 %v3825_v12, %v9883_v8  ;;  %4170 = vmatmul.bf16.gmra.mxu3 %v8324_v6  ;;  %v6589_v6 = vld [vmem:[%s10896_s1 + $0x86c] sm:$0xf]  ;;  %v6272_v8 = vld [vmem:[%s10896_s1 + $0x878] sm:$0xf0] }
 0x4ed   : > { %v6275_v55 = vor.u32 %v6589_v6, %v6272_v8 }
 0x4ee   : > { %v3875_v23 = vadd.f32 %v3874_v63, %v3826_v49  ;;  %6299 = vmatmul.msk.bf16.gmra.mxu2 %vm2779_vm1, %v8885_v13  ;;  %v6569_v49 = vld [vmem:[%s10896_s1 + $0x7cc] sm:$0xf] }
 0x4ef   : > { %v3975_v26 = vpop.f32.mrf.mxu3 }
 0x4f0   : > { %v3924_v42 = vadd.f32 %v3923_v27, %v3875_v23  ;;  %v3877_v31 = vpop.f32.mrf.mxu1  ;;  %v6192_v23 = vld [vmem:[%s10896_s1 + $0x7d8] sm:$0xf0] }
 0x4f1   : > { %v3926_v28 = vpop.f32.mrf.mxu2  ;;  %4072 = vmatmul.bf16.gmra.mxu1 %v11138_v22 }
 0x4f2   : > { %v10213_v41 = vadd.f32 %v3972_v16, %v3924_v42 }
 0x4f3   : > { %v3828_v36 = vpop.f32.mrf.mxu0 }
 0x4f4   : > { %v3829_v53 = vadd.f32 %v3828_v36, %v9903_v62  ;;  %v6208_v62 = vld [vmem:[%s10896_s1 + $0x7f8] sm:$0xf0] }
 0x4f5   : > { %v6211_v63 = vor.u32 %v6573_v10, %v6208_v62  ;;  %v5952_v36 = vld [vmem:[%s10896_s1 + $0x5f8] sm:$0xf0] }
 0x4f6   : > { %v3878_v19 = vadd.f32 %v3877_v31, %v3829_v53  ;;  %4023 = vmatmul.bf16.gmra.mxu0 %v11213_v43  ;;  %v6541_v53 = vld [vmem:[%s10896_s1 + $0x6ec] sm:$0xf] }
 0x4f7   : > { %v3977_v21 = vpop.f32.mrf.mxu3 }
 0x4f8   : > { %v3927_v38 = vadd.f32 %v3926_v28, %v3878_v19  ;;  %v3879_v61 = vpop.f32.mrf.mxu1  ;;  %v6195_v28 = vor.u32 %v6569_v49, %v6192_v23  ;;  %v6080_v19 = vld [vmem:[%s10896_s1 + $0x6f8] sm:$0xf0] }
 0x4f9   : > { %v3928_v51 = vpop.f32.mrf.mxu2 }
 0x4fa   : > { %v10230_v16 = vadd.f32 %v3975_v26, %v3927_v38  ;;  %v6509_v26 = vld [vmem:[%s10896_s1 + $0x5ec] sm:$0xf] }
 0x4fb   : > { %v3830_v27 = vpop.f32.mrf.mxu0  ;;  %v5955_v62 = vor.u32 %v6509_v26, %v5952_v36 }
 0x4fc   : > { %v3831_v12 = vadd.f32 %v3830_v27, %v9934_v14  ;;  %6878 = vmatmul.lmr.bf16.vlgmr.msra.gmra.16.mxu3  ;;  %v5936_v27 = vld [vmem:[%s10896_s1 + $0x5d8] sm:$0xf0] }
 0x4fd   : > { %4523 = vmatpush.bf16.msra.mxu3 %v6275_v55 }
 0x4fe   : > { %v3880_v42 = vadd.f32 %v3879_v61, %v3831_v12  ;;  %6847 = vmatmul.lmr.bf16.vlgmr.msra.gmra.16.mxu2  ;;  %v6505_v61 = vld [vmem:[%s10896_s1 + $0x5cc] sm:$0xf] }
 0x4ff   : > { %4470 = vmatpush.bf16.msra.mxu2 %v6211_v63  ;;  %v10242_v14 = vpop.f32.mrf.mxu3  ;;  %v6537_v63 = vld [vmem:[%s10896_s1 + $0x6cc] sm:$0xf] }
 0x500   : > { %v3929_v31 = vadd.f32 %v3928_v51, %v3880_v42  ;;  %v4038_v8 = vpop.f32.mrf.mxu1  ;;  %v6083_v51 = vor.u32 %v6541_v53, %v6080_v19  ;;  %v6565_v53 = vld [vmem:[%s10896_s1 + $0x7ac] sm:$0xf]  ;;  %v6176_v19 = vld [vmem:[%s10896_s1 + $0x7b8] sm:$0xf0] }
 0x501   : > { %v4087_v6 = vpop.f32.mrf.mxu2  ;;  %6788 = vmatmul.lmr.bf16.vlgmr.msra.gmra.16.mxu1 }
 0x502   : > { %v10253_v38 = vadd.f32 %v3977_v21, %v3929_v31  ;;  %v6064_v21 = vld [vmem:[%s10896_s1 + $0x6d8] sm:$0xf0]  ;;  %4421 = vmatpush.bf16.msra.mxu1 %v6083_v51 }
 0x503   : > { %v3989_v10 = vpop.f32.mrf.mxu0  ;;  %4471 = vmatpush.bf16.msra.mxu2 %v6195_v28  ;;  %v6067_v49 = vor.u32 %v6537_v63, %v6064_v21  ;;  %v6256_v51 = vld [vmem:[%s10896_s1 + $0x858] sm:$0xf0] }
 0x504   : > { %v3990_v55 = vadd.f32 %v3989_v10, %v10021_v46  ;;  %6879 = vmatmul.lmr.bf16.gmra.16.mxu3  ;;  %v5939_v46 = vor.u32 %v6505_v61, %v5936_v27  ;;  %v6179_v10 = vor.u32 %v6565_v53, %v6176_v19  ;;  %v6533_v27 = vld [vmem:[%s10896_s1 + $0x6ac] sm:$0xf]  ;;  %v6048_v63 = vld [vmem:[%s10896_s1 + $0x6b8] sm:$0xf0] }
 0x506   : > { %v4039_v12 = vadd.f32 %v4038_v8, %v3990_v55  ;;  %6701 = vmatmul.lmr.bf16.vlgmr.msra.gmra.16.mxu0  ;;  %6848 = vmatmul.lmr.bf16.gmra.16.mxu2 }
 0x507   : > { %4372 = vmatpush.bf16.msra.mxu0 %v5955_v62  ;;  %v10270_v42 = vpop.f32.mrf.mxu3  ;;  %4422 = vmatpush.bf16.msra.mxu1 %v6067_v49  ;;  %v6585_v62 = vld [vmem:[%s10896_s1 + $0x84c] sm:$0xf] }
 0x508   : > { %v10268_v23 = vadd.f32 %v4087_v6, %v4039_v12  ;;  %v4040_v28 = vpop.f32.mrf.mxu1  ;;  %v6501_v6 = vld [vmem:[%s10896_s1 + $0x5ac] sm:$0xf]  ;;  %v6259_v55 = vor.u32 %v6585_v62, %v6256_v51  ;;  %4472 = vmatpush.bf16.msra.mxu2 %v6179_v10 }
 0x509   : > { %v4089_v26 = vpop.f32.mrf.mxu2  ;;  %6789 = vmatmul.lmr.bf16.gmra.16.mxu1  ;;  %v6561_v62 = vld [vmem:[%s10896_s1 + $0x78c] sm:$0xf] }
 0x50a   : > { %4524 = vmatpush.bf16.msra.mxu3 %v6259_v55  ;;  %v6497_v51 = vld [vmem:[%s10896_s1 + $0x58c] sm:$0xf] }
 0x50b   : > { %v3991_v31 = vpop.f32.mrf.mxu0  ;;  %4373 = vmatpush.bf16.msra.mxu0 %v5939_v46  ;;  %v6051_v46 = vor.u32 %v6533_v27, %v6048_v63  ;;  %v6529_v27 = vld [vmem:[%s10896_s1 + $0x68c] sm:$0xf]  ;;  %v6032_v63 = vld [vmem:[%s10896_s1 + $0x698] sm:$0xf0] }
 0x50c   : > { %v3992_v36 = vadd.f32 %v3991_v31, %v10027_v11  ;;  %6880 = vmatmul.lmr.bf16.gmra.16.mxu3  ;;  %v5920_v11 = vld [vmem:[%s10896_s1 + $0x5b8] sm:$0xf0] }
 0x50d   : > { %v5923_v61 = vor.u32 %v6501_v6, %v5920_v11  ;;  %4423 = vmatpush.bf16.msra.mxu1 %v6051_v46 }
 0x50e   : > { %v4041_v8 = vadd.f32 %v4040_v28, %v3992_v36  ;;  %6702 = vmatmul.lmr.bf16.gmra.16.mxu0  ;;  %6849 = vmatmul.lmr.bf16.gmra.16.mxu2 }
 0x50f   : > { %v10297_v12 = vpop.f32.mrf.mxu3  ;;  %4374 = vmatpush.bf16.msra.mxu0 %v5923_v61 }
 0x510   : > { %v4090_v21 = vadd.f32 %v4089_v26, %v4041_v8  ;;  %v4043_v28 = vpop.f32.mrf.mxu1 }
 0x511   : > { %v4092_v49 = vpop.f32.mrf.mxu2  ;;  %6790 = vmatmul.lmr.bf16.gmra.16.mxu1 }
 0x513   : > { %v3994_v31 = vpop.f32.mrf.mxu0 }
 0x514   : > { %v3995_v36 = vadd.f32 %v3994_v31, %v10056_v52  ;;  %6881 = vmatmul.lmr.bf16.gmra.16.mxu3  ;;  %v6160_v52 = vld [vmem:[%s10896_s1 + $0x798] sm:$0xf0] }
 0x515   : > { %v6163_v55 = vor.u32 %v6561_v62, %v6160_v52 }
 0x516   : > { %v4044_v53 = vadd.f32 %v4043_v28, %v3995_v36  ;;  %6703 = vmatmul.lmr.bf16.gmra.16.mxu0  ;;  %6850 = vmatmul.lmr.bf16.gmra.16.mxu2 }
 0x517   : > { %v10300_v6 = vpop.f32.mrf.mxu3  ;;  %4473 = vmatpush.bf16.msra.mxu2 %v6163_v55  ;;  %v10330_v55 = vsel %vm4588_vm2, %v10268_v23, 0.0  ;;  %v6144_v23 = vld [vmem:[%s10896_s1 + $0x778] sm:$0xf0] }
 0x518   : > { %v4093_v19 = vadd.f32 %v4092_v49, %v4044_v53  ;;  %v4045_v8 = vpop.f32.mrf.mxu1  ;;  %v6035_v49 = vor.u32 %v6529_v27, %v6032_v63  ;;  %v6557_v63 = vld [vmem:[%s10896_s1 + $0x76c] sm:$0xf] }
 0x519   : > { %v4094_v26 = vpop.f32.mrf.mxu2  ;;  %6791 = vmatmul.lmr.bf16.gmra.16.mxu1 }
 0x51a   : > { %4424 = vmatpush.bf16.msra.mxu1 %v6035_v49  ;;  %v6581_v49 = vld [vmem:[%s10896_s1 + $0x82c] sm:$0xf] }
 0x51b   : > { %v3996_v10 = vpop.f32.mrf.mxu0 }
 0x51c   : > { %v3997_v11 = vadd.f32 %v3996_v10, %v10062_v18  ;;  %6882 = vmatmul.lmr.bf16.gmra.16.mxu3  ;;  %v5904_v18 = vld [vmem:[%s10896_s1 + $0x598] sm:$0xf0] }
 0x51d   : > { %v5907_v46 = vor.u32 %v6497_v51, %v5904_v18  ;;  %v10340_v18 = vsel %vm4590_vm4, %v4093_v19, 0.0  ;;  %v6147_v19 = vor.u32 %v6557_v63, %v6144_v23 }
 0x51e   : > { %v4046_v61 = vadd.f32 %v4045_v8, %v3997_v11  ;;  %6704 = vmatmul.lmr.bf16.gmra.16.mxu0  ;;  %6851 = vmatmul.lmr.bf16.gmra.16.mxu2 }
 0x51f   : > { %v10321_v31 = vpop.f32.mrf.mxu3  ;;  %4375 = vmatpush.bf16.msra.mxu0 %v5907_v46  ;;  %4474 = vmatpush.bf16.msra.mxu2 %v6147_v19 }
 0x520   : > { %v4095_v28 = vadd.f32 %v4094_v26, %v4046_v61  ;;  %v4048_v53 = vpop.f32.mrf.mxu1 }
 0x521   : > { %v4097_v36 = vpop.f32.mrf.mxu2  ;;  %6792 = vmatmul.lmr.bf16.gmra.16.mxu1 }
 0x523   : > { %v3999_v8 = vpop.f32.mrf.mxu0 }
 0x524   : > { %v4000_v10 = vadd.f32 %v3999_v8, %v10091_v58  ;;  %6883 = vmatmul.lmr.bf16.gmra.16.mxu3  ;;  %v10335_v58 = vsel %vm4589_vm3, %v4090_v21, 0.0  ;;  %v6493_v21 = vld [vmem:[%s10896_s1 + $0x56c] sm:$0xf] }
 0x525   : > { %11214 = vst [vmem:[#allocation62_spill] sm:$0xff] %v10335_v58 }
 0x526   : > { %v4049_v11 = vadd.f32 %v4048_v53, %v4000_v10  ;;  %6705 = vmatmul.lmr.bf16.gmra.16.mxu0  ;;  %6852 = vmatmul.lmr.bf16.gmra.16.mxu2  ;;  %v4876_v53 = vmul.f32 %v10335_v58, %v10335_v58 }
 0x527   : > { %v10324_v52 = vpop.f32.mrf.mxu3 }
 0x528   : > { %v4098_v62 = vadd.f32 %v4097_v36, %v4049_v11  ;;  %v4050_v26 = vpop.f32.mrf.mxu1  ;;  %v6240_v36 = vld [vmem:[%s10896_s1 + $0x838] sm:$0xf0]  ;;  %v6525_v11 = vld [vmem:[%s10896_s1 + $0x66c] sm:$0xf] }
 0x529   : > { %v4099_v51 = vpop.f32.mrf.mxu2  ;;  %6793 = vmatmul.lmr.bf16.gmra.16.mxu1  ;;  %v6243_v10 = vor.u32 %v6581_v49, %v6240_v36  ;;  %v4880_v49 = vmul.f32 %v10340_v18, %v10340_v18 }
 0x52b   : > { %v4001_v61 = vpop.f32.mrf.mxu0  ;;  %4525 = vmatpush.bf16.msra.mxu3 %v6243_v10 }
 0x52c   : > { %v4002_v27 = vadd.f32 %v4001_v61, %v10097_v32  ;;  %6884 = vmatmul.lmr.bf16.gmra.16.mxu3  ;;  %v5888_v32 = vld [vmem:[%s10896_s1 + $0x578] sm:$0xf0]  ;;  %v10372_v61 = vsel %vm4591_vm5, %v4095_v28, 0.0  ;;  %v10385_v28 = vsel %vm4592_vm6, %v4098_v62, 0.0 }
 0x52d   : > { %v5891_v8 = vor.u32 %v6493_v21, %v5888_v32  ;;  %v4872_v21 = vmul.f32 %v10330_v55, %v10330_v55  ;;  %v4807_v32 = vadd.f32 %v10335_v58, %v10330_v55 }
 0x52e   : > { %v4051_v46 = vadd.f32 %v4050_v26, %v4002_v27  ;;  %6706 = vmatmul.lmr.bf16.gmra.16.mxu0  ;;  %6853 = vmatmul.lmr.bf16.gmra.16.mxu2  ;;  %v6016_v26 = vld [vmem:[%s10896_s1 + $0x678] sm:$0xf0] }
 0x52f   : > { %v10374_v63 = vpop.f32.mrf.mxu3  ;;  %v6019_v23 = vor.u32 %v6525_v11, %v6016_v26  ;;  %4376 = vmatpush.bf16.msra.mxu0 %v5891_v8  ;;  %v4808_v19 = vadd.f32 %v4807_v32, %v10340_v18  ;;  %v4884_v11 = vmul.f32 %v10372_v61, %v10372_v61 }
 0x530   : > { %v4100_v27 = vadd.f32 %v4099_v51, %v4051_v46  ;;  %v4053_v51 = vpop.f32.mrf.mxu1  ;;  %v4976_v46 = vadd.f32 %v4876_v53, %v4872_v21 }
 0x531   : > { %v4102_v36 = vpop.f32.mrf.mxu2  ;;  %4425 = vmatpush.bf16.msra.mxu1 %v6019_v23  ;;  %v4809_v62 = vadd.f32 %v4808_v19, %v10372_v61  ;;  %v4888_v23 = vmul.f32 %v10385_v28, %v10385_v28 }
 0x532   : > { %v10393_v58 = vsel %vm4593_vm7, %v4100_v27, 0.0  ;;  %v4977_v10 = vadd.f32 %v4976_v46, %v4880_v49  ;;  %6794 = vmatmul.lmr.bf16.gmra.16.mxu1 }
 0x533   : > { %v4004_v26 = vpop.f32.mrf.mxu0  ;;  %11217 = vst [vmem:[#allocation63_spill] sm:$0xff] %v10393_v58  ;;  %v4810_v32 = vadd.f32 %v4809_v62, %v10385_v28  ;;  %v4892_v27 = vmul.f32 %v10393_v58, %v10393_v58 }
 0x534   : > { %v4005_v8 = vadd.f32 %v4004_v26, %v10126_v44  ;;  %6885 = vmatmul.lmr.bf16.gmra.16.mxu3  ;;  %v4978_v21 = vadd.f32 %v4977_v10, %v4884_v11 }
 0x535   : > { %v4811_v49 = vadd.f32 %v4810_v32, %v10393_v58 }
 0x536   : > { %v4054_v53 = vadd.f32 %v4053_v51, %v4005_v8  ;;  %6707 = vmatmul.lmr.bf16.gmra.16.mxu0  ;;  %6854 = vmatmul.lmr.bf16.gmra.16.mxu2  ;;  %v4979_v44 = vadd.f32 %v4978_v21, %v4888_v23  ;;  %v6553_v23 = vld [vmem:[%s10896_s1 + $0x74c] sm:$0xf] }
 0x537   : > { %v10402_v34 = vpop.f32.mrf.mxu3  ;;  %v6489_v21 = vld [vmem:[%s10896_s1 + $0x54c] sm:$0xf] }
 0x538   : > { %v4103_v56 = vadd.f32 %v4102_v36, %v4054_v53  ;;  %v4055_v51 = vpop.f32.mrf.mxu1  ;;  %v4980_v8 = vadd.f32 %v4979_v44, %v4892_v27  ;;  %v6521_v44 = vld [vmem:[%s10896_s1 + $0x64c] sm:$0xf] }
 0x539   : > { %v4104_v46 = vpop.f32.mrf.mxu2 }
 0x53a   : > { %v10408_v26 = vsel %vm4594_vm8, %v4103_v56, 0.0  ;;  %6795 = vmatmul.lmr.bf16.gmra.16.mxu1  ;;  %v6128_v56 = vld [vmem:[%s10896_s1 + $0x758] sm:$0xf0] }
 0x53b   : > { %11219 = vst [vmem:[#allocation64_spill] sm:$0xff] %v10408_v26  ;;  %v4812_v11 = vadd.f32 %v4811_v49, %v10408_v26  ;;  %v4896_v10 = vmul.f32 %v10408_v26, %v10408_v26  ;;  %v4006_v62 = vpop.f32.mrf.mxu0  ;;  %v6131_v27 = vor.u32 %v6553_v23, %v6128_v56  ;;  %v6000_v49 = vld [vmem:[%s10896_s1 + $0x658] sm:$0xf0] }
 0x53c   : > { %v4007_v36 = vadd.f32 %v4006_v62, %v10132_v4  ;;  %6886 = vmatmul.lmr.bf16.gmra.16.mxu3  ;;  %v5872_v4 = vld [vmem:[%s10896_s1 + $0x558] sm:$0xf0] }
 0x53d   : > { %v4981_v53 = vadd.f32 %v4980_v8, %v4896_v10  ;;  %v5875_v8 = vor.u32 %v6489_v21, %v5872_v4  ;;  %v6003_v10 = vor.u32 %v6521_v44, %v6000_v49  ;;  %4475 = vmatpush.bf16.msra.mxu2 %v6131_v27 }
 0x53e   : > { %v4056_v32 = vadd.f32 %v4055_v51, %v4007_v36  ;;  %6708 = vmatmul.lmr.bf16.gmra.16.mxu0  ;;  %6855 = vmatmul.lmr.bf16.gmra.16.mxu2 }
 0x53f   : > { %v10432_v26 = vpop.f32.mrf.mxu3  ;;  %4377 = vmatpush.bf16.msra.mxu0 %v5875_v8  ;;  %4426 = vmatpush.bf16.msra.mxu1 %v6003_v10 }
 0x540   : > { %v4105_v62 = vadd.f32 %v4104_v46, %v4056_v32  ;;  %v4058_v56 = vpop.f32.mrf.mxu1 }
 0x541   : > { %v4107_v51 = vpop.f32.mrf.mxu2 }
 0x542   : > { %v10437_v23 = vsel %vm4595_vm9, %v4105_v62, 0.0  ;;  %6796 = vmatmul.lmr.bf16.gmra.16.mxu1 }
 0x543   : > { %11221 = vst [vmem:[#allocation65_spill] sm:$0xff] %v10437_v23  ;;  %v4813_v19 = vadd.f32 %v4812_v11, %v10437_v23  ;;  %v4900_v58 = vmul.f32 %v10437_v23, %v10437_v23  ;;  %v4009_v21 = vpop.f32.mrf.mxu0 }
 0x544   : > { %v4010_v46 = vadd.f32 %v4009_v21, %v10161_v57  ;;  %6887 = vmatmul.lmr.bf16.gmra.16.mxu3  ;;  %v6112_v21 = vld [vmem:[%s10896_s1 + $0x738] sm:$0xf0] }
 0x545   : > { %v4982_v32 = vadd.f32 %v4981_v53, %v4900_v58 }
 0x546   : > { %v4059_v27 = vadd.f32 %v4058_v56, %v4010_v46  ;;  %6709 = vmatmul.lmr.bf16.gmra.16.mxu0  ;;  %6856 = vmatmul.lmr.bf16.gmra.16.mxu2 }
 0x547   : > { %v10443_v44 = vpop.f32.mrf.mxu3 }
 0x548   : > { %v4108_v4 = vadd.f32 %v4107_v51, %v4059_v27  ;;  %v4060_v10 = vpop.f32.mrf.mxu1  ;;  %v6549_v51 = vld [vmem:[%s10896_s1 + $0x72c] sm:$0xf] }
 0x549   : > { %v4109_v49 = vpop.f32.mrf.mxu2  ;;  %v6115_v27 = vor.u32 %v6549_v51, %v6112_v21 }
 0x54a   : > { %v10448_v11 = vsel %vm4596_vm10, %v4108_v4, 0.0  ;;  %6797 = vmatmul.lmr.bf16.gmra.16.mxu1  ;;  %v6224_v4 = vld [vmem:[%s10896_s1 + $0x818] sm:$0xf0] }
 0x54b   : > { %11223 = vst [vmem:[#allocation66_spill] sm:$0xff] %v10448_v11  ;;  %v4814_v62 = vadd.f32 %v4813_v19, %v10448_v11  ;;  %v4904_v57 = vmul.f32 %v10448_v11, %v10448_v11  ;;  %v4011_v58 = vpop.f32.mrf.mxu0  ;;  %v6485_v19 = vld [vmem:[%s10896_s1 + $0x52c] sm:$0xf]  ;;  %4476 = vmatpush.bf16.msra.mxu2 %v6115_v27 }
 0x54c   : > { %v4012_v53 = vadd.f32 %v4011_v58, %v10167_v47  ;;  %6888 = vmatmul.lmr.bf16.gmra.16.mxu3  ;;  %v5856_v47 = vld [vmem:[%s10896_s1 + $0x538] sm:$0xf0] }
 0x54d   : > { %v4983_v56 = vadd.f32 %v4982_v32, %v4904_v57  ;;  %v6577_v32 = vld [vmem:[%s10896_s1 + $0x80c] sm:$0xf]  ;;  %v5859_v57 = vor.u32 %v6485_v19, %v5856_v47 }
 0x54e   : > { %v4061_v46 = vadd.f32 %v4060_v10, %v4012_v53  ;;  %6710 = vmatmul.lmr.bf16.gmra.16.mxu0  ;;  %6857 = vmatmul.lmr.bf16.gmra.16.mxu2  ;;  %v6227_v58 = vor.u32 %v6577_v32, %v6224_v4  ;;  %v6517_v10 = vld [vmem:[%s10896_s1 + $0x62c] sm:$0xf]  ;;  %v5984_v53 = vld [vmem:[%s10896_s1 + $0x638] sm:$0xf0] }
 0x54f   : > { %v10478_v21 = vpop.f32.mrf.mxu3  ;;  %v5987_v11 = vor.u32 %v6517_v10, %v5984_v53  ;;  %4378 = vmatpush.bf16.msra.mxu0 %v5859_v57 }
 0x550   : > { %v4110_v51 = vadd.f32 %v4109_v49, %v4061_v46  ;;  %4526 = vmatpush.bf16.msra.mxu3 %v6227_v58  ;;  %v4063_v47 = vpop.f32.mrf.mxu1 }
 0x551   : > { %v4112_v8 = vpop.f32.mrf.mxu2  ;;  %4427 = vmatpush.bf16.msra.mxu1 %v5987_v11  ;;  %v6545_v11 = vld [vmem:[%s10896_s1 + $0x70c] sm:$0xf] }
 0x552   : > { %v10483_v19 = vsel %vm4597_vm11, %v4110_v51, 0.0  ;;  %6798 = vmatmul.lmr.bf16.gmra.16.mxu1 }
 0x553   : > { %11225 = vst [vmem:[#allocation67_spill] sm:$0xff] %v10483_v19  ;;  %v4815_v32 = vadd.f32 %v4814_v62, %v10483_v19  ;;  %v4908_v4 = vmul.f32 %v10483_v19, %v10483_v19  ;;  %v4014_v49 = vpop.f32.mrf.mxu0  ;;  %v6096_v62 = vld [vmem:[%s10896_s1 + $0x718] sm:$0xf0] }
 0x554   : > { %v4015_v46 = vadd.f32 %v4014_v49, %v10196_v15  ;;  %6889 = vmatmul.lmr.bf16.gmra.16.mxu3  ;;  %v6099_v51 = vor.u32 %v6545_v11, %v6096_v62  ;;  %v6481_v11 = vld [vmem:[%s10896_s1 + $0x50c] sm:$0xf] }
 0x555   : > { %v4984_v27 = vadd.f32 %v4983_v56, %v4908_v4 }
 0x556   : > { %v4064_v57 = vadd.f32 %v4063_v47, %v4015_v46  ;;  %6711 = vmatmul.lmr.bf16.gmra.16.mxu0  ;;  %6858 = vmatmul.lmr.bf16.gmra.16.mxu2 }
 0x557   : > { %v10489_v10 = vpop.f32.mrf.mxu3  ;;  %4477 = vmatpush.bf16.msra.mxu2 %v6099_v51 }
 0x558   : > { %v4113_v58 = vadd.f32 %v4112_v8, %v4064_v57  ;;  %v4065_v47 = vpop.f32.mrf.mxu1 }
 0x559   : > { %v4114_v53 = vpop.f32.mrf.mxu2 }
 0x55a   : > { %v10500_v56 = vsel %vm4598_vm12, %v4113_v58, 0.0  ;;  %6799 = vmatmul.lmr.bf16.gmra.16.mxu1  ;;  %v5840_v58 = vld [vmem:[%s10896_s1 + $0x518] sm:$0xf0] }
 0x55b   : > { %11227 = vst [vmem:[#allocation68_spill] sm:$0xff] %v10500_v56  ;;  %v4816_v8 = vadd.f32 %v4815_v32, %v10500_v56  ;;  %v4912_v4 = vmul.f32 %v10500_v56, %v10500_v56  ;;  %v4016_v49 = vpop.f32.mrf.mxu0  ;;  %v6513_v32 = vld [vmem:[%s10896_s1 + $0x60c] sm:$0xf]  ;;  %v5843_v51 = vor.u32 %v6481_v11, %v5840_v58 }
 0x55c   : > { %v4017_v46 = vadd.f32 %v4016_v49, %v10202_v30  ;;  %6890 = vmatmul.lmr.bf16.gmra.16.mxu3  ;;  %v5968_v30 = vld [vmem:[%s10896_s1 + $0x618] sm:$0xf0] }
 0x55d   : > { %v4985_v57 = vadd.f32 %v4984_v27, %v4912_v4  ;;  %v5971_v27 = vor.u32 %v6513_v32, %v5968_v30  ;;  %4379 = vmatpush.bf16.msra.mxu0 %v5843_v51 }
 0x55e   : > { %v4066_v62 = vadd.f32 %v4065_v47, %v4017_v46  ;;  %6712 = vmatmul.lmr.bf16.gmra.16.mxu0  ;;  %6859 = vmatmul.lmr.bf16.gmra.16.mxu2 }
 0x55f   : > { %v10518_v49 = vpop.f32.mrf.mxu3  ;;  %4428 = vmatpush.bf16.msra.mxu1 %v5971_v27 }
 0x560   : > { %v4115_v4 = vadd.f32 %v4114_v53, %v4066_v62  ;;  %v4068_v47 = vpop.f32.mrf.mxu1 }
 0x561   : > { %v4117_v56 = vpop.f32.mrf.mxu2 }
 0x562   : > { %v10523_v19 = vsel %vm4599_vm13, %v4115_v4, 0.0  ;;  %6800 = vmatmul.lmr.bf16.gmra.16.mxu1 }
 0x563   : > { %11229 = vst [vmem:[#allocation69_spill] sm:$0xff] %v10523_v19  ;;  %v4817_v46 = vadd.f32 %v4816_v8, %v10523_v19  ;;  %v4916_v11 = vmul.f32 %v10523_v19, %v10523_v19  ;;  %v4019_v58 = vpop.f32.mrf.mxu0 }
 0x564   : > { %v4020_v32 = vadd.f32 %v4019_v58, %v10207_v7  ;;  %6891 = vmatmul.lmr.bf16.gmra.16.mxu3 }
 0x565   : > { %v4986_v53 = vadd.f32 %v4985_v57, %v4916_v11 }
 0x566   : > { %v4069_v62 = vadd.f32 %v4068_v47, %v4020_v32  ;;  %6713 = vmatmul.lmr.bf16.gmra.16.mxu0  ;;  %6860 = vmatmul.lmr.bf16.gmra.16.mxu2 }
 0x567   : > { %v10529_v30 = vpop.f32.mrf.mxu3 }
 0x568   : > { %v4118_v51 = vadd.f32 %v4117_v56, %v4069_v62  ;;  %v4070_v15 = vpop.f32.mrf.mxu1 }
 0x569   : > { %v4119_v27 = vpop.f32.mrf.mxu2 }
 0x56a   : > { %v10534_v8 = vsel %vm4600_vm14, %v4118_v51, 0.0  ;;  %6801 = vmatmul.lmr.bf16.gmra.16.mxu1 }
 0x56b   : > { %11231 = vst [vmem:[#allocation21_spill] sm:$0xff] %v10534_v8  ;;  %v4818_v19 = vadd.f32 %v4817_v46, %v10534_v8  ;;  %v4920_v7 = vmul.f32 %v10534_v8, %v10534_v8  ;;  %v4021_v57 = vpop.f32.mrf.mxu0 }
 0x56c   : > { %v4022_v47 = vadd.f32 %v4021_v57, %v10213_v41  ;;  %6892 = vmatmul.lmr.bf16.gmra.16.mxu3 }
 0x56d   : > { %v4987_v11 = vadd.f32 %v4986_v53, %v4920_v7 }
 0x56e   : > { %v4071_v56 = vadd.f32 %v4070_v15, %v4022_v47  ;;  %6714 = vmatmul.lmr.bf16.gmra.16.mxu0  ;;  %6861 = vmatmul.lmr.bf16.gmra.16.mxu2 }
 0x56f   : > { %v10540_v32 = vpop.f32.mrf.mxu3 }
 0x570   : > { %v4120_v58 = vadd.f32 %v4119_v27, %v4071_v56  ;;  %v4073_v4 = vpop.f32.mrf.mxu1 }
 0x571   : > { %v4122_v62 = vpop.f32.mrf.mxu2 }
 0x572   : > { %v10545_v46 = vsel %vm11033_vm15, %v4120_v58, 0.0  ;;  %6802 = vmatmul.lmr.bf16.gmra.16.mxu1  ;;  %v11234_v58 = vld [vmem:[#allocation59_spill] sm:$0xff] }
 0x573   : > { %11233 = vst [vmem:[#allocation46_spill] sm:$0xff] %v10545_v46  ;;  %v4819_v8 = vadd.f32 %v4818_v19, %v10545_v46  ;;  %v4924_v41 = vmul.f32 %v10545_v46, %v10545_v46  ;;  %v4024_v53 = vpop.f32.mrf.mxu0  ;;  %vm11235_vm15 = vcmp.lt.s32.totalorder %v11234_v58, %v9481_v50 }
 0x574   : > { %v4025_v15 = vadd.f32 %v4024_v53, %v10230_v16  ;;  %6893 = vmatmul.lmr.bf16.gmra.16.mxu3  ;;  %v11237_v53 = vld [vmem:[#allocation23_spill] sm:$0xff] }
 0x575   : > { %v4988_v7 = vadd.f32 %v4987_v11, %v4924_v41 }
 0x576   : > { %v4074_v27 = vadd.f32 %v4073_v4, %v4025_v15  ;;  %6715 = vmatmul.lmr.bf16.gmra.16.mxu0  ;;  %6862 = vmatmul.lmr.bf16.gmra.16.mxu2 }
 0x577   : > { %v10551_v47 = vpop.f32.mrf.mxu3 }
 0x578   : > { %v4123_v57 = vadd.f32 %v4122_v62, %v4074_v27  ;;  %v4075_v51 = vpop.f32.mrf.mxu1 }
 0x579   : > { %v4124_v56 = vpop.f32.mrf.mxu2 }
 0x57a   : > { %v10556_v19 = vsel %vm11235_vm15, %v4123_v57, 0.0  ;;  %6803 = vmatmul.lmr.bf16.gmra.16.mxu1 }
 0x57b   : > { %11236 = vst [vmem:[#allocation70_spill] sm:$0xff] %v10556_v19  ;;  %v4820_v46 = vadd.f32 %v4819_v8, %v10556_v19  ;;  %v4928_v16 = vmul.f32 %v10556_v19, %v10556_v19  ;;  %v4026_v11 = vpop.f32.mrf.mxu0 }
 0x57c   : > { %v4027_v4 = vadd.f32 %v4026_v11, %v10253_v38  ;;  %6300 = vmatmul.msk.bf16.vlgmr.msra.gmra.mxu3 %vm2779_vm1, %v11200_v37 }
 0x57d   : > { %v4989_v41 = vadd.f32 %v4988_v7, %v4928_v16 }
 0x57e   : > { %v4076_v62 = vadd.f32 %v4075_v51, %v4027_v4  ;;  %6716 = vmatmul.lmr.bf16.gmra.16.mxu0  ;;  %4478 = vmatmul.bf16.vlgmr.msra.gmra.mxu2 %v11237_v53  ;;  %v11241_v4 = vld [vmem:[#allocation27_spill] sm:$0xff] }
 0x57f   : > { %v4332_v27 = vpop.f32.mrf.mxu3 }
 0x580   : > { %v4125_v15 = vadd.f32 %v4124_v56, %v4076_v62  ;;  %v4234_v19 = vpop.f32.mrf.mxu1  ;;  %v11240_v56 = vld [vmem:[#allocation22_spill] sm:$0xff] }
 0x581   : > { %v4283_v57 = vpop.f32.mrf.mxu2 }
 0x582   : > { %v10568_v8 = vsel %vm4603_vm0, %v4125_v15, 0.0  ;;  %4429 = vmatmul.bf16.vlgmr.msra.gmra.mxu1 %v11240_v56 }
 0x583   : > { %v10571_v38 = vadd.f32 %v4820_v46, %v10568_v8  ;;  %v4932_v7 = vmul.f32 %v10568_v8, %v10568_v8  ;;  %v4185_v37 = vpop.f32.mrf.mxu0 }
 0x584   : > { %v4186_v51 = vadd.f32 %v4185_v37, %v10242_v14 }
 0x585   : > { %11239 = vst [vmem:[#allocation24_spill] sm:$0xff] %v10571_v38  ;;  %v10576_v16 = vadd.f32 %v4989_v41, %v4932_v7 }
 0x586   : > { %v4235_v11 = vadd.f32 %v4234_v19, %v4186_v51  ;;  %4380 = vmatmul.bf16.vlgmr.msra.gmra.mxu0 %v11241_v4 }
 0x587   : > { %v4334_v53 = vpop.f32.mrf.mxu3 }
 0x588   : > { %v4284_v62 = vadd.f32 %v4283_v57, %v4235_v11  ;;  %v4236_v58 = vpop.f32.mrf.mxu1  ;;  %v11242_v11 = vld [vmem:[#allocation30_spill] sm:$0xff] }
 0x589   : > { %v4285_v15 = vpop.f32.mrf.mxu2 }
 0x58a   : > { %v10580_v23 = vadd.f32 %v4332_v27, %v4284_v62 }
 0x58b   : > { %v4187_v46 = vpop.f32.mrf.mxu0 }
 0x58c   : > { %v4188_v38 = vadd.f32 %v4187_v46, %v10270_v42  ;;  %6301 = vmatmul.msk.bf16.gmra.mxu3 %vm2779_vm1, %v8682_v25 }
 0x58e   : > { %v4237_v14 = vadd.f32 %v4236_v58, %v4188_v38  ;;  %4483 = vmatmul.bf16.gmra.mxu2 %v11128_v2 }
 0x58f   : > { %v4337_v7 = vpop.f32.mrf.mxu3 }
 0x590   : > { %v4286_v41 = vadd.f32 %v4285_v15, %v4237_v14  ;;  %v4239_v37 = vpop.f32.mrf.mxu1 }
 0x591   : > { %v4288_v19 = vpop.f32.mrf.mxu2 }
 0x592   : > { %v10586_v51 = vadd.f32 %v4334_v53, %v4286_v41  ;;  %4434 = vmatmul.bf16.gmra.mxu1 %v11207_v48 }
 0x593   : > { %v4190_v57 = vpop.f32.mrf.mxu0 }
 0x594   : > { %v4191_v56 = vadd.f32 %v4190_v57, %v10297_v12 }
 0x596   : > { %v4240_v27 = vadd.f32 %v4239_v37, %v4191_v56  ;;  %4385 = vmatmul.bf16.gmra.mxu0 %v11242_v11  ;;  %v11243_v37 = vld [vmem:[#allocation32_spill] sm:$0xff] }
 0x597   : > { %v4339_v4 = vpop.f32.mrf.mxu3 }
 0x598   : > { %v4289_v42 = vadd.f32 %v4288_v19, %v4240_v27  ;;  %v4241_v58 = vpop.f32.mrf.mxu1 }
 0x599   : > { %v4290_v25 = vpop.f32.mrf.mxu2 }
 0x59a   : > { %v10591_v38 = vadd.f32 %v4337_v7, %v4289_v42 }
 0x59b   : > { %v4192_v2 = vpop.f32.mrf.mxu0 }
 0x59c   : > { %v4193_v62 = vadd.f32 %v4192_v2, %v10300_v6  ;;  %6302 = vmatmul.msk.bf16.gmra.mxu3 %vm2779_vm1, %v8723_v60 }
 0x59e   : > { %v4242_v53 = vadd.f32 %v4241_v58, %v4193_v62  ;;  %4488 = vmatmul.bf16.gmra.mxu2 %v11132_v3 }
 0x59f   : > { %v4342_v48 = vpop.f32.mrf.mxu3 }
 0x5a0   : > { %v4291_v12 = vadd.f32 %v4290_v25, %v4242_v53  ;;  %v4244_v46 = vpop.f32.mrf.mxu1 }
 0x5a1   : > { %v4293_v15 = vpop.f32.mrf.mxu2 }
 0x5a2   : > { %v10597_v14 = vadd.f32 %v4339_v4, %v4291_v12  ;;  %4439 = vmatmul.bf16.gmra.mxu1 %v11208_v35  ;;  %v11244_v12 = vld [vmem:[#allocation35_spill] sm:$0xff] }
 0x5a3   : > { %v4195_v41 = vpop.f32.mrf.mxu0 }
 0x5a4   : > { %v4196_v19 = vadd.f32 %v4195_v41, %v10321_v31 }
 0x5a6   : > { %v4245_v7 = vadd.f32 %v4244_v46, %v4196_v19  ;;  %4390 = vmatmul.bf16.gmra.mxu0 %v11243_v37 }
 0x5a7   : > { %v4344_v57 = vpop.f32.mrf.mxu3 }
 0x5a8   : > { %v4294_v6 = vadd.f32 %v4293_v15, %v4245_v7  ;;  %v4246_v56 = vpop.f32.mrf.mxu1 }
 0x5a9   : > { %v4295_v60 = vpop.f32.mrf.mxu2 }
 0x5aa   : > { %v10602_v27 = vadd.f32 %v4342_v48, %v4294_v6 }
 0x5ab   : > { %v4197_v3 = vpop.f32.mrf.mxu0 }
 0x5ac   : > { %v4198_v11 = vadd.f32 %v4197_v3, %v10324_v52  ;;  %6303 = vmatmul.msk.bf16.gmra.mxu3 %vm2779_vm1, %v8761_v17  ;;  %v11245_v3 = vld [vmem:[#allocation38_spill] sm:$0xff] }
 0x5ae   : > { %v4247_v42 = vadd.f32 %v4246_v56, %v4198_v11  ;;  %4493 = vmatmul.bf16.gmra.mxu2 %v11134_v45 }
 0x5af   : > { %v4347_v35 = vpop.f32.mrf.mxu3 }
 0x5b0   : > { %v4296_v31 = vadd.f32 %v4295_v60, %v4247_v42  ;;  %v4249_v25 = vpop.f32.mrf.mxu1 }
 0x5b1   : > { %v4298_v4 = vpop.f32.mrf.mxu2 }
 0x5b2   : > { %v10608_v58 = vadd.f32 %v4344_v57, %v4296_v31  ;;  %4444 = vmatmul.bf16.gmra.mxu1 %v11209_v20 }
 0x5b3   : > { %v4200_v2 = vpop.f32.mrf.mxu0 }
 0x5b4   : > { %v4201_v62 = vadd.f32 %v4200_v2, %v10374_v63 }
 0x5b6   : > { %v4250_v53 = vadd.f32 %v4249_v25, %v4201_v62  ;;  %4395 = vmatmul.bf16.gmra.mxu0 %v11244_v12 }
 0x5b7   : > { %v4349_v48 = vpop.f32.mrf.mxu3 }
 0x5b8   : > { %v4299_v52 = vadd.f32 %v4298_v4, %v4250_v53  ;;  %v4251_v15 = vpop.f32.mrf.mxu1 }
 0x5b9   : > { %v4300_v17 = vpop.f32.mrf.mxu2 }
 0x5ba   : > { %v10613_v46 = vadd.f32 %v4347_v35, %v4299_v52 }
 0x5bb   : > { %v4202_v45 = vpop.f32.mrf.mxu0 }
 0x5bc   : > { %v4203_v41 = vadd.f32 %v4202_v45, %v10402_v34  ;;  %6304 = vmatmul.msk.bf16.gmra.mxu3 %vm2779_vm1, %v8798_v1 }
 0x5be   : > { %v4252_v19 = vadd.f32 %v4251_v15, %v4203_v41  ;;  %4498 = vmatmul.bf16.gmra.mxu2 %v11135_v40 }
 0x5bf   : > { %v4352_v20 = vpop.f32.mrf.mxu3 }
 0x5c0   : > { %v4301_v63 = vadd.f32 %v4300_v17, %v4252_v19  ;;  %v4254_v37 = vpop.f32.mrf.mxu1 }
 0x5c1   : > { %v4303_v7 = vpop.f32.mrf.mxu2 }
 0x5c2   : > { %v10619_v6 = vadd.f32 %v4349_v48, %v4301_v63  ;;  %4449 = vmatmul.bf16.gmra.mxu1 %v11210_v39  ;;  %v11246_v48 = vld [vmem:[#allocation40_spill] sm:$0xff] }
 0x5c3   : > { %v4205_v57 = vpop.f32.mrf.mxu0 }
 0x5c4   : > { %v4206_v60 = vadd.f32 %v4205_v57, %v10432_v26 }
 0x5c6   : > { %v4255_v56 = vadd.f32 %v4254_v37, %v4206_v60  ;;  %4400 = vmatmul.bf16.gmra.mxu0 %v11245_v3 }
 0x5c7   : > { %v4354_v11 = vpop.f32.mrf.mxu3 }
 0x5c8   : > { %v4304_v34 = vadd.f32 %v4303_v7, %v4255_v56  ;;  %v4256_v42 = vpop.f32.mrf.mxu1  ;;  %v11247_v56 = vld [vmem:[#allocation43_spill] sm:$0xff] }
 0x5c9   : > { %v4305_v1 = vpop.f32.mrf.mxu2 }
 0x5ca   : > { %v10624_v31 = vadd.f32 %v4352_v20, %v4304_v34 }
 0x5cb   : > { %v4207_v40 = vpop.f32.mrf.mxu0 }
 0x5cc   : > { %v4208_v35 = vadd.f32 %v4207_v40, %v10443_v44  ;;  %6305 = vmatmul.msk.bf16.gmra.mxu3 %vm2779_vm1, %v8835_v9 }
 0x5ce   : > { %v4257_v4 = vadd.f32 %v4256_v42, %v4208_v35  ;;  %4503 = vmatmul.bf16.gmra.mxu2 %v11136_v59 }
 0x5cf   : > { %v4357_v39 = vpop.f32.mrf.mxu3 }
 0x5d0   : > { %v4306_v26 = vadd.f32 %v4305_v1, %v4257_v4  ;;  %v4259_v2 = vpop.f32.mrf.mxu1 }
 0x5d1   : > { %v4308_v25 = vpop.f32.mrf.mxu2 }
 0x5d2   : > { %v10630_v62 = vadd.f32 %v4354_v11, %v4306_v26  ;;  %4454 = vmatmul.bf16.gmra.mxu1 %v11211_v29 }
 0x5d3   : > { %v4210_v53 = vpop.f32.mrf.mxu0 }
 0x5d4   : > { %v4211_v12 = vadd.f32 %v4210_v53, %v10478_v21 }
 0x5d6   : > { %v4260_v52 = vadd.f32 %v4259_v2, %v4211_v12  ;;  %4405 = vmatmul.bf16.gmra.mxu0 %v11246_v48  ;;  %v11248_v2 = vld [vmem:[#allocation45_spill] sm:$0xff] }
 0x5d7   : > { %v4359_v17 = vpop.f32.mrf.mxu3 }
 0x5d8   : > { %v4309_v44 = vadd.f32 %v4308_v25, %v4260_v52  ;;  %v4261_v15 = vpop.f32.mrf.mxu1 }
 0x5d9   : > { %v4310_v9 = vpop.f32.mrf.mxu2 }
 0x5da   : > { %v10635_v45 = vadd.f32 %v4357_v39, %v4309_v44 }
 0x5db   : > { %v4212_v59 = vpop.f32.mrf.mxu0 }
 0x5dc   : > { %v4213_v41 = vadd.f32 %v4212_v59, %v10489_v10  ;;  %6306 = vmatmul.msk.bf16.gmra.mxu3 %vm2779_vm1, %v8872_v0 }
 0x5de   : > { %v4262_v19 = vadd.f32 %v4261_v15, %v4213_v41  ;;  %4508 = vmatmul.bf16.gmra.mxu2 %v11137_v24 }
 0x5df   : > { %v4362_v29 = vpop.f32.mrf.mxu3 }
 0x5e0   : > { %v4311_v21 = vadd.f32 %v4310_v9, %v4262_v19  ;;  %v4264_v20 = vpop.f32.mrf.mxu1 }
 0x5e1   : > { %v4313_v63 = vpop.f32.mrf.mxu2 }
 0x5e2   : > { %v10641_v7 = vadd.f32 %v4359_v17, %v4311_v21  ;;  %4459 = vmatmul.bf16.gmra.mxu1 %v11212_v5 }
 0x5e3   : > { %v4215_v37 = vpop.f32.mrf.mxu0 }
 0x5e4   : > { %v4216_v57 = vadd.f32 %v4215_v37, %v10518_v49 }
 0x5e6   : > { %v4265_v60 = vadd.f32 %v4264_v20, %v4216_v57  ;;  %4410 = vmatmul.bf16.gmra.mxu0 %v11247_v56 }
 0x5e7   : > { %v4364_v3 = vpop.f32.mrf.mxu3 }
 0x5e8   : > { %v4314_v10 = vadd.f32 %v4313_v63, %v4265_v60  ;;  %v4266_v34 = vpop.f32.mrf.mxu1 }
 0x5e9   : > { %v4315_v0 = vpop.f32.mrf.mxu2 }
 0x5ea   : > { %v10646_v11 = vadd.f32 %v4362_v29, %v4314_v10 }
 0x5eb   : > { %v4217_v24 = vpop.f32.mrf.mxu0 }
 0x5ec   : > { %v4218_v1 = vadd.f32 %v4217_v24, %v10529_v30  ;;  %6307 = vmatmul.msk.bf16.gmra.mxu3 %vm2779_vm1, %v8885_v13 }
 0x5ee   : > { %v4267_v42 = vadd.f32 %v4266_v34, %v4218_v1  ;;  %4513 = vmatmul.bf16.gmra.mxu2 %v11138_v22 }
 0x5ef   : > { %v4367_v5 = vpop.f32.mrf.mxu3 }
 0x5f0   : > { %v4316_v49 = vadd.f32 %v4315_v0, %v4267_v42  ;;  %v4269_v35 = vpop.f32.mrf.mxu1 }
 0x5f1   : > { %v4318_v40 = vpop.f32.mrf.mxu2 }
 0x5f2   : > { %v10652_v4 = vadd.f32 %v4364_v3, %v4316_v49  ;;  %4464 = vmatmul.bf16.gmra.mxu1 %v11213_v43 }
 0x5f3   : > { %v4220_v26 = vpop.f32.mrf.mxu0 }
 0x5f4   : > { %v4221_v39 = vadd.f32 %v4220_v26, %v10540_v32 }
 0x5f6   : > { %v4270_v25 = vadd.f32 %v4269_v35, %v4221_v39  ;;  %4415 = vmatmul.bf16.gmra.mxu0 %v11248_v2 }
 0x5f7   : > { %v4369_v53 = vpop.f32.mrf.mxu3 }
 0x5f8   : > { %v4319_v30 = vadd.f32 %v4318_v40, %v4270_v25  ;;  %v4271_v12 = vpop.f32.mrf.mxu1 }
 0x5f9   : > { %v4320_v13 = vpop.f32.mrf.mxu2 }
 0x5fa   : > { %v10657_v52 = vadd.f32 %v4367_v5, %v4319_v30  ;;  %v11249_v5 = vld [vmem:[#allocation62_spill] sm:$0xff] }
 0x5fb   : > { %v4222_v22 = vpop.f32.mrf.mxu0 }
 0x5fc   : > { %v4223_v48 = vadd.f32 %v4222_v22, %v10551_v47 }
 0x5fe   : > { %v4272_v44 = vadd.f32 %v4271_v12, %v4223_v48 }
 0x5ff   : > { %v4528_v9 = vpop.f32.mrf.mxu3 }
 0x600   : > { %v4321_v17 = vadd.f32 %v4320_v13, %v4272_v44  ;;  %v4430_v32 = vpop.f32.mrf.mxu1 }
 0x601   : > { %v4479_v15 = vpop.f32.mrf.mxu2 }
 0x602   : > { %v10660_v59 = vadd.f32 %v4369_v53, %v4321_v17 }
 0x603   : > { %v4381_v43 = vpop.f32.mrf.mxu0 }
 0x604   : > { %v4382_v41 = vadd.f32 %v4381_v43, %v10580_v23 }
 0x606   : > { %v4431_v19 = vadd.f32 %v4430_v32, %v4382_v41 }
 0x607   : > { %v4530_v29 = vpop.f32.mrf.mxu3 }
 0x608   : > { %v4480_v21 = vadd.f32 %v4479_v15, %v4431_v19  ;;  %v4432_v37 = vpop.f32.mrf.mxu1 }
 0x609   : > { %v4481_v63 = vpop.f32.mrf.mxu2 }
 0x60a   : > { %v4529_v20 = vadd.f32 %v4528_v9, %v4480_v21 }
 0x60b   : > { %v4383_v57 = vpop.f32.mrf.mxu0 }
 0x60c   : > { %v4639_v47 = vsel %vm4588_vm2, %v4529_v20, 0.0  ;;  %v4384_v60 = vadd.f32 %v4383_v57, %v10586_v51  ;;  %vm11291_vm2 = vmmov %vm11235_vm15 }
 0x60d   : > { %v4701_v56 = vpack.c.bf16 %v4639_v47, %v10330_v55  ;;  %v4873_v49 = vmul.f32 %v4639_v47, %v4639_v47 }
 0x60e   : > { %v4433_v10 = vadd.f32 %v4432_v37, %v4384_v60 }
 0x60f   : > { %4733 = vst [vmem:[%s7630_s11 + $0x8] sm:$0xff] %v4701_v56  ;;  %v4533_v23 = vpop.f32.mrf.mxu3 }
 0x610   : > { %v4482_v3 = vadd.f32 %v4481_v63, %v4433_v10  ;;  %v4435_v24 = vpop.f32.mrf.mxu1 }
 0x611   : > { %v4484_v0 = vpop.f32.mrf.mxu2 }
 0x612   : > { %v4531_v34 = vadd.f32 %v4530_v29, %v4482_v3 }
 0x613   : > { %v4386_v1 = vpop.f32.mrf.mxu0 }
 0x614   : > { %v4643_v42 = vsel %vm4589_vm3, %v4531_v34, 0.0  ;;  %v4387_v33 = vadd.f32 %v4386_v1, %v10591_v38 }
 0x615   : > { %v4703_v51 = vpack.c.bf16 %v4643_v42, %v11249_v5  ;;  %v4828_v40 = vadd.f32 %v4643_v42, %v4639_v47  ;;  %v4877_v55 = vmul.f32 %v4643_v42, %v4643_v42 }
 0x616   : > { %v4436_v35 = vadd.f32 %v4435_v24, %v4387_v33 }
 0x617   : > { %4735 = vst [vmem:[%s7630_s11 + $0x18] sm:$0xff] %v4703_v51  ;;  %v4997_v26 = vadd.f32 %v4877_v55, %v4873_v49  ;;  %v4535_v25 = vpop.f32.mrf.mxu3 }
 0x618   : > { %v4485_v39 = vadd.f32 %v4484_v0, %v4436_v35  ;;  %v4437_v53 = vpop.f32.mrf.mxu1 }
 0x619   : > { %v4486_v2 = vpop.f32.mrf.mxu2 }
 0x61a   : > { %v4534_v30 = vadd.f32 %v4533_v23, %v4485_v39 }
 0x61b   : > { %v4388_v13 = vpop.f32.mrf.mxu0 }
 0x61c   : > { %v4647_v54 = vsel %vm4590_vm4, %v4534_v30, 0.0  ;;  %v4389_v38 = vadd.f32 %v4388_v13, %v10597_v14 }
 0x61d   : > { %v4705_v22 = vpack.c.bf16 %v4647_v54, %v10340_v18  ;;  %v4829_v48 = vadd.f32 %v4828_v40, %v4647_v54  ;;  %v4881_v44 = vmul.f32 %v4647_v54, %v4647_v54 }
 0x61e   : > { %v4438_v17 = vadd.f32 %v4437_v53, %v4389_v38 }
 0x61f   : > { %4737 = vst [vmem:[%s7630_s11 + $0x28] sm:$0xff] %v4705_v22  ;;  %v4998_v9 = vadd.f32 %v4997_v26, %v4881_v44  ;;  %v4538_v32 = vpop.f32.mrf.mxu3 }
 0x620   : > { %v4487_v15 = vadd.f32 %v4486_v2, %v4438_v17  ;;  %v4440_v19 = vpop.f32.mrf.mxu1  ;;  %v11254_v2 = vld [vmem:[#allocation63_spill] sm:$0xff] }
 0x621   : > { %v4489_v43 = vpop.f32.mrf.mxu2 }
 0x622   : > { %v4536_v41 = vadd.f32 %v4535_v25, %v4487_v15 }
 0x623   : > { %v4391_v21 = vpop.f32.mrf.mxu0 }
 0x624   : > { %v4651_v63 = vsel %vm4591_vm5, %v4536_v41, 0.0  ;;  %v4392_v14 = vadd.f32 %v4391_v21, %v10602_v27 }
 0x625   : > { %v4707_v18 = vpack.c.bf16 %v4651_v63, %v10372_v61  ;;  %v4830_v20 = vadd.f32 %v4829_v48, %v4651_v63  ;;  %v4885_v37 = vmul.f32 %v4651_v63, %v4651_v63 }
 0x626   : > { %v4441_v57 = vadd.f32 %v4440_v19, %v4392_v14 }
 0x627   : > { %4739 = vst [vmem:[%s7630_s11 + $0x38] sm:$0xff] %v4707_v18  ;;  %v4999_v47 = vadd.f32 %v4998_v9, %v4885_v37  ;;  %v4540_v56 = vpop.f32.mrf.mxu3 }
 0x628   : > { %v4490_v60 = vadd.f32 %v4489_v43, %v4441_v57  ;;  %v4442_v23 = vpop.f32.mrf.mxu1 }
 0x629   : > { %v4491_v10 = vpop.f32.mrf.mxu2 }
 0x62a   : > { %v4539_v3 = vadd.f32 %v4538_v32, %v4490_v60  ;;  %v11256_v32 = vld [vmem:[#allocation64_spill] sm:$0xff]  ;;  %v11257_v60 = vld [vmem:[#allocation65_spill] sm:$0xff] }
 0x62b   : > { %v4393_v0 = vpop.f32.mrf.mxu0 }
 0x62c   : > { %v4655_v24 = vsel %vm4592_vm6, %v4539_v3, 0.0  ;;  %v4394_v27 = vadd.f32 %v4393_v0, %v10608_v58 }
 0x62d   : > { %v4709_v61 = vpack.c.bf16 %v4655_v24, %v10385_v28  ;;  %v4831_v1 = vadd.f32 %v4830_v20, %v4655_v24  ;;  %v4889_v42 = vmul.f32 %v4655_v24, %v4655_v24 }
 0x62e   : > { %v4443_v33 = vadd.f32 %v4442_v23, %v4394_v27 }
 0x62f   : > { %4741 = vst [vmem:[%s7630_s11 + $0x48] sm:$0xff] %v4709_v61  ;;  %v5000_v49 = vadd.f32 %v4999_v47, %v4889_v42  ;;  %v4543_v51 = vpop.f32.mrf.mxu3 }
 0x630   : > { %v4492_v5 = vadd.f32 %v4491_v10, %v4443_v33  ;;  %v4445_v35 = vpop.f32.mrf.mxu1  ;;  %v11269_v33 = vld [vmem:[#allocation12_spill] sm:$0xff] }
 0x631   : > { %v4494_v40 = vpop.f32.mrf.mxu2 }
 0x632   : > { %v4541_v55 = vadd.f32 %v4540_v56, %v4492_v5 }
 0x633   : > { %v4396_v26 = vpop.f32.mrf.mxu0 }
 0x634   : > { %v4659_v25 = vsel %vm4593_vm7, %v4541_v55, 0.0  ;;  %v4397_v58 = vadd.f32 %v4396_v26, %v10613_v46 }
 0x635   : > { %v4711_v28 = vpack.c.bf16 %v4659_v25, %v11254_v2  ;;  %v4832_v30 = vadd.f32 %v4831_v1, %v4659_v25  ;;  %v4893_v53 = vmul.f32 %v4659_v25, %v4659_v25 }
 0x636   : > { %v4446_v13 = vadd.f32 %v4445_v35, %v4397_v58 }
 0x637   : > { %4743 = vst [vmem:[%s7630_s11 + $0x58] sm:$0xff] %v4711_v28  ;;  %v5001_v12 = vadd.f32 %v5000_v49, %v4893_v53  ;;  %v4545_v38 = vpop.f32.mrf.mxu3  ;;  %v11259_v49 = vld [vmem:[#allocation66_spill] sm:$0xff] }
 0x638   : > { %v4495_v54 = vadd.f32 %v4494_v40, %v4446_v13  ;;  %v4447_v44 = vpop.f32.mrf.mxu1  ;;  %v11261_v13 = vld [vmem:[#allocation67_spill] sm:$0xff] }
 0x639   : > { %v4496_v22 = vpop.f32.mrf.mxu2 }
 0x63a   : > { %v4544_v48 = vadd.f32 %v4543_v51, %v4495_v54 }
 0x63b   : > { %v4398_v17 = vpop.f32.mrf.mxu0 }
 0x63c   : > { %v4663_v15 = vsel %vm4594_vm8, %v4544_v48, 0.0  ;;  %v4399_v46 = vadd.f32 %v4398_v17, %v10619_v6 }
 0x63d   : > { %v4713_v43 = vpack.c.bf16 %v4663_v15, %v11256_v32  ;;  %v4833_v41 = vadd.f32 %v4832_v30, %v4663_v15  ;;  %v4897_v19 = vmul.f32 %v4663_v15, %v4663_v15  ;;  %v11262_v15 = vld [vmem:[#allocation19_spill] sm:$0xff] }
 0x63e   : > { %v4448_v21 = vadd.f32 %v4447_v44, %v4399_v46  ;;  %v4874_v46 = vmul.f32 %v11262_v15, %v11262_v15 }
 0x63f   : > { %4745 = vst [vmem:[%s7630_s11 + $0x68] sm:$0xff] %v4713_v43  ;;  %v5002_v29 = vadd.f32 %v5001_v12, %v4897_v19  ;;  %v4548_v14 = vpop.f32.mrf.mxu3  ;;  %v11263_v19 = vld [vmem:[#allocation20_spill] sm:$0xff] }
 0x640   : > { %v4497_v63 = vadd.f32 %v4496_v22, %v4448_v21  ;;  %v4450_v37 = vpop.f32.mrf.mxu1  ;;  %v11264_v21 = vld [vmem:[#allocation17_spill] sm:$0xff] }
 0x641   : > { %v4499_v18 = vpop.f32.mrf.mxu2 }
 0x642   : > { %v4546_v20 = vadd.f32 %v4545_v38, %v4497_v63 }
 0x643   : > { %v4401_v57 = vpop.f32.mrf.mxu0 }
 0x644   : > { %v4667_v47 = vsel %vm4595_vm9, %v4546_v20, 0.0  ;;  %v4402_v6 = vadd.f32 %v4401_v57, %v10624_v31  ;;  %v4765_v20 = vadd.f32 %v11262_v15, %v11263_v19 }
 0x645   : > { %v4715_v56 = vpack.c.bf16 %v4667_v47, %v11257_v60  ;;  %v4834_v10 = vadd.f32 %v4833_v41, %v4667_v47  ;;  %v4901_v3 = vmul.f32 %v4667_v47, %v4667_v47 }
 0x646   : > { %v4451_v23 = vadd.f32 %v4450_v37, %v4402_v6  ;;  %v11266_v37 = vld [vmem:[#allocation68_spill] sm:$0xff] }
 0x647   : > { %4747 = vst [vmem:[%s7630_s11 + $0x78] sm:$0xff] %v4715_v56  ;;  %v5003_v0 = vadd.f32 %v5002_v29, %v4901_v3  ;;  %v4550_v24 = vpop.f32.mrf.mxu3  ;;  %v4878_v29 = vmul.f32 %v11264_v21, %v11264_v21  ;;  %v11267_v56 = vld [vmem:[#allocation15_spill] sm:$0xff] }
 0x648   : > { %v4500_v34 = vadd.f32 %v4499_v18, %v4451_v23  ;;  %v4452_v1 = vpop.f32.mrf.mxu1  ;;  %v4766_v23 = vadd.f32 %v4765_v20, %v11264_v21 }
 0x649   : > { %v4501_v27 = vpop.f32.mrf.mxu2 }
 0x64a   : > { %v4549_v61 = vadd.f32 %v4548_v14, %v4500_v34 }
 0x64b   : > { %v4403_v42 = vpop.f32.mrf.mxu0 }
 0x64c   : > { %v4671_v36 = vsel %vm4596_vm10, %v4549_v61, 0.0  ;;  %v4404_v31 = vadd.f32 %v4403_v42, %v10630_v62  ;;  %v4767_v61 = vadd.f32 %v4766_v23, %v11267_v56 }
 0x64d   : > { %v4717_v5 = vpack.c.bf16 %v4671_v36, %v11259_v49  ;;  %v4835_v51 = vadd.f32 %v4834_v10, %v4671_v36  ;;  %v4905_v40 = vmul.f32 %v4671_v36, %v4671_v36  ;;  %v4882_v10 = vmul.f32 %v11267_v56, %v11267_v56 }
 0x64e   : > { %v4453_v55 = vadd.f32 %v4452_v1, %v4404_v31  ;;  %v4890_v36 = vmul.f32 %v11269_v33, %v11269_v33 }
 0x64f   : > { %4749 = vst [vmem:[%s7630_s11 + $0x88] sm:$0xff] %v4717_v5  ;;  %v5004_v35 = vadd.f32 %v5003_v0, %v4905_v40  ;;  %v4553_v39 = vpop.f32.mrf.mxu3 }
 0x650   : > { %v4502_v26 = vadd.f32 %v4501_v27, %v4453_v55  ;;  %v4455_v2 = vpop.f32.mrf.mxu1 }
 0x651   : > { %v4504_v25 = vpop.f32.mrf.mxu2 }
 0x652   : > { %v4551_v58 = vadd.f32 %v4550_v24, %v4502_v26  ;;  %v11268_v24 = vld [vmem:[#allocation14_spill] sm:$0xff] }
 0x653   : > { %v4406_v28 = vpop.f32.mrf.mxu0  ;;  %v4768_v5 = vadd.f32 %v4767_v61, %v11268_v24 }
 0x654   : > { %v4675_v53 = vsel %vm4597_vm11, %v4551_v58, 0.0  ;;  %v4407_v62 = vadd.f32 %v4406_v28, %v10635_v45  ;;  %v4870_v45 = vmul.f32 %v11263_v19, %v11263_v19 }
 0x655   : > { %v4719_v12 = vpack.c.bf16 %v4675_v53, %v11261_v13  ;;  %v4836_v54 = vadd.f32 %v4835_v51, %v4675_v53  ;;  %v4909_v38 = vmul.f32 %v4675_v53, %v4675_v53 }
 0x656   : > { %v4456_v22 = vadd.f32 %v4455_v2, %v4407_v62  ;;  %v4934_v60 = vadd.f32 %v4874_v46, %v4870_v45  ;;  %v11272_v2 = vld [vmem:[#allocation69_spill] sm:$0xff]  ;;  %v4769_v62 = vadd.f32 %v4768_v5, %v11269_v33 }
 0x657   : > { %4751 = vst [vmem:[%s7630_s11 + $0x98] sm:$0xff] %v4719_v12  ;;  %v5005_v48 = vadd.f32 %v5004_v35, %v4909_v38  ;;  %v4555_v9 = vpop.f32.mrf.mxu3  ;;  %v11270_v35 = vld [vmem:[#allocation11_spill] sm:$0xff]  ;;  %v11273_v12 = vld [vmem:[#allocation34_spill] sm:$0xff] }
 0x658   : > { %v4505_v44 = vadd.f32 %v4504_v25, %v4456_v22  ;;  %v4457_v43 = vpop.f32.mrf.mxu1  ;;  %v4935_v34 = vadd.f32 %v4934_v60, %v4878_v29  ;;  %v4894_v26 = vmul.f32 %v11270_v35, %v11270_v35 }
 0x659   : > { %v4506_v17 = vpop.f32.mrf.mxu2 }
 0x65a   : > { %v4554_v32 = vadd.f32 %v4553_v39, %v4505_v44  ;;  %v4936_v42 = vadd.f32 %v4935_v34, %v4882_v10  ;;  %v11279_v34 = vld [vmem:[#allocation49_spill] sm:$0xff] }
 0x65b   : > { %v4408_v41 = vpop.f32.mrf.mxu0 }
 0x65c   : > { %v4679_v14 = vsel %vm4598_vm12, %v4554_v32, 0.0  ;;  %v4409_v18 = vadd.f32 %v4408_v41, %v10641_v7  ;;  %v4886_v7 = vmul.f32 %v11268_v24, %v11268_v24  ;;  %v11275_v41 = vld [vmem:[#allocation47_spill] sm:$0xff]  ;;  %v4914_v24 = vmul.f32 %v11279_v34, %v11279_v34 }
 0x65d   : > { %v4721_v57 = vpack.c.bf16 %v4679_v14, %v11266_v37  ;;  %v4837_v47 = vadd.f32 %v4836_v54, %v4679_v14  ;;  %v4913_v6 = vmul.f32 %v4679_v14, %v4679_v14  ;;  %v4898_v54 = vmul.f32 %v11273_v12, %v11273_v12  ;;  %v11277_v37 = vld [vmem:[#allocation56_spill] sm:$0xff] }
 0x65e   : > { %v4458_v3 = vadd.f32 %v4457_v43, %v4409_v18  ;;  %v4937_v55 = vadd.f32 %v4936_v42, %v4886_v7  ;;  %v4906_v19 = vmul.f32 %v11275_v41, %v11275_v41 }
 0x65f   : > { %4753 = vst [vmem:[%s7630_s11 + $0xa8] sm:$0xff] %v4721_v57  ;;  %v5006_v0 = vadd.f32 %v5005_v48, %v4913_v6  ;;  %v4558_v51 = vpop.f32.mrf.mxu3  ;;  %v4770_v48 = vadd.f32 %v4769_v62, %v11270_v35  ;;  %v4910_v57 = vmul.f32 %v11277_v37, %v11277_v37  ;;  %v11282_v35 = vld [vmem:[#allocation58_spill] sm:$0xff] }
 0x660   : > { %v4507_v27 = vadd.f32 %v4506_v17, %v4458_v3  ;;  %v4460_v49 = vpop.f32.mrf.mxu1  ;;  %v4938_v13 = vadd.f32 %v4937_v55, %v4890_v36  ;;  %v11274_v17 = vld [vmem:[#allocation41_spill] sm:$0xff]  ;;  %vm11283_vm1 = vcmp.lt.s32.totalorder %v11282_v35, %v9481_v50 }
 0x661   : > { %v4509_v1 = vpop.f32.mrf.mxu2  ;;  %v4771_v15 = vadd.f32 %v4770_v48, %v11273_v12 }
 0x662   : > { %v4556_v31 = vadd.f32 %v4555_v9, %v4507_v27  ;;  %v4939_v44 = vadd.f32 %v4938_v13, %v4894_v26  ;;  %v4902_v9 = vmul.f32 %v11274_v17, %v11274_v17  ;;  %v11285_v13 = vld [vmem:[#allocation52_spill] sm:$0xff] }
 0x663   : > { %v4411_v40 = vpop.f32.mrf.mxu0  ;;  %v4772_v29 = vadd.f32 %v4771_v15, %v11274_v17  ;;  %v4926_v12 = vmul.f32 %v11285_v13, %v11285_v13 }
 0x664   : > { %v4683_v25 = vsel %vm4599_vm13, %v4556_v31, 0.0  ;;  %v4412_v58 = vadd.f32 %v4411_v40, %v10646_v11  ;;  %v4940_v46 = vadd.f32 %v4939_v44, %v4898_v54  ;;  %v11286_v44 = vld [vmem:[#allocation53_spill] sm:$0xff] }
 0x665   : > { %v4723_v28 = vpack.c.bf16 %v4683_v25, %v11272_v2  ;;  %v4838_v30 = vadd.f32 %v4837_v47, %v4683_v25  ;;  %v4917_v53 = vmul.f32 %v4683_v25, %v4683_v25  ;;  %v11278_v47 = vld [vmem:[#allocation21_spill] sm:$0xff]  ;;  %v4773_v3 = vadd.f32 %v4772_v29, %v11275_v41 }
 0x666   : > { %v4461_v38 = vadd.f32 %v4460_v49, %v4412_v58  ;;  %v4941_v63 = vadd.f32 %v4940_v46, %v4902_v9  ;;  %v11281_v49 = vld [vmem:[#allocation51_spill] sm:$0xff]  ;;  %v11284_v58 = vld [vmem:[#allocation46_spill] sm:$0xff]  ;;  %v4930_v17 = vmul.f32 %v11286_v44, %v11286_v44  ;;  %v11287_v9 = vld [vmem:[#allocation61_spill] sm:$0xff] }
 0x667   : > { %4755 = vst [vmem:[%s7630_s11 + $0xb8] sm:$0xff] %v4723_v28  ;;  %v5007_v22 = vadd.f32 %v5006_v0, %v4917_v53  ;;  %v4560_v10 = vpop.f32.mrf.mxu3  ;;  %v4774_v27 = vadd.f32 %v4773_v3, %v11277_v37  ;;  %v4922_v5 = vmul.f32 %v11281_v49, %v11281_v49 }
 0x668   : > { %v4510_v11 = vadd.f32 %v4509_v1, %v4461_v38  ;;  %v4462_v43 = vpop.f32.mrf.mxu1  ;;  %v4942_v0 = vadd.f32 %v4941_v63, %v4906_v19  ;;  %v11280_v1 = vld [vmem:[#allocation50_spill] sm:$0xff] }
 0x669   : > { %v4511_v45 = vpop.f32.mrf.mxu2  ;;  %v4918_v42 = vmul.f32 %v11280_v1, %v11280_v1  ;;  %v4775_v33 = vadd.f32 %v4774_v27, %v11279_v34 }
 0x66a   : > { %v4559_v32 = vadd.f32 %v4558_v51, %v4510_v11  ;;  %v4943_v61 = vadd.f32 %v4942_v0, %v4910_v57  ;;  %v4801_v11 = vrot.slane %v11287_v9, 4  ;;  %v4991_v57 = vrot.slane %v10576_v16, 4 }
 0x66b   : > { %v4413_v21 = vpop.f32.mrf.mxu0  ;;  %v4776_v55 = vadd.f32 %v4775_v33, %v11280_v1 }
 0x66c   : > { %v4687_v18 = vsel %vm4600_vm14, %v4559_v32, 0.0  ;;  %v4414_v20 = vadd.f32 %v4413_v21, %v10652_v4  ;;  %v4944_v31 = vadd.f32 %v4943_v61, %v4914_v24  ;;  %v4802_v14 = vadd.f32 %v4801_v11, %v11287_v9 }
 0x66d   : > { %v4725_v6 = vpack.c.bf16 %v4687_v18, %v11278_v47  ;;  %v4839_v60 = vadd.f32 %v4838_v30, %v4687_v18  ;;  %v4921_v56 = vmul.f32 %v4687_v18, %v4687_v18  ;;  %v4777_v62 = vadd.f32 %v4776_v55, %v11281_v49  ;;  %v11292_v47 = vld [vmem:[#allocation70_spill] sm:$0xff] }
 0x66e   : > { %v4463_v23 = vadd.f32 %v4462_v43, %v4414_v20  ;;  %v4945_v25 = vadd.f32 %v4944_v31, %v4918_v42  ;;  %v11288_v43 = vld [vmem:[#allocation54_spill] sm:$0xff]  ;;  %v4803_v27 = vrot.slane %v4802_v14, 2  ;;  %v4992_v61 = vadd.f32 %v4991_v57, %v10576_v16 }
 0x66f   : > { %4757 = vst [vmem:[%s7630_s11 + $0xc8] sm:$0xff] %v4725_v6  ;;  %v5008_v7 = vadd.f32 %v5007_v22, %v4921_v56  ;;  %v4563_v48 = vpop.f32.mrf.mxu3  ;;  %v4970_v41 = vrot.slane %v11288_v43, 4 }
 0x670   : > { %v4512_v4 = vadd.f32 %v4511_v45, %v4463_v23  ;;  %v4465_v40 = vpop.f32.mrf.mxu1  ;;  %v4946_v38 = vadd.f32 %v4945_v25, %v4922_v5  ;;  %v11289_v45 = vld [vmem:[#allocation24_spill] sm:$0xff]  ;;  %v4804_v5 = vadd.f32 %v4803_v27, %v4802_v14  ;;  %v4993_v16 = vrot.slane %v4992_v61, 2 }
 0x671   : > { %v4514_v53 = vpop.f32.mrf.mxu2  ;;  %v4822_v21 = vrot.slane %v11289_v45, 4  ;;  %v4971_v23 = vadd.f32 %v4970_v41, %v11288_v43 }
 0x672   : > { %v4561_v36 = vadd.f32 %v4560_v10, %v4512_v4  ;;  %v4947_v46 = vadd.f32 %v4946_v38, %v4926_v12 }
 0x673   : > { %v4416_v51 = vpop.f32.mrf.mxu0  ;;  %v4823_v34 = vadd.f32 %v4822_v21, %v11289_v45  ;;  %v4972_v33 = vrot.slane %v4971_v23, 2 }
 0x674   : > { %v4691_v26 = vsel %vm11283_vm1, %v4561_v36, 0.0  ;;  %v4417_v39 = vadd.f32 %v4416_v51, %v10657_v52  ;;  %v4778_v52 = vadd.f32 %v4777_v62, %v11285_v13  ;;  %v4948_v63 = vadd.f32 %v4947_v46, %v4930_v17 }
 0x675   : > { %v4727_v2 = vpack.c.bf16 %v4691_v26, %v11284_v58  ;;  %v4840_v28 = vadd.f32 %v4839_v60, %v4691_v26  ;;  %v4925_v30 = vmul.f32 %v4691_v26, %v4691_v26  ;;  %v4824_v31 = vrot.slane %v4823_v34, 2 }
 0x676   : > { %v4466_v54 = vadd.f32 %v4465_v40, %v4417_v39  ;;  %v4779_v32 = vadd.f32 %v4778_v52, %v11286_v44  ;;  %v4973_v25 = vadd.f32 %v4972_v33, %v4971_v23 }
 0x677   : > { %4759 = vst [vmem:[%s7630_s11 + $0xd8] sm:$0xff] %v4727_v2  ;;  %v5009_v22 = vadd.f32 %v5008_v7, %v4925_v30  ;;  %v4949_v7 = vrot.slane %v4948_v63, 4  ;;  %v4565_v1 = vpop.f32.mrf.mxu3  ;;  %v4825_v58 = vadd.f32 %v4824_v31, %v4823_v34 }
 0x678   : > { %v4515_v15 = vadd.f32 %v4514_v53, %v4466_v54  ;;  %v4467_v10 = vpop.f32.mrf.mxu1  ;;  %v4780_v3 = vrot.slane %v4779_v32, 4 }
 0x679   : > { %v4516_v24 = vpop.f32.mrf.mxu2  ;;  %v4950_v49 = vadd.f32 %v4949_v7, %v4948_v63 }
 0x67a   : > { %v4564_v19 = vadd.f32 %v4563_v48, %v4515_v15  ;;  %v4781_v42 = vadd.f32 %v4780_v3, %v4779_v32 }
 0x67b   : > { %v4418_v29 = vpop.f32.mrf.mxu0  ;;  %v4951_v30 = vrot.slane %v4950_v49, 2 }
 0x67c   : > { %v4695_v20 = vsel %vm11291_vm2, %v4564_v19, 0.0  ;;  %v4419_v37 = vadd.f32 %v4418_v29, %v10660_v59  ;;  %v4782_v39 = vrot.slane %v4781_v42, 2 }
 0x67d   : > { %v4729_v6 = vpack.c.bf16 %v4695_v20, %v11292_v47  ;;  %v4841_v60 = vadd.f32 %v4840_v28, %v4695_v20  ;;  %v4929_v56 = vmul.f32 %v4695_v20, %v4695_v20 }
 0x67e   : > { %v4468_v0 = vadd.f32 %v4467_v10, %v4419_v37 }
 0x67f   : > { %4761 = vst [vmem:[%s7630_s11 + $0xe8] sm:$0xff] %v4729_v6  ;;  %v5010_v59 = vadd.f32 %v5009_v22, %v4929_v56 }
 0x680   : > { %v4517_v4 = vadd.f32 %v4516_v24, %v4468_v0 }
 0x682   : > { %v4566_v36 = vadd.f32 %v4565_v1, %v4517_v4 }
 0x684   : > { %v4699_v40 = vsel %vm4603_vm0, %v4566_v36, 0.0 }
 0x685   : > { %v4731_v55 = vpack.c.bf16 %v4699_v40, %v10568_v8  ;;  %v4842_v35 = vadd.f32 %v4841_v60, %v4699_v40  ;;  %v4933_v26 = vmul.f32 %v4699_v40, %v4699_v40 }
 0x687   : > { %4763 = vst [vmem:[%s7630_s11 + $0xf8] sm:$0xff] %v4731_v55  ;;  %v4843_v2 = vrot.slane %v4842_v35, 4  ;;  %v5011_v28 = vadd.f32 %v5010_v59, %v4933_v26 }
 0x688   : > { %7085 = shalt.err (!%p7082_p13)
}
 0x689   : > { %s7215_s6 = smov 256   ;;  %s7216_s11 = smov 16   ;;  %v4805_v50 = vrot.slane %v4804_v5, 1  ;;  %v4994_v8 = vadd.f32 %v4993_v16, %v4992_v61  ;;  %v4844_v53 = vadd.f32 %v4843_v2, %v4842_v35  ;;  %v5012_v62 = vrot.slane %v5011_v28, 4  ;;  %v4764_v47 = vld [vmem:[#allocation5] sm:$0xf] }
 0x68a   : > { %6897 = dma.vmem_to_hbm [thread:$0]  (%p7320_p8), %s10818_s27, 4096, %s10820_s0, %s5032_s10, %s7215_s6, %s7215_s6, %s7216_s11   ;;  %v4783_v13 = vadd.f32 %v4782_v39, %v4781_v42  ;;  %v4974_v12 = vrot.slane %v4973_v25, 1  ;;  %v4826_v54 = vrot.slane %v4825_v58, 1  ;;  %v4952_v48 = vadd.f32 %v4951_v30, %v4950_v49  ;;  %v4869_v34 = vld [vmem:[#allocation7] sm:$0xf] }
 0x68b   : > { %v4845_v38 = vrot.slane %v4844_v53, 2  ;;  %v5013_v22 = vadd.f32 %v5012_v62, %v5011_v28  ;;  %v4806_v52 = vadd.f32 %v4805_v50, %v4804_v5  ;;  %v4995_v44 = vrot.slane %v4994_v8, 1  ;;  %s7217_s30 = smov [#allocation5]   ;;  %s5064_s24 = sshll.u32 %s10898_s3, 4  ;;  %s5065_s24 = int_to_ptr.hbm [resolvable:$true] %s5064_s24 }
 0x68c   : > { %v4784_v11 = vrot.slane %v4783_v13, 1  ;;  %v4975_v15 = vadd.f32 %v4974_v12, %v4973_v25  ;;  %v4827_v43 = vadd.f32 %v4826_v54, %v4825_v58  ;;  %v4953_v41 = vrot.slane %v4952_v48, 1  ;;  %s5062_s19 = sshll.u32 %s7217_s30, 4  ;;  %s7218_s27 = smov [#allocation7]   ;;  %s5063_s19 = int_to_ptr.vmem [resolvable:$true] %s5062_s19 }
 0x68d   : > { %v4846_v17 = vadd.f32 %v4845_v38, %v4844_v53  ;;  %v5014_v9 = vrot.slane %v5013_v22, 2  ;;  %v4853_v19 = vrot.slane %v4806_v52, 7  ;;  %v4996_v29 = vadd.f32 %v4995_v44, %v4994_v8  ;;  %s5074_s0 = sshll.u32 %s7218_s27, 4  ;;  %s5076_s7 = sshll.u32 %s10899_s4, 4  ;;  %s5075_s0 = int_to_ptr.vmem [resolvable:$true] %s5074_s0  ;;  %s5077_s7 = int_to_ptr.hbm [resolvable:$true] %s5076_s7 }
 0x68e   : > { %v4785_v63 = vadd.f32 %v4784_v11, %v4783_v13  ;;  %vm4856_vm3 = vcmask 1040384   ;;  %vm4858_vm4 = vcmask 1042434   ;;  %v5022_v14 = vrot.slane %v4975_v15, 7 }
 0x68f   : > { %v4847_v46 = vrot.slane %v4846_v17, 1  ;;  %v5015_v32 = vadd.f32 %v5014_v9, %v5013_v22  ;;  %v4854_v18 = vrot.slane %v4827_v43, 6  ;;  %vm4860_vm5 = vcmask 1041408  }
 0x690   : > { %v4954_v57 = vadd.f32 %v4953_v41, %v4952_v48  ;;  %v4857_v6 = vsel %vm4856_vm3, %v4785_v63, %v4853_v19  ;;  %v5023_v56 = vrot.slane %v4996_v29, 6  ;;  %v11294_v23 = vlaneseq }
 0x691   : > { %v5016_v45 = vrot.slane %v5015_v32, 1  ;;  %v4848_v21 = vadd.f32 %v4847_v46, %v4846_v17 }
 0x692   : > { %vm10845_vm6 = vcmp.lt.s32.totalorder %v11294_v23, 512  ;;  %v5025_v24 = vsel %vm4856_vm3, %v4954_v57, %v5022_v14 }
 0x693   : > { %v4855_v20 = vrot.slane %v4848_v21, 5  ;;  %v5017_v37 = vadd.f32 %v5016_v45, %v5015_v32 }
 0x695   : > { %v4859_v60 = vsel %vm4858_vm4, %v4854_v18, %v4855_v20  ;;  %v5024_v10 = vrot.slane %v5017_v37, 5 }
 0x696   : > { %v4861_v3 = vsel %vm4860_vm5, %v4857_v6, %v4859_v60 }
 0x697   : > { %v4863_v59 = vadd.f32 %v4861_v3, %v4764_v47  ;;  %v5026_v7 = vsel %vm4858_vm4, %v5023_v56, %v5024_v10 }
 0x698   : > { %v5027_v27 = vsel %vm4860_vm5, %v5025_v24, %v5026_v7 }
 0x699   : > { %4868 = vst.msk [vmem:[#allocation5] sm:$0xf] %vm10845_vm6, %v4863_v59  ;;  %v5029_v4 = vadd.f32 %v5027_v27, %v4869_v34 }
 0x69a   : > { %6899 = dma.vmem_to_hbm [thread:$0]  (%p7310_p5), %s5063_s19, 64, %s5065_s24, [#allocation6]  }
 0x69b   : > { %5030 = vst.msk [vmem:[#allocation7] sm:$0xf] %vm10845_vm6, %v5029_v4 }
 0x69c   : > { %6901 = dma.vmem_to_hbm [thread:$0]  (%p7310_p5), %s5075_s0, 64, %s5077_s7, [#allocation6]  }
 0x69d   : > { %7175 = dma.done.wait (%p7310_p5), [#allocation6], 128  }
 0x69e   : > { %7177 = vsyncadd (%p7310_p5), [#allocation6], 4294967168 }
 0x69f PF: > { %p6915_p8 = scmp.ge.s32.totalorder %s7212_s22, 2  ;;  %s5098_s8 = sand.u32 1, %s7184_s15  }
 0x6a0   : > { %s5099_s12 = scalar_lea.sflag [#allocation4], %s5098_s8 }
 0x6a1   : > { %p6908_p0 = pnand %p6915_p8, %p7324_p9 }
 0x6a3   : > { %p6909_p1 = pneg %p6908_p0 }
 0x6a5   : > { %7179 = dma.done.wait (%p6909_p1), %s5099_s12, 4096  }
 0x6a6   : > { %7181 = vsyncadd (%p6909_p1), %s5099_s12, 4294963200  ;;  %s19_s22 = sadd.s32 1, %s7212_s22   ;;  %s11297_s29 = sld [smem:[#allocation10_spill]] }
 0x6a7   : > { %p16_p2 = scmp.ge.s32.totalorder %s19_s22, 6   ;;  %s11298_s15 = smov %s7188_s16 }
 0x6a8   : > { %s11299_s16 = smov %s7192_s17  ;;  %s11300_s17 = smov %s7332_s9 }
 0x6a9   : > { %s11301_s18 = smov %s7204_s20  ;;  %s11302_s19 = smov %s7208_s21 }
 0x6aa   : > { %s11303_s20 = smov %s11306_s25  ;;  %18 = sbr.rel (!%p16_p2) target bundleno = 8 (0x8), region = 126 }
 0x6ac   : > { %s11304_s21 = smov %s11297_s29 }
 0x6af   :  { %5105 = vsyncpa [#allocation4], 1 }
 0x6b0   :  { %5107 = vsyncpa [#allocation4 + $0x1], 1 }
 0x6b1   :  { %5108 = vsyncpa [#allocation6], 1 }

</bundles_post_ra>
